<compile_context>
chip_gen: v5e
topology: v5e:2x2
jax: 0.10.0
libtpu: 0.0.40
codegen_flags: <defaults>
</compile_context>

<pallas_src>
import functools

import jax
import jax.numpy as jnp
from jax.experimental import pallas as pl
from jax.experimental.pallas import tpu as pltpu


# ----------------------------- Pallas kernel ------------------------------ #
def _mutimodel_text_kernel(x_ref, w1_ref, b1_ref, w2_ref, b2_ref, w3_ref,
                           b3_ref, wf1_ref, bf1_ref, wf2_ref, bf2_ref,
                           sel_ref, out_ref):
    x = x_ref[...]  # (block_b*L, 768) bf16, flat (batch*time, channels)

    def conv_relu_pool(h, w_ref, b_ref, s):
        # Conv1d(kernel=3) with taps at +0, +s, +2*s on the flat time axis,
        # then ReLU, then MaxPool1d(2) as max with the +s neighbour.  `s` is
        # the dilation created by the previous pooling stages; row t of the
        # result still corresponds to flat position t of the input sequence.
        y0 = jnp.dot(h, w_ref[0], preferred_element_type=jnp.float32)
        y1 = jnp.dot(h, w_ref[1], preferred_element_type=jnp.float32)
        y2 = jnp.dot(h, w_ref[2], preferred_element_type=jnp.float32)
        n = y0.shape[0] - 2 * s
        y = y0[:n] + y1[s:n + s] + y2[2 * s:n + 2 * s] + b_ref[...]
        y = jnp.maximum(y, 0.0)                        # ReLU
        return jnp.maximum(y[:n - s], y[s:n])          # MaxPool1d(2)

    # TextModle.textcnn (valid positions live at strides 2, 4, 8 after each
    # pooling stage; garbage rows near batch boundaries are never selected).
    h = conv_relu_pool(x, w1_ref, b1_ref, 1)                        # 768->256
    h = conv_relu_pool(h.astype(jnp.bfloat16), w2_ref, b2_ref, 2)   # 256->128
    h = conv_relu_pool(h.astype(jnp.bfloat16), w3_ref, b3_ref, 4)   # 128->64

    # adaptive_max_pool1d(., 1): max over the remaining valid positions
    # (flat offsets 8*j within each batch element), then gather one row per
    # batch element with the host-precomputed 0/1 selection matrix.
    n_sel = sel_ref.shape[1]
    hm = h[:n_sel]
    for off in range(8, h.shape[0] - n_sel + 1, 8):
        hm = jnp.maximum(hm, h[off:off + n_sel])
    feat = jnp.dot(sel_ref[...], hm,
                   preferred_element_type=jnp.float32)              # (block_b, 64)

    # classifier1 (Dropout == identity at inference); output padded to 128 lanes.
    z = jnp.maximum(
        jnp.dot(feat, wf1_ref[...], preferred_element_type=jnp.float32)
        + bf1_ref[...], 0.0)
    z = jnp.maximum(
        jnp.dot(z, wf2_ref[...], preferred_element_type=jnp.float32)
        + bf2_ref[...], 0.0)
    out_ref[...] = z


# ------------------------------ wrapper ------------------------------------ #
@functools.partial(jax.jit, static_argnames=("block_b",))
def muti_model_choice1(text, params, *, block_b=32):
    """text: (B, L, 768) float32; returns (B, num_classes) float32."""
    w1, b1, w2, b2, w3, b3, wf1, bf1, wf2, bf2 = params
    B, L, C = text.shape
    nc = wf2.shape[1]
    ncp = ((nc + 127) // 128) * 128           # lane-dense (padded) output width

    bblk = int(max(1, min(block_b, B)))
    bpad = ((B + bblk - 1) // bblk) * bblk
    assert (bblk * L) % 8 == 0, "block_b * seq_len must be a multiple of 8"

    # Static shape bookkeeping for the text CNN (matches PyTorch floor pools).
    p1 = (L - 2) // 2
    p2 = (p1 - 2) // 2
    p3 = (p2 - 2) // 2
    assert p3 >= 1, "sequence too short for the text CNN"
    rows = bblk * L
    n_sel = rows - 21 - 8 * (p3 - 1)          # length after conv/pool shrink
    assert (bblk - 1) * L < n_sel

    # Host-side prep: pad batch, cast activations/conv-weights to bf16, pad the
    # final linear to 128 output lanes, build the per-block selection matrix.
    xt = text
    if bpad != B:
        xt = jnp.concatenate(
            [xt, jnp.zeros((bpad - B, L, C), xt.dtype)], axis=0)
    x_flat = xt.astype(jnp.bfloat16).reshape(bpad * L, C)

    w1b, w2b, w3b = (w.astype(jnp.bfloat16) for w in (w1, w2, w3))
    wf2p = jnp.zeros((wf2.shape[0], ncp), jnp.float32).at[:, :nc].set(wf2)
    bf2p = jnp.zeros((1, ncp), jnp.float32).at[:, :nc].set(bf2)

    col = jax.lax.broadcasted_iota(jnp.int32, (bblk, n_sel), 1)
    row = jax.lax.broadcasted_iota(jnp.int32, (bblk, n_sel), 0)
    sel = (col == row * L).astype(jnp.float32)          # picks row b*L

    def _const(a):
        zeros = (0,) * a.ndim
        return pl.BlockSpec(a.shape, lambda i, _z=zeros: _z)

    out = pl.pallas_call(
        _mutimodel_text_kernel,
        out_shape=jax.ShapeDtypeStruct((bpad, ncp), jnp.float32),
        grid=(bpad // bblk,),
        in_specs=[
            pl.BlockSpec((bblk * L, C), lambda i: (i, 0)),   # text block (flat)
            _const(w1b), _const(b1),
            _const(w2b), _const(b2),
            _const(w3b), _const(b3),
            _const(wf1), _const(bf1),
            _const(wf2p), _const(bf2p),
            _const(sel),
        ],
        out_specs=pl.BlockSpec((bblk, ncp), lambda i: (i, 0)),
        compiler_params=pltpu.CompilerParams(
            dimension_semantics=("parallel",),
            vmem_limit_bytes=48 * 1024 * 1024),
    )(x_flat, w1b, b1, w2b, b2, w3b, b3, wf1, bf1, wf2p, bf2p, sel)
    return out[:B, :nc]


# -------------------------- pure-JAX reference ----------------------------- #
def _reference(text, params):
    w1, b1, w2, b2, w3, b3, wf1, bf1, wf2, bf2 = params

    def conv_relu(x, w, b):
        lout = x.shape[1] - 2
        y = (jnp.einsum('blc,cd->bld', x[:, 0:lout], w[0])
             + jnp.einsum('blc,cd->bld', x[:, 1:lout + 1], w[1])
             + jnp.einsum('blc,cd->bld', x[:, 2:lout + 2], w[2]) + b[None])
        return jnp.maximum(y, 0.0)

    def pool(x):
        p = x.shape[1] // 2
        return jnp.max(
            x[:, :2 * p].reshape(x.shape[0], p, 2, x.shape[2]), axis=2)

    h = pool(conv_relu(text, w1, b1))
    h = pool(conv_relu(h, w2, b2))
    h = pool(conv_relu(h, w3, b3))
    feat = jnp.max(h, axis=1)                       # adaptive_max_pool1d(., 1)
    z = jnp.maximum(feat @ wf1 + bf1, 0.0)
    z = jnp.maximum(z @ wf2 + bf2, 0.0)
    return z


# --------------------------------- main ------------------------------------ #
if __name__ == "__main__":
    B, L, HID, NC = 20, 32, 768, 10

    key = jax.random.PRNGKey(0)
    ks = jax.random.split(key, 12)

    # Deterministic parameter init (shapes follow the nn.Module __init__).
    # Conv weights stored as (k=3, in_ch, out_ch); Linear as (in, out).
    w1 = jax.random.normal(ks[0], (3, 768, 256), jnp.float32) * 0.02
    b1 = jax.random.normal(ks[1], (1, 256), jnp.float32) * 0.02
    w2 = jax.random.normal(ks[2], (3, 256, 128), jnp.float32) * 0.02
    b2 = jax.random.normal(ks[3], (1, 128), jnp.float32) * 0.02
    w3 = jax.random.normal(ks[4], (3, 128, 64), jnp.float32) * 0.02
    b3 = jax.random.normal(ks[5], (1, 64), jnp.float32) * 0.02
    wf1 = jax.random.normal(ks[6], (64, 256), jnp.float32) * 0.05
    bf1 = jax.random.normal(ks[7], (1, 256), jnp.float32) * 0.05
    wf2 = jax.random.normal(ks[8], (256, NC), jnp.float32) * 0.05
    bf2 = jax.random.normal(ks[9], (1, NC), jnp.float32) * 0.05
    params = (w1, b1, w2, b2, w3, b3, wf1, bf1, wf2, bf2)

    # Inputs: `text` is the BERT-style embedding (B, seq, 768).  `image` is
    # part of the module signature but unused on the choice==1 path.
    text = jax.random.normal(ks[10], (B, L, HID), jnp.float32)
    image = jax.random.normal(ks[11], (B, 3, 16, 16), jnp.float32)  # unused

    # block_b=8 -> 3 grid steps (20 padded to 24), M = 256 rows per matmul.
    out = jax.block_until_ready(muti_model_choice1(text, params, block_b=8))
    ref = jax.block_until_ready(_reference(text, params))

    assert out.shape == (B, NC), out.shape
    max_err = float(jnp.max(jnp.abs(out - ref)))
    # bf16 matmul operands with f32 accumulation -> loosened tolerance.
    assert jnp.allclose(out, ref, atol=2e-2, rtol=2e-2), max_err
    print("KERNEL_OK")
</pallas_src>

<mosaic_0001>
module attributes {stable_mosaic.version = 11 : i64} {
  func.func @_mutimodel_text_kernel(%arg0: i32, %arg1: memref<256x768xbf16, #tpu.memory_space<vmem>>, %arg2: memref<3x768x256xbf16, #tpu.memory_space<vmem>>, %arg3: memref<1x256xf32, #tpu.memory_space<vmem>>, %arg4: memref<3x256x128xbf16, #tpu.memory_space<vmem>>, %arg5: memref<1x128xf32, #tpu.memory_space<vmem>>, %arg6: memref<3x128x64xbf16, #tpu.memory_space<vmem>>, %arg7: memref<1x64xf32, #tpu.memory_space<vmem>>, %arg8: memref<64x256xf32, #tpu.memory_space<vmem>>, %arg9: memref<1x256xf32, #tpu.memory_space<vmem>>, %arg10: memref<256x128xf32, #tpu.memory_space<vmem>>, %arg11: memref<1x128xf32, #tpu.memory_space<vmem>>, %arg12: memref<8x227xf32, #tpu.memory_space<vmem>>, %arg13: memref<8x128xf32, #tpu.memory_space<vmem>>) attributes {dimension_semantics = [#tpu.dimension_semantics<parallel>], iteration_bounds = array<i64: 3>, scalar_prefetch = 0 : i64, scratch_operands = 0 : i64, tpu.core_type = #tpu.core_type<tc>, window_params = [{transform_indices = @transform_0, window_bounds = array<i64: 256, 768>}, {pipeline_mode = #tpu.pipeline_mode<synchronous>, transform_indices = @transform_1, window_bounds = array<i64: 3, 768, 256>}, {pipeline_mode = #tpu.pipeline_mode<synchronous>, transform_indices = @transform_2, window_bounds = array<i64: 1, 256>}, {pipeline_mode = #tpu.pipeline_mode<synchronous>, transform_indices = @transform_3, window_bounds = array<i64: 3, 256, 128>}, {pipeline_mode = #tpu.pipeline_mode<synchronous>, transform_indices = @transform_4, window_bounds = array<i64: 1, 128>}, {pipeline_mode = #tpu.pipeline_mode<synchronous>, transform_indices = @transform_5, window_bounds = array<i64: 3, 128, 64>}, {pipeline_mode = #tpu.pipeline_mode<synchronous>, transform_indices = @transform_6, window_bounds = array<i64: 1, 64>}, {pipeline_mode = #tpu.pipeline_mode<synchronous>, transform_indices = @transform_7, window_bounds = array<i64: 64, 256>}, {pipeline_mode = #tpu.pipeline_mode<synchronous>, transform_indices = @transform_8, window_bounds = array<i64: 1, 256>}, {pipeline_mode = #tpu.pipeline_mode<synchronous>, transform_indices = @transform_9, window_bounds = array<i64: 256, 128>}, {pipeline_mode = #tpu.pipeline_mode<synchronous>, transform_indices = @transform_10, window_bounds = array<i64: 1, 128>}, {pipeline_mode = #tpu.pipeline_mode<synchronous>, transform_indices = @transform_11, window_bounds = array<i64: 8, 227>}, {transform_indices = @transform_12, window_bounds = array<i64: 8, 128>}]} {
    %c0 = arith.constant 0 : index
    %c0_0 = arith.constant 0 : index
    %0 = vector.load %arg1[%c0, %c0_0] : memref<256x768xbf16, #tpu.memory_space<vmem>>, vector<256x768xbf16>
    %c0_1 = arith.constant 0 : index
    %c0_2 = arith.constant 0 : index
    %c0_3 = arith.constant 0 : index
    %1 = vector.load %arg2[%c0_1, %c0_2, %c0_3] : memref<3x768x256xbf16, #tpu.memory_space<vmem>>, vector<1x768x256xbf16>
    %2 = vector.shape_cast %1 : vector<1x768x256xbf16> to vector<768x256xbf16>
    %cst = arith.constant dense<0.000000e+00> : vector<256x256xf32>
    %3 = tpu.matmul %0, %2, %cst {dimension_numbers = #tpu.dot_dimension_numbers<[1], [0], [0], [1], [0, 0, 1, 1], [], []>} : vector<256x768xbf16>, vector<768x256xbf16>, vector<256x256xf32> -> vector<256x256xf32>
    %c1 = arith.constant 1 : index
    %c0_4 = arith.constant 0 : index
    %c0_5 = arith.constant 0 : index
    %4 = vector.load %arg2[%c1, %c0_4, %c0_5] : memref<3x768x256xbf16, #tpu.memory_space<vmem>>, vector<1x768x256xbf16>
    %5 = vector.shape_cast %4 : vector<1x768x256xbf16> to vector<768x256xbf16>
    %cst_6 = arith.constant dense<0.000000e+00> : vector<256x256xf32>
    %6 = tpu.matmul %0, %5, %cst_6 {dimension_numbers = #tpu.dot_dimension_numbers<[1], [0], [0], [1], [0, 0, 1, 1], [], []>} : vector<256x768xbf16>, vector<768x256xbf16>, vector<256x256xf32> -> vector<256x256xf32>
    %c2 = arith.constant 2 : index
    %c0_7 = arith.constant 0 : index
    %c0_8 = arith.constant 0 : index
    %7 = vector.load %arg2[%c2, %c0_7, %c0_8] : memref<3x768x256xbf16, #tpu.memory_space<vmem>>, vector<1x768x256xbf16>
    %8 = vector.shape_cast %7 : vector<1x768x256xbf16> to vector<768x256xbf16>
    %cst_9 = arith.constant dense<0.000000e+00> : vector<256x256xf32>
    %9 = tpu.matmul %0, %8, %cst_9 {dimension_numbers = #tpu.dot_dimension_numbers<[1], [0], [0], [1], [0, 0, 1, 1], [], []>} : vector<256x768xbf16>, vector<768x256xbf16>, vector<256x256xf32> -> vector<256x256xf32>
    %10 = vector.extract_strided_slice %3 {offsets = [0, 0], sizes = [254, 256], strides = [1, 1]} : vector<256x256xf32> to vector<254x256xf32>
    %11 = vector.extract_strided_slice %6 {offsets = [1, 0], sizes = [254, 256], strides = [1, 1]} : vector<256x256xf32> to vector<254x256xf32>
    %12 = arith.addf %10, %11 : vector<254x256xf32>
    %13 = vector.extract_strided_slice %9 {offsets = [2, 0], sizes = [254, 256], strides = [1, 1]} : vector<256x256xf32> to vector<254x256xf32>
    %14 = arith.addf %12, %13 : vector<254x256xf32>
    %c0_10 = arith.constant 0 : index
    %c0_11 = arith.constant 0 : index
    %15 = vector.load %arg3[%c0_10, %c0_11] : memref<1x256xf32, #tpu.memory_space<vmem>>, vector<1x256xf32>
    %16 = vector.broadcast %15 : vector<1x256xf32> to vector<254x256xf32>
    %17 = arith.addf %14, %16 : vector<254x256xf32>
    %cst_12 = arith.constant 0.000000e+00 : f32
    %18 = vector.broadcast %cst_12 : f32 to vector<254x256xf32>
    %19 = arith.maximumf %17, %18 : vector<254x256xf32>
    %20 = vector.extract_strided_slice %19 {offsets = [0, 0], sizes = [253, 256], strides = [1, 1]} : vector<254x256xf32> to vector<253x256xf32>
    %21 = vector.extract_strided_slice %19 {offsets = [1, 0], sizes = [253, 256], strides = [1, 1]} : vector<254x256xf32> to vector<253x256xf32>
    %22 = arith.maximumf %20, %21 : vector<253x256xf32>
    %23 = arith.truncf %22 : vector<253x256xf32> to vector<253x256xbf16>
    %c0_13 = arith.constant 0 : index
    %c0_14 = arith.constant 0 : index
    %c0_15 = arith.constant 0 : index
    %24 = vector.load %arg4[%c0_13, %c0_14, %c0_15] : memref<3x256x128xbf16, #tpu.memory_space<vmem>>, vector<1x256x128xbf16>
    %25 = vector.shape_cast %24 : vector<1x256x128xbf16> to vector<256x128xbf16>
    %cst_16 = arith.constant dense<0.000000e+00> : vector<253x128xf32>
    %26 = tpu.matmul %23, %25, %cst_16 {dimension_numbers = #tpu.dot_dimension_numbers<[1], [0], [0], [1], [0, 0, 1, 1], [], []>} : vector<253x256xbf16>, vector<256x128xbf16>, vector<253x128xf32> -> vector<253x128xf32>
    %c1_17 = arith.constant 1 : index
    %c0_18 = arith.constant 0 : index
    %c0_19 = arith.constant 0 : index
    %27 = vector.load %arg4[%c1_17, %c0_18, %c0_19] : memref<3x256x128xbf16, #tpu.memory_space<vmem>>, vector<1x256x128xbf16>
    %28 = vector.shape_cast %27 : vector<1x256x128xbf16> to vector<256x128xbf16>
    %cst_20 = arith.constant dense<0.000000e+00> : vector<253x128xf32>
    %29 = tpu.matmul %23, %28, %cst_20 {dimension_numbers = #tpu.dot_dimension_numbers<[1], [0], [0], [1], [0, 0, 1, 1], [], []>} : vector<253x256xbf16>, vector<256x128xbf16>, vector<253x128xf32> -> vector<253x128xf32>
    %c2_21 = arith.constant 2 : index
    %c0_22 = arith.constant 0 : index
    %c0_23 = arith.constant 0 : index
    %30 = vector.load %arg4[%c2_21, %c0_22, %c0_23] : memref<3x256x128xbf16, #tpu.memory_space<vmem>>, vector<1x256x128xbf16>
    %31 = vector.shape_cast %30 : vector<1x256x128xbf16> to vector<256x128xbf16>
    %cst_24 = arith.constant dense<0.000000e+00> : vector<253x128xf32>
    %32 = tpu.matmul %23, %31, %cst_24 {dimension_numbers = #tpu.dot_dimension_numbers<[1], [0], [0], [1], [0, 0, 1, 1], [], []>} : vector<253x256xbf16>, vector<256x128xbf16>, vector<253x128xf32> -> vector<253x128xf32>
    %33 = vector.extract_strided_slice %26 {offsets = [0, 0], sizes = [249, 128], strides = [1, 1]} : vector<253x128xf32> to vector<249x128xf32>
    %34 = vector.extract_strided_slice %29 {offsets = [2, 0], sizes = [249, 128], strides = [1, 1]} : vector<253x128xf32> to vector<249x128xf32>
    %35 = arith.addf %33, %34 : vector<249x128xf32>
    %36 = vector.extract_strided_slice %32 {offsets = [4, 0], sizes = [249, 128], strides = [1, 1]} : vector<253x128xf32> to vector<249x128xf32>
    %37 = arith.addf %35, %36 : vector<249x128xf32>
    %c0_25 = arith.constant 0 : index
    %c0_26 = arith.constant 0 : index
    %38 = vector.load %arg5[%c0_25, %c0_26] : memref<1x128xf32, #tpu.memory_space<vmem>>, vector<1x128xf32>
    %39 = vector.broadcast %38 : vector<1x128xf32> to vector<249x128xf32>
    %40 = arith.addf %37, %39 : vector<249x128xf32>
    %cst_27 = arith.constant 0.000000e+00 : f32
    %41 = vector.broadcast %cst_27 : f32 to vector<249x128xf32>
    %42 = arith.maximumf %40, %41 : vector<249x128xf32>
    %43 = vector.extract_strided_slice %42 {offsets = [0, 0], sizes = [247, 128], strides = [1, 1]} : vector<249x128xf32> to vector<247x128xf32>
    %44 = vector.extract_strided_slice %42 {offsets = [2, 0], sizes = [247, 128], strides = [1, 1]} : vector<249x128xf32> to vector<247x128xf32>
    %45 = arith.maximumf %43, %44 : vector<247x128xf32>
    %46 = arith.truncf %45 : vector<247x128xf32> to vector<247x128xbf16>
    %c0_28 = arith.constant 0 : index
    %c0_29 = arith.constant 0 : index
    %c0_30 = arith.constant 0 : index
    %47 = vector.load %arg6[%c0_28, %c0_29, %c0_30] : memref<3x128x64xbf16, #tpu.memory_space<vmem>>, vector<1x128x64xbf16>
    %48 = vector.shape_cast %47 : vector<1x128x64xbf16> to vector<128x64xbf16>
    %cst_31 = arith.constant dense<0.000000e+00> : vector<247x64xf32>
    %49 = tpu.matmul %46, %48, %cst_31 {dimension_numbers = #tpu.dot_dimension_numbers<[1], [0], [0], [1], [0, 0, 1, 1], [], []>} : vector<247x128xbf16>, vector<128x64xbf16>, vector<247x64xf32> -> vector<247x64xf32>
    %c1_32 = arith.constant 1 : index
    %c0_33 = arith.constant 0 : index
    %c0_34 = arith.constant 0 : index
    %50 = vector.load %arg6[%c1_32, %c0_33, %c0_34] : memref<3x128x64xbf16, #tpu.memory_space<vmem>>, vector<1x128x64xbf16>
    %51 = vector.shape_cast %50 : vector<1x128x64xbf16> to vector<128x64xbf16>
    %cst_35 = arith.constant dense<0.000000e+00> : vector<247x64xf32>
    %52 = tpu.matmul %46, %51, %cst_35 {dimension_numbers = #tpu.dot_dimension_numbers<[1], [0], [0], [1], [0, 0, 1, 1], [], []>} : vector<247x128xbf16>, vector<128x64xbf16>, vector<247x64xf32> -> vector<247x64xf32>
    %c2_36 = arith.constant 2 : index
    %c0_37 = arith.constant 0 : index
    %c0_38 = arith.constant 0 : index
    %53 = vector.load %arg6[%c2_36, %c0_37, %c0_38] : memref<3x128x64xbf16, #tpu.memory_space<vmem>>, vector<1x128x64xbf16>
    %54 = vector.shape_cast %53 : vector<1x128x64xbf16> to vector<128x64xbf16>
    %cst_39 = arith.constant dense<0.000000e+00> : vector<247x64xf32>
    %55 = tpu.matmul %46, %54, %cst_39 {dimension_numbers = #tpu.dot_dimension_numbers<[1], [0], [0], [1], [0, 0, 1, 1], [], []>} : vector<247x128xbf16>, vector<128x64xbf16>, vector<247x64xf32> -> vector<247x64xf32>
    %56 = vector.extract_strided_slice %49 {offsets = [0, 0], sizes = [239, 64], strides = [1, 1]} : vector<247x64xf32> to vector<239x64xf32>
    %57 = vector.extract_strided_slice %52 {offsets = [4, 0], sizes = [239, 64], strides = [1, 1]} : vector<247x64xf32> to vector<239x64xf32>
    %58 = arith.addf %56, %57 : vector<239x64xf32>
    %59 = vector.extract_strided_slice %55 {offsets = [8, 0], sizes = [239, 64], strides = [1, 1]} : vector<247x64xf32> to vector<239x64xf32>
    %60 = arith.addf %58, %59 : vector<239x64xf32>
    %c0_40 = arith.constant 0 : index
    %c0_41 = arith.constant 0 : index
    %61 = vector.load %arg7[%c0_40, %c0_41] : memref<1x64xf32, #tpu.memory_space<vmem>>, vector<1x64xf32>
    %62 = vector.broadcast %61 : vector<1x64xf32> to vector<239x64xf32>
    %63 = arith.addf %60, %62 : vector<239x64xf32>
    %cst_42 = arith.constant 0.000000e+00 : f32
    %64 = vector.broadcast %cst_42 : f32 to vector<239x64xf32>
    %65 = arith.maximumf %63, %64 : vector<239x64xf32>
    %66 = vector.extract_strided_slice %65 {offsets = [0, 0], sizes = [235, 64], strides = [1, 1]} : vector<239x64xf32> to vector<235x64xf32>
    %67 = vector.extract_strided_slice %65 {offsets = [4, 0], sizes = [235, 64], strides = [1, 1]} : vector<239x64xf32> to vector<235x64xf32>
    %68 = arith.maximumf %66, %67 : vector<235x64xf32>
    %69 = vector.extract_strided_slice %68 {offsets = [0, 0], sizes = [227, 64], strides = [1, 1]} : vector<235x64xf32> to vector<227x64xf32>
    %70 = vector.extract_strided_slice %68 {offsets = [8, 0], sizes = [227, 64], strides = [1, 1]} : vector<235x64xf32> to vector<227x64xf32>
    %71 = arith.maximumf %69, %70 : vector<227x64xf32>
    %c0_43 = arith.constant 0 : index
    %c0_44 = arith.constant 0 : index
    %72 = vector.load %arg12[%c0_43, %c0_44] : memref<8x227xf32, #tpu.memory_space<vmem>>, vector<8x227xf32>
    %cst_45 = arith.constant dense<0.000000e+00> : vector<8x64xf32>
    %73 = tpu.matmul %72, %71, %cst_45 {dimension_numbers = #tpu.dot_dimension_numbers<[1], [0], [0], [1], [0, 0, 1, 1], [], []>} : vector<8x227xf32>, vector<227x64xf32>, vector<8x64xf32> -> vector<8x64xf32>
    %c0_46 = arith.constant 0 : index
    %c0_47 = arith.constant 0 : index
    %74 = vector.load %arg8[%c0_46, %c0_47] : memref<64x256xf32, #tpu.memory_space<vmem>>, vector<64x256xf32>
    %cst_48 = arith.constant dense<0.000000e+00> : vector<8x256xf32>
    %75 = tpu.matmul %73, %74, %cst_48 {dimension_numbers = #tpu.dot_dimension_numbers<[1], [0], [0], [1], [0, 0, 1, 1], [], []>} : vector<8x64xf32>, vector<64x256xf32>, vector<8x256xf32> -> vector<8x256xf32>
    %c0_49 = arith.constant 0 : index
    %c0_50 = arith.constant 0 : index
    %76 = vector.load %arg9[%c0_49, %c0_50] : memref<1x256xf32, #tpu.memory_space<vmem>>, vector<1x256xf32>
    %77 = vector.broadcast %76 : vector<1x256xf32> to vector<8x256xf32>
    %78 = arith.addf %75, %77 : vector<8x256xf32>
    %cst_51 = arith.constant 0.000000e+00 : f32
    %79 = vector.broadcast %cst_51 : f32 to vector<8x256xf32>
    %80 = arith.maximumf %78, %79 : vector<8x256xf32>
    %c0_52 = arith.constant 0 : index
    %c0_53 = arith.constant 0 : index
    %81 = vector.load %arg10[%c0_52, %c0_53] : memref<256x128xf32, #tpu.memory_space<vmem>>, vector<256x128xf32>
    %cst_54 = arith.constant dense<0.000000e+00> : vector<8x128xf32>
    %82 = tpu.matmul %80, %81, %cst_54 {dimension_numbers = #tpu.dot_dimension_numbers<[1], [0], [0], [1], [0, 0, 1, 1], [], []>} : vector<8x256xf32>, vector<256x128xf32>, vector<8x128xf32> -> vector<8x128xf32>
    %c0_55 = arith.constant 0 : index
    %c0_56 = arith.constant 0 : index
    %83 = vector.load %arg11[%c0_55, %c0_56] : memref<1x128xf32, #tpu.memory_space<vmem>>, vector<1x128xf32>
    %84 = vector.broadcast %83 : vector<1x128xf32> to vector<8x128xf32>
    %85 = arith.addf %82, %84 : vector<8x128xf32>
    %cst_57 = arith.constant 0.000000e+00 : f32
    %86 = vector.broadcast %cst_57 : f32 to vector<8x128xf32>
    %87 = arith.maximumf %85, %86 : vector<8x128xf32>
    %c0_58 = arith.constant 0 : index
    %c0_59 = arith.constant 0 : index
    %88 = vector.load %arg13[%c0_58, %c0_59] : memref<8x128xf32, #tpu.memory_space<vmem>>, vector<8x128xf32>
    tpu.vector_store %arg13[%c0_58, %c0_59], %87 {strides = array<i32>} : memref<8x128xf32, #tpu.memory_space<vmem>>, vector<8x128xf32>,
    return
  }
  func.func @transform_0(%arg0: i32) -> (i32, i32) {
    %c0_i32 = arith.constant 0 : i32
    %c0_i32_0 = arith.constant 0 : i32
    return %arg0, %c0_i32 : i32, i32
  }
  func.func @transform_1(%arg0: i32) -> (i32, i32, i32) {
    %c0_i32 = arith.constant 0 : i32
    %c0_i32_0 = arith.constant 0 : i32
    %c0_i32_1 = arith.constant 0 : i32
    %c0_i32_2 = arith.constant 0 : i32
    return %c0_i32, %c0_i32_0, %c0_i32_1 : i32, i32, i32
  }
  func.func @transform_2(%arg0: i32) -> (i32, i32) {
    %c0_i32 = arith.constant 0 : i32
    %c0_i32_0 = arith.constant 0 : i32
    %c0_i32_1 = arith.constant 0 : i32
    return %c0_i32, %c0_i32_0 : i32, i32
  }
  func.func @transform_3(%arg0: i32) -> (i32, i32, i32) {
    %c0_i32 = arith.constant 0 : i32
    %c0_i32_0 = arith.constant 0 : i32
    %c0_i32_1 = arith.constant 0 : i32
    %c0_i32_2 = arith.constant 0 : i32
    return %c0_i32, %c0_i32_0, %c0_i32_1 : i32, i32, i32
  }
  func.func @transform_4(%arg0: i32) -> (i32, i32) {
    %c0_i32 = arith.constant 0 : i32
    %c0_i32_0 = arith.constant 0 : i32
    %c0_i32_1 = arith.constant 0 : i32
    return %c0_i32, %c0_i32_0 : i32, i32
  }
  func.func @transform_5(%arg0: i32) -> (i32, i32, i32) {
    %c0_i32 = arith.constant 0 : i32
    %c0_i32_0 = arith.constant 0 : i32
    %c0_i32_1 = arith.constant 0 : i32
    %c0_i32_2 = arith.constant 0 : i32
    return %c0_i32, %c0_i32_0, %c0_i32_1 : i32, i32, i32
  }
  func.func @transform_6(%arg0: i32) -> (i32, i32) {
    %c0_i32 = arith.constant 0 : i32
    %c0_i32_0 = arith.constant 0 : i32
    %c0_i32_1 = arith.constant 0 : i32
    return %c0_i32, %c0_i32_0 : i32, i32
  }
  func.func @transform_7(%arg0: i32) -> (i32, i32) {
    %c0_i32 = arith.constant 0 : i32
    %c0_i32_0 = arith.constant 0 : i32
    %c0_i32_1 = arith.constant 0 : i32
    return %c0_i32, %c0_i32_0 : i32, i32
  }
  func.func @transform_8(%arg0: i32) -> (i32, i32) {
    %c0_i32 = arith.constant 0 : i32
    %c0_i32_0 = arith.constant 0 : i32
    %c0_i32_1 = arith.constant 0 : i32
    return %c0_i32, %c0_i32_0 : i32, i32
  }
  func.func @transform_9(%arg0: i32) -> (i32, i32) {
    %c0_i32 = arith.constant 0 : i32
    %c0_i32_0 = arith.constant 0 : i32
    %c0_i32_1 = arith.constant 0 : i32
    return %c0_i32, %c0_i32_0 : i32, i32
  }
  func.func @transform_10(%arg0: i32) -> (i32, i32) {
    %c0_i32 = arith.constant 0 : i32
    %c0_i32_0 = arith.constant 0 : i32
    %c0_i32_1 = arith.constant 0 : i32
    return %c0_i32, %c0_i32_0 : i32, i32
  }
  func.func @transform_11(%arg0: i32) -> (i32, i32) {
    %c0_i32 = arith.constant 0 : i32
    %c0_i32_0 = arith.constant 0 : i32
    %c0_i32_1 = arith.constant 0 : i32
    return %c0_i32, %c0_i32_0 : i32, i32
  }
  func.func @transform_12(%arg0: i32) -> (i32, i32) {
    %c0_i32 = arith.constant 0 : i32
    %c0_i32_0 = arith.constant 0 : i32
    return %arg0, %c0_i32 : i32, i32
  }
}

</mosaic_0001>

<bundles_post_ra>
// kernel: muti_model_choice1.1
= control target key start
LH: loop header
LB: loop body
LE: loop exit
PB: predicated region body
PF: predicated region fallthrough
CT: control target
= control target key end

     0   :  { %s12350_s21 = smov 0   ;;  %s18688_s0 = inlined_call_operand.vmem [shape: bf16[768,768], index: 0, kind: input, shape index: {}]   ;;  %s18689_s1 = inlined_call_operand.vmem [shape: bf16[3,768,256], index: 1, kind: input, shape index: {}]   ;;  %s18690_s2 = inlined_call_operand.vmem [shape: f32[1,256], index: 2, kind: input, shape index: {}]   ;;  %s18691_s3 = inlined_call_operand.vmem [shape: bf16[3,256,128], index: 3, kind: input, shape index: {}]   ;;  %s18692_s4 = inlined_call_operand.vmem [shape: f32[1,128], index: 4, kind: input, shape index: {}]   ;;  %s18693_s5 = inlined_call_operand.vmem [shape: bf16[3,128,64], index: 5, kind: input, shape index: {}]   ;;  %s18694_s6 = inlined_call_operand.vmem [shape: f32[1,64], index: 6, kind: input, shape index: {}]   ;;  %s18695_s7 = inlined_call_operand.vmem [shape: f32[64,256], index: 7, kind: input, shape index: {}]   ;;  %s18696_s8 = inlined_call_operand.vmem [shape: f32[1,256], index: 8, kind: input, shape index: {}]   ;;  %s18697_s9 = inlined_call_operand.vmem [shape: f32[256,128], index: 9, kind: input, shape index: {}]   ;;  %s18698_s10 = inlined_call_operand.vmem [shape: f32[1,128], index: 10, kind: input, shape index: {}]   ;;  %s18699_s11 = inlined_call_operand.vmem [shape: f32[8,227], index: 11, kind: input, shape index: {}]   ;;  %s18700_s12 = inlined_call_operand.vmem [shape: f32[24,128], index: 12, kind: output, shape index: {}]  }
   0x1 LB: > { %s12356_s22 = sadd.s32 4294967295, %s12283_s21   ;;  %p9662_p0 = scmp.ge.s32.totalorder %s12283_s21, 1  ;;  %s12283_s21 = sphi %s12350_s21, %s22_s21  }
   0x2   : > { %p364_p1 = scmp.lt.s32.totalorder %s12283_s21, 4 }
   0x4   : > { %p365_p2 = pnand %p9662_p0, %p364_p1 }
   0x6   : > { %368 = sbr.rel (%p365_p2) target bundleno = 3677 (0xe5d), region = 68 }
   0xb   : > { %v10108_v0 = vld [vmem:[%s18689_s1 + $0x70] sm:$0xf]  ;;  %v11895_v1 = vld [vmem:[%s18689_s1 + $0x74] sm:$0xf0]  ;;  %v10100_v2 = vld [vmem:[%s18689_s1 + $0x60] sm:$0xf] }
   0xc   : > { %v10109_v3 = vor.u32 %v11895_v1, %v10108_v0  ;;  %v11893_v4 = vld [vmem:[%s18689_s1 + $0x64] sm:$0xf0]  ;;  %v10092_v6 = vld [vmem:[%s18689_s1 + $0x50] sm:$0xf]  ;;  %v11891_v7 = vld [vmem:[%s18689_s1 + $0x54] sm:$0xf0] }
   0xd   : > { %v10101_v5 = vor.u32 %v11893_v4, %v10100_v2  ;;  %v10093_v8 = vor.u32 %v11891_v7, %v10092_v6  ;;  %v10084_v9 = vld [vmem:[%s18689_s1 + $0x40] sm:$0xf]  ;;  %s9663_s19 = sshll.u32 %s12356_s22, 5  ;;  %v11889_v10 = vld [vmem:[%s18689_s1 + $0x44] sm:$0xf0]  ;;  %vm5991_vm0 = vcmask 1046528  }
   0xe   : > { %1569 = vmatpush.bf16.msra.mxu0 %v10109_v3  ;;  %12240 = vmatpush.bf16.msra.mxu1 %v10109_v3  ;;  %p407_p3 = scmp.lt.s32.totalorder %s9663_s19, 95  ;;  %v10085_v11 = vor.u32 %v11889_v10, %v10084_v9  ;;  %v10076_v12 = vld [vmem:[%s18689_s1 + $0x30] sm:$0xf]  ;;  %v11887_v13 = vld [vmem:[%s18689_s1 + $0x34] sm:$0xf0]  ;;  %vm6310_vm1 = vcmask 1045504  }
   0xf   : > { %12241 = vmatpush.bf16.msra.mxu2 %v10109_v3  ;;  %12242 = vmatpush.bf16.msra.mxu3 %v10109_v3  ;;  %v10077_v14 = vor.u32 %v11887_v13, %v10076_v12  ;;  %v10068_v15 = vld [vmem:[%s18689_s1 + $0x20] sm:$0xf]  ;;  %v11885_v16 = vld [vmem:[%s18689_s1 + $0x24] sm:$0xf0]  ;;  %v10060_v18 = vld [vmem:[%s18689_s1 + $0x10] sm:$0xf] }
  0x10   : > { %s19869_s19 = smov (!%p407_p3, %s9663_s19), 95  ;;  %v10069_v17 = vor.u32 %v11885_v16, %v10068_v15  ;;  %v11883_v19 = vld [vmem:[%s18689_s1 + $0x14] sm:$0xf0]  ;;  %v10052_v21 = vld [vmem:[%s18689_s1] sm:$0xf]  ;;  %vm8160_vm2 = vcmask 1043456  }
  0x11   : > { %s12264_s14 = smul.u32 24, %s19869_s19  ;;  %v10061_v20 = vor.u32 %v11883_v19, %v10060_v18  ;;  %v11881_v22 = vld [vmem:[%s18689_s1 + $0x4] sm:$0xf0]  ;;  %v10236_v24 = vld [vmem:[%s18689_s1 + $0x170] sm:$0xf]  ;;  %vm9415_vm3 = vcmask 1042432  }
  0x12   : > { %1570 = vmatpush.bf16.msra.mxu0 %v10101_v5  ;;  %12243 = vmatpush.bf16.msra.mxu1 %v10101_v5  ;;  %v11927_v25 = vld [vmem:[%s18689_s1 + $0x174] sm:$0xf0]  ;;  %v10300_v27 = vld [vmem:[%s18689_s1 + $0x1f0] sm:$0xf]  ;;  %v10053_v29 = vor.u32 %v11881_v22, %v10052_v21  ;;  %v10228_v37 = vld [vmem:[%s18689_s1 + $0x160] sm:$0xf] }
  0x13   : > { %12244 = vmatpush.bf16.msra.mxu2 %v10101_v5  ;;  %12245 = vmatpush.bf16.msra.mxu3 %v10101_v5  ;;  %s12406_s24 = scalar_lea.vmem %s18688_s0, %s12264_s14  ;;  %v11943_v28 = vld [vmem:[%s18689_s1 + $0x1f4] sm:$0xf0]  ;;  %v10237_v36 = vor.u32 %v11927_v25, %v10236_v24  ;;  %v11925_v41 = vld [vmem:[%s18689_s1 + $0x164] sm:$0xf0]  ;;  %v10292_v42 = vld [vmem:[%s18689_s1 + $0x1e0] sm:$0xf] }
  0x14   : > { %v9668_v23 = vld [vmem:[%s12406_s24] sm:$0xf]  ;;  %v11787_v26 = vld [vmem:[%s12406_s24 + $0x14] sm:$0xf0]  ;;  %v9932_v32 = vld [vmem:[%s12406_s24 + $0x210] sm:$0xf]  ;;  %v10301_v38 = vor.u32 %v11943_v28, %v10300_v27  ;;  %v10229_v46 = vor.u32 %v11925_v41, %v10228_v37 }
  0x15   : > { %v9812_v30 = vld [vmem:[%s12406_s24 + $0x120] sm:$0xf]  ;;  %v11823_v31 = vld [vmem:[%s12406_s24 + $0x134] sm:$0xf0]  ;;  %v11853_v33 = vld [vmem:[%s12406_s24 + $0x224] sm:$0xf0]  ;;  %v12437_v39 = vor.u32 %v11787_v26, %v9668_v23 }
  0x16   : > { %1571 = vmatpush.bf16.msra.mxu0 %v10093_v8  ;;  %12246 = vmatpush.bf16.msra.mxu1 %v10093_v8  ;;  %v9980_v34 = vld [vmem:[%s12406_s24 + $0x270] sm:$0xf]  ;;  %v11865_v35 = vld [vmem:[%s12406_s24 + $0x284] sm:$0xf0]  ;;  %v12439_v40 = vor.u32 %v11823_v31, %v9812_v30  ;;  %v12450_v44 = vor.u32 %v11853_v33, %v9932_v32  ;;  %v11923_v49 = vld [vmem:[%s18689_s1 + $0x154] sm:$0xf0] }
  0x17   : > { %12247 = vmatpush.bf16.msra.mxu2 %v10093_v8  ;;  %12248 = vmatpush.bf16.msra.mxu3 %v10093_v8  ;;  %18966 = vst [vmem:[#allocation2_spill] sm:$0xff] %v12437_v39  ;;  %v11941_v43 = vld [vmem:[%s18689_s1 + $0x1e4] sm:$0xf0]  ;;  %v12452_v45 = vor.u32 %v11865_v35, %v9980_v34  ;;  %v10220_v47 = vld [vmem:[%s18689_s1 + $0x150] sm:$0xf]  ;;  %vm9411_vm4 = vcmask 809984  }
  0x18   : > { %18967 = vst [vmem:[#allocation3_spill] sm:$0xff] %v12439_v40  ;;  %v10293_v48 = vor.u32 %v11941_v43, %v10292_v42  ;;  %v10284_v50 = vld [vmem:[%s18689_s1 + $0x1d0] sm:$0xf]  ;;  %v11939_v51 = vld [vmem:[%s18689_s1 + $0x1d4] sm:$0xf0]  ;;  %v10221_v52 = vor.u32 %v11923_v49, %v10220_v47  ;;  %vm9481_vm5 = vcmask 523264  }
  0x19   : > { %18968 = vst [vmem:[#allocation4_spill] sm:$0xff] %v12450_v44  ;;  %v10212_v53 = vld [vmem:[%s18689_s1 + $0x140] sm:$0xf]  ;;  %v10285_v54 = vor.u32 %v11939_v51, %v10284_v50  ;;  %v11921_v55 = vld [vmem:[%s18689_s1 + $0x144] sm:$0xf0]  ;;  %p413_p4 = scmp.lt.s32.totalorder %s12356_s22, 2 }
  0x1a   : > { %1572 = vmatpush.bf16.msra.mxu0 %v10085_v11  ;;  %12249 = vmatpush.bf16.msra.mxu1 %v10085_v11  ;;  %18969 = vst [vmem:[#allocation5_spill] sm:$0xff] %v12452_v45  ;;  %v10276_v56 = vld [vmem:[%s18689_s1 + $0x1c0] sm:$0xf]  ;;  %v11937_v57 = vld [vmem:[%s18689_s1 + $0x1c4] sm:$0xf0]  ;;  %v10213_v58 = vor.u32 %v11921_v55, %v10212_v53 }
  0x1b   : > { %12250 = vmatpush.bf16.msra.mxu2 %v10085_v11  ;;  %12251 = vmatpush.bf16.msra.mxu3 %v10085_v11  ;;  %v9692_v59 = vld [vmem:[%s12406_s24 + $0x30] sm:$0xf]  ;;  %v11793_v60 = vld [vmem:[%s12406_s24 + $0x44] sm:$0xf0]  ;;  %v10277_v62 = vor.u32 %v11937_v57, %v10276_v56  ;;  %v11919_v63 = vld [vmem:[%s18689_s1 + $0x134] sm:$0xf0] }
  0x1c   : > { %v10204_v61 = vld [vmem:[%s18689_s1 + $0x130] sm:$0xf]  ;;  %v11935_v1 = vld [vmem:[%s18689_s1 + $0x1b4] sm:$0xf0]  ;;  %v11829_v3 = vld [vmem:[%s12406_s24 + $0x164] sm:$0xf0]  ;;  %v12505_v11 = vor.u32 %v11793_v60, %v9692_v59 }
  0x1d   : > { %v10268_v0 = vld [vmem:[%s18689_s1 + $0x1b0] sm:$0xf]  ;;  %v9956_v4 = vld [vmem:[%s12406_s24 + $0x240] sm:$0xf]  ;;  %v11859_v5 = vld [vmem:[%s12406_s24 + $0x254] sm:$0xf0]  ;;  %v10205_v8 = vor.u32 %v11919_v63, %v10204_v61 }
  0x1e   : > { %1573 = vmatpush.bf16.msra.mxu0 %v10077_v14  ;;  %12252 = vmatpush.bf16.msra.mxu1 %v10077_v14  ;;  %v9836_v2 = vld [vmem:[%s12406_s24 + $0x150] sm:$0xf]  ;;  %v10004_v6 = vld [vmem:[%s12406_s24 + $0x2a0] sm:$0xf]  ;;  %v11871_v7 = vld [vmem:[%s12406_s24 + $0x2b4] sm:$0xf0]  ;;  %v10269_v10 = vor.u32 %v11935_v1, %v10268_v0  ;;  %v12518_v16 = vor.u32 %v11859_v5, %v9956_v4 }
  0x1f   : > { %12253 = vmatpush.bf16.msra.mxu2 %v10077_v14  ;;  %12254 = vmatpush.bf16.msra.mxu3 %v10077_v14  ;;  %v10196_v9 = vld [vmem:[%s18689_s1 + $0x120] sm:$0xf]  ;;  %18970 = vst [vmem:[#allocation6_spill] sm:$0xff] %v12505_v11  ;;  %v12507_v12 = vor.u32 %v11829_v3, %v9836_v2  ;;  %v11917_v13 = vld [vmem:[%s18689_s1 + $0x124] sm:$0xf0]  ;;  %s19871_s22 = smov (!%p413_p4, %s12356_s22), 2 }
  0x20   : > { %v10260_v14 = vld [vmem:[%s18689_s1 + $0x1a0] sm:$0xf]  ;;  %v11933_v15 = vld [vmem:[%s18689_s1 + $0x1a4] sm:$0xf0]  ;;  %18972 = vst [vmem:[#allocation8_spill] sm:$0xff] %v12518_v16  ;;  %v10197_v18 = vor.u32 %v11917_v13, %v10196_v9 }
  0x21   : > { %18971 = vst [vmem:[#allocation7_spill] sm:$0xff] %v12507_v12  ;;  %v10188_v19 = vld [vmem:[%s18689_s1 + $0x110] sm:$0xf]  ;;  %v10261_v21 = vor.u32 %v11933_v15, %v10260_v14  ;;  %v11931_v23 = vld [vmem:[%s18689_s1 + $0x194] sm:$0xf0] }
  0x22   : > { %1574 = vmatpush.bf16.msra.mxu0 %v10069_v17  ;;  %12255 = vmatpush.bf16.msra.mxu1 %v10069_v17  ;;  %v10252_v22 = vld [vmem:[%s18689_s1 + $0x190] sm:$0xf]  ;;  %v11911_v25 = vld [vmem:[%s18689_s1 + $0xf4] sm:$0xf0]  ;;  %v10164_v27 = vld [vmem:[%s18689_s1 + $0xe0] sm:$0xf] }
  0x23   : > { %12256 = vmatpush.bf16.msra.mxu2 %v10069_v17  ;;  %12257 = vmatpush.bf16.msra.mxu3 %v10069_v17  ;;  %v12520_v17 = vor.u32 %v11871_v7, %v10004_v6  ;;  %v10172_v24 = vld [vmem:[%s18689_s1 + $0xf0] sm:$0xf]  ;;  %v11909_v28 = vld [vmem:[%s18689_s1 + $0xe4] sm:$0xf0]  ;;  %v10180_v30 = vld [vmem:[%s18689_s1 + $0x100] sm:$0xf]  ;;  %v10253_v31 = vor.u32 %v11931_v23, %v10252_v22 }
  0x24   : > { %v10173_v26 = vor.u32 %v11911_v25, %v10172_v24  ;;  %v11913_v32 = vld [vmem:[%s18689_s1 + $0x104] sm:$0xf0]  ;;  %v10244_v33 = vld [vmem:[%s18689_s1 + $0x180] sm:$0xf]  ;;  %v10165_v35 = vor.u32 %v11909_v28, %v10164_v27  ;;  %v11907_v37 = vld [vmem:[%s18689_s1 + $0xd4] sm:$0xf0] }
  0x25   : > { %18973 = vst [vmem:[#allocation9_spill] sm:$0xff] %v12520_v17  ;;  %v11929_v34 = vld [vmem:[%s18689_s1 + $0x184] sm:$0xf0]  ;;  %v9716_v42 = vld [vmem:[%s12406_s24 + $0x60] sm:$0xf] }
  0x26   : > { %1575 = vmatpush.bf16.msra.mxu0 %v10061_v20  ;;  %12258 = vmatpush.bf16.msra.mxu1 %v10061_v20  ;;  %v10245_v41 = vor.u32 %v11929_v34, %v10244_v33  ;;  %v11799_v43 = vld [vmem:[%s12406_s24 + $0x74] sm:$0xf0]  ;;  %v9860_v47 = vld [vmem:[%s12406_s24 + $0x180] sm:$0xf]  ;;  %v10028_v49 = vld [vmem:[%s12406_s24 + $0x2d0] sm:$0xf] }
  0x27   : > { %12259 = vmatpush.bf16.msra.mxu2 %v10061_v20  ;;  %12260 = vmatpush.bf16.msra.mxu3 %v10061_v20  ;;  %v11915_v20 = vld [vmem:[%s18689_s1 + $0x114] sm:$0xf0]  ;;  %v11877_v50 = vld [vmem:[%s12406_s24 + $0x2e4] sm:$0xf0]  ;;  %v10148_v53 = vld [vmem:[%s18689_s1 + $0xc0] sm:$0xf]  ;;  %v12582_v55 = vor.u32 %v11799_v43, %v9716_v42 }
  0x28   : > { %v9676_v51 = vld [vmem:[%s12406_s24 + $0x8] sm:$0xf]  ;;  %v12586_v57 = vor.u32 %v11877_v50, %v10028_v49  ;;  %v10140_v60 = vld [vmem:[%s18689_s1 + $0xb0] sm:$0xf]  ;;  %v11903_v61 = vld [vmem:[%s18689_s1 + $0xb4] sm:$0xf0] }
  0x29   : > { %18974 = vst [vmem:[#allocation10_spill] sm:$0xff] %v12582_v55  ;;  %v11959_v63 = vld [vmem:[%s18689_s1 + $0x274] sm:$0xf0]  ;;  %v10141_v0 = vor.u32 %v11903_v61, %v10140_v60  ;;  %v10356_v2 = vld [vmem:[%s18689_s1 + $0x260] sm:$0xf] }
  0x2a   : > { %1576 = vmatpush.bf16.msra.mxu0 %v10053_v29  ;;  %12261 = vmatpush.bf16.msra.mxu1 %v10053_v29  ;;  %18976 = vst [vmem:[#allocation12_spill] sm:$0xff] %v12586_v57  ;;  %v11957_v3 = vld [vmem:[%s18689_s1 + $0x264] sm:$0xf0]  ;;  %v10132_v4 = vld [vmem:[%s18689_s1 + $0xa0] sm:$0xf] }
  0x2b   : > { %12262 = vmatpush.bf16.msra.mxu2 %v10053_v29  ;;  %12263 = vmatpush.bf16.msra.mxu3 %v10053_v29  ;;  %v10189_v29 = vor.u32 %v11915_v20, %v10188_v19  ;;  %v11901_v5 = vld [vmem:[%s18689_s1 + $0xa4] sm:$0xf0]  ;;  %v10357_v6 = vor.u32 %v11957_v3, %v10356_v2  ;;  %v10348_v7 = vld [vmem:[%s18689_s1 + $0x250] sm:$0xf]  ;;  %v11899_v13 = vld [vmem:[%s18689_s1 + $0x94] sm:$0xf0] }
  0x2c   : > { %v10133_v9 = vor.u32 %v11901_v5, %v10132_v4  ;;  %v9740_v14 = vld [vmem:[%s12406_s24 + $0x90] sm:$0xf]  ;;  %v11805_v15 = vld [vmem:[%s12406_s24 + $0xa4] sm:$0xf0]  ;;  %v11785_v23 = vld [vmem:[%s12406_s24 + $0xc] sm:$0xf] }
  0x2d   : > { %1577 = vmatmul.bf16.vlgmr.msra.gmra.mxu0 %v12437_v39  ;;  %1607 = vmatmul.bf16.vlgmr.msra.gmra.mxu1 %v12439_v40  ;;  %v11841_v20 = vld [vmem:[%s12406_s24 + $0x1c4] sm:$0xf0]  ;;  %v11794_v22 = vld [vmem:[%s12406_s24 + $0x4c] sm:$0xf0]  ;;  %v9678_v24 = vld [vmem:[%s12406_s24 + $0x20] sm:$0xf0] }
  0x2e   : > { %1632 = vmatmul.bf16.vlgmr.msra.gmra.mxu2 %v12450_v44  ;;  %1642 = vmatmul.bf16.vlgmr.msra.gmra.mxu3 %v12452_v45  ;;  %v11897_v27 = vld [vmem:[%s18689_s1 + $0x84] sm:$0xf0]  ;;  %v10340_v28 = vld [vmem:[%s18689_s1 + $0x240] sm:$0xf]  ;;  %v12656_v33 = vor.u32 %v11785_v23, %v9678_v24  ;;  %v11811_v49 = vld [vmem:[%s12406_s24 + $0xd4] sm:$0xf0] }
  0x2f   : > { %1747 = vmatpush.bf16.msrb.mxu2 %v10237_v36  ;;  %1836 = vmatpush.bf16.msrb.mxu3 %v10301_v38  ;;  %v10156_v36 = vld [vmem:[%s18689_s1 + $0xd0] sm:$0xf]  ;;  %v10181_v38 = vor.u32 %v11913_v32, %v10180_v30  ;;  %v12650_v30 = vor.u32 %v11805_v15, %v9740_v14  ;;  %v11949_v42 = vld [vmem:[%s18689_s1 + $0x224] sm:$0xf0]  ;;  %v9908_v50 = vld [vmem:[%s12406_s24 + $0x1e0] sm:$0xf] }
  0x30   : > { %1658 = vmatpush.bf16.msrb.mxu1 %v10173_v26  ;;  %v10116_v26 = vld [vmem:[%s18689_s1 + $0x80] sm:$0xf]  ;;  %18981 = vst [vmem:[#allocation17_spill] sm:$0xff] %v12656_v33  ;;  %v9788_v4 = vld [vmem:[%s12406_s24 + $0xf0] sm:$0xf] }
  0x31   : > { %18978 = vst [vmem:[#allocation14_spill] sm:$0xff] %v12650_v30  ;;  %v10117_v34 = vor.u32 %v11897_v27, %v10116_v26  ;;  %v10308_v61 = vld [vmem:[%s18689_s1 + $0x200] sm:$0xf]  ;;  %v11817_v5 = vld [vmem:[%s12406_s24 + $0x104] sm:$0xf0] }
  0x32   : > { %v12714_v14 = vor.u32 %v11817_v5, %v9788_v4  ;;  %v9684_v23 = vld [vmem:[%s12406_s24 + $0x10] sm:$0xf]  ;;  %v11789_v24 = vld [vmem:[%s12406_s24 + $0x24] sm:$0xf0]  ;;  %v11803_v26 = vld [vmem:[%s12406_s24 + $0x9c] sm:$0xf] }
  0x33   : > { %1748 = vmatpush.bf16.msrb.mxu2 %v10229_v46  ;;  %1837 = vmatpush.bf16.msrb.mxu3 %v10293_v48  ;;  %v10157_v46 = vor.u32 %v11907_v37, %v10156_v36  ;;  %v11835_v48 = vld [vmem:[%s12406_s24 + $0x194] sm:$0xf0]  ;;  %v10332_v36 = vld [vmem:[%s18689_s1 + $0x230] sm:$0xf]  ;;  %v9750_v27 = vld [vmem:[%s12406_s24 + $0xb0] sm:$0xf0] }
  0x34   : > { %1659 = vmatpush.bf16.msrb.mxu1 %v10165_v35  ;;  %v12584_v56 = vor.u32 %v11835_v48, %v9860_v47  ;;  %v11951_v37 = vld [vmem:[%s18689_s1 + $0x234] sm:$0xf0]  ;;  %v9764_v48 = vld [vmem:[%s12406_s24 + $0xc0] sm:$0xf]  ;;  %18986 = vst [vmem:[#allocation22_spill] sm:$0xff] %v12714_v14 }
  0x35   : > { %v11947_v47 = vld [vmem:[%s18689_s1 + $0x214] sm:$0xf0]  ;;  %v11825_v44 = vld [vmem:[%s12406_s24 + $0x144] sm:$0xf0] }
  0x36   : > { %18975 = vst [vmem:[#allocation11_spill] sm:$0xff] %v12584_v56 }
  0x37   : > { %1749 = vmatpush.bf16.msrb.mxu2 %v10221_v52  ;;  %1838 = vmatpush.bf16.msrb.mxu3 %v10285_v54  ;;  %v11788_v52 = vld [vmem:[%s12406_s24 + $0x1c] sm:$0xf0]  ;;  %v11905_v54 = vld [vmem:[%s18689_s1 + $0xc4] sm:$0xf0] }
  0x38   : > { %1660 = vmatpush.bf16.msrb.mxu1 %v10157_v46  ;;  %v10149_v59 = vor.u32 %v11905_v54, %v10148_v53  ;;  %v10316_v46 = vld [vmem:[%s18689_s1 + $0x210] sm:$0xf]  ;;  %v11800_v53 = vld [vmem:[%s12406_s24 + $0x7c] sm:$0xf0]  ;;  %v11791_v54 = vld [vmem:[%s12406_s24 + $0x3c] sm:$0xf] }
  0x39   : > { %v10317_v60 = vor.u32 %v11947_v47, %v10316_v46  ;;  %v11809_v46 = vld [vmem:[%s12406_s24 + $0xcc] sm:$0xf]  ;;  %v9774_v47 = vld [vmem:[%s12406_s24 + $0xe0] sm:$0xf0] }
  0x3b   : > { %1750 = vmatpush.bf16.msrb.mxu2 %v10213_v58  ;;  %1839 = vmatpush.bf16.msrb.mxu3 %v10277_v62  ;;  %v12588_v58 = vor.u32 %v11788_v52, %v9676_v51  ;;  %v10364_v62 = vld [vmem:[%s18689_s1 + $0x270] sm:$0xf]  ;;  %v11847_v51 = vld [vmem:[%s12406_s24 + $0x1f4] sm:$0xf0]  ;;  %v9724_v52 = vld [vmem:[%s12406_s24 + $0x68] sm:$0xf] }
  0x3c   : > { %1661 = vmatpush.bf16.msrb.mxu1 %v10149_v59  ;;  %v10365_v1 = vor.u32 %v11959_v63, %v10364_v62  ;;  %v9702_v59 = vld [vmem:[%s12406_s24 + $0x50] sm:$0xf0]  ;;  %v11945_v62 = vld [vmem:[%s18689_s1 + $0x204] sm:$0xf0]  ;;  %v12694_v63 = vor.u32 %v11811_v49, %v9764_v48 }
  0x3d   : > { %1582 = vmatmul.bf16.gmra.mxu0 %v12505_v11  ;;  %1612 = vmatmul.bf16.gmra.mxu1 %v12507_v12  ;;  %18977 = vst [vmem:[#allocation13_spill] sm:$0xff] %v12588_v58  ;;  %v12700_v2 = vor.u32 %v11791_v54, %v9702_v59  ;;  %v10309_v3 = vor.u32 %v11945_v62, %v10308_v61  ;;  %v9820_v54 = vld [vmem:[%s12406_s24 + $0x128] sm:$0xf]  ;;  %v9732_v59 = vld [vmem:[%s12406_s24 + $0x70] sm:$0xf] }
  0x3e   : > { %1637 = vmatmul.bf16.gmra.mxu2 %v12518_v16  ;;  %1647 = vmatmul.bf16.gmra.mxu3 %v12520_v17  ;;  %18982 = vst [vmem:[#allocation18_spill] sm:$0xff] %v12694_v63  ;;  %v11824_v61 = vld [vmem:[%s12406_s24 + $0x13c] sm:$0xf0]  ;;  %v11815_v62 = vld [vmem:[%s12406_s24 + $0xfc] sm:$0xf] }
  0x3f   : > { %1751 = vmatpush.bf16.msrb.mxu2 %v10205_v8  ;;  %1840 = vmatpush.bf16.msrb.mxu3 %v10269_v10  ;;  %v11955_v8 = vld [vmem:[%s18689_s1 + $0x254] sm:$0xf0]  ;;  %v10124_v10 = vld [vmem:[%s18689_s1 + $0x90] sm:$0xf]  ;;  %18985 = vst [vmem:[#allocation21_spill] sm:$0xff] %v12700_v2 }
  0x40   : > { %1925 = vmatpush.bf16.msrb.mxu0 %v10365_v1  ;;  %1662 = vmatpush.bf16.msrb.mxu1 %v10141_v0  ;;  %v10349_v19 = vor.u32 %v11955_v8, %v10348_v7  ;;  %v10125_v25 = vor.u32 %v11899_v13, %v10124_v10  ;;  %v12696_v0 = vor.u32 %v11847_v51, %v9908_v50  ;;  %v9670_v7 = vld [vmem:[%s12406_s24 + $0x18] sm:$0xf0]  ;;  %v9748_v8 = vld [vmem:[%s12406_s24 + $0x98] sm:$0xf]  ;;  %v11797_v10 = vld [vmem:[%s12406_s24 + $0x6c] sm:$0xf] }
  0x41   : > { %v12698_v1 = vor.u32 %v11800_v53, %v9724_v52  ;;  %v9726_v13 = vld [vmem:[%s12406_s24 + $0x80] sm:$0xf0]  ;;  %v12760_v51 = vor.u32 %v11809_v46, %v9774_v47  ;;  %v11802_v52 = vld [vmem:[%s12406_s24 + $0x94] sm:$0xf]  ;;  %v9742_v53 = vld [vmem:[%s12406_s24 + $0xa8] sm:$0xf0] }
  0x42   : > { %18983 = vst [vmem:[#allocation19_spill] sm:$0xff] %v12696_v0  ;;  %v12774_v4 = vor.u32 %v11802_v52, %v9742_v53 }
  0x43   : > { %1752 = vmatpush.bf16.msrb.mxu2 %v10197_v18  ;;  %1841 = vmatpush.bf16.msrb.mxu3 %v10261_v21  ;;  %v9884_v18 = vld [vmem:[%s12406_s24 + $0x1b0] sm:$0xf]  ;;  %v9700_v21 = vld [vmem:[%s12406_s24 + $0x38] sm:$0xf]  ;;  %18984 = vst [vmem:[#allocation20_spill] sm:$0xff] %v12698_v1 }
  0x44   : > { %1926 = vmatpush.bf16.msrb.mxu0 %v10357_v6  ;;  %1663 = vmatpush.bf16.msrb.mxu1 %v10133_v9  ;;  %v12654_v32 = vor.u32 %v11794_v22, %v9700_v21  ;;  %v11784_v6 = vld [vmem:[%s12406_s24 + $0x4] sm:$0xf]  ;;  %v11806_v9 = vld [vmem:[%s12406_s24 + $0xac] sm:$0xf0]  ;;  %v9694_v21 = vld [vmem:[%s12406_s24 + $0x48] sm:$0xf0] }
  0x45   : > { %v12716_v15 = vor.u32 %v11784_v6, %v9670_v7  ;;  %v9772_v22 = vld [vmem:[%s12406_s24 + $0xc8] sm:$0xf]  ;;  %18997 = vst [vmem:[#allocation33_spill] sm:$0xff] %v12760_v51 }
  0x46   : > { %18980 = vst [vmem:[#allocation16_spill] sm:$0xff] %v12654_v32 }
  0x47   : > { %1753 = vmatpush.bf16.msrb.mxu2 %v10189_v29  ;;  %1842 = vmatpush.bf16.msrb.mxu3 %v10253_v31  ;;  %v11953_v29 = vld [vmem:[%s18689_s1 + $0x244] sm:$0xf0]  ;;  %v12652_v31 = vor.u32 %v11841_v20, %v9884_v18  ;;  %18987 = vst [vmem:[#allocation23_spill] sm:$0xff] %v12716_v15  ;;  %v12718_v18 = vor.u32 %v11806_v9, %v9748_v8  ;;  %v11790_v20 = vld [vmem:[%s12406_s24 + $0x34] sm:$0xf] }
  0x48   : > { %1927 = vmatpush.bf16.msrb.mxu0 %v10349_v19  ;;  %1664 = vmatpush.bf16.msrb.mxu1 %v10125_v25  ;;  %v10341_v35 = vor.u32 %v11953_v29, %v10340_v28  ;;  %v12720_v19 = vor.u32 %v11797_v10, %v9726_v13  ;;  %v11812_v25 = vld [vmem:[%s12406_s24 + $0xdc] sm:$0xf0]  ;;  %v12734_v28 = vor.u32 %v11790_v20, %v9694_v21 }
  0x49   : > { %18979 = vst [vmem:[#allocation15_spill] sm:$0xff] %v12652_v31  ;;  %v12736_v29 = vor.u32 %v11789_v24, %v9684_v23  ;;  %v12782_v8 = vor.u32 %v11824_v61, %v9820_v54  ;;  %v9766_v23 = vld [vmem:[%s12406_s24 + $0xd8] sm:$0xf0]  ;;  %v9844_v24 = vld [vmem:[%s12406_s24 + $0x158] sm:$0xf] }
  0x4a   : > { %18988 = vst [vmem:[#allocation24_spill] sm:$0xff] %v12718_v18 }
  0x4b   : > { %1754 = vmatpush.bf16.msrb.mxu2 %v10181_v38  ;;  %1843 = vmatpush.bf16.msrb.mxu3 %v10245_v41  ;;  %v10333_v38 = vor.u32 %v11951_v37, %v10332_v36  ;;  %v10324_v41 = vld [vmem:[%s18689_s1 + $0x220] sm:$0xf]  ;;  %18989 = vst [vmem:[#allocation25_spill] sm:$0xff] %v12720_v19  ;;  %v11796_v36 = vld [vmem:[%s12406_s24 + $0x64] sm:$0xf] }
  0x4c   : > { %1665 = vmatpush.bf16.msrb.mxu1 %v10117_v34  ;;  %1928 = vmatpush.bf16.msrb.mxu0 %v10341_v35  ;;  %v10325_v43 = vor.u32 %v11949_v42, %v10324_v41  ;;  %18990 = vst [vmem:[#allocation26_spill] sm:$0xff] %v12734_v28  ;;  %v12738_v34 = vor.u32 %v11812_v25, %v9772_v22  ;;  %v9718_v37 = vld [vmem:[%s12406_s24 + $0x78] sm:$0xf0]  ;;  %v9708_v41 = vld [vmem:[%s12406_s24 + $0x40] sm:$0xf] }
  0x4d   : > { %1587 = vmatmul.bf16.gmra.mxu0 %v12582_v55  ;;  %1617 = vmatmul.bf16.gmra.mxu1 %v12584_v56  ;;  %18991 = vst [vmem:[#allocation27_spill] sm:$0xff] %v12736_v29  ;;  %v12740_v35 = vor.u32 %v11803_v26, %v9750_v27  ;;  %v11795_v42 = vld [vmem:[%s12406_s24 + $0x54] sm:$0xf0]  ;;  %v12754_v48 = vor.u32 %v11796_v36, %v9718_v37  ;;  %v11808_v22 = vld [vmem:[%s12406_s24 + $0xc4] sm:$0xf] }
  0x4e   : > { %1652 = vmatmul.bf16.gmra.mxu3 %v12586_v57  ;;  %1755 = vmatmul.bf16.vlgmr.msrb.gmra.mxu2 %v12588_v58  ;;  %18992 = vst [vmem:[#allocation28_spill] sm:$0xff] %v12738_v34  ;;  %v12756_v49 = vor.u32 %v11795_v42, %v9708_v41  ;;  %v9756_v25 = vld [vmem:[%s12406_s24 + $0xa0] sm:$0xf]  ;;  %v11807_v26 = vld [vmem:[%s12406_s24 + $0xb4] sm:$0xf0]  ;;  %v12810_v42 = vor.u32 %v11808_v22, %v9766_v23 }
  0x4f   : > { %18993 = vst [vmem:[#allocation29_spill] sm:$0xff] %v12740_v35  ;;  %v11830_v27 = vld [vmem:[%s12406_s24 + $0x16c] sm:$0xf0]  ;;  %v11821_v36 = vld [vmem:[%s12406_s24 + $0x12c] sm:$0xf] }
  0x50   : > { %1929 = vmatpush.bf16.msrb.mxu0 %v10333_v38  ;;  %v9796_v38 = vld [vmem:[%s12406_s24 + $0xf8] sm:$0xf]  ;;  %18994 = vst [vmem:[#allocation30_spill] sm:$0xff] %v12754_v48  ;;  %v9822_v37 = vld [vmem:[%s12406_s24 + $0x140] sm:$0xf0]  ;;  %v12818_v52 = vor.u32 %v11830_v27, %v9844_v24 }
  0x51   : > { %18995 = vst [vmem:[#allocation31_spill] sm:$0xff] %v12756_v49  ;;  %v12820_v53 = vor.u32 %v11821_v36, %v9822_v37  ;;  %v9868_v22 = vld [vmem:[%s12406_s24 + $0x188] sm:$0xf]  ;;  %v9780_v23 = vld [vmem:[%s12406_s24 + $0xd0] sm:$0xf] }
  0x52   : > { %18998 = vst [vmem:[#allocation34_spill] sm:$0xff] %v12774_v4  ;;  %v11813_v24 = vld [vmem:[%s12406_s24 + $0xe4] sm:$0xf0]  ;;  %v9846_v27 = vld [vmem:[%s12406_s24 + $0x170] sm:$0xf0] }
  0x53   : > { %19000 = vst [vmem:[#allocation36_spill] sm:$0xff] %v12782_v8  ;;  %v9918_v56 = vld [vmem:[%s12406_s24 + $0x200] sm:$0xf0] }
  0x54   : > { %1930 = vmatpush.bf16.msrb.mxu0 %v10325_v43  ;;  %v11818_v43 = vld [vmem:[%s12406_s24 + $0x10c] sm:$0xf0]  ;;  %19006 = vst [vmem:[#allocation42_spill] sm:$0xff] %v12810_v42 }
  0x55   : > { %v12758_v50 = vor.u32 %v11818_v43, %v9796_v38  ;;  %v12812_v43 = vor.u32 %v11807_v26, %v9756_v25  ;;  %19008 = vst [vmem:[#allocation44_spill] sm:$0xff] %v12818_v52  ;;  %v11836_v25 = vld [vmem:[%s12406_s24 + $0x19c] sm:$0xf0]  ;;  %v11827_v26 = vld [vmem:[%s12406_s24 + $0x15c] sm:$0xf] }
  0x56   : > { %19009 = vst [vmem:[#allocation45_spill] sm:$0xff] %v12820_v53 }
  0x57   : > { %18996 = vst [vmem:[#allocation32_spill] sm:$0xff] %v12758_v50 }
  0x58   : > { %1931 = vmatpush.bf16.msrb.mxu0 %v10317_v60  ;;  %v11801_v60 = vld [vmem:[%s12406_s24 + $0x84] sm:$0xf0]  ;;  %19007 = vst [vmem:[#allocation43_spill] sm:$0xff] %v12812_v43 }
  0x59   : > { %v12776_v5 = vor.u32 %v11801_v60, %v9732_v59 }
  0x5b   : > { %18999 = vst [vmem:[#allocation35_spill] sm:$0xff] %v12776_v5 }
  0x5c   : > { %1932 = vmatpush.bf16.msrb.mxu0 %v10309_v3  ;;  %v9798_v3 = vld [vmem:[%s12406_s24 + $0x110] sm:$0xf0] }
  0x5d   : > { %1592 = vmatmul.bf16.gmra.mxu0 %v12650_v30  ;;  %1622 = vmatmul.bf16.gmra.mxu1 %v12652_v31  ;;  %v12784_v9 = vor.u32 %v11815_v62, %v9798_v3  ;;  %v11814_v62 = vld [vmem:[%s12406_s24 + $0xf4] sm:$0xf]  ;;  %v9790_v3 = vld [vmem:[%s12406_s24 + $0x108] sm:$0xf0] }
  0x5e   : > { %1760 = vmatmul.bf16.gmra.mxu2 %v12654_v32  ;;  %1844 = vmatmul.bf16.vlgmr.msrb.gmra.mxu3 %v12656_v33  ;;  %v11842_v33 = vld [vmem:[%s12406_s24 + $0x1cc] sm:$0xf0] }
  0x5f   : > { %19001 = vst [vmem:[#allocation37_spill] sm:$0xff] %v12784_v9 }
  0x6d   : > { %1597 = vmatmul.bf16.gmra.mxu0 %v12694_v63  ;;  %1627 = vmatmul.bf16.gmra.mxu1 %v12696_v0  ;;  %v9894_v0 = vld [vmem:[%s12406_s24 + $0x1d0] sm:$0xf0] }
  0x6e   : > { %1765 = vmatmul.bf16.gmra.mxu2 %v12698_v1  ;;  %1849 = vmatmul.bf16.gmra.mxu3 %v12700_v2  ;;  %v12856_v2 = vor.u32 %v11827_v26, %v9846_v27  ;;  %v9892_v26 = vld [vmem:[%s12406_s24 + $0x1b8] sm:$0xf]  ;;  %v9804_v27 = vld [vmem:[%s12406_s24 + $0x100] sm:$0xf] }
  0x6f   : > { %v12890_v16 = vor.u32 %v11842_v33, %v9892_v26  ;;  %v11826_v33 = vld [vmem:[%s12406_s24 + $0x154] sm:$0xf]  ;;  %v9838_v26 = vld [vmem:[%s12406_s24 + $0x168] sm:$0xf0] }
  0x70   : > { %19017 = vst [vmem:[#allocation53_spill] sm:$0xff] %v12856_v2 }
  0x71   : > { %19022 = vst [vmem:[#allocation58_spill] sm:$0xff] %v12890_v16 }
  0x7d   : > { %1602 = vmatmul.bf16.gmra.mxu0 %v12714_v14  ;;  %1666 = vmatmul.bf16.vlgmr.msrb.gmra.mxu1 %v12716_v15 }
  0x7e   : > { %1770 = vmatmul.bf16.gmra.mxu2 %v12718_v18  ;;  %1854 = vmatmul.bf16.gmra.mxu3 %v12720_v19  ;;  %v12854_v19 = vor.u32 %v11836_v25, %v9868_v22  ;;  %v9814_v25 = vld [vmem:[%s12406_s24 + $0x138] sm:$0xf0] }
  0x80   : > { %19016 = vst [vmem:[#allocation52_spill] sm:$0xff] %v12854_v19 }
  0x8d   : > { %1671 = vmatmul.bf16.gmra.mxu1 %v12734_v28  ;;  %1933 = vmatmul.bf16.vlgmr.msrb.gmra.mxu0 %v12736_v29 }
  0x8e   : > { %1775 = vmatmul.bf16.gmra.mxu2 %v12738_v34  ;;  %1859 = vmatmul.bf16.gmra.mxu3 %v12740_v35 }
  0x9d   : > { %1676 = vmatmul.bf16.gmra.mxu1 %v12754_v48  ;;  %1938 = vmatmul.bf16.gmra.mxu0 %v12756_v49 }
  0x9e   : > { %1780 = vmatmul.bf16.gmra.mxu2 %v12758_v50  ;;  %1864 = vmatmul.bf16.gmra.mxu3 %v12760_v51 }
  0xaa   : > { %v12778_v6 = vpop.f32.mrf.mxu0  ;;  %v12780_v7 = vpop.f32.mrf.mxu1 }
  0xad   : > { %1681 = vmatmul.bf16.gmra.mxu1 %v12774_v4  ;;  %1943 = vmatmul.bf16.gmra.mxu0 %v12776_v5  ;;  %v11833_v5 = vld [vmem:[%s12406_s24 + $0x18c] sm:$0xf] }
  0xae   : > { %1785 = vmatmul.bf16.gmra.mxu2 %v12782_v8  ;;  %1869 = vmatmul.bf16.gmra.mxu3 %v12784_v9  ;;  %v12848_v9 = vor.u32 %v11813_v24, %v9780_v23  ;;  %v11820_v24 = vld [vmem:[%s12406_s24 + $0x124] sm:$0xf] }
  0xaf   : > { %v12882_v29 = vor.u32 %v11820_v24, %v9814_v25 }
  0xb0   : > { %19015 = vst [vmem:[#allocation51_spill] sm:$0xff] %v12848_v9 }
  0xb1   : > { %v12790_v10 = vpop.f32.mrf.mxu2  ;;  %v12792_v13 = vpop.f32.mrf.mxu3  ;;  %19020 = vst [vmem:[#allocation56_spill] sm:$0xff] %v12882_v29 }
  0xb2   : > { %19002 = vst [vmem:[#allocation38_spill] sm:$0xff] %v12790_v10  ;;  %v12794_v20 = vpop.f32.mrf.mxu0  ;;  %v12796_v21 = vpop.f32.mrf.mxu1 }
  0xb3   : > { %19003 = vst [vmem:[#allocation39_spill] sm:$0xff] %v12792_v13 }
  0xb9   : > { %v12806_v38 = vpop.f32.mrf.mxu2  ;;  %v12808_v41 = vpop.f32.mrf.mxu3 }
  0xba   : > { %19004 = vst [vmem:[#allocation40_spill] sm:$0xff] %v12806_v38  ;;  %v12814_v46 = vpop.f32.mrf.mxu0  ;;  %v12816_v47 = vpop.f32.mrf.mxu1 }
  0xbb   : > { %19005 = vst [vmem:[#allocation41_spill] sm:$0xff] %v12808_v41  ;;  %v11854_v41 = vld [vmem:[%s12406_s24 + $0x22c] sm:$0xf0] }
  0xbd   : > { %1686 = vmatmul.bf16.gmra.mxu1 %v12810_v42  ;;  %1948 = vmatmul.bf16.gmra.mxu0 %v12812_v43  ;;  %v11819_v43 = vld [vmem:[%s12406_s24 + $0x114] sm:$0xf0] }
  0xbe   : > { %1790 = vmatmul.bf16.gmra.mxu2 %v12818_v52  ;;  %1874 = vmatmul.bf16.gmra.mxu3 %v12820_v53  ;;  %v12846_v53 = vor.u32 %v11814_v62, %v9790_v3  ;;  %v12884_v57 = vor.u32 %v11819_v43, %v9804_v27  ;;  %v11848_v52 = vld [vmem:[%s12406_s24 + $0x1fc] sm:$0xf0] }
  0xc0   : > { %19014 = vst [vmem:[#allocation50_spill] sm:$0xff] %v12846_v53 }
  0xc1   : > { %v12826_v54 = vpop.f32.mrf.mxu2  ;;  %v12828_v59 = vpop.f32.mrf.mxu3  ;;  %19021 = vst [vmem:[#allocation57_spill] sm:$0xff] %v12884_v57 }
  0xc2   : > { %19010 = vst [vmem:[#allocation46_spill] sm:$0xff] %v12826_v54  ;;  %v12830_v60 = vpop.f32.mrf.mxu0  ;;  %v12832_v61 = vpop.f32.mrf.mxu1 }
  0xc3   : > { %19011 = vst [vmem:[#allocation47_spill] sm:$0xff] %v12828_v59  ;;  %v11831_v59 = vld [vmem:[%s12406_s24 + $0x174] sm:$0xf0] }
  0xc9   : > { %v12842_v36 = vpop.f32.mrf.mxu2  ;;  %v12844_v37 = vpop.f32.mrf.mxu3 }
  0xca   : > { %19012 = vst [vmem:[#allocation48_spill] sm:$0xff] %v12842_v36  ;;  %v12850_v51 = vpop.f32.mrf.mxu0  ;;  %v12852_v35 = vpop.f32.mrf.mxu1 }
  0xcb   : > { %19013 = vst [vmem:[#allocation49_spill] sm:$0xff] %v12844_v37 }
  0xcd   : > { %1691 = vmatmul.bf16.gmra.mxu1 %v12846_v53  ;;  %1953 = vmatmul.bf16.gmra.mxu0 %v12848_v9  ;;  %v9870_v9 = vld [vmem:[%s12406_s24 + $0x1a0] sm:$0xf0] }
  0xce   : > { %1795 = vmatmul.bf16.gmra.mxu2 %v12854_v19  ;;  %1879 = vmatmul.bf16.gmra.mxu3 %v12856_v2  ;;  %v12892_v19 = vor.u32 %v11833_v5, %v9870_v9  ;;  %v9916_v5 = vld [vmem:[%s12406_s24 + $0x1e8] sm:$0xf]  ;;  %v9828_v9 = vld [vmem:[%s12406_s24 + $0x130] sm:$0xf] }
  0xcf   : > { %v12916_v8 = vor.u32 %v11825_v44, %v9828_v9  ;;  %v12922_v31 = vor.u32 %v11848_v52, %v9916_v5  ;;  %v11832_v52 = vld [vmem:[%s12406_s24 + $0x184] sm:$0xf]  ;;  %v9862_v5 = vld [vmem:[%s12406_s24 + $0x198] sm:$0xf0] }
  0xd0   : > { %19023 = vst [vmem:[#allocation59_spill] sm:$0xff] %v12892_v19 }
  0xd1   : > { %v12862_v62 = vpop.f32.mrf.mxu3  ;;  %v12864_v3 = vpop.f32.mrf.mxu2  ;;  %19025 = vst [vmem:[#allocation61_spill] sm:$0xff] %v12916_v8 }
  0xd2   : > { %19018 = vst [vmem:[#allocation54_spill] sm:$0xff] %v12862_v62  ;;  %v12866_v23 = vpop.f32.mrf.mxu0  ;;  %v12868_v22 = vpop.f32.mrf.mxu1 }
  0xd3   : > { %19026 = vst [vmem:[#allocation62_spill] sm:$0xff] %v12922_v31 }
  0xd9   : > { %v12878_v49 = vpop.f32.mrf.mxu3  ;;  %v12880_v2 = vpop.f32.mrf.mxu2 }
  0xda   : > { %19019 = vst [vmem:[#allocation55_spill] sm:$0xff] %v12878_v49  ;;  %v12886_v17 = vpop.f32.mrf.mxu0  ;;  %v12888_v45 = vpop.f32.mrf.mxu1  ;;  %v11839_v49 = vld [vmem:[%s12406_s24 + $0x1bc] sm:$0xf] }
  0xdb   : > { %v12924_v50 = vor.u32 %v11839_v49, %v9894_v0  ;;  %v9940_v0 = vld [vmem:[%s12406_s24 + $0x218] sm:$0xf]  ;;  %v9852_v49 = vld [vmem:[%s12406_s24 + $0x160] sm:$0xf] }
  0xdc   : > { %v12950_v34 = vor.u32 %v11831_v59, %v9852_v49  ;;  %v11837_v49 = vld [vmem:[%s12406_s24 + $0x1a4] sm:$0xf0] }
  0xdd   : > { %1696 = vmatmul.bf16.gmra.mxu1 %v12882_v29  ;;  %1958 = vmatmul.bf16.gmra.mxu0 %v12884_v57  ;;  %19027 = vst [vmem:[#allocation63_spill] sm:$0xff] %v12924_v50  ;;  %v12954_v29 = vor.u32 %v11854_v41, %v9940_v0  ;;  %v9876_v0 = vld [vmem:[%s12406_s24 + $0x190] sm:$0xf] }
  0xde   : > { %1800 = vmatmul.bf16.gmra.mxu2 %v12890_v16  ;;  %1884 = vmatmul.bf16.gmra.mxu3 %v12892_v19  ;;  %v12914_v19 = vor.u32 %v11826_v33, %v9838_v26  ;;  %19029 = vst [vmem:[#allocation65_spill] sm:$0xff] %v12950_v34  ;;  %v12986_v53 = vor.u32 %v11837_v49, %v9876_v0  ;;  %v11890_v49 = vld [vmem:[%s18689_s1 + $0x54] sm:$0xf] }
  0xdf   : > { %19030 = vst [vmem:[#allocation66_spill] sm:$0xff] %v12954_v29 }
  0xe0   : > { %19024 = vst [vmem:[#allocation60_spill] sm:$0xff] %v12914_v19 }
  0xe1   : > { %v12898_v43 = vpop.f32.mrf.mxu2  ;;  %v1845_v24 = vpop.f32.mrf.mxu3  ;;  %19033 = vst [vmem:[#allocation69_spill] sm:$0xff] %v12986_v53 }
  0xe2   : > { %v12900_v25 = vpop.f32.mrf.mxu0  ;;  %v12902_v27 = vpop.f32.mrf.mxu1 }
  0xe9   : > { %v12912_v57 = vpop.f32.mrf.mxu2  ;;  %v1847_v16 = vpop.f32.mrf.mxu3 }
  0xea   : > { %v12918_v62 = vpop.f32.mrf.mxu0  ;;  %v12920_v37 = vpop.f32.mrf.mxu1 }
  0xed   : > { %1701 = vmatmul.bf16.gmra.mxu1 %v12914_v19  ;;  %1963 = vmatmul.bf16.gmra.mxu0 %v12916_v8  ;;  %v11845_v19 = vld [vmem:[%s12406_s24 + $0x1ec] sm:$0xf] }
  0xee   : > { %1805 = vmatmul.bf16.gmra.mxu2 %v12922_v31  ;;  %1889 = vmatmul.bf16.gmra.mxu3 %v12924_v50  ;;  %v12948_v50 = vor.u32 %v11832_v52, %v9862_v5  ;;  %v12956_v12 = vor.u32 %v11845_v19, %v9918_v56  ;;  %v9886_v52 = vld [vmem:[%s12406_s24 + $0x1c8] sm:$0xf0]  ;;  %v9964_v5 = vld [vmem:[%s12406_s24 + $0x248] sm:$0xf] }
  0xf0   : > { %19028 = vst [vmem:[#allocation64_spill] sm:$0xff] %v12948_v50 }
  0xf1   : > { %v12930_v44 = vpop.f32.mrf.mxu2  ;;  %v1850_v33 = vpop.f32.mrf.mxu3  ;;  %19031 = vst [vmem:[#allocation67_spill] sm:$0xff] %v12956_v12 }
  0xf2   : > { %v12932_v26 = vpop.f32.mrf.mxu0  ;;  %v12934_v9 = vpop.f32.mrf.mxu1 }
  0xf9   : > { %v12944_v8 = vpop.f32.mrf.mxu2  ;;  %v12946_v31 = vpop.f32.mrf.mxu3 }
  0xfa   : > { %v12952_v13 = vpop.f32.mrf.mxu0  ;;  %v1667_v36 = vpop.f32.mrf.mxu1 }
  0xfb   : > { %v1668_v18 = vadd.f32 %v1667_v36, %v12778_v6 }
  0xfd   : > { %v1757_v54 = vadd.f32 %v12864_v3, %v1668_v18  ;;  %1706 = vmatmul.bf16.gmra.mxu1 %v12948_v50  ;;  %1968 = vmatmul.bf16.gmra.mxu0 %v12950_v34  ;;  %v11838_v3 = vld [vmem:[%s12406_s24 + $0x1b4] sm:$0xf]  ;;  %v11860_v34 = vld [vmem:[%s12406_s24 + $0x25c] sm:$0xf0] }
  0xfe   : > { %1810 = vmatmul.bf16.gmra.mxu2 %v12954_v29  ;;  %1894 = vmatmul.bf16.gmra.mxu3 %v12956_v12  ;;  %v11851_v29 = vld [vmem:[%s12406_s24 + $0x21c] sm:$0xf]  ;;  %v9942_v12 = vld [vmem:[%s12406_s24 + $0x230] sm:$0xf0]  ;;  %v12984_v38 = vor.u32 %v11838_v3, %v9886_v52 }
  0xff   : > { %v1846_v56 = vadd.f32 %v1845_v24, %v1757_v54 }
 0x100   : > { %19032 = vst [vmem:[#allocation68_spill] sm:$0xff] %v12984_v38 }
 0x101   : > { %v12964_v19 = vpop.f32.mrf.mxu2  ;;  %v12966_v41 = vpop.f32.mrf.mxu3 }
 0x102   : > { %v12968_v6 = vpop.f32.mrf.mxu0  ;;  %v1669_v18 = vpop.f32.mrf.mxu1 }
 0x103   : > { %v1670_v59 = vadd.f32 %v1669_v18, %v12794_v20 }
 0x105   : > { %v1759_v36 = vadd.f32 %v12880_v2, %v1670_v59  ;;  %v12988_v2 = vor.u32 %v11860_v34, %v9964_v5  ;;  %v12990_v59 = vor.u32 %v11851_v29, %v9942_v12  ;;  %v10110_v12 = vld [vmem:[%s18689_s1 + $0x78] sm:$0xf0]  ;;  %v11892_v34 = vld [vmem:[%s18689_s1 + $0x64] sm:$0xf] }
 0x107   : > { %v1848_v54 = vadd.f32 %v1847_v16, %v1759_v36  ;;  %19034 = vst [vmem:[#allocation70_spill] sm:$0xff] %v12988_v2  ;;  %v11894_v36 = vld [vmem:[%s18689_s1 + $0x74] sm:$0xf] }
 0x108   : > { %19035 = vst [vmem:[#allocation71_spill] sm:$0xff] %v12990_v59 }
 0x109   : > { %v12980_v24 = vpop.f32.mrf.mxu2  ;;  %v12982_v50 = vpop.f32.mrf.mxu3 }
 0x10a   : > { %v1672_v20 = vpop.f32.mrf.mxu1  ;;  %v1934_v18 = vpop.f32.mrf.mxu0 }
 0x10b   : > { %v1673_v40 = vadd.f32 %v1672_v20, %v12814_v46  ;;  %v12993_v1 = vadd.f32 %v1934_v18, %v1846_v56  ;;  %v10102_v46 = vld [vmem:[%s18689_s1 + $0x68] sm:$0xf0]  ;;  %v10094_v20 = vld [vmem:[%s18689_s1 + $0x58] sm:$0xf0] }
 0x10d   : > { %19036 = vst [vmem:[#allocation72_spill] sm:$0xff] %v12993_v1  ;;  %v1762_v16 = vadd.f32 %v12898_v43, %v1673_v40  ;;  %1711 = vmatmul.bf16.gmra.mxu1 %v12984_v38  ;;  %1973 = vmatmul.bf16.gmra.mxu0 %v12986_v53  ;;  %v10113_v40 = vor.u32 %v11894_v36, %v10110_v12  ;;  %v9910_v36 = vld [vmem:[%s12406_s24 + $0x1f8] sm:$0xf0] }
 0x10e   : > { %1815 = vmatmul.bf16.gmra.mxu2 %v12988_v2  ;;  %1899 = vmatmul.bf16.gmra.mxu3 %v12990_v59  ;;  %v10097_v12 = vor.u32 %v11890_v49, %v10094_v20  ;;  %v11888_v59 = vld [vmem:[%s18689_s1 + $0x44] sm:$0xf] }
 0x10f   : > { %v1851_v29 = vadd.f32 %v1850_v33, %v1762_v16  ;;  %2103 = vmatpush.bf16.msra.mxu2 %v10113_v40  ;;  %v10105_v33 = vor.u32 %v11892_v34, %v10102_v46  ;;  %v11844_v16 = vld [vmem:[%s12406_s24 + $0x1e4] sm:$0xf]  ;;  %v9988_v40 = vld [vmem:[%s12406_s24 + $0x278] sm:$0xf]  ;;  %v9900_v34 = vld [vmem:[%s12406_s24 + $0x1c0] sm:$0xf] }
 0x110   : > { %v11843_v46 = vld [vmem:[%s12406_s24 + $0x1d4] sm:$0xf0]  ;;  %v13045_v49 = vor.u32 %v11844_v16, %v9910_v36  ;;  %v11886_v16 = vld [vmem:[%s18689_s1 + $0x34] sm:$0xf]  ;;  %v10070_v36 = vld [vmem:[%s18689_s1 + $0x28] sm:$0xf0] }
 0x111   : > { %v13012_v43 = vpop.f32.mrf.mxu2  ;;  %v13014_v56 = vpop.f32.mrf.mxu3  ;;  %v13047_v20 = vor.u32 %v11843_v46, %v9900_v34 }
 0x112   : > { %v1674_v3 = vpop.f32.mrf.mxu1  ;;  %v1936_v52 = vpop.f32.mrf.mxu0  ;;  %19038 = vst [vmem:[#allocation74_spill] sm:$0xff] %v13045_v49 }
 0x113   : > { %v1675_v5 = vadd.f32 %v1674_v3, %v12830_v60  ;;  %v13017_v0 = vadd.f32 %v1936_v52, %v1848_v54  ;;  %2104 = vmatpush.bf16.msra.mxu2 %v10105_v33  ;;  %v11866_v60 = vld [vmem:[%s12406_s24 + $0x28c] sm:$0xf0]  ;;  %v11857_v54 = vld [vmem:[%s12406_s24 + $0x24c] sm:$0xf]  ;;  %v9966_v3 = vld [vmem:[%s12406_s24 + $0x260] sm:$0xf0] }
 0x114   : > { %19039 = vst [vmem:[#allocation75_spill] sm:$0xff] %v13047_v20 }
 0x115   : > { %19037 = vst [vmem:[#allocation73_spill] sm:$0xff] %v13017_v0  ;;  %v1764_v18 = vadd.f32 %v12912_v57, %v1675_v5  ;;  %v10086_v57 = vld [vmem:[%s18689_s1 + $0x48] sm:$0xf0] }
 0x116   : > { %v10089_v38 = vor.u32 %v11888_v59, %v10086_v57  ;;  %v11882_v57 = vld [vmem:[%s18689_s1 + $0x14] sm:$0xf] }
 0x117   : > { %v1853_v52 = vadd.f32 %v12946_v31, %v1764_v18  ;;  %2105 = vmatpush.bf16.msra.mxu2 %v10097_v12  ;;  %v13049_v31 = vor.u32 %v11866_v60, %v9988_v40  ;;  %v13051_v18 = vor.u32 %v11857_v54, %v9966_v3  ;;  %v11908_v12 = vld [vmem:[%s18689_s1 + $0xe4] sm:$0xf] }
 0x119   : > { %v13041_v5 = vpop.f32.mrf.mxu2  ;;  %v13043_v33 = vpop.f32.mrf.mxu3  ;;  %19040 = vst [vmem:[#allocation76_spill] sm:$0xff] %v13049_v31 }
 0x11a   : > { %v1677_v53 = vpop.f32.mrf.mxu1  ;;  %v1939_v2 = vpop.f32.mrf.mxu0  ;;  %19041 = vst [vmem:[#allocation77_spill] sm:$0xff] %v13051_v18 }
 0x11b   : > { %v1678_v0 = vadd.f32 %v1677_v53, %v12850_v51  ;;  %v13054_v1 = vadd.f32 %v1939_v2, %v1851_v29  ;;  %v10078_v51 = vld [vmem:[%s18689_s1 + $0x38] sm:$0xf0]  ;;  %v11910_v53 = vld [vmem:[%s18689_s1 + $0xf4] sm:$0xf]  ;;  %2106 = vmatpush.bf16.msra.mxu2 %v10089_v38  ;;  %v10166_v38 = vld [vmem:[%s18689_s1 + $0xe8] sm:$0xf0] }
 0x11c   : > { %v10081_v59 = vor.u32 %v11886_v16, %v10078_v51  ;;  %v10169_v46 = vor.u32 %v11908_v12, %v10166_v38  ;;  %v10062_v16 = vld [vmem:[%s18689_s1 + $0x18] sm:$0xf0]  ;;  %v11906_v51 = vld [vmem:[%s18689_s1 + $0xd4] sm:$0xf]  ;;  %v11872_v12 = vld [vmem:[%s12406_s24 + $0x2bc] sm:$0xf0] }
 0x11d   : > { %19042 = vst [vmem:[#allocation78_spill] sm:$0xff] %v13054_v1  ;;  %v1767_v10 = vadd.f32 %v12930_v44, %v1678_v0  ;;  %1716 = vmatmul.bf16.gmra.mxu1 %v13045_v49  ;;  %1978 = vmatmul.bf16.gmra.mxu0 %v13047_v20  ;;  %v10174_v44 = vld [vmem:[%s18689_s1 + $0xf8] sm:$0xf0]  ;;  %v11884_v0 = vld [vmem:[%s18689_s1 + $0x24] sm:$0xf] }
 0x11e   : > { %1820 = vmatmul.bf16.gmra.mxu2 %v13049_v31  ;;  %1904 = vmatmul.bf16.gmra.mxu3 %v13051_v18  ;;  %v10177_v29 = vor.u32 %v11910_v53, %v10174_v44  ;;  %v10073_v3 = vor.u32 %v11884_v0, %v10070_v36  ;;  %v9934_v53 = vld [vmem:[%s12406_s24 + $0x228] sm:$0xf0]  ;;  %v10158_v44 = vld [vmem:[%s18689_s1 + $0xd8] sm:$0xf0]  ;;  %v11849_v0 = vld [vmem:[%s12406_s24 + $0x204] sm:$0xf0]  ;;  %v10065_v18 = vor.u32 %v11882_v57, %v10062_v16 }
 0x11f   : > { %v1856_v2 = vadd.f32 %v12966_v41, %v1767_v10  ;;  %2107 = vmatpush.bf16.msra.mxu2 %v10081_v59  ;;  %v10012_v59 = vld [vmem:[%s12406_s24 + $0x2a8] sm:$0xf]  ;;  %v10161_v36 = vor.u32 %v11906_v51, %v10158_v44  ;;  %v11863_v38 = vld [vmem:[%s12406_s24 + $0x27c] sm:$0xf] }
 0x120   : > { %2192 = vmatpush.bf16.msra.mxu3 %v10177_v29  ;;  %v9924_v29 = vld [vmem:[%s12406_s24 + $0x1f0] sm:$0xf] }
 0x121   : > { %v13083_v40 = vpop.f32.mrf.mxu2  ;;  %v13085_v10 = vpop.f32.mrf.mxu3 }
 0x122   : > { %v1679_v41 = vpop.f32.mrf.mxu1  ;;  %v1941_v34 = vpop.f32.mrf.mxu0 }
 0x123   : > { %v1680_v60 = vadd.f32 %v1679_v41, %v12866_v23  ;;  %v13091_v54 = vadd.f32 %v1941_v34, %v1853_v52  ;;  %v11850_v52 = vld [vmem:[%s12406_s24 + $0x214] sm:$0xf]  ;;  %2108 = vmatpush.bf16.msra.mxu2 %v10073_v3  ;;  %v10150_v3 = vld [vmem:[%s18689_s1 + $0xc8] sm:$0xf0] }
 0x124   : > { %2193 = vmatpush.bf16.msra.mxu3 %v10169_v46  ;;  %v9990_v41 = vld [vmem:[%s12406_s24 + $0x290] sm:$0xf0]  ;;  %v10054_v46 = vld [vmem:[%s18689_s1 + $0x8] sm:$0xf0]  ;;  %v13128_v20 = vor.u32 %v11850_v52, %v9934_v53 }
 0x125   : > { %19043 = vst [vmem:[#allocation79_spill] sm:$0xff] %v13091_v54  ;;  %v1769_v23 = vadd.f32 %v12944_v8, %v1680_v60  ;;  %v11880_v8 = vld [vmem:[%s18689_s1 + $0x4] sm:$0xf]  ;;  %v13137_v31 = vor.u32 %v11863_v38, %v9990_v41 }
 0x126   : > { %v11904_v60 = vld [vmem:[%s18689_s1 + $0xc4] sm:$0xf]  ;;  %19044 = vst [vmem:[#allocation80_spill] sm:$0xff] %v13128_v20  ;;  %v10057_v52 = vor.u32 %v11880_v8, %v10054_v46  ;;  %v11898_v46 = vld [vmem:[%s18689_s1 + $0x94] sm:$0xf] }
 0x127   : > { %v1858_v34 = vadd.f32 %v12982_v50, %v1769_v23  ;;  %v13130_v50 = vor.u32 %v11849_v0, %v9924_v29  ;;  %v13135_v23 = vor.u32 %v11872_v12, %v10012_v59  ;;  %19047 = vst [vmem:[#allocation83_spill] sm:$0xff] %v13137_v31  ;;  %2109 = vmatpush.bf16.msra.mxu2 %v10065_v18  ;;  %v11902_v59 = vld [vmem:[%s18689_s1 + $0xb4] sm:$0xf]  ;;  %v10142_v0 = vld [vmem:[%s18689_s1 + $0xb8] sm:$0xf0] }
 0x128   : > { %2194 = vmatpush.bf16.msra.mxu3 %v10161_v36  ;;  %v10153_v53 = vor.u32 %v11904_v60, %v10150_v3  ;;  %v11900_v18 = vld [vmem:[%s18689_s1 + $0xa4] sm:$0xf]  ;;  %v10126_v60 = vld [vmem:[%s18689_s1 + $0x98] sm:$0xf0] }
 0x129   : > { %v13124_v51 = vpop.f32.mrf.mxu2  ;;  %v13126_v44 = vpop.f32.mrf.mxu3  ;;  %19045 = vst [vmem:[#allocation81_spill] sm:$0xff] %v13130_v50 }
 0x12a   : > { %v1682_v57 = vpop.f32.mrf.mxu1  ;;  %v1944_v16 = vpop.f32.mrf.mxu0  ;;  %19046 = vst [vmem:[#allocation82_spill] sm:$0xff] %v13135_v23 }
 0x12b   : > { %v1683_v54 = vadd.f32 %v1682_v57, %v12886_v17  ;;  %v13140_v1 = vadd.f32 %v1944_v16, %v1856_v2  ;;  %2110 = vmatpush.bf16.msra.mxu2 %v10057_v52  ;;  %v10134_v2 = vld [vmem:[%s18689_s1 + $0xa8] sm:$0xf0]  ;;  %v11856_v57 = vld [vmem:[%s12406_s24 + $0x244] sm:$0xf]  ;;  %v9958_v16 = vld [vmem:[%s12406_s24 + $0x258] sm:$0xf0] }
 0x12c   : > { %2195 = vmatpush.bf16.msra.mxu3 %v10153_v53  ;;  %v10137_v8 = vor.u32 %v11900_v18, %v10134_v2  ;;  %v10036_v52 = vld [vmem:[%s12406_s24 + $0x2d8] sm:$0xf]  ;;  %v9948_v53 = vld [vmem:[%s12406_s24 + $0x220] sm:$0xf]  ;;  %v11896_v18 = vld [vmem:[%s18689_s1 + $0x84] sm:$0xf] }
 0x12d   : > { %v1772_v29 = vadd.f32 %v12964_v19, %v1683_v54  ;;  %1721 = vmatmul.bf16.gmra.mxu1 %v13128_v20  ;;  %1983 = vmatmul.bf16.gmra.mxu0 %v13130_v50  ;;  %v10145_v19 = vor.u32 %v11902_v59, %v10142_v0  ;;  %v10014_v59 = vld [vmem:[%s12406_s24 + $0x2c0] sm:$0xf0] }
 0x12e   : > { %1825 = vmatmul.bf16.gmra.mxu2 %v13135_v23  ;;  %1909 = vmatmul.bf16.gmra.mxu3 %v13137_v31  ;;  %v10428_v23 = vld [vmem:[%s18689_s1 + $0x2f0] sm:$0xf] }
 0x12f   : > { %v1861_v17 = vadd.f32 %v13014_v56, %v1772_v29  ;;  %v11855_v29 = vld [vmem:[%s12406_s24 + $0x234] sm:$0xf0] }
 0x130   : > { %2196 = vmatpush.bf16.msra.mxu3 %v10145_v19  ;;  %v10129_v19 = vor.u32 %v11898_v46, %v10126_v60 }
 0x131   : > { %v13160_v54 = vpop.f32.mrf.mxu2  ;;  %v13162_v56 = vpop.f32.mrf.mxu3 }
 0x132   : > { %v1684_v36 = vpop.f32.mrf.mxu1  ;;  %v1946_v12 = vpop.f32.mrf.mxu0 }
 0x133   : > { %v1685_v38 = vadd.f32 %v1684_v36, %v12900_v25  ;;  %v13165_v41 = vadd.f32 %v1946_v12, %v1858_v34  ;;  %v11878_v25 = vld [vmem:[%s12406_s24 + $0x2ec] sm:$0xf0]  ;;  %v11869_v34 = vld [vmem:[%s12406_s24 + $0x2ac] sm:$0xf]  ;;  %v13193_v12 = vor.u32 %v11856_v57, %v9958_v16  ;;  %v11975_v57 = vld [vmem:[%s18689_s1 + $0x2f4] sm:$0xf0] }
 0x134   : > { %2197 = vmatpush.bf16.msra.mxu3 %v10137_v8  ;;  %v13197_v8 = vor.u32 %v11878_v25, %v10036_v52  ;;  %v13199_v46 = vor.u32 %v11869_v34, %v10014_v59  ;;  %v10429_v52 = vor.u32 %v11975_v57, %v10428_v23  ;;  %v10412_v34 = vld [vmem:[%s18689_s1 + $0x2d0] sm:$0xf]  ;;  %v11971_v59 = vld [vmem:[%s18689_s1 + $0x2d4] sm:$0xf0]  ;;  %v11861_v57 = vld [vmem:[%s12406_s24 + $0x264] sm:$0xf0] }
 0x135   : > { %v1774_v3 = vadd.f32 %v12980_v24, %v1685_v38  ;;  %v10118_v24 = vld [vmem:[%s18689_s1 + $0x88] sm:$0xf0]  ;;  %19048 = vst [vmem:[#allocation84_spill] sm:$0xff] %v13193_v12  ;;  %v13195_v38 = vor.u32 %v11855_v29, %v9948_v53 }
 0x136   : > { %19050 = vst [vmem:[#allocation86_spill] sm:$0xff] %v13197_v8  ;;  %v10121_v50 = vor.u32 %v11896_v18, %v10118_v24  ;;  %2014 = vmatpush.bf16.msra.mxu1 %v10429_v52  ;;  %v11862_v18 = vld [vmem:[%s12406_s24 + $0x274] sm:$0xf]  ;;  %v10413_v24 = vor.u32 %v11971_v59, %v10412_v34  ;;  %v10404_v52 = vld [vmem:[%s18689_s1 + $0x2c0] sm:$0xf] }
 0x137   : > { %v1863_v0 = vadd.f32 %v13043_v33, %v1774_v3  ;;  %19049 = vst [vmem:[#allocation85_spill] sm:$0xff] %v13195_v38 }
 0x138   : > { %19051 = vst [vmem:[#allocation87_spill] sm:$0xff] %v13199_v46  ;;  %2198 = vmatpush.bf16.msra.mxu3 %v10129_v19 }
 0x139   : > { %v13189_v2 = vpop.f32.mrf.mxu2  ;;  %v13191_v36 = vpop.f32.mrf.mxu3 }
 0x13a   : > { %v1687_v31 = vpop.f32.mrf.mxu1  ;;  %v1949_v33 = vpop.f32.mrf.mxu0 }
 0x13b   : > { %v1688_v60 = vadd.f32 %v1687_v31, %v12918_v62  ;;  %v13202_v3 = vadd.f32 %v1949_v33, %v1861_v17  ;;  %v10420_v31 = vld [vmem:[%s18689_s1 + $0x2e0] sm:$0xf]  ;;  %v9982_v33 = vld [vmem:[%s12406_s24 + $0x288] sm:$0xf0] }
 0x13c   : > { %2199 = vmatpush.bf16.msra.mxu3 %v10121_v50 }
 0x13d   : > { %v1777_v16 = vadd.f32 %v13012_v43, %v1688_v60  ;;  %1726 = vmatmul.bf16.gmra.mxu1 %v13193_v12  ;;  %1988 = vmatmul.bf16.gmra.mxu0 %v13195_v38  ;;  %v11973_v43 = vld [vmem:[%s18689_s1 + $0x2e4] sm:$0xf0]  ;;  %v9972_v60 = vld [vmem:[%s12406_s24 + $0x250] sm:$0xf] }
 0x13e   : > { %1830 = vmatmul.bf16.gmra.mxu2 %v13197_v8  ;;  %1914 = vmatmul.bf16.gmra.mxu3 %v13199_v46 }
 0x13f   : > { %v1866_v62 = vadd.f32 %v13085_v10, %v1777_v16  ;;  %v10421_v10 = vor.u32 %v11973_v43, %v10420_v31  ;;  %v11875_v16 = vld [vmem:[%s12406_s24 + $0x2dc] sm:$0xf]  ;;  %v11969_v31 = vld [vmem:[%s18689_s1 + $0x2c4] sm:$0xf0] }
 0x141   : > { %v13222_v23 = vpop.f32.mrf.mxu2  ;;  %v13224_v17 = vpop.f32.mrf.mxu3  ;;  %2015 = vmatpush.bf16.msra.mxu1 %v10421_v10  ;;  %v13253_v10 = vor.u32 %v11862_v18, %v9982_v33  ;;  %v11967_v18 = vld [vmem:[%s18689_s1 + $0x2b4] sm:$0xf0] }
 0x142   : > { %v1689_v50 = vpop.f32.mrf.mxu1  ;;  %v1951_v53 = vpop.f32.mrf.mxu0 }
 0x143   : > { %v1690_v29 = vadd.f32 %v1689_v50, %v12932_v26  ;;  %v13227_v25 = vadd.f32 %v1951_v53, %v1863_v0  ;;  %v10038_v26 = vld [vmem:[%s12406_s24 + $0x2f0] sm:$0xf0]  ;;  %19052 = vst [vmem:[#allocation88_spill] sm:$0xff] %v13253_v10  ;;  %v13255_v50 = vor.u32 %v11861_v57, %v9972_v60  ;;  %v10405_v53 = vor.u32 %v11969_v31, %v10404_v52  ;;  %v11924_v52 = vld [vmem:[%s18689_s1 + $0x164] sm:$0xf] }
 0x144   : > { %v13257_v34 = vor.u32 %v11875_v16, %v10038_v26  ;;  %v10388_v16 = vld [vmem:[%s18689_s1 + $0x2a0] sm:$0xf]  ;;  %v11965_v26 = vld [vmem:[%s18689_s1 + $0x2a4] sm:$0xf0] }
 0x145   : > { %v1779_v19 = vadd.f32 %v13041_v5, %v1690_v29  ;;  %2016 = vmatpush.bf16.msra.mxu1 %v10413_v24  ;;  %19053 = vst [vmem:[#allocation89_spill] sm:$0xff] %v13255_v50  ;;  %v10396_v24 = vld [vmem:[%s18689_s1 + $0x2b0] sm:$0xf] }
 0x146   : > { %19054 = vst [vmem:[#allocation90_spill] sm:$0xff] %v13257_v34  ;;  %v10397_v60 = vor.u32 %v11967_v18, %v10396_v24 }
 0x147   : > { %v1868_v0 = vadd.f32 %v13126_v44, %v1779_v19 }
 0x149   : > { %v13249_v43 = vpop.f32.mrf.mxu2  ;;  %v13251_v5 = vpop.f32.mrf.mxu3  ;;  %2017 = vmatpush.bf16.msra.mxu1 %v10405_v53 }
 0x14a   : > { %v1692_v29 = vpop.f32.mrf.mxu1  ;;  %v1954_v44 = vpop.f32.mrf.mxu0 }
 0x14b   : > { %v1693_v59 = vadd.f32 %v1692_v29, %v12952_v13  ;;  %v13260_v19 = vadd.f32 %v1954_v44, %v1866_v62  ;;  %v11926_v13 = vld [vmem:[%s18689_s1 + $0x174] sm:$0xf]  ;;  %v10238_v62 = vld [vmem:[%s18689_s1 + $0x178] sm:$0xf0]  ;;  %v10230_v29 = vld [vmem:[%s18689_s1 + $0x168] sm:$0xf0] }
 0x14c   : > { %v10241_v57 = vor.u32 %v11926_v13, %v10238_v62  ;;  %v10233_v24 = vor.u32 %v11924_v52, %v10230_v29  ;;  %v11963_v13 = vld [vmem:[%s18689_s1 + $0x294] sm:$0xf0]  ;;  %v11922_v62 = vld [vmem:[%s18689_s1 + $0x154] sm:$0xf]  ;;  %v9996_v52 = vld [vmem:[%s12406_s24 + $0x280] sm:$0xf] }
 0x14d   : > { %v1782_v33 = vadd.f32 %v13083_v40, %v1693_v59  ;;  %1731 = vmatmul.bf16.gmra.mxu1 %v13253_v10  ;;  %1993 = vmatmul.bf16.gmra.mxu0 %v13255_v50 }
 0x14e   : > { %1919 = vmatmul.bf16.gmra.mxu3 %v13257_v34  ;;  %2111 = vmatmul.bf16.vlgmr.msra.gmra.mxu2 %v12437_v39 }
 0x14f   : > { %v1871_v40 = vadd.f32 %v13162_v56, %v1782_v33  ;;  %2018 = vmatpush.bf16.msra.mxu1 %v10397_v60  ;;  %2281 = vmatpush.bf16.msra.mxu0 %v10241_v57  ;;  %v10389_v56 = vor.u32 %v11965_v26, %v10388_v16  ;;  %v10380_v60 = vld [vmem:[%s18689_s1 + $0x290] sm:$0xf]  ;;  %v11868_v16 = vld [vmem:[%s12406_s24 + $0x2a4] sm:$0xf]  ;;  %v10006_v26 = vld [vmem:[%s12406_s24 + $0x2b8] sm:$0xf0] }
 0x151   : > { %v13289_v31 = vpop.f32.mrf.mxu2  ;;  %v13291_v53 = vpop.f32.mrf.mxu3 }
 0x152   : > { %v1694_v44 = vpop.f32.mrf.mxu1  ;;  %v1956_v59 = vpop.f32.mrf.mxu0 }
 0x153   : > { %v1695_v18 = vadd.f32 %v1694_v44, %v12968_v6  ;;  %v13297_v33 = vadd.f32 %v1956_v59, %v1868_v0  ;;  %2019 = vmatpush.bf16.msra.mxu1 %v10389_v56  ;;  %2282 = vmatpush.bf16.msra.mxu0 %v10233_v24  ;;  %v10381_v6 = vor.u32 %v11963_v13, %v10380_v60  ;;  %v10222_v0 = vld [vmem:[%s18689_s1 + $0x158] sm:$0xf0]  ;;  %v11867_v56 = vld [vmem:[%s12406_s24 + $0x294] sm:$0xf0]  ;;  %v10372_v59 = vld [vmem:[%s18689_s1 + $0x280] sm:$0xf] }
 0x154   : > { %v10225_v29 = vor.u32 %v11922_v62, %v10222_v0  ;;  %v11920_v24 = vld [vmem:[%s18689_s1 + $0x144] sm:$0xf]  ;;  %v13330_v13 = vor.u32 %v11868_v16, %v10006_v26  ;;  %v11918_v16 = vld [vmem:[%s18689_s1 + $0x134] sm:$0xf]  ;;  %v10206_v26 = vld [vmem:[%s18689_s1 + $0x138] sm:$0xf0] }
 0x155   : > { %v1784_v57 = vadd.f32 %v13124_v51, %v1695_v18  ;;  %v11961_v51 = vld [vmem:[%s18689_s1 + $0x284] sm:$0xf0] }
 0x156   : > { %19055 = vst [vmem:[#allocation91_spill] sm:$0xff] %v13330_v13  ;;  %v10373_v62 = vor.u32 %v11961_v51, %v10372_v59 }
 0x157   : > { %v1873_v44 = vadd.f32 %v13191_v36, %v1784_v57  ;;  %2020 = vmatpush.bf16.msra.mxu1 %v10381_v6  ;;  %2283 = vmatpush.bf16.msra.mxu0 %v10225_v29  ;;  %v13332_v36 = vor.u32 %v11867_v56, %v9996_v52  ;;  %v10214_v57 = vld [vmem:[%s18689_s1 + $0x148] sm:$0xf0]  ;;  %v10209_v56 = vor.u32 %v11918_v16, %v10206_v26  ;;  %v11874_v16 = vld [vmem:[%s12406_s24 + $0x2d4] sm:$0xf] }
 0x158   : > { %v10217_v29 = vor.u32 %v11920_v24, %v10214_v57 }
 0x159   : > { %v13326_v18 = vpop.f32.mrf.mxu2  ;;  %v13328_v60 = vpop.f32.mrf.mxu3  ;;  %19056 = vst [vmem:[#allocation92_spill] sm:$0xff] %v13332_v36 }
 0x15a   : > { %v1697_v6 = vpop.f32.mrf.mxu1  ;;  %v1959_v0 = vpop.f32.mrf.mxu0 }
 0x15b   : > { %v1698_v34 = vadd.f32 %v1697_v6, %v12780_v7  ;;  %v13338_v46 = vadd.f32 %v1959_v0, %v1871_v40  ;;  %2021 = vmatpush.bf16.msra.mxu1 %v10373_v62  ;;  %2284 = vmatpush.bf16.msra.mxu0 %v10217_v29  ;;  %v11916_v40 = vld [vmem:[%s18689_s1 + $0x124] sm:$0xf]  ;;  %v11914_v6 = vld [vmem:[%s18689_s1 + $0x114] sm:$0xf]  ;;  %v10190_v0 = vld [vmem:[%s18689_s1 + $0x118] sm:$0xf0] }
 0x15c   : > { %v10193_v26 = vor.u32 %v11914_v6, %v10190_v0 }
 0x15d   : > { %v1787_v52 = vadd.f32 %v13160_v54, %v1698_v34  ;;  %1736 = vmatmul.bf16.gmra.mxu1 %v13330_v13  ;;  %1998 = vmatmul.bf16.gmra.mxu0 %v13332_v36  ;;  %v10198_v54 = vld [vmem:[%s18689_s1 + $0x128] sm:$0xf0] }
 0x15e   : > { %2116 = vmatmul.bf16.gmra.mxu2 %v12505_v11  ;;  %2200 = vmatmul.bf16.vlgmr.msra.gmra.mxu3 %v12716_v15  ;;  %v10201_v51 = vor.u32 %v11916_v40, %v10198_v54  ;;  %v11873_v40 = vld [vmem:[%s12406_s24 + $0x2c4] sm:$0xf0]  ;;  %v10182_v54 = vld [vmem:[%s18689_s1 + $0x108] sm:$0xf0] }
 0x15f   : > { %v1876_v7 = vadd.f32 %v13224_v17, %v1787_v52  ;;  %2285 = vmatpush.bf16.msra.mxu0 %v10209_v56  ;;  %v10030_v52 = vld [vmem:[%s12406_s24 + $0x2e8] sm:$0xf0]  ;;  %v10020_v56 = vld [vmem:[%s12406_s24 + $0x2b0] sm:$0xf] }
 0x161   : > { %v13358_v34 = vpop.f32.mrf.mxu2  ;;  %v1885_v59 = vpop.f32.mrf.mxu3 }
 0x162   : > { %v1699_v24 = vpop.f32.mrf.mxu1  ;;  %v1961_v62 = vpop.f32.mrf.mxu0 }
 0x163   : > { %v1700_v17 = vadd.f32 %v1699_v24, %v12796_v21  ;;  %v13361_v57 = vadd.f32 %v1961_v62, %v1873_v44  ;;  %2286 = vmatpush.bf16.msra.mxu0 %v10201_v51  ;;  %v11912_v44 = vld [vmem:[%s18689_s1 + $0x104] sm:$0xf]  ;;  %v13385_v62 = vor.u32 %v11873_v40, %v10020_v56 }
 0x165   : > { %v1789_v29 = vadd.f32 %v13189_v2, %v1700_v17  ;;  %v13383_v2 = vor.u32 %v11874_v16, %v10030_v52  ;;  %19058 = vst [vmem:[#allocation94_spill] sm:$0xff] %v13385_v62  ;;  %v10185_v17 = vor.u32 %v11912_v44, %v10182_v54  ;;  %v10044_v54 = vld [vmem:[%s12406_s24 + $0x2e0] sm:$0xf] }
 0x167   : > { %v1878_v21 = vadd.f32 %v13251_v5, %v1789_v29  ;;  %2287 = vmatpush.bf16.msra.mxu0 %v10193_v26  ;;  %19057 = vst [vmem:[#allocation93_spill] sm:$0xff] %v13383_v2 }
 0x169   : > { %v13381_v51 = vpop.f32.mrf.mxu2  ;;  %v1887_v24 = vpop.f32.mrf.mxu3 }
 0x16a   : > { %v1702_v6 = vpop.f32.mrf.mxu1  ;;  %v1964_v0 = vpop.f32.mrf.mxu0 }
 0x16b   : > { %v1703_v5 = vadd.f32 %v1702_v6, %v12816_v47  ;;  %v13388_v29 = vadd.f32 %v1964_v0, %v1876_v7  ;;  %2288 = vmatpush.bf16.msra.mxu0 %v10185_v17  ;;  %v11879_v17 = vld [vmem:[%s12406_s24 + $0x2f4] sm:$0xf0]  ;;  %v11786_v6 = vld [vmem:[%s12406_s24 + $0x14] sm:$0xf]  ;;  %v9686_v0 = vld [vmem:[%s12406_s24 + $0x28] sm:$0xf0] }
 0x16c   : > { %v13411_v15 = vor.u32 %v11786_v6, %v9686_v0 }
 0x16d   : > { %v1792_v26 = vadd.f32 %v13222_v23, %v1703_v5  ;;  %1741 = vmatmul.bf16.gmra.mxu1 %v13383_v2  ;;  %2003 = vmatmul.bf16.gmra.mxu0 %v13385_v62 }
 0x16e   : > { %2121 = vmatmul.bf16.gmra.mxu2 %v12582_v55  ;;  %2205 = vmatmul.bf16.gmra.mxu3 %v12734_v28  ;;  %19060 = vst [vmem:[#allocation96_spill] sm:$0xff] %v13411_v15 }
 0x16f   : > { %v1881_v16 = vadd.f32 %v13291_v53, %v1792_v26  ;;  %v13409_v26 = vor.u32 %v11879_v17, %v10044_v54 }
 0x171   : > { %v13396_v47 = vpop.f32.mrf.mxu2  ;;  %v1890_v7 = vpop.f32.mrf.mxu3  ;;  %19059 = vst [vmem:[#allocation95_spill] sm:$0xff] %v13409_v26 }
 0x172   : > { %v1704_v52 = vpop.f32.mrf.mxu1  ;;  %v1966_v56 = vpop.f32.mrf.mxu0 }
 0x173   : > { %v1705_v40 = vadd.f32 %v1704_v52, %v12832_v61  ;;  %v13399_v44 = vadd.f32 %v1966_v56, %v1878_v21 }
 0x175   : > { %v1794_v23 = vadd.f32 %v13249_v43, %v1705_v40 }
 0x177   : > { %v1883_v5 = vadd.f32 %v13328_v60, %v1794_v23 }
 0x179   : > { %v13407_v28 = vpop.f32.mrf.mxu2  ;;  %v1892_v53 = vpop.f32.mrf.mxu3 }
 0x17a   : > { %v1707_v62 = vpop.f32.mrf.mxu1  ;;  %v1969_v36 = vpop.f32.mrf.mxu0 }
 0x17b   : > { %v1708_v61 = vadd.f32 %v1707_v62, %v12852_v35  ;;  %v13414_v43 = vadd.f32 %v1969_v36, %v1881_v16  ;;  %v11792_v62 = vld [vmem:[%s12406_s24 + $0x44] sm:$0xf]  ;;  %v9710_v16 = vld [vmem:[%s12406_s24 + $0x58] sm:$0xf0] }
 0x17c   : > { %v13431_v0 = vor.u32 %v11792_v62, %v9710_v16 }
 0x17d   : > { %v1797_v21 = vadd.f32 %v13289_v31, %v1708_v61  ;;  %2008 = vmatmul.bf16.gmra.mxu0 %v13409_v26  ;;  %2022 = vmatmul.bf16.vlgmr.msra.gmra.mxu1 %v13411_v15 }
 0x17e   : > { %2126 = vmatmul.bf16.gmra.mxu2 %v12650_v30  ;;  %2210 = vmatmul.bf16.gmra.mxu3 %v12754_v48  ;;  %19061 = vst [vmem:[#allocation97_spill] sm:$0xff] %v13431_v0 }
 0x17f   : > { %v1886_v60 = vadd.f32 %v1885_v59, %v1797_v21 }
 0x181   : > { %v13421_v52 = vpop.f32.mrf.mxu2  ;;  %v1895_v56 = vpop.f32.mrf.mxu3 }
 0x182   : > { %v1709_v40 = vpop.f32.mrf.mxu1  ;;  %v1971_v23 = vpop.f32.mrf.mxu0 }
 0x183   : > { %v1710_v35 = vadd.f32 %v1709_v40, %v12868_v22  ;;  %v13424_v36 = vadd.f32 %v1971_v23, %v1883_v5 }
 0x185   : > { %v1799_v31 = vadd.f32 %v13326_v18, %v1710_v35  ;;  %v11798_v35 = vld [vmem:[%s12406_s24 + $0x74] sm:$0xf] }
 0x187   : > { %v1888_v54 = vadd.f32 %v1887_v24, %v1799_v31  ;;  %v9734_v31 = vld [vmem:[%s12406_s24 + $0x88] sm:$0xf0] }
 0x189   : > { %v13429_v17 = vpop.f32.mrf.mxu2  ;;  %v1897_v6 = vpop.f32.mrf.mxu3 }
 0x18a   : > { %v1712_v59 = vpop.f32.mrf.mxu1  ;;  %v1974_v61 = vpop.f32.mrf.mxu0 }
 0x18b   : > { %v1713_v21 = vadd.f32 %v1712_v59, %v12888_v45  ;;  %v13434_v48 = vadd.f32 %v1974_v61, %v1886_v60  ;;  %v13451_v61 = vor.u32 %v11798_v35, %v9734_v31 }
 0x18d   : > { %v1802_v22 = vadd.f32 %v13358_v34, %v1713_v21  ;;  %2027 = vmatmul.bf16.gmra.mxu1 %v13431_v0  ;;  %2289 = vmatmul.bf16.vlgmr.msra.gmra.mxu0 %v12588_v58  ;;  %19062 = vst [vmem:[#allocation98_spill] sm:$0xff] %v13451_v61 }
 0x18e   : > { %2131 = vmatmul.bf16.gmra.mxu2 %v12694_v63  ;;  %2215 = vmatmul.bf16.gmra.mxu3 %v12774_v4 }
 0x18f   : > { %v1891_v18 = vadd.f32 %v1890_v7, %v1802_v22 }
 0x191   : > { %v13441_v24 = vpop.f32.mrf.mxu2  ;;  %v1900_v5 = vpop.f32.mrf.mxu3 }
 0x192   : > { %v1714_v40 = vpop.f32.mrf.mxu1  ;;  %v1976_v23 = vpop.f32.mrf.mxu0 }
 0x193   : > { %v1715_v45 = vadd.f32 %v1714_v40, %v12902_v27  ;;  %v13444_v60 = vadd.f32 %v1976_v23, %v1888_v54 }
 0x195   : > { %v1804_v34 = vadd.f32 %v13381_v51, %v1715_v45  ;;  %v11804_v45 = vld [vmem:[%s12406_s24 + $0xa4] sm:$0xf] }
 0x197   : > { %v1893_v62 = vadd.f32 %v1892_v53, %v1804_v34  ;;  %v9758_v34 = vld [vmem:[%s12406_s24 + $0xb8] sm:$0xf0] }
 0x199   : > { %v13449_v16 = vpop.f32.mrf.mxu2  ;;  %v1902_v59 = vpop.f32.mrf.mxu3 }
 0x19a   : > { %v1717_v7 = vpop.f32.mrf.mxu1  ;;  %v1979_v21 = vpop.f32.mrf.mxu0 }
 0x19b   : > { %v1718_v22 = vadd.f32 %v1717_v7, %v12920_v37  ;;  %v13454_v4 = vadd.f32 %v1979_v21, %v1891_v18  ;;  %v13471_v21 = vor.u32 %v11804_v45, %v9758_v34  ;;  %v19068_v34 = vld [vmem:[#allocation40_spill] sm:$0xff] }
 0x19d   : > { %v1807_v27 = vadd.f32 %v13396_v47, %v1718_v22  ;;  %2032 = vmatmul.bf16.gmra.mxu1 %v13451_v61  ;;  %2294 = vmatmul.bf16.gmra.mxu0 %v12654_v32  ;;  %19063 = vst [vmem:[#allocation99_spill] sm:$0xff] %v13471_v21 }
 0x19e   : > { %2136 = vmatmul.bf16.gmra.mxu2 %v12714_v14  ;;  %2220 = vmatmul.bf16.gmra.mxu3 %v12810_v42 }
 0x19f   : > { %v1896_v51 = vadd.f32 %v1895_v56, %v1807_v27  ;;  %v19064_v27 = vld [vmem:[#allocation38_spill] sm:$0xff] }
 0x1a1   : > { %v13461_v53 = vpop.f32.mrf.mxu2  ;;  %v1905_v54 = vpop.f32.mrf.mxu3 }
 0x1a2   : > { %v1719_v40 = vpop.f32.mrf.mxu1  ;;  %v1981_v23 = vpop.f32.mrf.mxu0 }
 0x1a3   : > { %v1720_v37 = vadd.f32 %v1719_v40, %v12934_v9  ;;  %v13464_v18 = vadd.f32 %v1981_v23, %v1893_v62  ;;  %v19067_v62 = vld [vmem:[#allocation50_spill] sm:$0xff] }
 0x1a5   : > { %v1809_v47 = vadd.f32 %v13407_v28, %v1720_v37  ;;  %v19065_v28 = vld [vmem:[#allocation20_spill] sm:$0xff] }
 0x1a7   : > { %v1898_v35 = vadd.f32 %v1897_v6, %v1809_v47  ;;  %v19066_v6 = vld [vmem:[#allocation3_spill] sm:$0xff] }
 0x1a9   : > { %v13469_v31 = vpop.f32.mrf.mxu2  ;;  %v1907_v7 = vpop.f32.mrf.mxu3 }
 0x1aa   : > { %v1722_v56 = vpop.f32.mrf.mxu1  ;;  %v1984_v22 = vpop.f32.mrf.mxu0 }
 0x1ab   : > { %v1723_v42 = vadd.f32 %v1722_v56, %v19064_v27  ;;  %v13474_v32 = vadd.f32 %v1984_v22, %v1896_v51  ;;  %v9782_v22 = vld [vmem:[%s12406_s24 + $0xe8] sm:$0xf0] }
 0x1ad   : > { %v1812_v9 = vadd.f32 %v13421_v52, %v1723_v42  ;;  %2037 = vmatmul.bf16.gmra.mxu1 %v13471_v21  ;;  %2299 = vmatmul.bf16.gmra.mxu0 %v19065_v28  ;;  %v11810_v52 = vld [vmem:[%s12406_s24 + $0xd4] sm:$0xf] }
 0x1ae   : > { %2141 = vmatmul.bf16.gmra.mxu2 %v19066_v6  ;;  %2225 = vmatmul.bf16.gmra.mxu3 %v19067_v62  ;;  %v13491_v26 = vor.u32 %v11810_v52, %v9782_v22  ;;  %v19070_v62 = vld [vmem:[#allocation46_spill] sm:$0xff] }
 0x1af   : > { %v1901_v40 = vadd.f32 %v1900_v5, %v1812_v9 }
 0x1b0   : > { %19069 = vst [vmem:[#allocation38_spill] sm:$0xff] %v13491_v26 }
 0x1b1   : > { %v13481_v23 = vpop.f32.mrf.mxu2  ;;  %v1910_v37 = vpop.f32.mrf.mxu3 }
 0x1b2   : > { %v1724_v47 = vpop.f32.mrf.mxu1  ;;  %v1986_v45 = vpop.f32.mrf.mxu0 }
 0x1b3   : > { %v1725_v56 = vadd.f32 %v1724_v47, %v19068_v34  ;;  %v13484_v51 = vadd.f32 %v1986_v45, %v1898_v35  ;;  %v19073_v47 = vld [vmem:[#allocation56_spill] sm:$0xff] }
 0x1b5   : > { %v1814_v42 = vadd.f32 %v13429_v17, %v1725_v56  ;;  %v19071_v17 = vld [vmem:[#allocation24_spill] sm:$0xff] }
 0x1b7   : > { %v1903_v27 = vadd.f32 %v1902_v59, %v1814_v42  ;;  %v19072_v59 = vld [vmem:[#allocation7_spill] sm:$0xff] }
 0x1b9   : > { %v13489_v28 = vpop.f32.mrf.mxu2  ;;  %v1912_v58 = vpop.f32.mrf.mxu3 }
 0x1ba   : > { %v1727_v5 = vpop.f32.mrf.mxu1  ;;  %v1989_v9 = vpop.f32.mrf.mxu0 }
 0x1bb   : > { %v1728_v50 = vadd.f32 %v1727_v5, %v19070_v62  ;;  %v13494_v38 = vadd.f32 %v1989_v9, %v1901_v40  ;;  %v19074_v62 = vld [vmem:[#allocation48_spill] sm:$0xff]  ;;  %v9806_v5 = vld [vmem:[%s12406_s24 + $0x118] sm:$0xf0] }
 0x1bd   : > { %v1817_v35 = vadd.f32 %v13441_v24, %v1728_v50  ;;  %2042 = vmatmul.bf16.gmra.mxu1 %v13491_v26  ;;  %2304 = vmatmul.bf16.gmra.mxu0 %v19071_v17  ;;  %v11816_v24 = vld [vmem:[%s12406_s24 + $0x104] sm:$0xf] }
 0x1be   : > { %2146 = vmatmul.bf16.gmra.mxu2 %v19072_v59  ;;  %2230 = vmatmul.bf16.gmra.mxu3 %v19073_v47  ;;  %v13511_v6 = vor.u32 %v11816_v24, %v9806_v5  ;;  %v19077_v47 = vld [vmem:[#allocation39_spill] sm:$0xff]  ;;  %v19082_v5 = vld [vmem:[#allocation41_spill] sm:$0xff] }
 0x1bf   : > { %v1906_v45 = vadd.f32 %v1905_v54, %v1817_v35 }
 0x1c0   : > { %19076 = vst [vmem:[#allocation46_spill] sm:$0xff] %v13511_v6 }
 0x1c1   : > { %v13501_v34 = vpop.f32.mrf.mxu2  ;;  %v1915_v56 = vpop.f32.mrf.mxu3 }
 0x1c2   : > { %v1729_v42 = vpop.f32.mrf.mxu1  ;;  %v1991_v52 = vpop.f32.mrf.mxu0 }
 0x1c3   : > { %v1730_v22 = vadd.f32 %v1729_v42, %v19074_v62  ;;  %v13504_v40 = vadd.f32 %v1991_v52, %v1903_v27  ;;  %v19081_v42 = vld [vmem:[#allocation60_spill] sm:$0xff] }
 0x1c5   : > { %19075 = vst [vmem:[#allocation40_spill] sm:$0xff] %v13504_v40  ;;  %v1819_v50 = vadd.f32 %v13449_v16, %v1730_v22  ;;  %v19079_v16 = vld [vmem:[#allocation28_spill] sm:$0xff] }
 0x1c7   : > { %v1908_v9 = vadd.f32 %v1907_v7, %v1819_v50  ;;  %v19080_v7 = vld [vmem:[#allocation11_spill] sm:$0xff] }
 0x1c9   : > { %v13509_v17 = vpop.f32.mrf.mxu2  ;;  %v1917_v59 = vpop.f32.mrf.mxu3 }
 0x1ca   : > { %v1732_v54 = vpop.f32.mrf.mxu1  ;;  %v1994_v35 = vpop.f32.mrf.mxu0 }
 0x1cb   : > { %v1733_v14 = vadd.f32 %v1732_v54, %v19077_v47  ;;  %v13514_v63 = vadd.f32 %v1994_v35, %v1906_v45 }
 0x1cd   : > { %19078 = vst [vmem:[#allocation48_spill] sm:$0xff] %v13514_v63  ;;  %v1822_v27 = vadd.f32 %v13461_v53, %v1733_v14  ;;  %2047 = vmatmul.bf16.gmra.mxu1 %v13511_v6  ;;  %2309 = vmatmul.bf16.gmra.mxu0 %v19079_v16  ;;  %v11822_v14 = vld [vmem:[%s12406_s24 + $0x134] sm:$0xf]  ;;  %v9830_v53 = vld [vmem:[%s12406_s24 + $0x148] sm:$0xf0] }
 0x1ce   : > { %2151 = vmatmul.bf16.gmra.mxu2 %v19080_v7  ;;  %2235 = vmatmul.bf16.gmra.mxu3 %v19081_v42  ;;  %v13527_v63 = vor.u32 %v11822_v14, %v9830_v53  ;;  %v19090_v53 = vld [vmem:[#allocation49_spill] sm:$0xff] }
 0x1cf   : > { %v1911_v52 = vadd.f32 %v1910_v37, %v1822_v27  ;;  %v19085_v37 = vld [vmem:[#allocation47_spill] sm:$0xff] }
 0x1d0   : > { %19084 = vst [vmem:[#allocation41_spill] sm:$0xff] %v13527_v63 }
 0x1d1   : > { %v1920_v62 = vpop.f32.mrf.mxu3  ;;  %v2112_v22 = vpop.f32.mrf.mxu2 }
 0x1d2   : > { %v1734_v50 = vpop.f32.mrf.mxu1  ;;  %v1996_v24 = vpop.f32.mrf.mxu0 }
 0x1d3   : > { %v1735_v47 = vadd.f32 %v1734_v50, %v19082_v5  ;;  %v13522_v54 = vadd.f32 %v1996_v24, %v1908_v9  ;;  %v19088_v50 = vld [vmem:[#allocation15_spill] sm:$0xff] }
 0x1d5   : > { %19083 = vst [vmem:[#allocation39_spill] sm:$0xff] %v13522_v54  ;;  %v1824_v45 = vadd.f32 %v13469_v31, %v1735_v47  ;;  %v19087_v31 = vld [vmem:[#allocation32_spill] sm:$0xff] }
 0x1d7   : > { %v1913_v35 = vadd.f32 %v1912_v58, %v1824_v45  ;;  %v19089_v58 = vld [vmem:[#allocation64_spill] sm:$0xff] }
 0x1d9   : > { %v1922_v30 = vpop.f32.mrf.mxu3  ;;  %v2114_v16 = vpop.f32.mrf.mxu2 }
 0x1da   : > { %v1737_v7 = vpop.f32.mrf.mxu1  ;;  %v1999_v42 = vpop.f32.mrf.mxu0 }
 0x1db   : > { %v1738_v27 = vadd.f32 %v1737_v7, %v19085_v37  ;;  %v13530_v40 = vadd.f32 %v1999_v42, %v1911_v52  ;;  %v11828_v37 = vld [vmem:[%s12406_s24 + $0x164] sm:$0xf] }
 0x1dd   : > { %19086 = vst [vmem:[#allocation47_spill] sm:$0xff] %v13530_v40  ;;  %v1827_v9 = vadd.f32 %v13481_v23, %v1738_v27  ;;  %2052 = vmatmul.bf16.gmra.mxu1 %v13527_v63  ;;  %2314 = vmatmul.bf16.gmra.mxu0 %v19087_v31  ;;  %v9854_v27 = vld [vmem:[%s12406_s24 + $0x178] sm:$0xf0] }
 0x1de   : > { %2156 = vmatmul.bf16.gmra.mxu2 %v19088_v50  ;;  %2240 = vmatmul.bf16.gmra.mxu3 %v19089_v58  ;;  %v13543_v50 = vor.u32 %v11828_v37, %v9854_v27 }
 0x1df   : > { %v1916_v24 = vadd.f32 %v1915_v56, %v1827_v9 }
 0x1e0   : > { %19091 = vst [vmem:[#allocation49_spill] sm:$0xff] %v13543_v50 }
 0x1e1   : > { %v2117_v5 = vpop.f32.mrf.mxu2  ;;  %v2201_v47 = vpop.f32.mrf.mxu3 }
 0x1e2   : > { %v2202_v45 = vadd.f32 %v2201_v47, %v2112_v22  ;;  %v1739_v14 = vpop.f32.mrf.mxu1  ;;  %v2001_v7 = vpop.f32.mrf.mxu0  ;;  %v19092_v22 = vld [vmem:[#allocation54_spill] sm:$0xff] }
 0x1e3   : > { %v1740_v42 = vadd.f32 %v1739_v14, %v19090_v53  ;;  %v13538_v52 = vadd.f32 %v2001_v7, %v1913_v35  ;;  %v19095_v14 = vld [vmem:[#allocation68_spill] sm:$0xff] }
 0x1e5   : > { %v1829_v23 = vadd.f32 %v13489_v28, %v1740_v42  ;;  %v19093_v28 = vld [vmem:[#allocation36_spill] sm:$0xff] }
 0x1e7   : > { %v1918_v40 = vadd.f32 %v1917_v59, %v1829_v23  ;;  %v19094_v59 = vld [vmem:[#allocation19_spill] sm:$0xff] }
 0x1e9   : > { %v2119_v31 = vpop.f32.mrf.mxu2  ;;  %v2203_v54 = vpop.f32.mrf.mxu3 }
 0x1ea   : > { %v13545_v58 = vadd.f32 %v2203_v54, %v2114_v16  ;;  %v1742_v56 = vpop.f32.mrf.mxu1  ;;  %v2004_v9 = vpop.f32.mrf.mxu0 }
 0x1eb   : > { %v1743_v47 = vadd.f32 %v1742_v56, %v19092_v22  ;;  %v13548_v63 = vadd.f32 %v2004_v9, %v1916_v24  ;;  %v19096_v24 = vld [vmem:[#allocation55_spill] sm:$0xff]  ;;  %v11834_v56 = vld [vmem:[%s12406_s24 + $0x194] sm:$0xf] }
 0x1ec   : > { %v9878_v9 = vld [vmem:[%s12406_s24 + $0x1a8] sm:$0xf0] }
 0x1ed   : > { %v1832_v35 = vadd.f32 %v13501_v34, %v1743_v47  ;;  %2057 = vmatmul.bf16.gmra.mxu1 %v13543_v50  ;;  %2319 = vmatmul.bf16.gmra.mxu0 %v19093_v28 }
 0x1ee   : > { %2161 = vmatmul.bf16.gmra.mxu2 %v19094_v59  ;;  %2245 = vmatmul.bf16.gmra.mxu3 %v19095_v14  ;;  %v13563_v59 = vor.u32 %v11834_v56, %v9878_v9  ;;  %v11840_v9 = vld [vmem:[%s12406_s24 + $0x1c4] sm:$0xf] }
 0x1ef   : > { %v1921_v16 = vadd.f32 %v1920_v62, %v1832_v35 }
 0x1f0   : > { %19097 = vst [vmem:[#allocation54_spill] sm:$0xff] %v13563_v59 }
 0x1f1   : > { %v2122_v54 = vpop.f32.mrf.mxu2  ;;  %v2206_v7 = vpop.f32.mrf.mxu3 }
 0x1f2   : > { %v13555_v53 = vadd.f32 %v2206_v7, %v2117_v5  ;;  %v1744_v42 = vpop.f32.mrf.mxu1  ;;  %v2006_v23 = vpop.f32.mrf.mxu0 }
 0x1f3   : > { %v1745_v37 = vadd.f32 %v1744_v42, %v19096_v24  ;;  %v13558_v27 = vadd.f32 %v2006_v23, %v1918_v40  ;;  %v19098_v42 = vld [vmem:[#allocation72_spill] sm:$0xff] }
 0x1f5   : > { %v1834_v34 = vadd.f32 %v13509_v17, %v1745_v37  ;;  %v19100_v17 = vld [vmem:[#allocation44_spill] sm:$0xff] }
 0x1f7   : > { %v1923_v22 = vadd.f32 %v1922_v30, %v1834_v34  ;;  %v19101_v30 = vld [vmem:[#allocation4_spill] sm:$0xff] }
 0x1f9   : > { %v2124_v47 = vpop.f32.mrf.mxu2  ;;  %v2208_v28 = vpop.f32.mrf.mxu3 }
 0x1fa   : > { %v13565_v62 = vadd.f32 %v2208_v28, %v2119_v31  ;;  %v2009_v5 = vpop.f32.mrf.mxu0  ;;  %v2023_v35 = vpop.f32.mrf.mxu1 }
 0x1fb   : > { %v13567_v7 = vadd.f32 %v2009_v5, %v1921_v16  ;;  %v13570_v40 = vadd.f32 %v2023_v35, %v19098_v42  ;;  %v19102_v16 = vld [vmem:[#allocation73_spill] sm:$0xff] }
 0x1fc   : > { %v9902_v5 = vld [vmem:[%s12406_s24 + $0x1d8] sm:$0xf0] }
 0x1fd   : > { %19099 = vst [vmem:[#allocation55_spill] sm:$0xff] %v13570_v40  ;;  %2062 = vmatmul.bf16.gmra.mxu1 %v13563_v59  ;;  %2324 = vmatmul.bf16.gmra.mxu0 %v19100_v17  ;;  %v13585_v40 = vor.u32 %v11840_v9, %v9902_v5 }
 0x1fe   : > { %2166 = vmatmul.bf16.gmra.mxu2 %v19101_v30  ;;  %2250 = vmatmul.bf16.gmra.mxu3 %v13045_v49  ;;  %v19105_v30 = vld [vmem:[#allocation78_spill] sm:$0xff] }
 0x1ff   : > { %19104 = vst [vmem:[#allocation73_spill] sm:$0xff] %v13585_v40 }
 0x201   : > { %v2127_v23 = vpop.f32.mrf.mxu2  ;;  %v2211_v31 = vpop.f32.mrf.mxu3 }
 0x202   : > { %v13576_v28 = vadd.f32 %v2211_v31, %v2122_v54  ;;  %v2011_v24 = vpop.f32.mrf.mxu0  ;;  %v2025_v37 = vpop.f32.mrf.mxu1 }
 0x203   : > { %v13578_v34 = vadd.f32 %v2011_v24, %v1923_v22  ;;  %v13581_v56 = vadd.f32 %v2025_v37, %v19102_v16  ;;  %v11958_v22 = vld [vmem:[%s18689_s1 + $0x274] sm:$0xf]  ;;  %v10366_v24 = vld [vmem:[%s18689_s1 + $0x278] sm:$0xf0] }
 0x204   : > { %v19107_v37 = vld [vmem:[#allocation52_spill] sm:$0xff] }
 0x205   : > { %19103 = vst [vmem:[#allocation72_spill] sm:$0xff] %v13581_v56  ;;  %v19108_v16 = vld [vmem:[#allocation8_spill] sm:$0xff] }
 0x206   : > { %v11954_v56 = vld [vmem:[%s18689_s1 + $0x254] sm:$0xf] }
 0x209   : > { %v2129_v35 = vpop.f32.mrf.mxu2  ;;  %v2213_v42 = vpop.f32.mrf.mxu3 }
 0x20a   : > { %v13587_v14 = vadd.f32 %v2213_v42, %v2124_v47  ;;  %v2028_v49 = vpop.f32.mrf.mxu1  ;;  %v2290_v17 = vpop.f32.mrf.mxu0  ;;  %v10369_v47 = vor.u32 %v11958_v22, %v10366_v24  ;;  %v19109_v24 = vld [vmem:[#allocation79_spill] sm:$0xff] }
 0x20b   : > { %v13590_v54 = vadd.f32 %v2028_v49, %v19105_v30  ;;  %v13592_v31 = vadd.f32 %v2290_v17, %v2202_v45  ;;  %v11956_v49 = vld [vmem:[%s18689_s1 + $0x264] sm:$0xf]  ;;  %v10358_v45 = vld [vmem:[%s18689_s1 + $0x268] sm:$0xf0] }
 0x20c   : > { %2459 = vmatpush.bf16.msrb.mxu2 %v10369_v47  ;;  %v10361_v9 = vor.u32 %v11956_v49, %v10358_v45  ;;  %v9926_v45 = vld [vmem:[%s12406_s24 + $0x208] sm:$0xf0] }
 0x20d   : > { %19106 = vst [vmem:[#allocation78_spill] sm:$0xff] %v13590_v54  ;;  %2067 = vmatmul.bf16.gmra.mxu1 %v13585_v40  ;;  %2329 = vmatmul.bf16.gmra.mxu0 %v19107_v37 }
 0x20e   : > { %2171 = vmatmul.bf16.gmra.mxu2 %v19108_v16  ;;  %2255 = vmatmul.bf16.gmra.mxu3 %v13128_v20  ;;  %v10350_v20 = vld [vmem:[%s18689_s1 + $0x258] sm:$0xf0]  ;;  %v11950_v16 = vld [vmem:[%s18689_s1 + $0x234] sm:$0xf] }
 0x20f   : > { %v10353_v49 = vor.u32 %v11954_v56, %v10350_v20 }
 0x210   : > { %2460 = vmatpush.bf16.msrb.mxu2 %v10361_v9 }
 0x211   : > { %v2132_v17 = vpop.f32.mrf.mxu2  ;;  %v2216_v30 = vpop.f32.mrf.mxu3 }
 0x212   : > { %v13610_v5 = vadd.f32 %v2216_v30, %v2127_v23  ;;  %v2030_v42 = vpop.f32.mrf.mxu1  ;;  %v2292_v22 = vpop.f32.mrf.mxu0  ;;  %v11846_v23 = vld [vmem:[%s12406_s24 + $0x1f4] sm:$0xf]  ;;  %v11952_v30 = vld [vmem:[%s18689_s1 + $0x244] sm:$0xf] }
 0x213   : > { %v13613_v54 = vadd.f32 %v2030_v42, %v19109_v24  ;;  %v13616_v47 = vadd.f32 %v2292_v22, %v13545_v58  ;;  %v10342_v58 = vld [vmem:[%s18689_s1 + $0x248] sm:$0xf0]  ;;  %v13632_v22 = vor.u32 %v11846_v23, %v9926_v45  ;;  %v10334_v23 = vld [vmem:[%s18689_s1 + $0x238] sm:$0xf0] }
 0x214   : > { %2461 = vmatpush.bf16.msrb.mxu2 %v10353_v49  ;;  %v10345_v24 = vor.u32 %v11952_v30, %v10342_v58  ;;  %v19115_v45 = vld [vmem:[#allocation5_spill] sm:$0xff]  ;;  %v11948_v58 = vld [vmem:[%s18689_s1 + $0x224] sm:$0xf] }
 0x215   : > { %19110 = vst [vmem:[#allocation79_spill] sm:$0xff] %v13613_v54 }
 0x216   : > { %19111 = vst [vmem:[#allocation100_spill] sm:$0xff] %v13632_v22 }
 0x218   : > { %2462 = vmatpush.bf16.msrb.mxu2 %v10345_v24 }
 0x219   : > { %v2134_v9 = vpop.f32.mrf.mxu2  ;;  %v2218_v42 = vpop.f32.mrf.mxu3 }
 0x21a   : > { %v13634_v54 = vadd.f32 %v2218_v42, %v2129_v35  ;;  %v2033_v37 = vpop.f32.mrf.mxu1  ;;  %v2295_v20 = vpop.f32.mrf.mxu0  ;;  %v11974_v35 = vld [vmem:[%s18689_s1 + $0x2f4] sm:$0xf]  ;;  %v10326_v42 = vld [vmem:[%s18689_s1 + $0x228] sm:$0xf0] }
 0x21b   : > { %v13637_v56 = vadd.f32 %v2033_v37, %v13140_v1  ;;  %v13640_v49 = vadd.f32 %v2295_v20, %v13555_v53  ;;  %v19114_v1 = vld [vmem:[#allocation58_spill] sm:$0xff]  ;;  %v10337_v37 = vor.u32 %v11950_v16, %v10334_v23  ;;  %v10430_v53 = vld [vmem:[%s18689_s1 + $0x2f8] sm:$0xf0]  ;;  %v10329_v23 = vor.u32 %v11948_v58, %v10326_v42  ;;  %v11946_v58 = vld [vmem:[%s18689_s1 + $0x214] sm:$0xf] }
 0x21c   : > { %v10433_v30 = vor.u32 %v11974_v35, %v10430_v53  ;;  %v11972_v16 = vld [vmem:[%s18689_s1 + $0x2e4] sm:$0xf]  ;;  %v10422_v35 = vld [vmem:[%s18689_s1 + $0x2e8] sm:$0xf0]  ;;  %v10318_v42 = vld [vmem:[%s18689_s1 + $0x218] sm:$0xf0] }
 0x21d   : > { %19112 = vst [vmem:[#allocation101_spill] sm:$0xff] %v13637_v56  ;;  %2072 = vmatmul.bf16.gmra.mxu1 %v13632_v22  ;;  %2334 = vmatmul.bf16.gmra.mxu0 %v19114_v1  ;;  %v10425_v56 = vor.u32 %v11972_v16, %v10422_v35  ;;  %v10321_v16 = vor.u32 %v11946_v58, %v10318_v42  ;;  %v11944_v35 = vld [vmem:[%s18689_s1 + $0x204] sm:$0xf] }
 0x21e   : > { %19113 = vst [vmem:[#allocation102_spill] sm:$0xff] %v13640_v49  ;;  %2176 = vmatmul.bf16.gmra.mxu2 %v19115_v45  ;;  %2260 = vmatmul.bf16.gmra.mxu3 %v13193_v12 }
 0x21f   : > { %2463 = vmatpush.bf16.msrb.mxu2 %v10337_v37  ;;  %2548 = vmatpush.bf16.msrb.mxu3 %v10433_v30 }
 0x221   : > { %v2137_v24 = vpop.f32.mrf.mxu2  ;;  %v2221_v20 = vpop.f32.mrf.mxu3 }
 0x222   : > { %v13670_v37 = vadd.f32 %v2221_v20, %v2132_v17  ;;  %v2035_v53 = vpop.f32.mrf.mxu1  ;;  %v2297_v30 = vpop.f32.mrf.mxu0  ;;  %v11970_v17 = vld [vmem:[%s18689_s1 + $0x2d4] sm:$0xf]  ;;  %v11852_v20 = vld [vmem:[%s12406_s24 + $0x224] sm:$0xf] }
 0x223   : > { %v13673_v12 = vadd.f32 %v2035_v53, %v13165_v41  ;;  %v13676_v1 = vadd.f32 %v2297_v30, %v13565_v62  ;;  %2464 = vmatpush.bf16.msrb.mxu2 %v10329_v23  ;;  %2549 = vmatpush.bf16.msrb.mxu3 %v10425_v56  ;;  %v10414_v41 = vld [vmem:[%s18689_s1 + $0x2d8] sm:$0xf0]  ;;  %v10310_v53 = vld [vmem:[%s18689_s1 + $0x208] sm:$0xf0]  ;;  %v11968_v56 = vld [vmem:[%s18689_s1 + $0x2c4] sm:$0xf] }
 0x224   : > { %v10417_v62 = vor.u32 %v11970_v17, %v10414_v41  ;;  %v9950_v23 = vld [vmem:[%s12406_s24 + $0x238] sm:$0xf0]  ;;  %v10313_v17 = vor.u32 %v11944_v35, %v10310_v53 }
 0x225   : > { %19116 = vst [vmem:[#allocation103_spill] sm:$0xff] %v13673_v12  ;;  %v13701_v42 = vor.u32 %v11852_v20, %v9950_v23  ;;  %v11966_v20 = vld [vmem:[%s18689_s1 + $0x2b4] sm:$0xf]  ;;  %v19120_v23 = vld [vmem:[#allocation62_spill] sm:$0xff] }
 0x226   : > { %19117 = vst [vmem:[#allocation104_spill] sm:$0xff] %v13676_v1 }
 0x227   : > { %2465 = vmatpush.bf16.msrb.mxu2 %v10321_v16  ;;  %2550 = vmatpush.bf16.msrb.mxu3 %v10417_v62  ;;  %19118 = vst [vmem:[#allocation105_spill] sm:$0xff] %v13701_v42  ;;  %v10406_v16 = vld [vmem:[%s18689_s1 + $0x2c8] sm:$0xf0] }
 0x228   : > { %v10409_v45 = vor.u32 %v11968_v56, %v10406_v16 }
 0x229   : > { %v2139_v30 = vpop.f32.mrf.mxu2  ;;  %v2223_v58 = vpop.f32.mrf.mxu3 }
 0x22a   : > { %v13706_v41 = vadd.f32 %v2223_v58, %v2134_v9  ;;  %v2038_v62 = vpop.f32.mrf.mxu1  ;;  %v2300_v12 = vpop.f32.mrf.mxu0  ;;  %v10398_v9 = vld [vmem:[%s18689_s1 + $0x2b8] sm:$0xf0] }
 0x22b   : > { %v13709_v1 = vadd.f32 %v2038_v62, %v13202_v3  ;;  %v13712_v49 = vadd.f32 %v2300_v12, %v13576_v28  ;;  %2466 = vmatpush.bf16.msrb.mxu2 %v10313_v17  ;;  %2551 = vmatpush.bf16.msrb.mxu3 %v10409_v45  ;;  %v10401_v35 = vor.u32 %v11966_v20, %v10398_v9  ;;  %v19121_v3 = vld [vmem:[#allocation9_spill] sm:$0xff]  ;;  %v11964_v12 = vld [vmem:[%s18689_s1 + $0x2a4] sm:$0xf]  ;;  %v10390_v28 = vld [vmem:[%s18689_s1 + $0x2a8] sm:$0xf0] }
 0x22c   : > { %v10393_v56 = vor.u32 %v11964_v12, %v10390_v28  ;;  %v11962_v9 = vld [vmem:[%s18689_s1 + $0x294] sm:$0xf]  ;;  %v9974_v28 = vld [vmem:[%s12406_s24 + $0x268] sm:$0xf0] }
 0x22d   : > { %19119 = vst [vmem:[#allocation106_spill] sm:$0xff] %v13709_v1  ;;  %2077 = vmatmul.bf16.gmra.mxu1 %v13701_v42  ;;  %2339 = vmatmul.bf16.gmra.mxu0 %v19120_v23  ;;  %v11934_v23 = vld [vmem:[%s18689_s1 + $0x1b4] sm:$0xf] }
 0x22e   : > { %2181 = vmatmul.bf16.gmra.mxu2 %v19121_v3  ;;  %2265 = vmatmul.bf16.gmra.mxu3 %v13253_v10  ;;  %v11942_v10 = vld [vmem:[%s18689_s1 + $0x1f4] sm:$0xf] }
 0x22f   : > { %2552 = vmatpush.bf16.msrb.mxu3 %v10401_v35  ;;  %v10382_v35 = vld [vmem:[%s18689_s1 + $0x298] sm:$0xf0] }
 0x230   : > { %v10385_v12 = vor.u32 %v11962_v9, %v10382_v35 }
 0x231   : > { %v2142_v45 = vpop.f32.mrf.mxu2  ;;  %v2226_v53 = vpop.f32.mrf.mxu3 }
 0x232   : > { %v13730_v58 = vadd.f32 %v2226_v53, %v2137_v24  ;;  %v2040_v17 = vpop.f32.mrf.mxu1  ;;  %v2302_v16 = vpop.f32.mrf.mxu0  ;;  %v11858_v24 = vld [vmem:[%s12406_s24 + $0x254] sm:$0xf] }
 0x233   : > { %v13733_v62 = vadd.f32 %v2040_v17, %v13227_v25  ;;  %v13736_v20 = vadd.f32 %v2302_v16, %v13587_v14  ;;  %2553 = vmatpush.bf16.msrb.mxu3 %v10393_v56  ;;  %v11960_v25 = vld [vmem:[%s18689_s1 + $0x284] sm:$0xf]  ;;  %v10374_v14 = vld [vmem:[%s18689_s1 + $0x288] sm:$0xf0]  ;;  %v13752_v16 = vor.u32 %v11858_v24, %v9974_v28  ;;  %v10302_v24 = vld [vmem:[%s18689_s1 + $0x1f8] sm:$0xf0] }
 0x234   : > { %v10305_v28 = vor.u32 %v11942_v10, %v10302_v24 }
 0x235   : > { %19122 = vst [vmem:[#allocation107_spill] sm:$0xff] %v13733_v62  ;;  %v10377_v62 = vor.u32 %v11960_v25, %v10374_v14  ;;  %v19126_v25 = vld [vmem:[#allocation12_spill] sm:$0xff] }
 0x236   : > { %19123 = vst [vmem:[#allocation108_spill] sm:$0xff] %v13752_v16  ;;  %2370 = vmatpush.bf16.msrb.mxu1 %v10305_v28 }
 0x237   : > { %2554 = vmatpush.bf16.msrb.mxu3 %v10385_v12 }
 0x239   : > { %v2144_v53 = vpop.f32.mrf.mxu2  ;;  %v2228_v17 = vpop.f32.mrf.mxu3 }
 0x23a   : > { %v13754_v1 = vadd.f32 %v2228_v17, %v2139_v30  ;;  %v2043_v56 = vpop.f32.mrf.mxu1  ;;  %v2305_v9 = vpop.f32.mrf.mxu0  ;;  %v19125_v30 = vld [vmem:[#allocation66_spill] sm:$0xff] }
 0x23b   : > { %v13757_v35 = vadd.f32 %v2043_v56, %v13260_v19  ;;  %v13760_v12 = vadd.f32 %v2305_v9, %v13610_v5  ;;  %2555 = vmatpush.bf16.msrb.mxu3 %v10377_v62  ;;  %v11940_v19 = vld [vmem:[%s18689_s1 + $0x1e4] sm:$0xf]  ;;  %v10294_v5 = vld [vmem:[%s18689_s1 + $0x1e8] sm:$0xf0] }
 0x23c   : > { %v10297_v17 = vor.u32 %v11940_v19, %v10294_v5  ;;  %v9998_v5 = vld [vmem:[%s12406_s24 + $0x298] sm:$0xf0] }
 0x23d   : > { %19124 = vst [vmem:[#allocation109_spill] sm:$0xff] %v13757_v35  ;;  %2082 = vmatmul.bf16.gmra.mxu1 %v13752_v16  ;;  %2344 = vmatmul.bf16.gmra.mxu0 %v19125_v30  ;;  %v11938_v35 = vld [vmem:[%s18689_s1 + $0x1d4] sm:$0xf] }
 0x23e   : > { %2186 = vmatmul.bf16.gmra.mxu2 %v19126_v25  ;;  %2270 = vmatmul.bf16.gmra.mxu3 %v13330_v13  ;;  %v10286_v13 = vld [vmem:[%s18689_s1 + $0x1d8] sm:$0xf0] }
 0x23f   : > { %2371 = vmatpush.bf16.msrb.mxu1 %v10297_v17  ;;  %v10289_v19 = vor.u32 %v11938_v35, %v10286_v13 }
 0x241   : > { %v2147_v62 = vpop.f32.mrf.mxu2  ;;  %v2231_v14 = vpop.f32.mrf.mxu3 }
 0x242   : > { %v13778_v56 = vadd.f32 %v2231_v14, %v2142_v45  ;;  %v2045_v10 = vpop.f32.mrf.mxu1  ;;  %v2307_v9 = vpop.f32.mrf.mxu0  ;;  %v11864_v45 = vld [vmem:[%s12406_s24 + $0x284] sm:$0xf] }
 0x243   : > { %v13781_v24 = vadd.f32 %v2045_v10, %v13297_v33  ;;  %v13784_v28 = vadd.f32 %v2307_v9, %v13634_v54  ;;  %2372 = vmatpush.bf16.msrb.mxu1 %v10289_v19  ;;  %v11936_v33 = vld [vmem:[%s18689_s1 + $0x1c4] sm:$0xf]  ;;  %v10278_v54 = vld [vmem:[%s18689_s1 + $0x1c8] sm:$0xf0]  ;;  %v13800_v10 = vor.u32 %v11864_v45, %v9998_v5  ;;  %v10270_v45 = vld [vmem:[%s18689_s1 + $0x1b8] sm:$0xf0] }
 0x244   : > { %v10281_v9 = vor.u32 %v11936_v33, %v10278_v54  ;;  %v19131_v5 = vld [vmem:[#allocation27_spill] sm:$0xff]  ;;  %v11932_v54 = vld [vmem:[%s18689_s1 + $0x1a4] sm:$0xf] }
 0x245   : > { %19127 = vst [vmem:[#allocation110_spill] sm:$0xff] %v13781_v24 }
 0x246   : > { %19128 = vst [vmem:[#allocation111_spill] sm:$0xff] %v13800_v10 }
 0x247   : > { %2373 = vmatpush.bf16.msrb.mxu1 %v10281_v9 }
 0x249   : > { %v2149_v14 = vpop.f32.mrf.mxu2  ;;  %v2233_v17 = vpop.f32.mrf.mxu3 }
 0x24a   : > { %v13802_v24 = vadd.f32 %v2233_v17, %v2144_v53  ;;  %v2048_v30 = vpop.f32.mrf.mxu1  ;;  %v2310_v13 = vpop.f32.mrf.mxu0  ;;  %v10588_v53 = vld [vmem:[%s18689_s1 + $0x370] sm:$0xf]  ;;  %v10262_v17 = vld [vmem:[%s18689_s1 + $0x1a8] sm:$0xf0] }
 0x24b   : > { %v13805_v35 = vadd.f32 %v2048_v30, %v13338_v46  ;;  %v13808_v19 = vadd.f32 %v2310_v13, %v13670_v37  ;;  %v19130_v46 = vld [vmem:[#allocation70_spill] sm:$0xff]  ;;  %v10273_v30 = vor.u32 %v11934_v23, %v10270_v45  ;;  %v11991_v37 = vld [vmem:[%s18689_s1 + $0x374] sm:$0xf0]  ;;  %v10265_v45 = vor.u32 %v11932_v54, %v10262_v17  ;;  %v11930_v54 = vld [vmem:[%s18689_s1 + $0x194] sm:$0xf] }
 0x24c   : > { %v10589_v33 = vor.u32 %v11991_v37, %v10588_v53  ;;  %v10580_v23 = vld [vmem:[%s18689_s1 + $0x360] sm:$0xf]  ;;  %v11989_v53 = vld [vmem:[%s18689_s1 + $0x364] sm:$0xf0]  ;;  %v10254_v17 = vld [vmem:[%s18689_s1 + $0x198] sm:$0xf0] }
 0x24d   : > { %19129 = vst [vmem:[#allocation112_spill] sm:$0xff] %v13805_v35  ;;  %2087 = vmatmul.bf16.gmra.mxu1 %v13800_v10  ;;  %2349 = vmatmul.bf16.gmra.mxu0 %v19130_v46  ;;  %v10581_v35 = vor.u32 %v11989_v53, %v10580_v23  ;;  %v10257_v23 = vor.u32 %v11930_v54, %v10254_v17  ;;  %v11928_v53 = vld [vmem:[%s18689_s1 + $0x184] sm:$0xf] }
 0x24e   : > { %2275 = vmatmul.bf16.gmra.mxu3 %v13383_v2  ;;  %2467 = vmatmul.bf16.vlgmr.msrb.gmra.mxu2 %v19131_v5 }
 0x24f   : > { %2374 = vmatpush.bf16.msrb.mxu1 %v10273_v30  ;;  %3214 = vmatpush.bf16.msrb.mxu0 %v10589_v33 }
 0x251   : > { %v2152_v9 = vpop.f32.mrf.mxu2  ;;  %v2236_v13 = vpop.f32.mrf.mxu3 }
 0x252   : > { %v13838_v30 = vadd.f32 %v2236_v13, %v2147_v62  ;;  %v2050_v37 = vpop.f32.mrf.mxu1  ;;  %v2312_v33 = vpop.f32.mrf.mxu0  ;;  %v10572_v62 = vld [vmem:[%s18689_s1 + $0x350] sm:$0xf]  ;;  %v11870_v13 = vld [vmem:[%s12406_s24 + $0x2b4] sm:$0xf] }
 0x253   : > { %v13841_v2 = vadd.f32 %v2050_v37, %v13361_v57  ;;  %v13844_v46 = vadd.f32 %v2312_v33, %v13706_v41  ;;  %2375 = vmatpush.bf16.msrb.mxu1 %v10265_v45  ;;  %3215 = vmatpush.bf16.msrb.mxu0 %v10581_v35  ;;  %v11987_v57 = vld [vmem:[%s18689_s1 + $0x354] sm:$0xf0]  ;;  %v10022_v45 = vld [vmem:[%s12406_s24 + $0x2c8] sm:$0xf0]  ;;  %v10564_v35 = vld [vmem:[%s18689_s1 + $0x340] sm:$0xf] }
 0x254   : > { %v10573_v41 = vor.u32 %v11987_v57, %v10572_v62  ;;  %v10246_v37 = vld [vmem:[%s18689_s1 + $0x188] sm:$0xf0]  ;;  %v13869_v17 = vor.u32 %v11870_v13, %v10022_v45  ;;  %v10556_v13 = vld [vmem:[%s18689_s1 + $0x330] sm:$0xf] }
 0x255   : > { %19132 = vst [vmem:[#allocation113_spill] sm:$0xff] %v13841_v2  ;;  %v10249_v62 = vor.u32 %v11928_v53, %v10246_v37  ;;  %v19135_v45 = vld [vmem:[#allocation76_spill] sm:$0xff] }
 0x256   : > { %19133 = vst [vmem:[#allocation114_spill] sm:$0xff] %v13869_v17 }
 0x257   : > { %2376 = vmatpush.bf16.msrb.mxu1 %v10257_v23  ;;  %3216 = vmatpush.bf16.msrb.mxu0 %v10573_v41  ;;  %v11985_v23 = vld [vmem:[%s18689_s1 + $0x344] sm:$0xf0] }
 0x258   : > { %v10565_v5 = vor.u32 %v11985_v23, %v10564_v35 }
 0x259   : > { %v2154_v33 = vpop.f32.mrf.mxu2  ;;  %v2238_v54 = vpop.f32.mrf.mxu3 }
 0x25a   : > { %v13874_v57 = vadd.f32 %v2238_v54, %v2149_v14  ;;  %v2053_v41 = vpop.f32.mrf.mxu1  ;;  %v2315_v2 = vpop.f32.mrf.mxu0  ;;  %v11983_v14 = vld [vmem:[%s18689_s1 + $0x334] sm:$0xf0] }
 0x25b   : > { %v13877_v25 = vadd.f32 %v2053_v41, %v13388_v29  ;;  %v13880_v3 = vadd.f32 %v2315_v2, %v13730_v58  ;;  %2377 = vmatpush.bf16.msrb.mxu1 %v10249_v62  ;;  %3217 = vmatpush.bf16.msrb.mxu0 %v10565_v5  ;;  %v10557_v53 = vor.u32 %v11983_v14, %v10556_v13  ;;  %v19136_v29 = vld [vmem:[#allocation31_spill] sm:$0xff]  ;;  %v10548_v2 = vld [vmem:[%s18689_s1 + $0x320] sm:$0xf]  ;;  %v10540_v14 = vld [vmem:[%s18689_s1 + $0x310] sm:$0xf] }
 0x25c   : > { %v11981_v58 = vld [vmem:[%s18689_s1 + $0x324] sm:$0xf0] }
 0x25d   : > { %19134 = vst [vmem:[#allocation115_spill] sm:$0xff] %v13877_v25  ;;  %2092 = vmatmul.bf16.gmra.mxu1 %v13869_v17  ;;  %2354 = vmatmul.bf16.gmra.mxu0 %v19135_v45  ;;  %v10549_v35 = vor.u32 %v11981_v58, %v10548_v2  ;;  %v11876_v2 = vld [vmem:[%s12406_s24 + $0x2e4] sm:$0xf]  ;;  %v19141_v45 = vld [vmem:[#allocation35_spill] sm:$0xff] }
 0x25e   : > { %2472 = vmatmul.bf16.gmra.mxu2 %v19136_v29  ;;  %2556 = vmatmul.bf16.vlgmr.msrb.gmra.mxu3 %v13411_v15 }
 0x25f   : > { %3218 = vmatpush.bf16.msrb.mxu0 %v10557_v53  ;;  %v11979_v53 = vld [vmem:[%s18689_s1 + $0x314] sm:$0xf0] }
 0x260   : > { %v10541_v25 = vor.u32 %v11979_v53, %v10540_v14  ;;  %v19140_v53 = vld [vmem:[#allocation82_spill] sm:$0xff] }
 0x261   : > { %v2157_v5 = vpop.f32.mrf.mxu2  ;;  %v2241_v37 = vpop.f32.mrf.mxu3 }
 0x262   : > { %v2242_v54 = vadd.f32 %v2241_v37, %v2152_v9  ;;  %v2055_v62 = vpop.f32.mrf.mxu1  ;;  %v2317_v23 = vpop.f32.mrf.mxu0  ;;  %v10046_v9 = vld [vmem:[%s12406_s24 + $0x2f8] sm:$0xf0]  ;;  %s9665_s24 = sshll.u32 %s19871_s22, 3 }
 0x263   : > { %v13899_v41 = vadd.f32 %v2055_v62, %v13399_v44  ;;  %v13902_v13 = vadd.f32 %v2317_v23, %v13754_v1  ;;  %3219 = vmatpush.bf16.msrb.mxu0 %v10549_v35  ;;  %v10532_v44 = vld [vmem:[%s18689_s1 + $0x300] sm:$0xf]  ;;  %v11977_v1 = vld [vmem:[%s18689_s1 + $0x304] sm:$0xf0]  ;;  %v13918_v62 = vor.u32 %v11876_v2, %v10046_v9  ;;  %s416_s19 = scalar_lea.vmem %s18700_s12, %s9665_s24 }
 0x264   : > { %v10533_v23 = vor.u32 %v11977_v1, %v10532_v44 }
 0x265   : > { %19137 = vst [vmem:[#allocation116_spill] sm:$0xff] %v13899_v41 }
 0x266   : > { %19138 = vst [vmem:[#allocation117_spill] sm:$0xff] %v13918_v62 }
 0x267   : > { %3220 = vmatpush.bf16.msrb.mxu0 %v10541_v25 }
 0x269   : > { %v2159_v58 = vpop.f32.mrf.mxu2  ;;  %v2243_v37 = vpop.f32.mrf.mxu3 }
 0x26a   : > { %v2244_v41 = vadd.f32 %v2243_v37, %v2154_v33  ;;  %v2058_v15 = vpop.f32.mrf.mxu1  ;;  %v2320_v35 = vpop.f32.mrf.mxu0 }
 0x26b   : > { %v13921_v14 = vadd.f32 %v2058_v15, %v13414_v43  ;;  %v13924_v25 = vadd.f32 %v2320_v35, %v13778_v56  ;;  %3221 = vmatpush.bf16.msrb.mxu0 %v10533_v23 }
 0x26d   : > { %19139 = vst [vmem:[#allocation118_spill] sm:$0xff] %v13921_v14  ;;  %2097 = vmatmul.bf16.gmra.mxu1 %v13918_v62  ;;  %2359 = vmatmul.bf16.gmra.mxu0 %v19140_v53 }
 0x26e   : > { %2477 = vmatmul.bf16.gmra.mxu2 %v19141_v45  ;;  %2561 = vmatmul.bf16.gmra.mxu3 %v13431_v0 }
 0x271   : > { %v2162_v2 = vpop.f32.mrf.mxu2  ;;  %v2246_v9 = vpop.f32.mrf.mxu3 }
 0x272   : > { %v2247_v33 = vadd.f32 %v2246_v9, %v2157_v5  ;;  %v2060_v44 = vpop.f32.mrf.mxu1  ;;  %v2322_v1 = vpop.f32.mrf.mxu0  ;;  %v19144_v5 = vld [vmem:[#allocation17_spill] sm:$0xff] }
 0x273   : > { %v13931_v15 = vadd.f32 %v2060_v44, %v13424_v36  ;;  %v13934_v43 = vadd.f32 %v2322_v1, %v13802_v24  ;;  %v19145_v36 = vld [vmem:[#allocation43_spill] sm:$0xff] }
 0x275   : > { %19142 = vst [vmem:[#allocation119_spill] sm:$0xff] %v13931_v15 }
 0x279   : > { %v2164_v56 = vpop.f32.mrf.mxu2  ;;  %v2248_v37 = vpop.f32.mrf.mxu3 }
 0x27a   : > { %v2249_v23 = vadd.f32 %v2248_v37, %v2159_v58  ;;  %v2063_v35 = vpop.f32.mrf.mxu1  ;;  %v2325_v14 = vpop.f32.mrf.mxu0 }
 0x27b   : > { %v13937_v53 = vadd.f32 %v2063_v35, %v13434_v48  ;;  %v13940_v0 = vadd.f32 %v2325_v14, %v13838_v30 }
 0x27d   : > { %19143 = vst [vmem:[#allocation120_spill] sm:$0xff] %v13937_v53  ;;  %2364 = vmatmul.bf16.gmra.mxu0 %v13197_v8  ;;  %2378 = vmatmul.bf16.vlgmr.msrb.gmra.mxu1 %v19144_v5 }
 0x27e   : > { %2482 = vmatmul.bf16.gmra.mxu2 %v19145_v36  ;;  %2566 = vmatmul.bf16.gmra.mxu3 %v13451_v61  ;;  %v19148_v36 = vld [vmem:[#allocation21_spill] sm:$0xff] }
 0x281   : > { %v2167_v24 = vpop.f32.mrf.mxu2  ;;  %v2251_v9 = vpop.f32.mrf.mxu3 }
 0x282   : > { %v2252_v44 = vadd.f32 %v2251_v9, %v2162_v2  ;;  %v2065_v58 = vpop.f32.mrf.mxu1  ;;  %v2327_v1 = vpop.f32.mrf.mxu0  ;;  %v19149_v2 = vld [vmem:[#allocation51_spill] sm:$0xff] }
 0x283   : > { %v13947_v37 = vadd.f32 %v2065_v58, %v13444_v60  ;;  %v13950_v48 = vadd.f32 %v2327_v1, %v13874_v57 }
 0x285   : > { %19146 = vst [vmem:[#allocation121_spill] sm:$0xff] %v13947_v37 }
 0x289   : > { %v2169_v30 = vpop.f32.mrf.mxu2  ;;  %v2253_v14 = vpop.f32.mrf.mxu3 }
 0x28a   : > { %v2254_v35 = vadd.f32 %v2253_v14, %v2164_v56  ;;  %v2068_v53 = vpop.f32.mrf.mxu1  ;;  %v2330_v15 = vpop.f32.mrf.mxu0 }
 0x28b   : > { %v13953_v8 = vadd.f32 %v2068_v53, %v13454_v4  ;;  %v13955_v61 = vadd.f32 %v2330_v15, %v2242_v54 }
 0x28d   : > { %19147 = vst [vmem:[#allocation122_spill] sm:$0xff] %v13953_v8  ;;  %2383 = vmatmul.bf16.gmra.mxu1 %v19148_v36  ;;  %3222 = vmatmul.bf16.vlgmr.msrb.gmra.mxu0 %v12437_v39 }
 0x28e   : > { %2487 = vmatmul.bf16.gmra.mxu2 %v19149_v2  ;;  %2571 = vmatmul.bf16.gmra.mxu3 %v13471_v21  ;;  %v19152_v21 = vld [vmem:[#allocation25_spill] sm:$0xff] }
 0x291   : > { %v2172_v60 = vpop.f32.mrf.mxu2  ;;  %v2256_v57 = vpop.f32.mrf.mxu3 }
 0x292   : > { %v2257_v9 = vadd.f32 %v2256_v57, %v2167_v24  ;;  %v2070_v58 = vpop.f32.mrf.mxu1  ;;  %v2332_v56 = vpop.f32.mrf.mxu0  ;;  %v19153_v24 = vld [vmem:[#allocation57_spill] sm:$0xff] }
 0x293   : > { %v13962_v1 = vadd.f32 %v2070_v58, %v13464_v18  ;;  %v13964_v4 = vadd.f32 %v2332_v56, %v2244_v41 }
 0x295   : > { %19150 = vst [vmem:[#allocation123_spill] sm:$0xff] %v13962_v1 }
 0x299   : > { %v2174_v54 = vpop.f32.mrf.mxu2  ;;  %v2258_v53 = vpop.f32.mrf.mxu3 }
 0x29a   : > { %v2259_v15 = vadd.f32 %v2258_v53, %v2169_v30  ;;  %v2073_v14 = vpop.f32.mrf.mxu1  ;;  %v2335_v8 = vpop.f32.mrf.mxu0 }
 0x29b   : > { %v13967_v37 = vadd.f32 %v2073_v14, %v13474_v32  ;;  %v13969_v39 = vadd.f32 %v2335_v8, %v2247_v33 }
 0x29d   : > { %19151 = vst [vmem:[#allocation124_spill] sm:$0xff] %v13967_v37  ;;  %2388 = vmatmul.bf16.gmra.mxu1 %v19152_v21  ;;  %3227 = vmatmul.bf16.gmra.mxu0 %v12505_v11 }
 0x29e   : > { %2492 = vmatmul.bf16.gmra.mxu2 %v19153_v24  ;;  %2576 = vmatmul.bf16.gmra.mxu3 %v13491_v26  ;;  %v19156_v26 = vld [vmem:[#allocation29_spill] sm:$0xff] }
 0x2a1   : > { %v2177_v18 = vpop.f32.mrf.mxu2  ;;  %v2261_v41 = vpop.f32.mrf.mxu3 }
 0x2a2   : > { %v2262_v57 = vadd.f32 %v2261_v41, %v2172_v60  ;;  %v2075_v58 = vpop.f32.mrf.mxu1  ;;  %v2337_v30 = vpop.f32.mrf.mxu0  ;;  %v19157_v60 = vld [vmem:[#allocation61_spill] sm:$0xff] }
 0x2a3   : > { %v13976_v56 = vadd.f32 %v2075_v58, %v13484_v51  ;;  %v13978_v32 = vadd.f32 %v2337_v30, %v2249_v23  ;;  %v19158_v30 = vld [vmem:[#allocation40_spill] sm:$0xff] }
 0x2a5   : > { %19154 = vst [vmem:[#allocation125_spill] sm:$0xff] %v13976_v56 }
 0x2a9   : > { %v2179_v8 = vpop.f32.mrf.mxu2  ;;  %v2263_v33 = vpop.f32.mrf.mxu3 }
 0x2aa   : > { %v2264_v53 = vadd.f32 %v2263_v33, %v2174_v54  ;;  %v2078_v14 = vpop.f32.mrf.mxu1  ;;  %v2340_v37 = vpop.f32.mrf.mxu0 }
 0x2ab   : > { %v13981_v1 = vadd.f32 %v2078_v14, %v13494_v38  ;;  %v13983_v11 = vadd.f32 %v2340_v37, %v2252_v44 }
 0x2ad   : > { %19155 = vst [vmem:[#allocation126_spill] sm:$0xff] %v13981_v1  ;;  %2393 = vmatmul.bf16.gmra.mxu1 %v19156_v26  ;;  %3232 = vmatmul.bf16.gmra.mxu0 %v12582_v55  ;;  %v19160_v55 = vld [vmem:[#allocation48_spill] sm:$0xff] }
 0x2ae   : > { %2497 = vmatmul.bf16.gmra.mxu2 %v19157_v60  ;;  %2581 = vmatmul.bf16.gmra.mxu3 %v13511_v6  ;;  %v19163_v6 = vld [vmem:[#allocation33_spill] sm:$0xff] }
 0x2b1   : > { %v2182_v51 = vpop.f32.mrf.mxu2  ;;  %v2266_v23 = vpop.f32.mrf.mxu3 }
 0x2b2   : > { %v2267_v41 = vadd.f32 %v2266_v23, %v2177_v18  ;;  %v2080_v58 = vpop.f32.mrf.mxu1  ;;  %v2342_v54 = vpop.f32.mrf.mxu0  ;;  %v19164_v18 = vld [vmem:[#allocation14_spill] sm:$0xff]  ;;  %v19165_v23 = vld [vmem:[#allocation65_spill] sm:$0xff] }
 0x2b3   : > { %v13990_v33 = vadd.f32 %v2080_v58, %v19158_v30  ;;  %v13992_v38 = vadd.f32 %v2342_v54, %v2254_v35  ;;  %v19166_v58 = vld [vmem:[#allocation41_spill] sm:$0xff] }
 0x2b5   : > { %19159 = vst [vmem:[#allocation40_spill] sm:$0xff] %v13990_v33 }
 0x2b9   : > { %v2184_v44 = vpop.f32.mrf.mxu2  ;;  %v2268_v37 = vpop.f32.mrf.mxu3 }
 0x2ba   : > { %v2269_v14 = vadd.f32 %v2268_v37, %v2179_v8  ;;  %v2083_v1 = vpop.f32.mrf.mxu1  ;;  %v2345_v56 = vpop.f32.mrf.mxu0  ;;  %v19167_v37 = vld [vmem:[#allocation39_spill] sm:$0xff] }
 0x2bb   : > { %v13995_v24 = vadd.f32 %v2083_v1, %v19160_v55  ;;  %v13997_v60 = vadd.f32 %v2345_v56, %v2257_v9 }
 0x2bd   : > { %19161 = vst [vmem:[#allocation48_spill] sm:$0xff] %v13995_v24  ;;  %2398 = vmatmul.bf16.gmra.mxu1 %v19163_v6  ;;  %3237 = vmatmul.bf16.gmra.mxu0 %v19164_v18  ;;  %v19169_v18 = vld [vmem:[#allocation47_spill] sm:$0xff] }
 0x2be   : > { %19162 = vst [vmem:[#allocation127_spill] sm:$0xff] %v13997_v60  ;;  %2502 = vmatmul.bf16.gmra.mxu2 %v19165_v23  ;;  %2586 = vmatmul.bf16.gmra.mxu3 %v19166_v58  ;;  %v19171_v58 = vld [vmem:[#allocation37_spill] sm:$0xff] }
 0x2c1   : > { %v2187_v35 = vpop.f32.mrf.mxu2  ;;  %v2271_v54 = vpop.f32.mrf.mxu3 }
 0x2c2   : > { %v2272_v30 = vadd.f32 %v2271_v54, %v2182_v51  ;;  %v2085_v33 = vpop.f32.mrf.mxu1  ;;  %v2347_v8 = vpop.f32.mrf.mxu0  ;;  %v19172_v51 = vld [vmem:[#allocation18_spill] sm:$0xff]  ;;  %v19173_v54 = vld [vmem:[#allocation69_spill] sm:$0xff] }
 0x2c3   : > { %v14004_v2 = vadd.f32 %v2085_v33, %v19167_v37  ;;  %v14006_v55 = vadd.f32 %v2347_v8, %v2259_v15 }
 0x2c5   : > { %19168 = vst [vmem:[#allocation39_spill] sm:$0xff] %v14004_v2 }
 0x2c9   : > { %v2189_v9 = vpop.f32.mrf.mxu2  ;;  %v2273_v1 = vpop.f32.mrf.mxu3 }
 0x2ca   : > { %v2274_v56 = vadd.f32 %v2273_v1, %v2184_v44  ;;  %v2088_v24 = vpop.f32.mrf.mxu1  ;;  %v2350_v45 = vpop.f32.mrf.mxu0 }
 0x2cb   : > { %v14009_v60 = vadd.f32 %v2088_v24, %v19169_v18  ;;  %v14011_v23 = vadd.f32 %v2350_v45, %v2262_v57 }
 0x2cd   : > { %19170 = vst [vmem:[#allocation47_spill] sm:$0xff] %v14009_v60  ;;  %2403 = vmatmul.bf16.gmra.mxu1 %v19171_v58  ;;  %3242 = vmatmul.bf16.gmra.mxu0 %v19172_v51 }
 0x2ce   : > { %2507 = vmatmul.bf16.gmra.mxu2 %v19173_v54  ;;  %2591 = vmatmul.bf16.gmra.mxu3 %v13543_v50  ;;  %v19176_v50 = vld [vmem:[#allocation45_spill] sm:$0xff] }
 0x2d1   : > { %v2276_v15 = vpop.f32.mrf.mxu3  ;;  %v2468_v33 = vpop.f32.mrf.mxu2 }
 0x2d2   : > { %v2277_v8 = vadd.f32 %v2276_v15, %v2187_v35  ;;  %v2090_v37 = vpop.f32.mrf.mxu1  ;;  %v2352_v44 = vpop.f32.mrf.mxu0  ;;  %v19177_v35 = vld [vmem:[#allocation22_spill] sm:$0xff]  ;;  %v19178_v15 = vld [vmem:[#allocation75_spill] sm:$0xff] }
 0x2d3   : > { %v14018_v1 = vadd.f32 %v2090_v37, %v13538_v52  ;;  %v14020_v24 = vadd.f32 %v2352_v44, %v2264_v53 }
 0x2d5   : > { %19174 = vst [vmem:[#allocation128_spill] sm:$0xff] %v14018_v1 }
 0x2d9   : > { %v2278_v45 = vpop.f32.mrf.mxu3  ;;  %v2470_v57 = vpop.f32.mrf.mxu2 }
 0x2da   : > { %v2279_v18 = vadd.f32 %v2278_v45, %v2189_v9  ;;  %v2093_v60 = vpop.f32.mrf.mxu1  ;;  %v2355_v2 = vpop.f32.mrf.mxu0 }
 0x2db   : > { %v14023_v51 = vadd.f32 %v2093_v60, %v13548_v63  ;;  %v14025_v54 = vadd.f32 %v2355_v2, %v2267_v41 }
 0x2dd   : > { %19175 = vst [vmem:[#allocation129_spill] sm:$0xff] %v14023_v51  ;;  %2408 = vmatmul.bf16.gmra.mxu1 %v19176_v50  ;;  %3247 = vmatmul.bf16.gmra.mxu0 %v19177_v35  ;;  %v19183_v35 = vld [vmem:[#allocation53_spill] sm:$0xff] }
 0x2de   : > { %2512 = vmatmul.bf16.gmra.mxu2 %v19178_v15  ;;  %2596 = vmatmul.bf16.gmra.mxu3 %v13563_v59  ;;  %v19184_v59 = vld [vmem:[#allocation3_spill] sm:$0xff]  ;;  %v19185_v15 = vld [vmem:[#allocation81_spill] sm:$0xff] }
 0x2e1   : > { %v2473_v52 = vpop.f32.mrf.mxu2  ;;  %v2557_v53 = vpop.f32.mrf.mxu3 }
 0x2e2   : > { %v2095_v37 = vpop.f32.mrf.mxu1  ;;  %v2357_v44 = vpop.f32.mrf.mxu0 }
 0x2e3   : > { %v14032_v9 = vadd.f32 %v2095_v37, %v13558_v27  ;;  %v14034_v45 = vadd.f32 %v2357_v44, %v2269_v14 }
 0x2e5   : > { %19179 = vst [vmem:[#allocation130_spill] sm:$0xff] %v14032_v9 }
 0x2e6   : > { %19180 = vst [vmem:[#allocation131_spill] sm:$0xff] %v14034_v45  ;;  %v19188_v45 = vld [vmem:[#allocation7_spill] sm:$0xff] }
 0x2e9   : > { %v2475_v63 = vpop.f32.mrf.mxu2  ;;  %v2559_v2 = vpop.f32.mrf.mxu3 }
 0x2ea   : > { %v2098_v60 = vpop.f32.mrf.mxu1  ;;  %v2360_v41 = vpop.f32.mrf.mxu0 }
 0x2eb   : > { %v14037_v51 = vadd.f32 %v2098_v60, %v13567_v7  ;;  %v14039_v1 = vadd.f32 %v2360_v41, %v2272_v30 }
 0x2ed   : > { %19181 = vst [vmem:[#allocation132_spill] sm:$0xff] %v14037_v51  ;;  %2413 = vmatmul.bf16.gmra.mxu1 %v19183_v35  ;;  %3252 = vmatmul.bf16.gmra.mxu0 %v19184_v59  ;;  %v19189_v35 = vld [vmem:[#allocation85_spill] sm:$0xff] }
 0x2ee   : > { %19182 = vst [vmem:[#allocation133_spill] sm:$0xff] %v14039_v1  ;;  %2517 = vmatmul.bf16.gmra.mxu2 %v19185_v15  ;;  %2601 = vmatmul.bf16.gmra.mxu3 %v13585_v40  ;;  %v19187_v1 = vld [vmem:[#allocation59_spill] sm:$0xff] }
 0x2f1   : > { %v14045_v27 = vpop.f32.mrf.mxu2  ;;  %v2562_v14 = vpop.f32.mrf.mxu3 }
 0x2f2   : > { %v2100_v37 = vpop.f32.mrf.mxu1  ;;  %v2362_v44 = vpop.f32.mrf.mxu0 }
 0x2f3   : > { %v14048_v9 = vadd.f32 %v2100_v37, %v13578_v34  ;;  %v14050_v7 = vadd.f32 %v2362_v44, %v2274_v56 }
 0x2f5   : > { %19186 = vst [vmem:[#allocation134_spill] sm:$0xff] %v14048_v9 }
 0x2f9   : > { %v14052_v30 = vpop.f32.mrf.mxu2  ;;  %v2564_v60 = vpop.f32.mrf.mxu3 }
 0x2fa   : > { %v2365_v41 = vpop.f32.mrf.mxu0  ;;  %v2379_v51 = vpop.f32.mrf.mxu1 }
 0x2fb   : > { %v14054_v59 = vadd.f32 %v2365_v41, %v2277_v8  ;;  %v2380_v15 = vadd.f32 %v2379_v51, %v13592_v31 }
 0x2fd   : > { %v2469_v40 = vadd.f32 %v2468_v33, %v2380_v15  ;;  %2418 = vmatmul.bf16.gmra.mxu1 %v19187_v1  ;;  %3257 = vmatmul.bf16.gmra.mxu0 %v19188_v45 }
 0x2fe   : > { %2522 = vmatmul.bf16.gmra.mxu2 %v19189_v35  ;;  %2606 = vmatmul.bf16.gmra.mxu3 %v13632_v22 }
 0x2ff   : > { %v14061_v34 = vadd.f32 %v2557_v53, %v2469_v40  ;;  %v19192_v40 = vld [vmem:[#allocation102_spill] sm:$0xff] }
 0x301   : > { %19190 = vst [vmem:[#allocation135_spill] sm:$0xff] %v14061_v34  ;;  %v14063_v56 = vpop.f32.mrf.mxu2  ;;  %v2567_v37 = vpop.f32.mrf.mxu3  ;;  %v10716_v34 = vld [vmem:[%s18689_s1 + $0x470] sm:$0xf] }
 0x302   : > { %v2367_v44 = vpop.f32.mrf.mxu0  ;;  %v2381_v9 = vpop.f32.mrf.mxu1 }
 0x303   : > { %v14065_v8 = vadd.f32 %v2367_v44, %v2279_v18  ;;  %v2382_v31 = vadd.f32 %v2381_v9, %v13616_v47  ;;  %v12023_v47 = vld [vmem:[%s18689_s1 + $0x474] sm:$0xf0]  ;;  %v19193_v18 = vld [vmem:[#allocation63_spill] sm:$0xff] }
 0x304   : > { %v19194_v9 = vld [vmem:[#allocation11_spill] sm:$0xff]  ;;  %v19195_v44 = vld [vmem:[#allocation89_spill] sm:$0xff] }
 0x305   : > { %v2471_v51 = vadd.f32 %v2470_v57, %v2382_v31 }
 0x307   : > { %v14068_v33 = vadd.f32 %v2559_v2, %v2471_v51  ;;  %v10717_v2 = vor.u32 %v12023_v47, %v10716_v34 }
 0x309   : > { %19191 = vst [vmem:[#allocation136_spill] sm:$0xff] %v14068_v33  ;;  %v14070_v15 = vpop.f32.mrf.mxu2  ;;  %v14072_v41 = vpop.f32.mrf.mxu3  ;;  %3392 = vmatpush.bf16.msra.mxu2 %v10717_v2  ;;  %v19197_v33 = vld [vmem:[#allocation104_spill] sm:$0xff]  ;;  %v12019_v2 = vld [vmem:[%s18689_s1 + $0x454] sm:$0xf0] }
 0x30a   : > { %v2384_v45 = vpop.f32.mrf.mxu1  ;;  %v14074_v22 = vpop.f32.mrf.mxu0 }
 0x30b   : > { %v2385_v53 = vadd.f32 %v2384_v45, %v19192_v40  ;;  %v10708_v45 = vld [vmem:[%s18689_s1 + $0x460] sm:$0xf] }
 0x30d   : > { %v2474_v57 = vadd.f32 %v2473_v52, %v2385_v53  ;;  %2423 = vmatmul.bf16.gmra.mxu1 %v19193_v18  ;;  %3262 = vmatmul.bf16.gmra.mxu0 %v19194_v9  ;;  %v12021_v52 = vld [vmem:[%s18689_s1 + $0x464] sm:$0xf0] }
 0x30e   : > { %2527 = vmatmul.bf16.gmra.mxu2 %v19195_v44  ;;  %2611 = vmatmul.bf16.gmra.mxu3 %v13701_v42  ;;  %v10709_v34 = vor.u32 %v12021_v52, %v10708_v45  ;;  %v10692_v45 = vld [vmem:[%s18689_s1 + $0x440] sm:$0xf] }
 0x30f   : > { %v14087_v31 = vadd.f32 %v2562_v14, %v2474_v57  ;;  %v10700_v57 = vld [vmem:[%s18689_s1 + $0x450] sm:$0xf] }
 0x310   : > { %3393 = vmatpush.bf16.msra.mxu2 %v10709_v34  ;;  %v10701_v42 = vor.u32 %v12019_v2, %v10700_v57  ;;  %v19199_v57 = vld [vmem:[#allocation67_spill] sm:$0xff] }
 0x311   : > { %19196 = vst [vmem:[#allocation102_spill] sm:$0xff] %v14087_v31  ;;  %v14095_v51 = vpop.f32.mrf.mxu2  ;;  %v14097_v40 = vpop.f32.mrf.mxu3  ;;  %v19200_v2 = vld [vmem:[#allocation15_spill] sm:$0xff] }
 0x312   : > { %v2386_v53 = vpop.f32.mrf.mxu1  ;;  %v14099_v47 = vpop.f32.mrf.mxu0 }
 0x313   : > { %v2387_v14 = vadd.f32 %v2386_v53, %v19197_v33  ;;  %v12017_v33 = vld [vmem:[%s18689_s1 + $0x444] sm:$0xf0] }
 0x314   : > { %3394 = vmatpush.bf16.msra.mxu2 %v10701_v42  ;;  %v10693_v53 = vor.u32 %v12017_v33, %v10692_v45  ;;  %v10684_v42 = vld [vmem:[%s18689_s1 + $0x430] sm:$0xf] }
 0x315   : > { %v2476_v31 = vadd.f32 %v2475_v63, %v2387_v14  ;;  %v19201_v45 = vld [vmem:[#allocation92_spill] sm:$0xff] }
 0x317   : > { %v14108_v9 = vadd.f32 %v2564_v60, %v2476_v31  ;;  %v12015_v60 = vld [vmem:[%s18689_s1 + $0x434] sm:$0xf0]  ;;  %v10780_v31 = vld [vmem:[%s18689_s1 + $0x4f0] sm:$0xf] }
 0x318   : > { %3395 = vmatpush.bf16.msra.mxu2 %v10693_v53 }
 0x319   : > { %19198 = vst [vmem:[#allocation104_spill] sm:$0xff] %v14108_v9  ;;  %v14116_v52 = vpop.f32.mrf.mxu2  ;;  %v14118_v34 = vpop.f32.mrf.mxu3 }
 0x31a   : > { %v2389_v44 = vpop.f32.mrf.mxu1  ;;  %v14120_v35 = vpop.f32.mrf.mxu0 }
 0x31b   : > { %v2390_v63 = vadd.f32 %v2389_v44, %v13712_v49  ;;  %v10685_v49 = vor.u32 %v12015_v60, %v10684_v42  ;;  %v12039_v44 = vld [vmem:[%s18689_s1 + $0x4f4] sm:$0xf0]  ;;  %v10772_v42 = vld [vmem:[%s18689_s1 + $0x4e0] sm:$0xf] }
 0x31c   : > { %v10781_v33 = vor.u32 %v12039_v44, %v10780_v31  ;;  %v12037_v31 = vld [vmem:[%s18689_s1 + $0x4e4] sm:$0xf0] }
 0x31d   : > { %v2479_v14 = vadd.f32 %v14045_v27, %v2390_v63  ;;  %2428 = vmatmul.bf16.gmra.mxu1 %v19199_v57  ;;  %3267 = vmatmul.bf16.gmra.mxu0 %v19200_v2  ;;  %v10676_v27 = vld [vmem:[%s18689_s1 + $0x420] sm:$0xf]  ;;  %v12013_v63 = vld [vmem:[%s18689_s1 + $0x424] sm:$0xf0]  ;;  %v10773_v44 = vor.u32 %v12037_v31, %v10772_v42 }
 0x31e   : > { %2532 = vmatmul.bf16.gmra.mxu2 %v19201_v45  ;;  %2616 = vmatmul.bf16.gmra.mxu3 %v13752_v16  ;;  %v10660_v31 = vld [vmem:[%s18689_s1 + $0x400] sm:$0xf] }
 0x31f   : > { %v14140_v53 = vadd.f32 %v2567_v37, %v2479_v14  ;;  %3396 = vmatpush.bf16.msra.mxu2 %v10685_v49  ;;  %3481 = vmatpush.bf16.msra.mxu3 %v10781_v33  ;;  %v10677_v37 = vor.u32 %v12013_v63, %v10676_v27  ;;  %v12011_v27 = vld [vmem:[%s18689_s1 + $0x414] sm:$0xf0]  ;;  %v10764_v63 = vld [vmem:[%s18689_s1 + $0x4d0] sm:$0xf] }
 0x321   : > { %19202 = vst [vmem:[#allocation137_spill] sm:$0xff] %v14140_v53  ;;  %v14151_v60 = vpop.f32.mrf.mxu2  ;;  %v14153_v9 = vpop.f32.mrf.mxu3  ;;  %v10668_v53 = vld [vmem:[%s18689_s1 + $0x410] sm:$0xf] }
 0x322   : > { %v2391_v14 = vpop.f32.mrf.mxu1  ;;  %v14158_v49 = vpop.f32.mrf.mxu0  ;;  %v10669_v2 = vor.u32 %v12011_v27, %v10668_v53 }
 0x323   : > { %v2392_v33 = vadd.f32 %v2391_v14, %v13736_v20  ;;  %3397 = vmatpush.bf16.msra.mxu2 %v10677_v37  ;;  %3482 = vmatpush.bf16.msra.mxu3 %v10773_v44  ;;  %v12035_v20 = vld [vmem:[%s18689_s1 + $0x4d4] sm:$0xf0]  ;;  %v12009_v14 = vld [vmem:[%s18689_s1 + $0x404] sm:$0xf0] }
 0x324   : > { %v10765_v42 = vor.u32 %v12035_v20, %v10764_v63  ;;  %v10748_v20 = vld [vmem:[%s18689_s1 + $0x4b0] sm:$0xf] }
 0x325   : > { %v2481_v16 = vadd.f32 %v14052_v30, %v2392_v33  ;;  %v10756_v30 = vld [vmem:[%s18689_s1 + $0x4c0] sm:$0xf] }
 0x327   : > { %v14175_v37 = vadd.f32 %v14072_v41, %v2481_v16  ;;  %3398 = vmatpush.bf16.msra.mxu2 %v10669_v2  ;;  %3483 = vmatpush.bf16.msra.mxu3 %v10765_v42  ;;  %v10661_v16 = vor.u32 %v12009_v14, %v10660_v31  ;;  %v12033_v41 = vld [vmem:[%s18689_s1 + $0x4c4] sm:$0xf0]  ;;  %v12031_v42 = vld [vmem:[%s18689_s1 + $0x4b4] sm:$0xf0] }
 0x328   : > { %v10757_v27 = vor.u32 %v12033_v41, %v10756_v30  ;;  %v19204_v14 = vld [vmem:[#allocation71_spill] sm:$0xff]  ;;  %v10749_v45 = vor.u32 %v12031_v42, %v10748_v20  ;;  %v19206_v30 = vld [vmem:[#allocation94_spill] sm:$0xff]  ;;  %v12027_v42 = vld [vmem:[%s18689_s1 + $0x494] sm:$0xf0] }
 0x329   : > { %19203 = vst [vmem:[#allocation138_spill] sm:$0xff] %v14175_v37  ;;  %v14186_v53 = vpop.f32.mrf.mxu2  ;;  %v14188_v44 = vpop.f32.mrf.mxu3  ;;  %v19205_v37 = vld [vmem:[#allocation19_spill] sm:$0xff] }
 0x32a   : > { %v2394_v2 = vpop.f32.mrf.mxu1  ;;  %v14193_v33 = vpop.f32.mrf.mxu0 }
 0x32b   : > { %v2395_v63 = vadd.f32 %v2394_v2, %v13760_v12  ;;  %3399 = vmatpush.bf16.msra.mxu2 %v10661_v16  ;;  %3484 = vmatpush.bf16.msra.mxu3 %v10757_v27  ;;  %v10740_v16 = vld [vmem:[%s18689_s1 + $0x4a0] sm:$0xf] }
 0x32d   : > { %v2484_v31 = vadd.f32 %v14063_v56, %v2395_v63  ;;  %2433 = vmatmul.bf16.gmra.mxu1 %v19204_v14  ;;  %3272 = vmatmul.bf16.gmra.mxu0 %v19205_v37  ;;  %v12029_v56 = vld [vmem:[%s18689_s1 + $0x4a4] sm:$0xf0] }
 0x32e   : > { %2537 = vmatmul.bf16.gmra.mxu2 %v19206_v30  ;;  %2621 = vmatmul.bf16.gmra.mxu3 %v13800_v10  ;;  %v10741_v27 = vor.u32 %v12029_v56, %v10740_v16  ;;  %v12025_v16 = vld [vmem:[%s18689_s1 + $0x484] sm:$0xf0] }
 0x32f   : > { %v14208_v12 = vadd.f32 %v14097_v40, %v2484_v31  ;;  %3485 = vmatpush.bf16.msra.mxu3 %v10749_v45  ;;  %v10732_v45 = vld [vmem:[%s18689_s1 + $0x490] sm:$0xf] }
 0x331   : > { %19207 = vst [vmem:[#allocation139_spill] sm:$0xff] %v14208_v12  ;;  %v14216_v41 = vpop.f32.mrf.mxu2  ;;  %v14218_v2 = vpop.f32.mrf.mxu3  ;;  %v10733_v12 = vor.u32 %v12027_v42, %v10732_v45  ;;  %v19209_v42 = vld [vmem:[#allocation77_spill] sm:$0xff] }
 0x332   : > { %v2396_v63 = vpop.f32.mrf.mxu1  ;;  %v14220_v20 = vpop.f32.mrf.mxu0 }
 0x333   : > { %v2397_v40 = vadd.f32 %v2396_v63, %v13784_v28  ;;  %3486 = vmatpush.bf16.msra.mxu3 %v10741_v27  ;;  %v10724_v28 = vld [vmem:[%s18689_s1 + $0x480] sm:$0xf] }
 0x334   : > { %v10725_v63 = vor.u32 %v12025_v16, %v10724_v28  ;;  %v19211_v16 = vld [vmem:[#allocation95_spill] sm:$0xff] }
 0x335   : > { %v2486_v31 = vadd.f32 %v14070_v15, %v2397_v40  ;;  %v12007_v40 = vld [vmem:[%s18689_s1 + $0x3f4] sm:$0xf0] }
 0x337   : > { %v14231_v10 = vadd.f32 %v14118_v34, %v2486_v31  ;;  %3487 = vmatpush.bf16.msra.mxu3 %v10733_v12  ;;  %v10652_v12 = vld [vmem:[%s18689_s1 + $0x3f0] sm:$0xf] }
 0x338   : > { %v19210_v31 = vld [vmem:[#allocation4_spill] sm:$0xff]  ;;  %v10653_v28 = vor.u32 %v12007_v40, %v10652_v12 }
 0x339   : > { %19208 = vst [vmem:[#allocation140_spill] sm:$0xff] %v14231_v10  ;;  %v14239_v56 = vpop.f32.mrf.mxu2  ;;  %v14241_v27 = vpop.f32.mrf.mxu3 }
 0x33a   : > { %v2399_v37 = vpop.f32.mrf.mxu1  ;;  %v14243_v15 = vpop.f32.mrf.mxu0  ;;  %3303 = vmatpush.bf16.msra.mxu1 %v10653_v28  ;;  %v12003_v28 = vld [vmem:[%s18689_s1 + $0x3d4] sm:$0xf0] }
 0x33b   : > { %v2400_v34 = vadd.f32 %v2399_v37, %v13808_v19  ;;  %3488 = vmatpush.bf16.msra.mxu3 %v10725_v63  ;;  %v10644_v37 = vld [vmem:[%s18689_s1 + $0x3e0] sm:$0xf] }
 0x33d   : > { %v2489_v45 = vadd.f32 %v14095_v51, %v2400_v34  ;;  %2438 = vmatmul.bf16.gmra.mxu1 %v19209_v42  ;;  %3277 = vmatmul.bf16.gmra.mxu0 %v19210_v31  ;;  %v12005_v51 = vld [vmem:[%s18689_s1 + $0x3e4] sm:$0xf0] }
 0x33e   : > { %2542 = vmatmul.bf16.gmra.mxu2 %v19211_v16  ;;  %2626 = vmatmul.bf16.gmra.mxu3 %v13869_v17  ;;  %v10645_v12 = vor.u32 %v12005_v51, %v10644_v37  ;;  %v12001_v37 = vld [vmem:[%s18689_s1 + $0x3c4] sm:$0xf0] }
 0x33f   : > { %v14258_v19 = vadd.f32 %v14153_v9, %v2489_v45  ;;  %v10636_v45 = vld [vmem:[%s18689_s1 + $0x3d0] sm:$0xf] }
 0x340   : > { %3304 = vmatpush.bf16.msra.mxu1 %v10645_v12  ;;  %v10637_v17 = vor.u32 %v12003_v28, %v10636_v45  ;;  %v19214_v28 = vld [vmem:[#allocation83_spill] sm:$0xff] }
 0x341   : > { %19212 = vst [vmem:[#allocation141_spill] sm:$0xff] %v14258_v19  ;;  %v14266_v63 = vpop.f32.mrf.mxu2  ;;  %v14268_v34 = vpop.f32.mrf.mxu3 }
 0x342   : > { %v2401_v40 = vpop.f32.mrf.mxu1  ;;  %v14270_v10 = vpop.f32.mrf.mxu0 }
 0x343   : > { %v2402_v9 = vadd.f32 %v2401_v40, %v13844_v46  ;;  %v10628_v46 = vld [vmem:[%s18689_s1 + $0x3c0] sm:$0xf] }
 0x344   : > { %3305 = vmatpush.bf16.msra.mxu1 %v10637_v17  ;;  %v10629_v40 = vor.u32 %v12001_v37, %v10628_v46  ;;  %v10620_v17 = vld [vmem:[%s18689_s1 + $0x3b0] sm:$0xf]  ;;  %v19216_v37 = vld [vmem:[#allocation13_spill] sm:$0xff] }
 0x345   : > { %v2491_v19 = vadd.f32 %v14116_v52, %v2402_v9  ;;  %v10844_v9 = vld [vmem:[%s18689_s1 + $0x570] sm:$0xf] }
 0x346   : > { %v19215_v46 = vld [vmem:[#allocation8_spill] sm:$0xff] }
 0x347   : > { %v14281_v31 = vadd.f32 %v14188_v44, %v2491_v19  ;;  %v11999_v19 = vld [vmem:[%s18689_s1 + $0x3b4] sm:$0xf0] }
 0x348   : > { %3306 = vmatpush.bf16.msra.mxu1 %v10629_v40 }
 0x349   : > { %19213 = vst [vmem:[#allocation142_spill] sm:$0xff] %v14281_v31  ;;  %v14289_v51 = vpop.f32.mrf.mxu2  ;;  %v14291_v12 = vpop.f32.mrf.mxu3 }
 0x34a   : > { %v2404_v16 = vpop.f32.mrf.mxu1  ;;  %v14293_v52 = vpop.f32.mrf.mxu0 }
 0x34b   : > { %v2405_v44 = vadd.f32 %v2404_v16, %v13880_v3  ;;  %v10621_v3 = vor.u32 %v11999_v19, %v10620_v17  ;;  %v12055_v16 = vld [vmem:[%s18689_s1 + $0x574] sm:$0xf0]  ;;  %v10836_v17 = vld [vmem:[%s18689_s1 + $0x560] sm:$0xf] }
 0x34c   : > { %v10845_v40 = vor.u32 %v12055_v16, %v10844_v9 }
 0x34d   : > { %v2494_v45 = vadd.f32 %v14151_v60, %v2405_v44  ;;  %2443 = vmatmul.bf16.gmra.mxu1 %v19214_v28  ;;  %3282 = vmatmul.bf16.gmra.mxu0 %v19215_v46  ;;  %v10612_v60 = vld [vmem:[%s18689_s1 + $0x3a0] sm:$0xf]  ;;  %v11997_v44 = vld [vmem:[%s18689_s1 + $0x3a4] sm:$0xf0] }
 0x34e   : > { %2631 = vmatmul.bf16.gmra.mxu3 %v13918_v62  ;;  %3400 = vmatmul.bf16.vlgmr.msra.gmra.mxu2 %v19216_v37  ;;  %v10604_v62 = vld [vmem:[%s18689_s1 + $0x390] sm:$0xf] }
 0x34f   : > { %v14314_v31 = vadd.f32 %v14218_v2, %v2494_v45  ;;  %3307 = vmatpush.bf16.msra.mxu1 %v10621_v3  ;;  %3570 = vmatpush.bf16.msra.mxu0 %v10845_v40  ;;  %v10613_v2 = vor.u32 %v11997_v44, %v10612_v60  ;;  %v12053_v45 = vld [vmem:[%s18689_s1 + $0x564] sm:$0xf0]  ;;  %v11995_v60 = vld [vmem:[%s18689_s1 + $0x394] sm:$0xf0]  ;;  %v10828_v44 = vld [vmem:[%s18689_s1 + $0x550] sm:$0xf] }
 0x350   : > { %v10837_v40 = vor.u32 %v12053_v45, %v10836_v17  ;;  %v10605_v37 = vor.u32 %v11995_v60, %v10604_v62  ;;  %v10596_v45 = vld [vmem:[%s18689_s1 + $0x380] sm:$0xf] }
 0x351   : > { %19217 = vst [vmem:[#allocation143_spill] sm:$0xff] %v14314_v31  ;;  %v14325_v19 = vpop.f32.mrf.mxu2  ;;  %v14327_v9 = vpop.f32.mrf.mxu3  ;;  %v10820_v62 = vld [vmem:[%s18689_s1 + $0x540] sm:$0xf] }
 0x352   : > { %v2406_v3 = vpop.f32.mrf.mxu1  ;;  %v14332_v16 = vpop.f32.mrf.mxu0 }
 0x353   : > { %v2407_v31 = vadd.f32 %v2406_v3, %v13902_v13  ;;  %3308 = vmatpush.bf16.msra.mxu1 %v10613_v2  ;;  %3571 = vmatpush.bf16.msra.mxu0 %v10837_v40  ;;  %v12051_v13 = vld [vmem:[%s18689_s1 + $0x554] sm:$0xf0]  ;;  %v11993_v3 = vld [vmem:[%s18689_s1 + $0x384] sm:$0xf0] }
 0x354   : > { %v10829_v17 = vor.u32 %v12051_v13, %v10828_v44  ;;  %v10597_v40 = vor.u32 %v11993_v3, %v10596_v45  ;;  %v10812_v13 = vld [vmem:[%s18689_s1 + $0x530] sm:$0xf]  ;;  %v19219_v3 = vld [vmem:[#allocation87_spill] sm:$0xff] }
 0x355   : > { %v2496_v46 = vadd.f32 %v14186_v53, %v2407_v31 }
 0x357   : > { %v14349_v2 = vadd.f32 %v14241_v27, %v2496_v46  ;;  %3309 = vmatpush.bf16.msra.mxu1 %v10605_v37  ;;  %3572 = vmatpush.bf16.msra.mxu0 %v10829_v17  ;;  %v12049_v27 = vld [vmem:[%s18689_s1 + $0x544] sm:$0xf0]  ;;  %v12047_v17 = vld [vmem:[%s18689_s1 + $0x534] sm:$0xf0] }
 0x358   : > { %v10821_v60 = vor.u32 %v12049_v27, %v10820_v62  ;;  %v10813_v30 = vor.u32 %v12047_v17, %v10812_v13  ;;  %v19221_v62 = vld [vmem:[#allocation16_spill] sm:$0xff] }
 0x359   : > { %19218 = vst [vmem:[#allocation144_spill] sm:$0xff] %v14349_v2  ;;  %v14360_v53 = vpop.f32.mrf.mxu2  ;;  %v2594_v31 = vpop.f32.mrf.mxu3  ;;  %v19220_v2 = vld [vmem:[#allocation5_spill] sm:$0xff] }
 0x35a   : > { %v2409_v46 = vpop.f32.mrf.mxu1  ;;  %v14365_v37 = vpop.f32.mrf.mxu0 }
 0x35b   : > { %v2410_v44 = vadd.f32 %v2409_v46, %v13924_v25  ;;  %3310 = vmatpush.bf16.msra.mxu1 %v10597_v40  ;;  %3573 = vmatpush.bf16.msra.mxu0 %v10821_v60  ;;  %v10804_v40 = vld [vmem:[%s18689_s1 + $0x520] sm:$0xf] }
 0x35d   : > { %v2499_v45 = vadd.f32 %v14216_v41, %v2410_v44  ;;  %2448 = vmatmul.bf16.gmra.mxu1 %v19219_v3  ;;  %3287 = vmatmul.bf16.gmra.mxu0 %v19220_v2  ;;  %v12045_v41 = vld [vmem:[%s18689_s1 + $0x524] sm:$0xf0] }
 0x35e   : > { %3405 = vmatmul.bf16.gmra.mxu2 %v19221_v62  ;;  %3489 = vmatmul.bf16.vlgmr.msra.gmra.mxu3 %v19144_v5  ;;  %v10805_v60 = vor.u32 %v12045_v41, %v10804_v40  ;;  %v12041_v40 = vld [vmem:[%s18689_s1 + $0x504] sm:$0xf0] }
 0x35f   : > { %v14380_v25 = vadd.f32 %v14268_v34, %v2499_v45  ;;  %3574 = vmatpush.bf16.msra.mxu0 %v10813_v30  ;;  %v10796_v30 = vld [vmem:[%s18689_s1 + $0x510] sm:$0xf]  ;;  %v12043_v34 = vld [vmem:[%s18689_s1 + $0x514] sm:$0xf0] }
 0x361   : > { %19222 = vst [vmem:[#allocation145_spill] sm:$0xff] %v14380_v25  ;;  %v2513_v27 = vpop.f32.mrf.mxu2  ;;  %v2597_v46 = vpop.f32.mrf.mxu3  ;;  %v10797_v25 = vor.u32 %v12043_v34, %v10796_v30  ;;  %v19226_v30 = vld [vmem:[#allocation20_spill] sm:$0xff] }
 0x362   : > { %v2411_v44 = vpop.f32.mrf.mxu1  ;;  %v14388_v13 = vpop.f32.mrf.mxu0 }
 0x363   : > { %v2412_v17 = vadd.f32 %v2411_v44, %v13934_v43  ;;  %3575 = vmatpush.bf16.msra.mxu0 %v10805_v60  ;;  %v10788_v43 = vld [vmem:[%s18689_s1 + $0x500] sm:$0xf] }
 0x364   : > { %v10789_v44 = vor.u32 %v12041_v40, %v10788_v43 }
 0x365   : > { %v2501_v45 = vadd.f32 %v14239_v56, %v2412_v17  ;;  %v19225_v17 = vld [vmem:[#allocation9_spill] sm:$0xff] }
 0x367   : > { %v14399_v5 = vadd.f32 %v14291_v12, %v2501_v45  ;;  %3576 = vmatpush.bf16.msra.mxu0 %v10797_v25  ;;  %v19224_v25 = vld [vmem:[#allocation90_spill] sm:$0xff] }
 0x369   : > { %19223 = vst [vmem:[#allocation146_spill] sm:$0xff] %v14399_v5  ;;  %v2515_v41 = vpop.f32.mrf.mxu2  ;;  %v2599_v60 = vpop.f32.mrf.mxu3 }
 0x36a   : > { %v2414_v2 = vpop.f32.mrf.mxu1  ;;  %v14407_v62 = vpop.f32.mrf.mxu0 }
 0x36b   : > { %v2415_v56 = vadd.f32 %v2414_v2, %v13940_v0  ;;  %3577 = vmatpush.bf16.msra.mxu0 %v10789_v44 }
 0x36d   : > { %v2504_v12 = vadd.f32 %v14266_v63, %v2415_v56  ;;  %2453 = vmatmul.bf16.gmra.mxu1 %v19224_v25  ;;  %3292 = vmatmul.bf16.gmra.mxu0 %v19225_v17 }
 0x36e   : > { %3410 = vmatmul.bf16.gmra.mxu2 %v19226_v30  ;;  %3494 = vmatmul.bf16.gmra.mxu3 %v19148_v36 }
 0x36f   : > { %v14416_v34 = vadd.f32 %v14327_v9, %v2504_v12  ;;  %v19230_v12 = vld [vmem:[#allocation12_spill] sm:$0xff] }
 0x371   : > { %19227 = vst [vmem:[#allocation147_spill] sm:$0xff] %v14416_v34  ;;  %v2518_v45 = vpop.f32.mrf.mxu2  ;;  %v2602_v43 = vpop.f32.mrf.mxu3  ;;  %v19231_v34 = vld [vmem:[#allocation23_spill] sm:$0xff] }
 0x372   : > { %v2416_v40 = vpop.f32.mrf.mxu1  ;;  %v14418_v5 = vpop.f32.mrf.mxu0 }
 0x373   : > { %19228 = vst [vmem:[#allocation148_spill] sm:$0xff] %v14418_v5  ;;  %v2417_v0 = vadd.f32 %v2416_v40, %v13950_v48  ;;  %v19232_v5 = vld [vmem:[#allocation24_spill] sm:$0xff] }
 0x375   : > { %v2506_v63 = vadd.f32 %v14289_v51, %v2417_v0 }
 0x377   : > { %v14422_v2 = vadd.f32 %v2594_v31, %v2506_v63 }
 0x379   : > { %19229 = vst [vmem:[#allocation149_spill] sm:$0xff] %v14422_v2  ;;  %v2520_v44 = vpop.f32.mrf.mxu2  ;;  %v2604_v56 = vpop.f32.mrf.mxu3 }
 0x37a   : > { %v2419_v17 = vpop.f32.mrf.mxu1  ;;  %v14424_v30 = vpop.f32.mrf.mxu0 }
 0x37b   : > { %v2420_v36 = vadd.f32 %v2419_v17, %v13955_v61 }
 0x37d   : > { %v2509_v9 = vadd.f32 %v14325_v19, %v2420_v36  ;;  %3297 = vmatmul.bf16.gmra.mxu0 %v19230_v12  ;;  %3311 = vmatmul.bf16.vlgmr.msra.gmra.mxu1 %v19231_v34 }
 0x37e   : > { %3415 = vmatmul.bf16.gmra.mxu2 %v19232_v5  ;;  %3499 = vmatmul.bf16.gmra.mxu3 %v19152_v21  ;;  %v19237_v5 = vld [vmem:[#allocation28_spill] sm:$0xff] }
 0x37f   : > { %v14432_v48 = vadd.f32 %v2597_v46, %v2509_v9  ;;  %v19235_v9 = vld [vmem:[#allocation26_spill] sm:$0xff] }
 0x381   : > { %19233 = vst [vmem:[#allocation150_spill] sm:$0xff] %v14432_v48  ;;  %v2523_v51 = vpop.f32.mrf.mxu2  ;;  %v2607_v31 = vpop.f32.mrf.mxu3  ;;  %v19236_v48 = vld [vmem:[#allocation27_spill] sm:$0xff] }
 0x382   : > { %v2421_v40 = vpop.f32.mrf.mxu1  ;;  %v14434_v0 = vpop.f32.mrf.mxu0 }
 0x383   : > { %v2422_v63 = vadd.f32 %v2421_v40, %v13964_v4 }
 0x385   : > { %v2511_v61 = vadd.f32 %v14360_v53, %v2422_v63 }
 0x387   : > { %v14438_v36 = vadd.f32 %v2599_v60, %v2511_v61 }
 0x389   : > { %19234 = vst [vmem:[#allocation151_spill] sm:$0xff] %v14438_v36  ;;  %v2525_v19 = vpop.f32.mrf.mxu2  ;;  %v2609_v17 = vpop.f32.mrf.mxu3 }
 0x38a   : > { %v2424_v2 = vpop.f32.mrf.mxu1  ;;  %v14440_v12 = vpop.f32.mrf.mxu0 }
 0x38b   : > { %v2425_v21 = vadd.f32 %v2424_v2, %v13969_v39 }
 0x38d   : > { %v2514_v46 = vadd.f32 %v2513_v27, %v2425_v21  ;;  %3316 = vmatmul.bf16.gmra.mxu1 %v19235_v9  ;;  %3578 = vmatmul.bf16.vlgmr.msra.gmra.mxu0 %v19236_v48 }
 0x38e   : > { %3420 = vmatmul.bf16.gmra.mxu2 %v19237_v5  ;;  %3504 = vmatmul.bf16.gmra.mxu3 %v19156_v26 }
 0x38f   : > { %v14447_v4 = vadd.f32 %v2602_v43, %v2514_v46  ;;  %v19240_v43 = vld [vmem:[#allocation30_spill] sm:$0xff]  ;;  %v19241_v46 = vld [vmem:[#allocation32_spill] sm:$0xff] }
 0x391   : > { %19238 = vst [vmem:[#allocation152_spill] sm:$0xff] %v14447_v4  ;;  %v2528_v53 = vpop.f32.mrf.mxu2  ;;  %v2612_v60 = vpop.f32.mrf.mxu3 }
 0x392   : > { %v2426_v40 = vpop.f32.mrf.mxu1  ;;  %v14449_v63 = vpop.f32.mrf.mxu0 }
 0x393   : > { %v2427_v61 = vadd.f32 %v2426_v40, %v13978_v32 }
 0x395   : > { %v2516_v36 = vadd.f32 %v2515_v41, %v2427_v61 }
 0x397   : > { %v14452_v39 = vadd.f32 %v2604_v56, %v2516_v36 }
 0x399   : > { %19239 = vst [vmem:[#allocation153_spill] sm:$0xff] %v14452_v39  ;;  %v2530_v21 = vpop.f32.mrf.mxu2  ;;  %v2614_v27 = vpop.f32.mrf.mxu3 }
 0x39a   : > { %v2429_v2 = vpop.f32.mrf.mxu1  ;;  %v14454_v48 = vpop.f32.mrf.mxu0 }
 0x39b   : > { %v2430_v5 = vadd.f32 %v2429_v2, %v13983_v11 }
 0x39d   : > { %v2519_v26 = vadd.f32 %v2518_v45, %v2430_v5  ;;  %3321 = vmatmul.bf16.gmra.mxu1 %v19240_v43  ;;  %3583 = vmatmul.bf16.gmra.mxu0 %v19136_v29  ;;  %v19244_v29 = vld [vmem:[#allocation127_spill] sm:$0xff] }
 0x39e   : > { %3425 = vmatmul.bf16.gmra.mxu2 %v19241_v46  ;;  %3509 = vmatmul.bf16.gmra.mxu3 %v19163_v6 }
 0x39f   : > { %v14461_v32 = vadd.f32 %v2607_v31, %v2519_v26  ;;  %v19245_v26 = vld [vmem:[#allocation34_spill] sm:$0xff]  ;;  %v19246_v31 = vld [vmem:[#allocation35_spill] sm:$0xff] }
 0x3a1   : > { %19242 = vst [vmem:[#allocation154_spill] sm:$0xff] %v14461_v32  ;;  %v2533_v41 = vpop.f32.mrf.mxu2  ;;  %v2617_v56 = vpop.f32.mrf.mxu3  ;;  %v19247_v32 = vld [vmem:[#allocation36_spill] sm:$0xff] }
 0x3a2   : > { %v2431_v36 = vpop.f32.mrf.mxu1  ;;  %v14463_v40 = vpop.f32.mrf.mxu0 }
 0x3a3   : > { %v2432_v61 = vadd.f32 %v2431_v36, %v13992_v38 }
 0x3a5   : > { %v2521_v39 = vadd.f32 %v2520_v44, %v2432_v61 }
 0x3a7   : > { %v14466_v11 = vadd.f32 %v2609_v17, %v2521_v39 }
 0x3a9   : > { %19243 = vst [vmem:[#allocation155_spill] sm:$0xff] %v14466_v11  ;;  %v2535_v5 = vpop.f32.mrf.mxu2  ;;  %v2619_v45 = vpop.f32.mrf.mxu3 }
 0x3aa   : > { %v2434_v2 = vpop.f32.mrf.mxu1  ;;  %v14468_v4 = vpop.f32.mrf.mxu0 }
 0x3ab   : > { %v2435_v46 = vadd.f32 %v2434_v2, %v19244_v29 }
 0x3ad   : > { %v2524_v6 = vadd.f32 %v2523_v51, %v2435_v46  ;;  %3326 = vmatmul.bf16.gmra.mxu1 %v19245_v26  ;;  %3588 = vmatmul.bf16.gmra.mxu0 %v19246_v31 }
 0x3ae   : > { %3430 = vmatmul.bf16.gmra.mxu2 %v19247_v32  ;;  %3514 = vmatmul.bf16.gmra.mxu3 %v19171_v58 }
 0x3af   : > { %v14475_v38 = vadd.f32 %v2612_v60, %v2524_v6  ;;  %v19250_v6 = vld [vmem:[#allocation42_spill] sm:$0xff]  ;;  %v19251_v60 = vld [vmem:[#allocation43_spill] sm:$0xff] }
 0x3b1   : > { %19248 = vst [vmem:[#allocation127_spill] sm:$0xff] %v14475_v38  ;;  %v2538_v44 = vpop.f32.mrf.mxu2  ;;  %v2622_v17 = vpop.f32.mrf.mxu3  ;;  %v19252_v38 = vld [vmem:[#allocation44_spill] sm:$0xff] }
 0x3b2   : > { %v2436_v39 = vpop.f32.mrf.mxu1  ;;  %v14477_v36 = vpop.f32.mrf.mxu0 }
 0x3b3   : > { %v2437_v61 = vadd.f32 %v2436_v39, %v14006_v55 }
 0x3b5   : > { %v2526_v11 = vadd.f32 %v2525_v19, %v2437_v61 }
 0x3b7   : > { %v14480_v29 = vadd.f32 %v2614_v27, %v2526_v11 }
 0x3b9   : > { %19249 = vst [vmem:[#allocation156_spill] sm:$0xff] %v14480_v29  ;;  %v2540_v51 = vpop.f32.mrf.mxu2  ;;  %v2624_v46 = vpop.f32.mrf.mxu3 }
 0x3ba   : > { %v2439_v2 = vpop.f32.mrf.mxu1  ;;  %v14482_v31 = vpop.f32.mrf.mxu0 }
 0x3bb   : > { %v2440_v32 = vadd.f32 %v2439_v2, %v14011_v23 }
 0x3bd   : > { %v2529_v58 = vadd.f32 %v2528_v53, %v2440_v32  ;;  %3331 = vmatmul.bf16.gmra.mxu1 %v19250_v6  ;;  %3593 = vmatmul.bf16.gmra.mxu0 %v19251_v60 }
 0x3be   : > { %3435 = vmatmul.bf16.gmra.mxu2 %v19252_v38  ;;  %3519 = vmatmul.bf16.gmra.mxu3 %v19176_v50 }
 0x3bf   : > { %v14489_v55 = vadd.f32 %v2617_v56, %v2529_v58  ;;  %v19257_v58 = vld [vmem:[#allocation50_spill] sm:$0xff]  ;;  %v19258_v56 = vld [vmem:[#allocation51_spill] sm:$0xff] }
 0x3c1   : > { %19253 = vst [vmem:[#allocation157_spill] sm:$0xff] %v14489_v55  ;;  %v2543_v19 = vpop.f32.mrf.mxu2  ;;  %v2627_v27 = vpop.f32.mrf.mxu3  ;;  %v19259_v55 = vld [vmem:[#allocation52_spill] sm:$0xff] }
 0x3c2   : > { %v2441_v11 = vpop.f32.mrf.mxu1  ;;  %v14491_v39 = vpop.f32.mrf.mxu0 }
 0x3c3   : > { %19254 = vst [vmem:[#allocation158_spill] sm:$0xff] %v14491_v39  ;;  %v2442_v61 = vadd.f32 %v2441_v11, %v14020_v24  ;;  %v19260_v39 = vld [vmem:[#allocation53_spill] sm:$0xff] }
 0x3c5   : > { %v2531_v29 = vadd.f32 %v2530_v21, %v2442_v61  ;;  %v19262_v61 = vld [vmem:[#allocation131_spill] sm:$0xff] }
 0x3c7   : > { %v14494_v23 = vadd.f32 %v2619_v45, %v2531_v29 }
 0x3c9   : > { %19255 = vst [vmem:[#allocation159_spill] sm:$0xff] %v14494_v23  ;;  %v2545_v53 = vpop.f32.mrf.mxu2  ;;  %v2629_v32 = vpop.f32.mrf.mxu3 }
 0x3ca   : > { %v2444_v2 = vpop.f32.mrf.mxu1  ;;  %v14496_v60 = vpop.f32.mrf.mxu0 }
 0x3cb   : > { %19256 = vst [vmem:[#allocation160_spill] sm:$0xff] %v14496_v60  ;;  %v2445_v38 = vadd.f32 %v2444_v2, %v14025_v54 }
 0x3cd   : > { %v2534_v50 = vadd.f32 %v2533_v41, %v2445_v38  ;;  %3336 = vmatmul.bf16.gmra.mxu1 %v19257_v58  ;;  %3598 = vmatmul.bf16.gmra.mxu0 %v19258_v56 }
 0x3ce   : > { %3440 = vmatmul.bf16.gmra.mxu2 %v19259_v55  ;;  %3524 = vmatmul.bf16.gmra.mxu3 %v19260_v39  ;;  %v19264_v55 = vld [vmem:[#allocation133_spill] sm:$0xff] }
 0x3cf   : > { %v14503_v24 = vadd.f32 %v2622_v17, %v2534_v50  ;;  %v19265_v50 = vld [vmem:[#allocation56_spill] sm:$0xff]  ;;  %v19266_v17 = vld [vmem:[#allocation57_spill] sm:$0xff] }
 0x3d1   : > { %19261 = vst [vmem:[#allocation161_spill] sm:$0xff] %v14503_v24  ;;  %v2632_v21 = vpop.f32.mrf.mxu3  ;;  %v3401_v45 = vpop.f32.mrf.mxu2  ;;  %v19267_v24 = vld [vmem:[#allocation58_spill] sm:$0xff] }
 0x3d2   : > { %v2446_v29 = vpop.f32.mrf.mxu1  ;;  %v14505_v11 = vpop.f32.mrf.mxu0 }
 0x3d3   : > { %v2447_v23 = vadd.f32 %v2446_v29, %v19262_v61 }
 0x3d5   : > { %v2536_v60 = vadd.f32 %v2535_v5, %v2447_v23 }
 0x3d7   : > { %v14508_v54 = vadd.f32 %v2624_v46, %v2536_v60 }
 0x3d9   : > { %19263 = vst [vmem:[#allocation131_spill] sm:$0xff] %v14508_v54  ;;  %v2634_v41 = vpop.f32.mrf.mxu3  ;;  %v3403_v38 = vpop.f32.mrf.mxu2 }
 0x3da   : > { %v2449_v2 = vpop.f32.mrf.mxu1  ;;  %v14510_v56 = vpop.f32.mrf.mxu0 }
 0x3db   : > { %v2450_v58 = vadd.f32 %v2449_v2, %v19264_v55 }
 0x3dd   : > { %v2539_v39 = vadd.f32 %v2538_v44, %v2450_v58  ;;  %3341 = vmatmul.bf16.gmra.mxu1 %v19265_v50  ;;  %3603 = vmatmul.bf16.gmra.mxu0 %v19266_v17 }
 0x3de   : > { %3445 = vmatmul.bf16.gmra.mxu2 %v19267_v24  ;;  %3529 = vmatmul.bf16.gmra.mxu3 %v19187_v1  ;;  %v19272_v24 = vld [vmem:[#allocation62_spill] sm:$0xff] }
 0x3df   : > { %v14517_v29 = vadd.f32 %v2627_v27, %v2539_v39  ;;  %v19270_v39 = vld [vmem:[#allocation60_spill] sm:$0xff] }
 0x3e1   : > { %19268 = vst [vmem:[#allocation133_spill] sm:$0xff] %v14517_v29  ;;  %v3406_v5 = vpop.f32.mrf.mxu2  ;;  %v3490_v46 = vpop.f32.mrf.mxu3  ;;  %v19271_v29 = vld [vmem:[#allocation61_spill] sm:$0xff] }
 0x3e2   : > { %v2451_v60 = vpop.f32.mrf.mxu1  ;;  %v14519_v23 = vpop.f32.mrf.mxu0 }
 0x3e3   : > { %v2452_v61 = vadd.f32 %v2451_v60, %v14050_v7 }
 0x3e5   : > { %v2541_v54 = vadd.f32 %v2540_v51, %v2452_v61 }
 0x3e7   : > { %v14522_v55 = vadd.f32 %v2629_v32, %v2541_v54 }
 0x3e9   : > { %19269 = vst [vmem:[#allocation162_spill] sm:$0xff] %v14522_v55  ;;  %v14524_v44 = vpop.f32.mrf.mxu2  ;;  %v3492_v58 = vpop.f32.mrf.mxu3 }
 0x3ea   : > { %v2454_v2 = vpop.f32.mrf.mxu1  ;;  %v14526_v17 = vpop.f32.mrf.mxu0 }
 0x3eb   : > { %v2455_v1 = vadd.f32 %v2454_v2, %v14054_v59 }
 0x3ed   : > { %v2544_v27 = vadd.f32 %v2543_v19, %v2455_v1  ;;  %3346 = vmatmul.bf16.gmra.mxu1 %v19270_v39  ;;  %3608 = vmatmul.bf16.gmra.mxu0 %v19271_v29 }
 0x3ee   : > { %3450 = vmatmul.bf16.gmra.mxu2 %v19272_v24  ;;  %3534 = vmatmul.bf16.gmra.mxu3 %v19193_v18  ;;  %v19276_v18 = vld [vmem:[#allocation65_spill] sm:$0xff]  ;;  %v19277_v24 = vld [vmem:[#allocation66_spill] sm:$0xff] }
 0x3ef   : > { %v14533_v7 = vadd.f32 %v2632_v21, %v2544_v27 }
 0x3f1   : > { %19273 = vst [vmem:[#allocation163_spill] sm:$0xff] %v14533_v7  ;;  %v14535_v51 = vpop.f32.mrf.mxu2  ;;  %v3495_v32 = vpop.f32.mrf.mxu3  ;;  %v19275_v7 = vld [vmem:[#allocation64_spill] sm:$0xff] }
 0x3f2   : > { %v2456_v54 = vpop.f32.mrf.mxu1  ;;  %v14537_v60 = vpop.f32.mrf.mxu0 }
 0x3f3   : > { %v2457_v61 = vadd.f32 %v2456_v54, %v14065_v8 }
 0x3f5   : > { %v2546_v59 = vadd.f32 %v2545_v53, %v2457_v61 }
 0x3f7   : > { %v14540_v1 = vadd.f32 %v2634_v41, %v2546_v59 }
 0x3f9   : > { %19274 = vst [vmem:[#allocation164_spill] sm:$0xff] %v14540_v1  ;;  %v14542_v19 = vpop.f32.mrf.mxu2  ;;  %v3497_v2 = vpop.f32.mrf.mxu3 }
 0x3fa   : > { %v14544_v55 = vpop.f32.mrf.mxu0  ;;  %v3312_v29 = vpop.f32.mrf.mxu1 }
 0x3fb   : > { %v3313_v21 = vadd.f32 %v3312_v29, %v14074_v22 }
 0x3fd   : > { %v3402_v27 = vadd.f32 %v3401_v45, %v3313_v21  ;;  %3351 = vmatmul.bf16.gmra.mxu1 %v19275_v7  ;;  %3613 = vmatmul.bf16.gmra.mxu0 %v19276_v18 }
 0x3fe   : > { %3455 = vmatmul.bf16.gmra.mxu2 %v19277_v24  ;;  %3539 = vmatmul.bf16.gmra.mxu3 %v19199_v57 }
 0x3ff   : > { %v3491_v8 = vadd.f32 %v3490_v46, %v3402_v27  ;;  %v11990_v46 = vld [vmem:[%s18689_s1 + $0x374] sm:$0xf] }
 0x401   : > { %v14551_v53 = vpop.f32.mrf.mxu2  ;;  %v3500_v41 = vpop.f32.mrf.mxu3 }
 0x402   : > { %v14553_v54 = vpop.f32.mrf.mxu0  ;;  %v3314_v61 = vpop.f32.mrf.mxu1 }
 0x403   : > { %v3315_v59 = vadd.f32 %v3314_v61, %v14099_v47  ;;  %v10590_v47 = vld [vmem:[%s18689_s1 + $0x378] sm:$0xf0]  ;;  %v19280_v61 = vld [vmem:[#allocation70_spill] sm:$0xff] }
 0x404   : > { %v10593_v27 = vor.u32 %v11990_v46, %v10590_v47 }
 0x405   : > { %v3404_v1 = vadd.f32 %v3403_v38, %v3315_v59 }
 0x406   : > { %3748 = vmatpush.bf16.msrb.mxu2 %v10593_v27 }
 0x407   : > { %v3493_v22 = vadd.f32 %v3492_v58, %v3404_v1  ;;  %v19278_v58 = vld [vmem:[#allocation68_spill] sm:$0xff]  ;;  %v19279_v1 = vld [vmem:[#allocation69_spill] sm:$0xff] }
 0x409   : > { %v14556_v45 = vpop.f32.mrf.mxu2  ;;  %v14558_v29 = vpop.f32.mrf.mxu3 }
 0x40a   : > { %v3317_v21 = vpop.f32.mrf.mxu1  ;;  %v3579_v18 = vpop.f32.mrf.mxu0 }
 0x40b   : > { %v3318_v24 = vadd.f32 %v3317_v21, %v14120_v35  ;;  %v14561_v57 = vadd.f32 %v3579_v18, %v3491_v8  ;;  %v11988_v18 = vld [vmem:[%s18689_s1 + $0x364] sm:$0xf]  ;;  %v10582_v8 = vld [vmem:[%s18689_s1 + $0x368] sm:$0xf0] }
 0x40c   : > { %v10585_v59 = vor.u32 %v11988_v18, %v10582_v8 }
 0x40d   : > { %v3407_v38 = vadd.f32 %v3406_v5, %v3318_v24  ;;  %3356 = vmatmul.bf16.gmra.mxu1 %v19278_v58  ;;  %3618 = vmatmul.bf16.gmra.mxu0 %v19279_v1 }
 0x40e   : > { %3460 = vmatmul.bf16.gmra.mxu2 %v19280_v61  ;;  %3544 = vmatmul.bf16.gmra.mxu3 %v19204_v14 }
 0x40f   : > { %v3496_v35 = vadd.f32 %v3495_v32, %v3407_v38  ;;  %3749 = vmatpush.bf16.msrb.mxu2 %v10585_v59  ;;  %v11986_v32 = vld [vmem:[%s18689_s1 + $0x354] sm:$0xf]  ;;  %v10574_v38 = vld [vmem:[%s18689_s1 + $0x358] sm:$0xf0] }
 0x410   : > { %v10577_v1 = vor.u32 %v11986_v32, %v10574_v38  ;;  %v12006_v32 = vld [vmem:[%s18689_s1 + $0x3f4] sm:$0xf] }
 0x411   : > { %v14579_v24 = vpop.f32.mrf.mxu2  ;;  %v14581_v5 = vpop.f32.mrf.mxu3 }
 0x412   : > { %v3319_v21 = vpop.f32.mrf.mxu1  ;;  %v3581_v46 = vpop.f32.mrf.mxu0 }
 0x413   : > { %v3320_v47 = vadd.f32 %v3319_v21, %v14158_v49  ;;  %v14584_v14 = vadd.f32 %v3581_v46, %v3493_v22  ;;  %3750 = vmatpush.bf16.msrb.mxu2 %v10577_v1  ;;  %v11984_v49 = vld [vmem:[%s18689_s1 + $0x344] sm:$0xf]  ;;  %v10566_v22 = vld [vmem:[%s18689_s1 + $0x348] sm:$0xf0]  ;;  %v10558_v1 = vld [vmem:[%s18689_s1 + $0x338] sm:$0xf0] }
 0x414   : > { %v10569_v59 = vor.u32 %v11984_v49, %v10566_v22  ;;  %v10654_v49 = vld [vmem:[%s18689_s1 + $0x3f8] sm:$0xf0]  ;;  %v19283_v22 = vld [vmem:[#allocation76_spill] sm:$0xff] }
 0x415   : > { %v3409_v27 = vadd.f32 %v14524_v44, %v3320_v47 }
 0x417   : > { %v3498_v61 = vadd.f32 %v3497_v2, %v3409_v27  ;;  %3751 = vmatpush.bf16.msrb.mxu2 %v10569_v59  ;;  %v11982_v2 = vld [vmem:[%s18689_s1 + $0x334] sm:$0xf]  ;;  %v19281_v27 = vld [vmem:[#allocation74_spill] sm:$0xff]  ;;  %v10657_v59 = vor.u32 %v12006_v32, %v10654_v49 }
 0x419   : > { %v14599_v18 = vpop.f32.mrf.mxu2  ;;  %v14601_v8 = vpop.f32.mrf.mxu3  ;;  %3837 = vmatpush.bf16.msrb.mxu3 %v10657_v59 }
 0x41a   : > { %v3322_v21 = vpop.f32.mrf.mxu1  ;;  %v3584_v46 = vpop.f32.mrf.mxu0 }
 0x41b   : > { %v3323_v44 = vadd.f32 %v3322_v21, %v14193_v33  ;;  %v14604_v47 = vadd.f32 %v3584_v46, %v3496_v35  ;;  %v19282_v33 = vld [vmem:[#allocation75_spill] sm:$0xff]  ;;  %v10561_v35 = vor.u32 %v11982_v2, %v10558_v1 }
 0x41c   : > { %v10550_v46 = vld [vmem:[%s18689_s1 + $0x328] sm:$0xf0] }
 0x41d   : > { %v3412_v38 = vadd.f32 %v14535_v51, %v3323_v44  ;;  %3361 = vmatmul.bf16.gmra.mxu1 %v19281_v27  ;;  %3623 = vmatmul.bf16.gmra.mxu0 %v19282_v33  ;;  %v11980_v51 = vld [vmem:[%s18689_s1 + $0x324] sm:$0xf]  ;;  %v11978_v33 = vld [vmem:[%s18689_s1 + $0x314] sm:$0xf] }
 0x41e   : > { %3465 = vmatmul.bf16.gmra.mxu2 %v19283_v22  ;;  %3549 = vmatmul.bf16.gmra.mxu3 %v19209_v42  ;;  %v12004_v44 = vld [vmem:[%s18689_s1 + $0x3e4] sm:$0xf]  ;;  %v10553_v32 = vor.u32 %v11980_v51, %v10550_v46  ;;  %v10542_v51 = vld [vmem:[%s18689_s1 + $0x318] sm:$0xf0]  ;;  %v12002_v46 = vld [vmem:[%s18689_s1 + $0x3d4] sm:$0xf] }
 0x41f   : > { %v3501_v21 = vadd.f32 %v3500_v41, %v3412_v38  ;;  %3752 = vmatpush.bf16.msrb.mxu2 %v10561_v35  ;;  %v10646_v41 = vld [vmem:[%s18689_s1 + $0x3e8] sm:$0xf0]  ;;  %v19285_v22 = vld [vmem:[#allocation80_spill] sm:$0xff] }
 0x420   : > { %v10649_v49 = vor.u32 %v12004_v44, %v10646_v41  ;;  %v10545_v41 = vor.u32 %v11978_v33, %v10542_v51 }
 0x421   : > { %v14632_v2 = vpop.f32.mrf.mxu2  ;;  %v14634_v1 = vpop.f32.mrf.mxu3 }
 0x422   : > { %v3324_v38 = vpop.f32.mrf.mxu1  ;;  %v3586_v35 = vpop.f32.mrf.mxu0  ;;  %3838 = vmatpush.bf16.msrb.mxu3 %v10649_v49 }
 0x423   : > { %v3325_v59 = vadd.f32 %v3324_v38, %v14220_v20  ;;  %v14640_v42 = vadd.f32 %v3586_v35, %v3498_v61  ;;  %3753 = vmatpush.bf16.msrb.mxu2 %v10553_v32  ;;  %v10638_v20 = vld [vmem:[%s18689_s1 + $0x3d8] sm:$0xf0]  ;;  %v11976_v38 = vld [vmem:[%s18689_s1 + $0x304] sm:$0xf]  ;;  %v10534_v35 = vld [vmem:[%s18689_s1 + $0x308] sm:$0xf0] }
 0x424   : > { %v10641_v61 = vor.u32 %v12002_v46, %v10638_v20 }
 0x425   : > { %19284 = vst [vmem:[#allocation165_spill] sm:$0xff] %v14640_v42  ;;  %v3414_v44 = vadd.f32 %v14542_v19, %v3325_v59  ;;  %v12000_v19 = vld [vmem:[%s18689_s1 + $0x3c4] sm:$0xf]  ;;  %v10537_v59 = vor.u32 %v11976_v38, %v10534_v35  ;;  %v10622_v38 = vld [vmem:[%s18689_s1 + $0x3b8] sm:$0xf0] }
 0x426   : > { %3839 = vmatpush.bf16.msrb.mxu3 %v10641_v61  ;;  %v11998_v61 = vld [vmem:[%s18689_s1 + $0x3b4] sm:$0xf]  ;;  %v19286_v42 = vld [vmem:[#allocation81_spill] sm:$0xff] }
 0x427   : > { %v3503_v32 = vadd.f32 %v14558_v29, %v3414_v44  ;;  %3754 = vmatpush.bf16.msrb.mxu2 %v10545_v41  ;;  %v10630_v29 = vld [vmem:[%s18689_s1 + $0x3c8] sm:$0xf0] }
 0x428   : > { %v10633_v44 = vor.u32 %v12000_v19, %v10630_v29  ;;  %v10625_v19 = vor.u32 %v11998_v61, %v10622_v38 }
 0x429   : > { %v14665_v33 = vpop.f32.mrf.mxu2  ;;  %v14667_v49 = vpop.f32.mrf.mxu3 }
 0x42a   : > { %v3327_v51 = vpop.f32.mrf.mxu1  ;;  %v3589_v46 = vpop.f32.mrf.mxu0  ;;  %3840 = vmatpush.bf16.msrb.mxu3 %v10633_v44 }
 0x42b   : > { %v3328_v41 = vadd.f32 %v3327_v51, %v14243_v15  ;;  %v14673_v20 = vadd.f32 %v3589_v46, %v3501_v21  ;;  %3755 = vmatpush.bf16.msrb.mxu2 %v10537_v59  ;;  %v19287_v15 = vld [vmem:[#allocation82_spill] sm:$0xff] }
 0x42c   : > { %v11996_v59 = vld [vmem:[%s18689_s1 + $0x3a4] sm:$0xf] }
 0x42d   : > { %v3417_v35 = vadd.f32 %v14551_v53, %v3328_v41  ;;  %3366 = vmatmul.bf16.gmra.mxu1 %v19285_v22  ;;  %3628 = vmatmul.bf16.gmra.mxu0 %v19286_v42  ;;  %v10614_v53 = vld [vmem:[%s18689_s1 + $0x3a8] sm:$0xf0] }
 0x42e   : > { %3470 = vmatmul.bf16.gmra.mxu2 %v19287_v15  ;;  %3554 = vmatmul.bf16.gmra.mxu3 %v19214_v28  ;;  %v10617_v46 = vor.u32 %v11996_v59, %v10614_v53  ;;  %v19296_v15 = vld [vmem:[#allocation92_spill] sm:$0xff] }
 0x42f   : > { %v3506_v21 = vadd.f32 %v14581_v5, %v3417_v35  ;;  %3841 = vmatpush.bf16.msrb.mxu3 %v10625_v19  ;;  %v11994_v5 = vld [vmem:[%s18689_s1 + $0x394] sm:$0xf]  ;;  %v10606_v35 = vld [vmem:[%s18689_s1 + $0x398] sm:$0xf0] }
 0x430   : > { %v10609_v28 = vor.u32 %v11994_v5, %v10606_v35  ;;  %v19288_v35 = vld [vmem:[#allocation84_spill] sm:$0xff] }
 0x431   : > { %v14693_v29 = vpop.f32.mrf.mxu2  ;;  %v14695_v51 = vpop.f32.mrf.mxu3 }
 0x432   : > { %v3329_v44 = vpop.f32.mrf.mxu1  ;;  %v3591_v41 = vpop.f32.mrf.mxu0 }
 0x433   : > { %v3330_v61 = vadd.f32 %v3329_v44, %v14270_v10  ;;  %v14698_v38 = vadd.f32 %v3591_v41, %v3503_v32  ;;  %3842 = vmatpush.bf16.msrb.mxu3 %v10617_v46  ;;  %v11992_v10 = vld [vmem:[%s18689_s1 + $0x384] sm:$0xf]  ;;  %v10598_v32 = vld [vmem:[%s18689_s1 + $0x388] sm:$0xf0] }
 0x434   : > { %v10601_v44 = vor.u32 %v11992_v10, %v10598_v32  ;;  %v19290_v32 = vld [vmem:[#allocation86_spill] sm:$0xff] }
 0x435   : > { %v3419_v19 = vadd.f32 %v14556_v45, %v3330_v61 }
 0x437   : > { %v3508_v59 = vadd.f32 %v14601_v8, %v3419_v19  ;;  %3843 = vmatpush.bf16.msrb.mxu3 %v10609_v28  ;;  %v10908_v28 = vld [vmem:[%s18689_s1 + $0x5f0] sm:$0xf]  ;;  %v12071_v8 = vld [vmem:[%s18689_s1 + $0x5f4] sm:$0xf0] }
 0x438   : > { %v19289_v19 = vld [vmem:[#allocation85_spill] sm:$0xff]  ;;  %v10909_v10 = vor.u32 %v12071_v8, %v10908_v28 }
 0x439   : > { %v14714_v53 = vpop.f32.mrf.mxu2  ;;  %v14716_v46 = vpop.f32.mrf.mxu3 }
 0x43a   : > { %v3332_v41 = vpop.f32.mrf.mxu1  ;;  %v3594_v42 = vpop.f32.mrf.mxu0  ;;  %3659 = vmatpush.bf16.msrb.mxu1 %v10909_v10 }
 0x43b   : > { %v3333_v45 = vadd.f32 %v3332_v41, %v14293_v52  ;;  %v14719_v61 = vadd.f32 %v3594_v42, %v3506_v21  ;;  %3844 = vmatpush.bf16.msrb.mxu3 %v10601_v44  ;;  %v10900_v52 = vld [vmem:[%s18689_s1 + $0x5e0] sm:$0xf] }
 0x43d   : > { %v3422_v5 = vadd.f32 %v14579_v24, %v3333_v45  ;;  %3371 = vmatmul.bf16.gmra.mxu1 %v19288_v35  ;;  %3633 = vmatmul.bf16.gmra.mxu0 %v19289_v19  ;;  %v12069_v24 = vld [vmem:[%s18689_s1 + $0x5e4] sm:$0xf0] }
 0x43e   : > { %3475 = vmatmul.bf16.gmra.mxu2 %v19290_v32  ;;  %3559 = vmatmul.bf16.gmra.mxu3 %v19219_v3  ;;  %v10901_v41 = vor.u32 %v12069_v24, %v10900_v52 }
 0x43f   : > { %v3511_v42 = vadd.f32 %v14634_v1, %v3422_v5  ;;  %v10892_v1 = vld [vmem:[%s18689_s1 + $0x5d0] sm:$0xf]  ;;  %v12067_v5 = vld [vmem:[%s18689_s1 + $0x5d4] sm:$0xf0] }
 0x440   : > { %3660 = vmatpush.bf16.msrb.mxu1 %v10901_v41  ;;  %v10893_v19 = vor.u32 %v12067_v5, %v10892_v1  ;;  %v12022_v1 = vld [vmem:[%s18689_s1 + $0x474] sm:$0xf] }
 0x441   : > { %v14739_v21 = vpop.f32.mrf.mxu2  ;;  %v14741_v44 = vpop.f32.mrf.mxu3 }
 0x442   : > { %v3334_v45 = vpop.f32.mrf.mxu1  ;;  %v3596_v28 = vpop.f32.mrf.mxu0 }
 0x443   : > { %v3335_v8 = vadd.f32 %v3334_v45, %v14332_v16  ;;  %v14744_v3 = vadd.f32 %v3596_v28, %v3508_v59  ;;  %v10884_v16 = vld [vmem:[%s18689_s1 + $0x5c0] sm:$0xf]  ;;  %v12065_v59 = vld [vmem:[%s18689_s1 + $0x5c4] sm:$0xf0] }
 0x444   : > { %3661 = vmatpush.bf16.msrb.mxu1 %v10893_v19  ;;  %v10885_v45 = vor.u32 %v12065_v59, %v10884_v16  ;;  %v12063_v19 = vld [vmem:[%s18689_s1 + $0x5b4] sm:$0xf0]  ;;  %v19293_v16 = vld [vmem:[#allocation2_spill] sm:$0xff] }
 0x445   : > { %v3424_v10 = vadd.f32 %v14599_v18, %v3335_v8 }
 0x447   : > { %v3513_v52 = vadd.f32 %v14667_v49, %v3424_v10  ;;  %v10876_v49 = vld [vmem:[%s18689_s1 + $0x5b0] sm:$0xf] }
 0x448   : > { %3662 = vmatpush.bf16.msrb.mxu1 %v10885_v45  ;;  %v19291_v10 = vld [vmem:[#allocation88_spill] sm:$0xff] }
 0x449   : > { %v14760_v24 = vpop.f32.mrf.mxu2  ;;  %v14762_v41 = vpop.f32.mrf.mxu3 }
 0x44a   : > { %v3337_v28 = vpop.f32.mrf.mxu1  ;;  %v3599_v32 = vpop.f32.mrf.mxu0 }
 0x44b   : > { %v3338_v18 = vadd.f32 %v3337_v28, %v14365_v37  ;;  %v14765_v8 = vadd.f32 %v3599_v32, %v3511_v42  ;;  %v19292_v37 = vld [vmem:[#allocation89_spill] sm:$0xff]  ;;  %v10877_v32 = vor.u32 %v12063_v19, %v10876_v49  ;;  %v12061_v28 = vld [vmem:[%s18689_s1 + $0x5a4] sm:$0xf0] }
 0x44c   : > { %v10718_v42 = vld [vmem:[%s18689_s1 + $0x478] sm:$0xf0] }
 0x44d   : > { %v3427_v5 = vadd.f32 %v14632_v2, %v3338_v18  ;;  %3376 = vmatmul.bf16.gmra.mxu1 %v19291_v10  ;;  %3638 = vmatmul.bf16.gmra.mxu0 %v19292_v37  ;;  %v10721_v59 = vor.u32 %v12022_v1, %v10718_v42  ;;  %v10868_v2 = vld [vmem:[%s18689_s1 + $0x5a0] sm:$0xf]  ;;  %v12020_v18 = vld [vmem:[%s18689_s1 + $0x464] sm:$0xf]  ;;  %v10860_v37 = vld [vmem:[%s18689_s1 + $0x590] sm:$0xf] }
 0x44e   : > { %3564 = vmatmul.bf16.gmra.mxu3 %v19224_v25  ;;  %3756 = vmatmul.bf16.vlgmr.msrb.gmra.mxu2 %v19293_v16  ;;  %v10869_v1 = vor.u32 %v12061_v28, %v10868_v2  ;;  %v12059_v2 = vld [vmem:[%s18689_s1 + $0x594] sm:$0xf0]  ;;  %v12018_v28 = vld [vmem:[%s18689_s1 + $0x454] sm:$0xf]  ;;  %v19295_v16 = vld [vmem:[#allocation91_spill] sm:$0xff] }
 0x44f   : > { %v3516_v45 = vadd.f32 %v14695_v51, %v3427_v5  ;;  %3663 = vmatpush.bf16.msrb.mxu1 %v10877_v32  ;;  %3926 = vmatpush.bf16.msrb.mxu0 %v10721_v59  ;;  %v10710_v51 = vld [vmem:[%s18689_s1 + $0x468] sm:$0xf0] }
 0x450   : > { %v10713_v42 = vor.u32 %v12020_v18, %v10710_v51  ;;  %v10861_v51 = vor.u32 %v12059_v2, %v10860_v37 }
 0x451   : > { %v14794_v49 = vpop.f32.mrf.mxu2  ;;  %v14796_v19 = vpop.f32.mrf.mxu3 }
 0x452   : > { %v3339_v5 = vpop.f32.mrf.mxu1  ;;  %v3601_v32 = vpop.f32.mrf.mxu0 }
 0x453   : > { %v3340_v59 = vadd.f32 %v3339_v5, %v14388_v13  ;;  %v14802_v25 = vadd.f32 %v3601_v32, %v3513_v52  ;;  %3664 = vmatpush.bf16.msrb.mxu1 %v10869_v1  ;;  %3927 = vmatpush.bf16.msrb.mxu0 %v10713_v42  ;;  %v10702_v13 = vld [vmem:[%s18689_s1 + $0x458] sm:$0xf0]  ;;  %v10852_v5 = vld [vmem:[%s18689_s1 + $0x580] sm:$0xf]  ;;  %v12057_v32 = vld [vmem:[%s18689_s1 + $0x584] sm:$0xf0] }
 0x454   : > { %v10705_v52 = vor.u32 %v12018_v28, %v10702_v13 }
 0x455   : > { %v3429_v18 = vadd.f32 %v14665_v33, %v3340_v59  ;;  %v12016_v33 = vld [vmem:[%s18689_s1 + $0x444] sm:$0xf]  ;;  %v10853_v59 = vor.u32 %v12057_v32, %v10852_v5  ;;  %v10686_v5 = vld [vmem:[%s18689_s1 + $0x438] sm:$0xf0] }
 0x457   : > { %v3518_v1 = vadd.f32 %v14716_v46, %v3429_v18  ;;  %3665 = vmatpush.bf16.msrb.mxu1 %v10861_v51  ;;  %3928 = vmatpush.bf16.msrb.mxu0 %v10705_v52  ;;  %v10694_v46 = vld [vmem:[%s18689_s1 + $0x448] sm:$0xf0]  ;;  %v12014_v52 = vld [vmem:[%s18689_s1 + $0x434] sm:$0xf] }
 0x458   : > { %v10697_v18 = vor.u32 %v12016_v33, %v10694_v46  ;;  %v10689_v33 = vor.u32 %v12014_v52, %v10686_v5  ;;  %v19298_v52 = vld [vmem:[#allocation148_spill] sm:$0xff] }
 0x459   : > { %v14827_v37 = vpop.f32.mrf.mxu2  ;;  %v3527_v42 = vpop.f32.mrf.mxu3 }
 0x45a   : > { %v3342_v2 = vpop.f32.mrf.mxu1  ;;  %v3604_v28 = vpop.f32.mrf.mxu0 }
 0x45b   : > { %v3343_v51 = vadd.f32 %v3342_v2, %v14407_v62  ;;  %v14833_v13 = vadd.f32 %v3604_v28, %v3516_v45  ;;  %3666 = vmatpush.bf16.msrb.mxu1 %v10853_v59  ;;  %3929 = vmatpush.bf16.msrb.mxu0 %v10697_v18  ;;  %v19297_v62 = vld [vmem:[#allocation6_spill] sm:$0xff] }
 0x45c   : > { %v12012_v59 = vld [vmem:[%s18689_s1 + $0x424] sm:$0xf] }
 0x45d   : > { %19294 = vst [vmem:[#allocation166_spill] sm:$0xff] %v14833_v13  ;;  %v3432_v32 = vadd.f32 %v14693_v29, %v3343_v51  ;;  %3381 = vmatmul.bf16.gmra.mxu1 %v19295_v16  ;;  %3643 = vmatmul.bf16.gmra.mxu0 %v19296_v15  ;;  %v10678_v29 = vld [vmem:[%s18689_s1 + $0x428] sm:$0xf0] }
 0x45e   : > { %3761 = vmatmul.bf16.gmra.mxu2 %v19297_v62  ;;  %3845 = vmatmul.bf16.vlgmr.msrb.gmra.mxu3 %v19231_v34  ;;  %v10681_v28 = vor.u32 %v12012_v59, %v10678_v29  ;;  %v10662_v29 = vld [vmem:[%s18689_s1 + $0x408] sm:$0xf0] }
 0x45f   : > { %v3521_v45 = vadd.f32 %v14741_v44, %v3432_v32  ;;  %3930 = vmatpush.bf16.msrb.mxu0 %v10689_v33  ;;  %v12010_v44 = vld [vmem:[%s18689_s1 + $0x414] sm:$0xf]  ;;  %v10670_v32 = vld [vmem:[%s18689_s1 + $0x418] sm:$0xf0] }
 0x460   : > { %v10673_v15 = vor.u32 %v12010_v44, %v10670_v32  ;;  %v19303_v44 = vld [vmem:[#allocation10_spill] sm:$0xff] }
 0x461   : > { %v14853_v46 = vpop.f32.mrf.mxu2  ;;  %v3530_v2 = vpop.f32.mrf.mxu3 }
 0x462   : > { %v3344_v18 = vpop.f32.mrf.mxu1  ;;  %v3606_v51 = vpop.f32.mrf.mxu0 }
 0x463   : > { %v3345_v5 = vadd.f32 %v3344_v18, %v19298_v52  ;;  %v14856_v34 = vadd.f32 %v3606_v51, %v3518_v1  ;;  %3931 = vmatpush.bf16.msrb.mxu0 %v10681_v28  ;;  %v12008_v1 = vld [vmem:[%s18689_s1 + $0x404] sm:$0xf] }
 0x464   : > { %v10665_v51 = vor.u32 %v12008_v1, %v10662_v29 }
 0x465   : > { %19299 = vst [vmem:[#allocation148_spill] sm:$0xff] %v14856_v34  ;;  %v3434_v33 = vadd.f32 %v14714_v53, %v3345_v5  ;;  %v19302_v5 = vld [vmem:[#allocation94_spill] sm:$0xff] }
 0x467   : > { %v3523_v59 = vadd.f32 %v14762_v41, %v3434_v33  ;;  %3932 = vmatpush.bf16.msrb.mxu0 %v10673_v15  ;;  %v19301_v41 = vld [vmem:[#allocation93_spill] sm:$0xff] }
 0x469   : > { %v3448_v28 = vpop.f32.mrf.mxu2  ;;  %v3532_v18 = vpop.f32.mrf.mxu3 }
 0x46a   : > { %v3347_v52 = vpop.f32.mrf.mxu1  ;;  %v3609_v62 = vpop.f32.mrf.mxu0 }
 0x46b   : > { %v3348_v34 = vadd.f32 %v3347_v52, %v14424_v30  ;;  %v14873_v53 = vadd.f32 %v3609_v62, %v3521_v45  ;;  %3933 = vmatpush.bf16.msrb.mxu0 %v10665_v51 }
 0x46d   : > { %19300 = vst [vmem:[#allocation167_spill] sm:$0xff] %v14873_v53  ;;  %v3437_v15 = vadd.f32 %v14739_v21, %v3348_v34  ;;  %3386 = vmatmul.bf16.gmra.mxu1 %v19301_v41  ;;  %3648 = vmatmul.bf16.gmra.mxu0 %v19302_v5  ;;  %v19305_v53 = vld [vmem:[#allocation96_spill] sm:$0xff] }
 0x46e   : > { %3766 = vmatmul.bf16.gmra.mxu2 %v19303_v44  ;;  %3850 = vmatmul.bf16.gmra.mxu3 %v19235_v9 }
 0x46f   : > { %v3526_v32 = vadd.f32 %v14796_v19, %v3437_v15  ;;  %v19304_v15 = vld [vmem:[#allocation95_spill] sm:$0xff] }
 0x471   : > { %v3451_v33 = vpop.f32.mrf.mxu2  ;;  %v3535_v1 = vpop.f32.mrf.mxu3 }
 0x472   : > { %v3349_v29 = vpop.f32.mrf.mxu1  ;;  %v3611_v13 = vpop.f32.mrf.mxu0 }
 0x473   : > { %v3350_v30 = vadd.f32 %v3349_v29, %v14434_v0  ;;  %v14882_v62 = vadd.f32 %v3611_v13, %v3523_v59  ;;  %v19306_v0 = vld [vmem:[#allocation14_spill] sm:$0xff] }
 0x475   : > { %v3439_v34 = vadd.f32 %v14760_v24, %v3350_v30 }
 0x477   : > { %v3528_v21 = vadd.f32 %v3527_v42, %v3439_v34 }
 0x479   : > { %v3453_v45 = vpop.f32.mrf.mxu2  ;;  %v3537_v51 = vpop.f32.mrf.mxu3 }
 0x47a   : > { %v3352_v52 = vpop.f32.mrf.mxu1  ;;  %v3614_v5 = vpop.f32.mrf.mxu0 }
 0x47b   : > { %v3353_v44 = vadd.f32 %v3352_v52, %v14440_v12  ;;  %v14886_v9 = vadd.f32 %v3614_v5, %v3526_v32 }
 0x47d   : > { %v3442_v19 = vadd.f32 %v14794_v49, %v3353_v44  ;;  %3653 = vmatmul.bf16.gmra.mxu0 %v19304_v15  ;;  %3667 = vmatmul.bf16.vlgmr.msrb.gmra.mxu1 %v19305_v53 }
 0x47e   : > { %3771 = vmatmul.bf16.gmra.mxu2 %v19306_v0  ;;  %3855 = vmatmul.bf16.gmra.mxu3 %v19240_v43  ;;  %v19309_v43 = vld [vmem:[#allocation13_spill] sm:$0xff] }
 0x47f   : > { %v3531_v24 = vadd.f32 %v3530_v2, %v3442_v19  ;;  %v19308_v19 = vld [vmem:[#allocation97_spill] sm:$0xff] }
 0x481   : > { %v3456_v42 = vpop.f32.mrf.mxu2  ;;  %v3540_v13 = vpop.f32.mrf.mxu3 }
 0x482   : > { %v3354_v59 = vpop.f32.mrf.mxu1  ;;  %v3616_v29 = vpop.f32.mrf.mxu0 }
 0x483   : > { %v3355_v30 = vadd.f32 %v3354_v59, %v14449_v63  ;;  %v14894_v12 = vadd.f32 %v3616_v29, %v3528_v21  ;;  %v19310_v63 = vld [vmem:[#allocation18_spill] sm:$0xff] }
 0x485   : > { %v3444_v5 = vadd.f32 %v14827_v37, %v3355_v30 }
 0x487   : > { %v3533_v49 = vadd.f32 %v3532_v18, %v3444_v5 }
 0x489   : > { %v3458_v44 = vpop.f32.mrf.mxu2  ;;  %v3542_v32 = vpop.f32.mrf.mxu3 }
 0x48a   : > { %v3357_v34 = vpop.f32.mrf.mxu1  ;;  %v3619_v52 = vpop.f32.mrf.mxu0 }
 0x48b   : > { %v3358_v15 = vadd.f32 %v3357_v34, %v14454_v48  ;;  %v14898_v0 = vadd.f32 %v3619_v52, %v3531_v24 }
 0x48d   : > { %19307 = vst [vmem:[#allocation168_spill] sm:$0xff] %v14898_v0  ;;  %v3447_v2 = vadd.f32 %v14853_v46, %v3358_v15  ;;  %3672 = vmatmul.bf16.gmra.mxu1 %v19308_v19  ;;  %3934 = vmatmul.bf16.vlgmr.msrb.gmra.mxu0 %v19309_v43  ;;  %v19313_v0 = vld [vmem:[#allocation22_spill] sm:$0xff] }
 0x48e   : > { %3776 = vmatmul.bf16.gmra.mxu2 %v19310_v63  ;;  %3860 = vmatmul.bf16.gmra.mxu3 %v19245_v26 }
 0x48f   : > { %v3536_v37 = vadd.f32 %v3535_v1, %v3447_v2  ;;  %v19311_v1 = vld [vmem:[#allocation98_spill] sm:$0xff]  ;;  %v19312_v2 = vld [vmem:[#allocation16_spill] sm:$0xff] }
 0x491   : > { %v3461_v18 = vpop.f32.mrf.mxu2  ;;  %v3545_v21 = vpop.f32.mrf.mxu3 }
 0x492   : > { %v3359_v59 = vpop.f32.mrf.mxu1  ;;  %v3621_v29 = vpop.f32.mrf.mxu0 }
 0x493   : > { %v3360_v30 = vadd.f32 %v3359_v59, %v14463_v40  ;;  %v14906_v48 = vadd.f32 %v3621_v29, %v3533_v49 }
 0x495   : > { %v3449_v24 = vadd.f32 %v3448_v28, %v3360_v30 }
 0x497   : > { %v3538_v5 = vadd.f32 %v3537_v51, %v3449_v24 }
 0x499   : > { %v3463_v46 = vpop.f32.mrf.mxu2  ;;  %v3547_v15 = vpop.f32.mrf.mxu3 }
 0x49a   : > { %v3362_v34 = vpop.f32.mrf.mxu1  ;;  %v3624_v52 = vpop.f32.mrf.mxu0 }
 0x49b   : > { %v3363_v43 = vadd.f32 %v3362_v34, %v14468_v4  ;;  %v14909_v63 = vadd.f32 %v3624_v52, %v3536_v37 }
 0x49d   : > { %v3452_v26 = vadd.f32 %v3451_v33, %v3363_v43  ;;  %3677 = vmatmul.bf16.gmra.mxu1 %v19311_v1  ;;  %3939 = vmatmul.bf16.gmra.mxu0 %v19312_v2 }
 0x49e   : > { %3781 = vmatmul.bf16.gmra.mxu2 %v19313_v0  ;;  %3865 = vmatmul.bf16.gmra.mxu3 %v19250_v6  ;;  %v19318_v0 = vld [vmem:[#allocation3_spill] sm:$0xff] }
 0x49f   : > { %v3541_v40 = vadd.f32 %v3540_v13, %v3452_v26  ;;  %v19316_v26 = vld [vmem:[#allocation99_spill] sm:$0xff]  ;;  %v19317_v13 = vld [vmem:[#allocation20_spill] sm:$0xff] }
 0x4a1   : > { %v3466_v28 = vpop.f32.mrf.mxu2  ;;  %v3550_v51 = vpop.f32.mrf.mxu3 }
 0x4a2   : > { %v3364_v49 = vpop.f32.mrf.mxu1  ;;  %v3626_v59 = vpop.f32.mrf.mxu0 }
 0x4a3   : > { %v3365_v29 = vadd.f32 %v3364_v49, %v14477_v36  ;;  %v14916_v30 = vadd.f32 %v3626_v59, %v3538_v5  ;;  %v19319_v36 = vld [vmem:[#allocation50_spill] sm:$0xff] }
 0x4a5   : > { %19314 = vst [vmem:[#allocation169_spill] sm:$0xff] %v14916_v30  ;;  %v3454_v4 = vadd.f32 %v3453_v45, %v3365_v29  ;;  %v19320_v29 = vld [vmem:[#allocation158_spill] sm:$0xff] }
 0x4a7   : > { %v3543_v37 = vadd.f32 %v3542_v32, %v3454_v4 }
 0x4a9   : > { %v3468_v43 = vpop.f32.mrf.mxu2  ;;  %v3552_v33 = vpop.f32.mrf.mxu3 }
 0x4aa   : > { %v3367_v24 = vpop.f32.mrf.mxu1  ;;  %v3629_v34 = vpop.f32.mrf.mxu0 }
 0x4ab   : > { %v3368_v52 = vadd.f32 %v3367_v24, %v14482_v31  ;;  %v14919_v2 = vadd.f32 %v3629_v34, %v3541_v40 }
 0x4ad   : > { %19315 = vst [vmem:[#allocation170_spill] sm:$0xff] %v14919_v2  ;;  %v3457_v6 = vadd.f32 %v3456_v42, %v3368_v52  ;;  %3682 = vmatmul.bf16.gmra.mxu1 %v19316_v26  ;;  %3944 = vmatmul.bf16.gmra.mxu0 %v19317_v13  ;;  %v19321_v13 = vld [vmem:[#allocation160_spill] sm:$0xff]  ;;  %v19324_v26 = vld [vmem:[#allocation7_spill] sm:$0xff] }
 0x4ae   : > { %3786 = vmatmul.bf16.gmra.mxu2 %v19318_v0  ;;  %3870 = vmatmul.bf16.gmra.mxu3 %v19319_v36 }
 0x4af   : > { %v3546_v5 = vadd.f32 %v3545_v21, %v3457_v6  ;;  %v19322_v6 = vld [vmem:[#allocation38_spill] sm:$0xff]  ;;  %v19323_v21 = vld [vmem:[#allocation24_spill] sm:$0xff] }
 0x4b1   : > { %v3471_v45 = vpop.f32.mrf.mxu2  ;;  %v3555_v32 = vpop.f32.mrf.mxu3 }
 0x4b2   : > { %v3369_v49 = vpop.f32.mrf.mxu1  ;;  %v3631_v59 = vpop.f32.mrf.mxu0 }
 0x4b3   : > { %v3370_v4 = vadd.f32 %v3369_v49, %v19320_v29  ;;  %v14926_v30 = vadd.f32 %v3631_v59, %v3543_v37 }
 0x4b5   : > { %v3459_v31 = vadd.f32 %v3458_v44, %v3370_v4 }
 0x4b7   : > { %v3548_v40 = vadd.f32 %v3547_v15, %v3459_v31 }
 0x4b9   : > { %v3473_v42 = vpop.f32.mrf.mxu2  ;;  %v3557_v24 = vpop.f32.mrf.mxu3 }
 0x4ba   : > { %v3372_v34 = vpop.f32.mrf.mxu1  ;;  %v3634_v52 = vpop.f32.mrf.mxu0 }
 0x4bb   : > { %v3373_v2 = vadd.f32 %v3372_v34, %v19321_v13  ;;  %v14929_v0 = vadd.f32 %v3634_v52, %v3546_v5 }
 0x4bd   : > { %v3462_v36 = vadd.f32 %v3461_v18, %v3373_v2  ;;  %3687 = vmatmul.bf16.gmra.mxu1 %v19322_v6  ;;  %3949 = vmatmul.bf16.gmra.mxu0 %v19323_v21 }
 0x4be   : > { %3791 = vmatmul.bf16.gmra.mxu2 %v19324_v26  ;;  %3875 = vmatmul.bf16.gmra.mxu3 %v19265_v50  ;;  %v19327_v26 = vld [vmem:[#allocation11_spill] sm:$0xff] }
 0x4bf   : > { %v3551_v37 = vadd.f32 %v3550_v51, %v3462_v36  ;;  %v19325_v51 = vld [vmem:[#allocation46_spill] sm:$0xff]  ;;  %v19326_v36 = vld [vmem:[#allocation28_spill] sm:$0xff] }
 0x4c1   : > { %v3476_v44 = vpop.f32.mrf.mxu2  ;;  %v3560_v15 = vpop.f32.mrf.mxu3 }
 0x4c2   : > { %v3374_v49 = vpop.f32.mrf.mxu1  ;;  %v3636_v59 = vpop.f32.mrf.mxu0 }
 0x4c3   : > { %v3375_v29 = vadd.f32 %v3374_v49, %v14505_v11  ;;  %v14936_v4 = vadd.f32 %v3636_v59, %v3548_v40 }
 0x4c5   : > { %v3464_v13 = vadd.f32 %v3463_v46, %v3375_v29 }
 0x4c7   : > { %v3553_v5 = vadd.f32 %v3552_v33, %v3464_v13 }
 0x4c9   : > { %v3478_v18 = vpop.f32.mrf.mxu2  ;;  %v3562_v2 = vpop.f32.mrf.mxu3 }
 0x4ca   : > { %v3377_v31 = vpop.f32.mrf.mxu1  ;;  %v3639_v34 = vpop.f32.mrf.mxu0 }
 0x4cb   : > { %v3378_v52 = vadd.f32 %v3377_v31, %v14510_v56  ;;  %v14939_v21 = vadd.f32 %v3639_v34, %v3551_v37 }
 0x4cd   : > { %v3467_v50 = vadd.f32 %v3466_v28, %v3378_v52  ;;  %3692 = vmatmul.bf16.gmra.mxu1 %v19325_v51  ;;  %3954 = vmatmul.bf16.gmra.mxu0 %v19326_v36 }
 0x4ce   : > { %3796 = vmatmul.bf16.gmra.mxu2 %v19327_v26  ;;  %3880 = vmatmul.bf16.gmra.mxu3 %v19270_v39  ;;  %v19330_v26 = vld [vmem:[#allocation15_spill] sm:$0xff] }
 0x4cf   : > { %v3556_v11 = vadd.f32 %v3555_v32, %v3467_v50  ;;  %v19328_v50 = vld [vmem:[#allocation41_spill] sm:$0xff]  ;;  %v19329_v32 = vld [vmem:[#allocation32_spill] sm:$0xff] }
 0x4d1   : > { %v3565_v46 = vpop.f32.mrf.mxu3  ;;  %v3757_v33 = vpop.f32.mrf.mxu2 }
 0x4d2   : > { %v3379_v40 = vpop.f32.mrf.mxu1  ;;  %v3641_v49 = vpop.f32.mrf.mxu0 }
 0x4d3   : > { %v3380_v59 = vadd.f32 %v3379_v40, %v14519_v23  ;;  %v14946_v29 = vadd.f32 %v3641_v49, %v3553_v5 }
 0x4d5   : > { %v3469_v56 = vadd.f32 %v3468_v43, %v3380_v59 }
 0x4d7   : > { %v3558_v37 = vadd.f32 %v3557_v24, %v3469_v56 }
 0x4d9   : > { %v3567_v28 = vpop.f32.mrf.mxu3  ;;  %v3759_v13 = vpop.f32.mrf.mxu2 }
 0x4da   : > { %v3382_v31 = vpop.f32.mrf.mxu1  ;;  %v3644_v34 = vpop.f32.mrf.mxu0 }
 0x4db   : > { %v3383_v52 = vadd.f32 %v3382_v31, %v14526_v17  ;;  %v14949_v36 = vadd.f32 %v3644_v34, %v3556_v11 }
 0x4dd   : > { %v3472_v39 = vadd.f32 %v3471_v45, %v3383_v52  ;;  %3697 = vmatmul.bf16.gmra.mxu1 %v19328_v50  ;;  %3959 = vmatmul.bf16.gmra.mxu0 %v19329_v32 }
 0x4de   : > { %3801 = vmatmul.bf16.gmra.mxu2 %v19330_v26  ;;  %3885 = vmatmul.bf16.gmra.mxu3 %v19275_v7 }
 0x4df   : > { %v3561_v23 = vadd.f32 %v3560_v15, %v3472_v39 }
 0x4e1   : > { %v3762_v43 = vpop.f32.mrf.mxu2  ;;  %v3846_v24 = vpop.f32.mrf.mxu3 }
 0x4e2   : > { %v3847_v5 = vadd.f32 %v3846_v24, %v3757_v33  ;;  %v3384_v40 = vpop.f32.mrf.mxu1  ;;  %v3646_v49 = vpop.f32.mrf.mxu0  ;;  %v19331_v33 = vld [vmem:[#allocation49_spill] sm:$0xff]  ;;  %v19332_v24 = vld [vmem:[#allocation36_spill] sm:$0xff] }
 0x4e3   : > { %v3385_v59 = vadd.f32 %v3384_v40, %v14537_v60  ;;  %v14956_v17 = vadd.f32 %v3646_v49, %v3558_v37  ;;  %v19333_v60 = vld [vmem:[#allocation19_spill] sm:$0xff] }
 0x4e5   : > { %v3474_v11 = vadd.f32 %v3473_v42, %v3385_v59 }
 0x4e7   : > { %v3563_v45 = vadd.f32 %v3562_v2, %v3474_v11 }
 0x4e9   : > { %v3764_v56 = vpop.f32.mrf.mxu2  ;;  %v3848_v31 = vpop.f32.mrf.mxu3 }
 0x4ea   : > { %v14958_v34 = vadd.f32 %v3848_v31, %v3759_v13  ;;  %v3387_v52 = vpop.f32.mrf.mxu1  ;;  %v3649_v32 = vpop.f32.mrf.mxu0 }
 0x4eb   : > { %v3388_v7 = vadd.f32 %v3387_v52, %v14544_v55  ;;  %v14961_v39 = vadd.f32 %v3649_v32, %v3561_v23 }
 0x4ed   : > { %v3477_v15 = vadd.f32 %v3476_v44, %v3388_v7  ;;  %3702 = vmatmul.bf16.gmra.mxu1 %v19331_v33  ;;  %3964 = vmatmul.bf16.gmra.mxu0 %v19332_v24  ;;  %v19355_v24 = vld [vmem:[#allocation62_spill] sm:$0xff] }
 0x4ee   : > { %3806 = vmatmul.bf16.gmra.mxu2 %v19333_v60  ;;  %3890 = vmatmul.bf16.gmra.mxu3 %v19278_v58 }
 0x4ef   : > { %v3566_v42 = vadd.f32 %v3565_v46, %v3477_v15  ;;  %v19335_v15 = vld [vmem:[#allocation44_spill] sm:$0xff] }
 0x4f1   : > { %v3767_v2 = vpop.f32.mrf.mxu2  ;;  %v3851_v37 = vpop.f32.mrf.mxu3 }
 0x4f2   : > { %v14967_v13 = vadd.f32 %v3851_v37, %v3762_v43  ;;  %v3389_v40 = vpop.f32.mrf.mxu1  ;;  %v3651_v49 = vpop.f32.mrf.mxu0  ;;  %v19334_v43 = vld [vmem:[#allocation54_spill] sm:$0xff]  ;;  %v19336_v37 = vld [vmem:[#allocation4_spill] sm:$0xff] }
 0x4f3   : > { %v3390_v55 = vadd.f32 %v3389_v40, %v14553_v54  ;;  %v14970_v32 = vadd.f32 %v3651_v49, %v3563_v45 }
 0x4f5   : > { %v3479_v7 = vadd.f32 %v3478_v18, %v3390_v55 }
 0x4f7   : > { %v3568_v44 = vadd.f32 %v3567_v28, %v3479_v7  ;;  %v19337_v7 = vld [vmem:[#allocation55_spill] sm:$0xff] }
 0x4f9   : > { %v3769_v23 = vpop.f32.mrf.mxu2  ;;  %v3853_v59 = vpop.f32.mrf.mxu3 }
 0x4fa   : > { %v14972_v11 = vadd.f32 %v3853_v59, %v3764_v56  ;;  %v3654_v31 = vpop.f32.mrf.mxu0  ;;  %v3668_v52 = vpop.f32.mrf.mxu1 }
 0x4fb   : > { %v14974_v58 = vadd.f32 %v3654_v31, %v3566_v42  ;;  %v3669_v46 = vadd.f32 %v3668_v52, %v14561_v57 }
 0x4fd   : > { %3707 = vmatmul.bf16.gmra.mxu1 %v19334_v43  ;;  %3969 = vmatmul.bf16.gmra.mxu0 %v19335_v15  ;;  %v5992_v57 = vrot.slane %v3669_v46, 1  ;;  %v10846_v46 = vld [vmem:[%s18689_s1 + $0x578] sm:$0xf0] }
 0x4fe   : > { %3811 = vmatmul.bf16.gmra.mxu2 %v19336_v37  ;;  %3895 = vmatmul.bf16.gmra.mxu3 %v19281_v27 }
 0x501   : > { %v3772_v54 = vpop.f32.mrf.mxu2  ;;  %v3856_v18 = vpop.f32.mrf.mxu3 }
 0x502   : > { %v14981_v28 = vadd.f32 %v3856_v18, %v3767_v2  ;;  %v3656_v45 = vpop.f32.mrf.mxu0  ;;  %v3670_v56 = vpop.f32.mrf.mxu1 }
 0x503   : > { %v14983_v40 = vadd.f32 %v3656_v45, %v3568_v44  ;;  %v3671_v42 = vadd.f32 %v3670_v56, %v14584_v14  ;;  %v12054_v14 = vld [vmem:[%s18689_s1 + $0x574] sm:$0xf]  ;;  %v19339_v56 = vld [vmem:[#allocation73_spill] sm:$0xff] }
 0x505   : > { %v5993_v49 = vrot.slane %v3671_v42, 1  ;;  %v19340_v42 = vld [vmem:[#allocation52_spill] sm:$0xff] }
 0x507   : > { %v5994_v55 = vsel %vm5991_vm0, %v5992_v57, %v5993_v49  ;;  %v19341_v57 = vld [vmem:[#allocation8_spill] sm:$0xff] }
 0x508   : > { %v14988_v59 = vadd.f32 %v5994_v55, %v19337_v7  ;;  %v12052_v7 = vld [vmem:[%s18689_s1 + $0x564] sm:$0xf] }
 0x509   : > { %v3774_v31 = vpop.f32.mrf.mxu2  ;;  %v3858_v52 = vpop.f32.mrf.mxu3 }
 0x50a   : > { %19338 = vst [vmem:[#allocation158_spill] sm:$0xff] %v14988_v59  ;;  %v14990_v27 = vadd.f32 %v3858_v52, %v3769_v23  ;;  %v3673_v2 = vpop.f32.mrf.mxu1  ;;  %v3935_v18 = vpop.f32.mrf.mxu0  ;;  %v10849_v23 = vor.u32 %v12054_v14, %v10846_v46 }
 0x50b   : > { %v3674_v15 = vadd.f32 %v3673_v2, %v14604_v47  ;;  %v14993_v44 = vadd.f32 %v3935_v18, %v3847_v5  ;;  %v19342_v5 = vld [vmem:[#allocation72_spill] sm:$0xff] }
 0x50c   : > { %4104 = vmatpush.bf16.msra.mxu2 %v10849_v23 }
 0x50d   : > { %v5998_v45 = vrot.slane %v3674_v15, 1  ;;  %3712 = vmatmul.bf16.gmra.mxu1 %v19339_v56  ;;  %3974 = vmatmul.bf16.gmra.mxu0 %v19340_v42  ;;  %v10838_v15 = vld [vmem:[%s18689_s1 + $0x568] sm:$0xf0] }
 0x50e   : > { %3816 = vmatmul.bf16.gmra.mxu2 %v19341_v57  ;;  %3900 = vmatmul.bf16.gmra.mxu3 %v19285_v22  ;;  %v10841_v18 = vor.u32 %v12052_v7, %v10838_v15  ;;  %v19345_v15 = vld [vmem:[#allocation78_spill] sm:$0xff] }
 0x50f   : > { %v5999_v47 = vsel %vm5991_vm0, %v5993_v49, %v5998_v45  ;;  %v19344_v49 = vld [vmem:[#allocation165_spill] sm:$0xff] }
 0x510   : > { %v15007_v55 = vadd.f32 %v5999_v47, %v19342_v5  ;;  %4105 = vmatpush.bf16.msra.mxu2 %v10841_v18  ;;  %v12050_v5 = vld [vmem:[%s18689_s1 + $0x554] sm:$0xf] }
 0x511   : > { %v3777_v52 = vpop.f32.mrf.mxu2  ;;  %v3861_v2 = vpop.f32.mrf.mxu3 }
 0x512   : > { %19343 = vst [vmem:[#allocation160_spill] sm:$0xff] %v15007_v55  ;;  %v15015_v14 = vadd.f32 %v3861_v2, %v3772_v54  ;;  %v3675_v46 = vpop.f32.mrf.mxu1  ;;  %v3937_v59 = vpop.f32.mrf.mxu0  ;;  %v10830_v55 = vld [vmem:[%s18689_s1 + $0x558] sm:$0xf0] }
 0x513   : > { %v3676_v23 = vadd.f32 %v3675_v46, %v19344_v49  ;;  %v15019_v47 = vadd.f32 %v3937_v59, %v14958_v34  ;;  %v10833_v7 = vor.u32 %v12050_v5, %v10830_v55  ;;  %v12048_v34 = vld [vmem:[%s18689_s1 + $0x544] sm:$0xf]  ;;  %v10822_v59 = vld [vmem:[%s18689_s1 + $0x548] sm:$0xf0] }
 0x514   : > { %v10825_v49 = vor.u32 %v12048_v34, %v10822_v59  ;;  %v19347_v34 = vld [vmem:[#allocation100_spill] sm:$0xff]  ;;  %v10910_v59 = vld [vmem:[%s18689_s1 + $0x5f8] sm:$0xf0] }
 0x515   : > { %v6002_v22 = vrot.slane %v3676_v23, 1  ;;  %4106 = vmatpush.bf16.msra.mxu2 %v10833_v7  ;;  %v12046_v7 = vld [vmem:[%s18689_s1 + $0x534] sm:$0xf] }
 0x517   : > { %v6003_v54 = vsel %vm5991_vm0, %v5998_v45, %v6002_v22 }
 0x518   : > { %v15029_v2 = vadd.f32 %v6003_v54, %v19345_v15  ;;  %v10814_v54 = vld [vmem:[%s18689_s1 + $0x538] sm:$0xf0] }
 0x519   : > { %v3779_v18 = vpop.f32.mrf.mxu2  ;;  %v3863_v46 = vpop.f32.mrf.mxu3  ;;  %4107 = vmatpush.bf16.msra.mxu2 %v10825_v49 }
 0x51a   : > { %19346 = vst [vmem:[#allocation55_spill] sm:$0xff] %v15029_v2  ;;  %v15037_v42 = vadd.f32 %v3863_v46, %v3774_v31  ;;  %v3678_v55 = vpop.f32.mrf.mxu1  ;;  %v3940_v23 = vpop.f32.mrf.mxu0  ;;  %v12070_v31 = vld [vmem:[%s18689_s1 + $0x5f4] sm:$0xf]  ;;  %v19349_v46 = vld [vmem:[#allocation5_spill] sm:$0xff] }
 0x51b   : > { %v3679_v45 = vadd.f32 %v3678_v55, %v14673_v20  ;;  %v15041_v5 = vadd.f32 %v3940_v23, %v14967_v13  ;;  %v19348_v20 = vld [vmem:[#allocation58_spill] sm:$0xff]  ;;  %v10817_v13 = vor.u32 %v12046_v7, %v10814_v54  ;;  %v10913_v49 = vor.u32 %v12070_v31, %v10910_v59  ;;  %v19350_v23 = vld [vmem:[#allocation79_spill] sm:$0xff] }
 0x51c   : > { %v10806_v7 = vld [vmem:[%s18689_s1 + $0x528] sm:$0xf0]  ;;  %v12068_v54 = vld [vmem:[%s18689_s1 + $0x5e4] sm:$0xf] }
 0x51d   : > { %v6006_v15 = vrot.slane %v3679_v45, 1  ;;  %3717 = vmatmul.bf16.gmra.mxu1 %v19347_v34  ;;  %3979 = vmatmul.bf16.gmra.mxu0 %v19348_v20  ;;  %v12044_v45 = vld [vmem:[%s18689_s1 + $0x524] sm:$0xf] }
 0x51e   : > { %3821 = vmatmul.bf16.gmra.mxu2 %v19349_v46  ;;  %3905 = vmatmul.bf16.gmra.mxu3 %v19288_v35 }
 0x51f   : > { %v6007_v55 = vsel %vm5991_vm0, %v6002_v22, %v6006_v15  ;;  %4108 = vmatpush.bf16.msra.mxu2 %v10817_v13  ;;  %4193 = vmatpush.bf16.msra.mxu3 %v10913_v49  ;;  %v10809_v22 = vor.u32 %v12044_v45, %v10806_v7  ;;  %v10902_v13 = vld [vmem:[%s18689_s1 + $0x5e8] sm:$0xf0]  ;;  %v12042_v45 = vld [vmem:[%s18689_s1 + $0x514] sm:$0xf]  ;;  %v10798_v7 = vld [vmem:[%s18689_s1 + $0x518] sm:$0xf0] }
 0x520   : > { %v15061_v2 = vadd.f32 %v6007_v55, %v19350_v23 }
 0x521   : > { %v3782_v31 = vpop.f32.mrf.mxu2  ;;  %v3866_v59 = vpop.f32.mrf.mxu3 }
 0x522   : > { %19351 = vst [vmem:[#allocation72_spill] sm:$0xff] %v15061_v2  ;;  %v15075_v49 = vadd.f32 %v3866_v59, %v3777_v52  ;;  %v3680_v55 = vpop.f32.mrf.mxu1  ;;  %v3942_v23 = vpop.f32.mrf.mxu0  ;;  %v10905_v2 = vor.u32 %v12068_v54, %v10902_v13  ;;  %v12066_v52 = vld [vmem:[%s18689_s1 + $0x5d4] sm:$0xf]  ;;  %v10801_v59 = vor.u32 %v12042_v45, %v10798_v7 }
 0x523   : > { %v3681_v35 = vadd.f32 %v3680_v55, %v14698_v38  ;;  %v15079_v20 = vadd.f32 %v3942_v23, %v14972_v11  ;;  %4109 = vmatpush.bf16.msra.mxu2 %v10809_v22  ;;  %v10894_v38 = vld [vmem:[%s18689_s1 + $0x5d8] sm:$0xf0]  ;;  %v12040_v55 = vld [vmem:[%s18689_s1 + $0x504] sm:$0xf] }
 0x524   : > { %4194 = vmatpush.bf16.msra.mxu3 %v10905_v2  ;;  %v10897_v11 = vor.u32 %v12066_v52, %v10894_v38  ;;  %v19352_v22 = vld [vmem:[#allocation101_spill] sm:$0xff]  ;;  %v12064_v23 = vld [vmem:[%s18689_s1 + $0x5c4] sm:$0xf]  ;;  %v10886_v52 = vld [vmem:[%s18689_s1 + $0x5c8] sm:$0xf0] }
 0x525   : > { %v6010_v54 = vrot.slane %v3681_v35, 1  ;;  %v10790_v35 = vld [vmem:[%s18689_s1 + $0x508] sm:$0xf0] }
 0x527   : > { %v6011_v2 = vsel %vm5991_vm0, %v6006_v15, %v6010_v54  ;;  %4110 = vmatpush.bf16.msra.mxu2 %v10801_v59  ;;  %v10793_v15 = vor.u32 %v12040_v55, %v10790_v35  ;;  %v12062_v55 = vld [vmem:[%s18689_s1 + $0x5b4] sm:$0xf]  ;;  %v10878_v35 = vld [vmem:[%s18689_s1 + $0x5b8] sm:$0xf0] }
 0x528   : > { %v15095_v13 = vadd.f32 %v6011_v2, %v19352_v22  ;;  %4195 = vmatpush.bf16.msra.mxu3 %v10897_v11  ;;  %v10889_v2 = vor.u32 %v12064_v23, %v10886_v52  ;;  %v10881_v23 = vor.u32 %v12062_v55, %v10878_v35 }
 0x529   : > { %v3784_v45 = vpop.f32.mrf.mxu2  ;;  %v3868_v7 = vpop.f32.mrf.mxu3 }
 0x52a   : > { %19353 = vst [vmem:[#allocation165_spill] sm:$0xff] %v15095_v13  ;;  %v15109_v59 = vadd.f32 %v3868_v7, %v3779_v18  ;;  %v3683_v38 = vpop.f32.mrf.mxu1  ;;  %v3945_v11 = vpop.f32.mrf.mxu0  ;;  %v19354_v7 = vld [vmem:[#allocation105_spill] sm:$0xff] }
 0x52b   : > { %v3684_v22 = vadd.f32 %v3683_v38, %v14719_v61  ;;  %v15113_v13 = vadd.f32 %v3945_v11, %v14981_v28  ;;  %4111 = vmatpush.bf16.msra.mxu2 %v10793_v15  ;;  %v19356_v61 = vld [vmem:[#allocation9_spill] sm:$0xff]  ;;  %v19357_v15 = vld [vmem:[#allocation103_spill] sm:$0xff]  ;;  %v12060_v38 = vld [vmem:[%s18689_s1 + $0x5a4] sm:$0xf] }
 0x52c   : > { %4196 = vmatpush.bf16.msra.mxu3 %v10889_v2  ;;  %v10870_v11 = vld [vmem:[%s18689_s1 + $0x5a8] sm:$0xf0] }
 0x52d   : > { %v6014_v18 = vrot.slane %v3684_v22, 1  ;;  %3722 = vmatmul.bf16.gmra.mxu1 %v19354_v7  ;;  %3984 = vmatmul.bf16.gmra.mxu0 %v19355_v24  ;;  %v10873_v55 = vor.u32 %v12060_v38, %v10870_v11  ;;  %v19359_v11 = vld [vmem:[#allocation106_spill] sm:$0xff] }
 0x52e   : > { %3826 = vmatmul.bf16.gmra.mxu2 %v19356_v61  ;;  %3910 = vmatmul.bf16.gmra.mxu3 %v19291_v10 }
 0x52f   : > { %v6015_v28 = vsel %vm5991_vm0, %v6010_v54, %v6014_v18 }
 0x530   : > { %v15127_v52 = vadd.f32 %v6015_v28, %v19357_v15  ;;  %4197 = vmatpush.bf16.msra.mxu3 %v10881_v23  ;;  %v12058_v23 = vld [vmem:[%s18689_s1 + $0x594] sm:$0xf]  ;;  %v10862_v15 = vld [vmem:[%s18689_s1 + $0x598] sm:$0xf0] }
 0x531   : > { %v3787_v2 = vpop.f32.mrf.mxu2  ;;  %v3871_v22 = vpop.f32.mrf.mxu3  ;;  %v10865_v38 = vor.u32 %v12058_v23, %v10862_v15 }
 0x532   : > { %19358 = vst [vmem:[#allocation78_spill] sm:$0xff] %v15127_v52  ;;  %v15135_v35 = vadd.f32 %v3871_v22, %v3782_v31  ;;  %v3685_v10 = vpop.f32.mrf.mxu1  ;;  %v3947_v24 = vpop.f32.mrf.mxu0 }
 0x533   : > { %v3686_v54 = vadd.f32 %v3685_v10, %v14744_v3  ;;  %v15139_v28 = vadd.f32 %v3947_v24, %v14990_v27  ;;  %v12056_v3 = vld [vmem:[%s18689_s1 + $0x584] sm:$0xf]  ;;  %v10854_v27 = vld [vmem:[%s18689_s1 + $0x588] sm:$0xf0] }
 0x534   : > { %4198 = vmatpush.bf16.msra.mxu3 %v10873_v55  ;;  %v10857_v55 = vor.u32 %v12056_v3, %v10854_v27  ;;  %v19361_v3 = vld [vmem:[#allocation108_spill] sm:$0xff] }
 0x535   : > { %v6018_v52 = vrot.slane %v3686_v54, 1 }
 0x537   : > { %v6019_v31 = vsel %vm5991_vm0, %v6014_v18, %v6018_v52 }
 0x538   : > { %v15149_v22 = vadd.f32 %v6019_v31, %v19359_v11  ;;  %4199 = vmatpush.bf16.msra.mxu3 %v10865_v38  ;;  %v12038_v38 = vld [vmem:[%s18689_s1 + $0x4f4] sm:$0xf]  ;;  %v10782_v31 = vld [vmem:[%s18689_s1 + $0x4f8] sm:$0xf0] }
 0x539   : > { %v3789_v10 = vpop.f32.mrf.mxu2  ;;  %v3873_v24 = vpop.f32.mrf.mxu3  ;;  %v10785_v27 = vor.u32 %v12038_v38, %v10782_v31 }
 0x53a   : > { %19360 = vst [vmem:[#allocation79_spill] sm:$0xff] %v15149_v22  ;;  %v15157_v61 = vadd.f32 %v3873_v24, %v3784_v45  ;;  %v3688_v54 = vpop.f32.mrf.mxu1  ;;  %v3950_v23 = vpop.f32.mrf.mxu0  ;;  %v19362_v45 = vld [vmem:[#allocation66_spill] sm:$0xff]  ;;  %v19363_v24 = vld [vmem:[#allocation12_spill] sm:$0xff] }
 0x53b   : > { %v3689_v18 = vadd.f32 %v3688_v54, %v14765_v8  ;;  %v15161_v15 = vadd.f32 %v3950_v23, %v15015_v14  ;;  %4015 = vmatpush.bf16.msra.mxu1 %v10785_v27  ;;  %v19364_v14 = vld [vmem:[#allocation107_spill] sm:$0xff]  ;;  %v12036_v54 = vld [vmem:[%s18689_s1 + $0x4e4] sm:$0xf] }
 0x53c   : > { %4200 = vmatpush.bf16.msra.mxu3 %v10857_v55  ;;  %v10774_v23 = vld [vmem:[%s18689_s1 + $0x4e8] sm:$0xf0] }
 0x53d   : > { %v6022_v11 = vrot.slane %v3689_v18, 1  ;;  %3727 = vmatmul.bf16.gmra.mxu1 %v19361_v3  ;;  %3989 = vmatmul.bf16.gmra.mxu0 %v19362_v45  ;;  %v10777_v31 = vor.u32 %v12036_v54, %v10774_v23  ;;  %v19366_v23 = vld [vmem:[#allocation109_spill] sm:$0xff] }
 0x53e   : > { %3831 = vmatmul.bf16.gmra.mxu2 %v19363_v24  ;;  %3915 = vmatmul.bf16.gmra.mxu3 %v19295_v16 }
 0x53f   : > { %v6023_v8 = vsel %vm5991_vm0, %v6018_v52, %v6022_v11  ;;  %4016 = vmatpush.bf16.msra.mxu1 %v10777_v31 }
 0x540   : > { %v15175_v55 = vadd.f32 %v6023_v8, %v19364_v14  ;;  %v12034_v8 = vld [vmem:[%s18689_s1 + $0x4d4] sm:$0xf]  ;;  %v10766_v14 = vld [vmem:[%s18689_s1 + $0x4d8] sm:$0xf0] }
 0x541   : > { %v3792_v18 = vpop.f32.mrf.mxu2  ;;  %v3876_v38 = vpop.f32.mrf.mxu3  ;;  %v10769_v54 = vor.u32 %v12034_v8, %v10766_v14 }
 0x542   : > { %19365 = vst [vmem:[#allocation101_spill] sm:$0xff] %v15175_v55  ;;  %v15183_v22 = vadd.f32 %v3876_v38, %v3787_v2  ;;  %v3690_v16 = vpop.f32.mrf.mxu1  ;;  %v3952_v45 = vpop.f32.mrf.mxu0 }
 0x543   : > { %v3691_v52 = vadd.f32 %v3690_v16, %v14802_v25  ;;  %v15187_v27 = vadd.f32 %v3952_v45, %v15037_v42  ;;  %4017 = vmatpush.bf16.msra.mxu1 %v10769_v54  ;;  %v12032_v25 = vld [vmem:[%s18689_s1 + $0x4c4] sm:$0xf]  ;;  %v10758_v16 = vld [vmem:[%s18689_s1 + $0x4c8] sm:$0xf0] }
 0x544   : > { %v10761_v31 = vor.u32 %v12032_v25, %v10758_v16  ;;  %v19369_v16 = vld [vmem:[#allocation111_spill] sm:$0xff] }
 0x545   : > { %v6026_v55 = vrot.slane %v3691_v52, 1 }
 0x547   : > { %v6027_v2 = vsel %vm5991_vm0, %v6022_v11, %v6026_v55  ;;  %v19368_v11 = vld [vmem:[#allocation166_spill] sm:$0xff]  ;;  %4018 = vmatpush.bf16.msra.mxu1 %v10761_v31  ;;  %v12087_v31 = vld [vmem:[%s18689_s1 + $0x674] sm:$0xf0] }
 0x548   : > { %v15197_v38 = vadd.f32 %v6027_v2, %v19366_v23  ;;  %v12030_v2 = vld [vmem:[%s18689_s1 + $0x4b4] sm:$0xf]  ;;  %v10750_v23 = vld [vmem:[%s18689_s1 + $0x4b8] sm:$0xf0] }
 0x549   : > { %v3794_v42 = vpop.f32.mrf.mxu2  ;;  %v3878_v45 = vpop.f32.mrf.mxu3 }
 0x54a   : > { %19367 = vst [vmem:[#allocation103_spill] sm:$0xff] %v15197_v38  ;;  %v15205_v24 = vadd.f32 %v3878_v45, %v3789_v10  ;;  %v3693_v52 = vpop.f32.mrf.mxu1  ;;  %v3955_v8 = vpop.f32.mrf.mxu0  ;;  %v11068_v10 = vld [vmem:[%s18689_s1 + $0x670] sm:$0xf]  ;;  %v19370_v45 = vld [vmem:[#allocation70_spill] sm:$0xff] }
 0x54b   : > { %v3694_v14 = vadd.f32 %v3693_v52, %v19368_v11  ;;  %v15209_v54 = vadd.f32 %v3955_v8, %v15075_v49  ;;  %v10753_v49 = vor.u32 %v12030_v2, %v10750_v23  ;;  %v19371_v52 = vld [vmem:[#allocation27_spill] sm:$0xff]  ;;  %v11069_v8 = vor.u32 %v12087_v31, %v11068_v10  ;;  %v19372_v38 = vld [vmem:[#allocation110_spill] sm:$0xff] }
 0x54c   : > { %v10742_v2 = vld [vmem:[%s18689_s1 + $0x4a8] sm:$0xf0]  ;;  %v11060_v23 = vld [vmem:[%s18689_s1 + $0x660] sm:$0xf] }
 0x54d   : > { %v6030_v25 = vrot.slane %v3694_v14, 1  ;;  %3732 = vmatmul.bf16.gmra.mxu1 %v19369_v16  ;;  %3994 = vmatmul.bf16.gmra.mxu0 %v19370_v45  ;;  %v12028_v14 = vld [vmem:[%s18689_s1 + $0x4a4] sm:$0xf] }
 0x54e   : > { %3920 = vmatmul.bf16.gmra.mxu3 %v19301_v41  ;;  %4112 = vmatmul.bf16.vlgmr.msra.gmra.mxu2 %v19371_v52  ;;  %v19374_v41 = vld [vmem:[#allocation148_spill] sm:$0xff] }
 0x54f   : > { %v6031_v11 = vsel %vm5991_vm0, %v6026_v55, %v6030_v25  ;;  %4019 = vmatpush.bf16.msra.mxu1 %v10753_v49  ;;  %4859 = vmatpush.bf16.msra.mxu0 %v11069_v8  ;;  %v10745_v55 = vor.u32 %v12028_v14, %v10742_v2  ;;  %v12026_v14 = vld [vmem:[%s18689_s1 + $0x494] sm:$0xf]  ;;  %v10734_v2 = vld [vmem:[%s18689_s1 + $0x498] sm:$0xf0] }
 0x550   : > { %v15229_v46 = vadd.f32 %v6031_v11, %v19372_v38  ;;  %v12085_v38 = vld [vmem:[%s18689_s1 + $0x664] sm:$0xf0] }
 0x551   : > { %v3797_v10 = vpop.f32.mrf.mxu2  ;;  %v3881_v31 = vpop.f32.mrf.mxu3 }
 0x552   : > { %19373 = vst [vmem:[#allocation106_spill] sm:$0xff] %v15229_v46  ;;  %v15243_v49 = vadd.f32 %v3881_v31, %v3792_v18  ;;  %v3695_v8 = vpop.f32.mrf.mxu1  ;;  %v3957_v11 = vpop.f32.mrf.mxu0  ;;  %v11061_v46 = vor.u32 %v12085_v38, %v11060_v23  ;;  %v11052_v18 = vld [vmem:[%s18689_s1 + $0x650] sm:$0xf]  ;;  %v10737_v31 = vor.u32 %v12026_v14, %v10734_v2 }
 0x553   : > { %v3696_v45 = vadd.f32 %v3695_v8, %v19374_v41  ;;  %v15247_v52 = vadd.f32 %v3957_v11, %v15109_v59  ;;  %4020 = vmatpush.bf16.msra.mxu1 %v10745_v55  ;;  %v12083_v41 = vld [vmem:[%s18689_s1 + $0x654] sm:$0xf0]  ;;  %v19376_v55 = vld [vmem:[#allocation112_spill] sm:$0xff]  ;;  %v12024_v8 = vld [vmem:[%s18689_s1 + $0x484] sm:$0xf] }
 0x554   : > { %4860 = vmatpush.bf16.msra.mxu0 %v11061_v46  ;;  %v11053_v59 = vor.u32 %v12083_v41, %v11052_v18  ;;  %v11044_v11 = vld [vmem:[%s18689_s1 + $0x640] sm:$0xf]  ;;  %v12081_v18 = vld [vmem:[%s18689_s1 + $0x644] sm:$0xf0] }
 0x555   : > { %19375 = vst [vmem:[#allocation107_spill] sm:$0xff] %v15247_v52  ;;  %v6034_v23 = vrot.slane %v3696_v45, 1  ;;  %v10726_v45 = vld [vmem:[%s18689_s1 + $0x488] sm:$0xf0]  ;;  %v19380_v52 = vld [vmem:[#allocation76_spill] sm:$0xff] }
 0x557   : > { %v6035_v46 = vsel %vm5991_vm0, %v6030_v25, %v6034_v23  ;;  %4021 = vmatpush.bf16.msra.mxu1 %v10737_v31  ;;  %v10729_v25 = vor.u32 %v12024_v8, %v10726_v45  ;;  %v11036_v8 = vld [vmem:[%s18689_s1 + $0x630] sm:$0xf]  ;;  %v12079_v45 = vld [vmem:[%s18689_s1 + $0x634] sm:$0xf0] }
 0x558   : > { %v15263_v38 = vadd.f32 %v6035_v46, %v19376_v55  ;;  %4861 = vmatpush.bf16.msra.mxu0 %v11053_v59  ;;  %v11045_v46 = vor.u32 %v12081_v18, %v11044_v11  ;;  %v19378_v55 = vld [vmem:[#allocation167_spill] sm:$0xff]  ;;  %v11037_v11 = vor.u32 %v12079_v45, %v11036_v8 }
 0x559   : > { %v3799_v14 = vpop.f32.mrf.mxu2  ;;  %v3883_v2 = vpop.f32.mrf.mxu3  ;;  %v19381_v18 = vld [vmem:[#allocation31_spill] sm:$0xff] }
 0x55a   : > { %19377 = vst [vmem:[#allocation109_spill] sm:$0xff] %v15263_v38  ;;  %v15277_v31 = vadd.f32 %v3883_v2, %v3794_v42  ;;  %v3698_v41 = vpop.f32.mrf.mxu1  ;;  %v3960_v59 = vpop.f32.mrf.mxu0  ;;  %v19379_v2 = vld [vmem:[#allocation114_spill] sm:$0xff] }
 0x55b   : > { %v3699_v38 = vadd.f32 %v3698_v41, %v19378_v55  ;;  %v15281_v57 = vadd.f32 %v3960_v59, %v15135_v35  ;;  %4022 = vmatpush.bf16.msra.mxu1 %v10729_v25  ;;  %v19382_v25 = vld [vmem:[#allocation113_spill] sm:$0xff]  ;;  %v11028_v59 = vld [vmem:[%s18689_s1 + $0x620] sm:$0xf] }
 0x55c   : > { %4862 = vmatpush.bf16.msra.mxu0 %v11045_v46 }
 0x55d   : > { %v6038_v42 = vrot.slane %v3699_v38, 1  ;;  %3737 = vmatmul.bf16.gmra.mxu1 %v19379_v2  ;;  %3999 = vmatmul.bf16.gmra.mxu0 %v19380_v52  ;;  %v12077_v38 = vld [vmem:[%s18689_s1 + $0x624] sm:$0xf0] }
 0x55e   : > { %4117 = vmatmul.bf16.gmra.mxu2 %v19381_v18  ;;  %4201 = vmatmul.bf16.vlgmr.msra.gmra.mxu3 %v19305_v53  ;;  %v11029_v8 = vor.u32 %v12077_v38, %v11028_v59  ;;  %v19385_v38 = vld [vmem:[#allocation115_spill] sm:$0xff] }
 0x55f   : > { %v6039_v35 = vsel %vm5991_vm0, %v6034_v23, %v6038_v42 }
 0x560   : > { %v15295_v41 = vadd.f32 %v6039_v35, %v19382_v25  ;;  %4863 = vmatpush.bf16.msra.mxu0 %v11037_v11  ;;  %v11020_v11 = vld [vmem:[%s18689_s1 + $0x610] sm:$0xf]  ;;  %v12075_v25 = vld [vmem:[%s18689_s1 + $0x614] sm:$0xf0] }
 0x561   : > { %v3802_v46 = vpop.f32.mrf.mxu2  ;;  %v3886_v55 = vpop.f32.mrf.mxu3  ;;  %v11021_v59 = vor.u32 %v12075_v25, %v11020_v11 }
 0x562   : > { %19383 = vst [vmem:[#allocation166_spill] sm:$0xff] %v15295_v41  ;;  %v15303_v45 = vadd.f32 %v3886_v55, %v3797_v10  ;;  %v3700_v53 = vpop.f32.mrf.mxu1  ;;  %v3962_v52 = vpop.f32.mrf.mxu0 }
 0x563   : > { %v3701_v23 = vadd.f32 %v3700_v53, %v14882_v62  ;;  %v15307_v35 = vadd.f32 %v3962_v52, %v15157_v61  ;;  %v11012_v53 = vld [vmem:[%s18689_s1 + $0x600] sm:$0xf]  ;;  %v12073_v62 = vld [vmem:[%s18689_s1 + $0x604] sm:$0xf0] }
 0x564   : > { %4864 = vmatpush.bf16.msra.mxu0 %v11029_v8  ;;  %v11013_v8 = vor.u32 %v12073_v62, %v11012_v53  ;;  %v19391_v53 = vld [vmem:[#allocation116_spill] sm:$0xff] }
 0x565   : > { %19384 = vst [vmem:[#allocation110_spill] sm:$0xff] %v15307_v35  ;;  %v6042_v41 = vrot.slane %v3701_v23, 1 }
 0x567   : > { %v6043_v10 = vsel %vm5991_vm0, %v6038_v42, %v6042_v41 }
 0x568   : > { %v15317_v55 = vadd.f32 %v6043_v10, %v19385_v38  ;;  %4865 = vmatpush.bf16.msra.mxu0 %v11021_v59  ;;  %v19388_v10 = vld [vmem:[#allocation117_spill] sm:$0xff]  ;;  %v19389_v38 = vld [vmem:[#allocation82_spill] sm:$0xff] }
 0x569   : > { %v3804_v61 = vpop.f32.mrf.mxu2  ;;  %v3888_v52 = vpop.f32.mrf.mxu3 }
 0x56a   : > { %19386 = vst [vmem:[#allocation148_spill] sm:$0xff] %v15317_v55  ;;  %v15325_v18 = vadd.f32 %v3888_v52, %v3799_v14  ;;  %v3703_v23 = vpop.f32.mrf.mxu1  ;;  %v3965_v11 = vpop.f32.mrf.mxu0  ;;  %v19390_v55 = vld [vmem:[#allocation35_spill] sm:$0xff] }
 0x56b   : > { %v3704_v42 = vadd.f32 %v3703_v23, %v14886_v9  ;;  %v15329_v25 = vadd.f32 %v3965_v11, %v15183_v22 }
 0x56c   : > { %4866 = vmatpush.bf16.msra.mxu0 %v11013_v8 }
 0x56d   : > { %19387 = vst [vmem:[#allocation112_spill] sm:$0xff] %v15329_v25  ;;  %v6046_v59 = vrot.slane %v3704_v42, 1  ;;  %3742 = vmatmul.bf16.gmra.mxu1 %v19388_v10  ;;  %4004 = vmatmul.bf16.gmra.mxu0 %v19389_v38  ;;  %v19393_v25 = vld [vmem:[#allocation118_spill] sm:$0xff] }
 0x56e   : > { %4122 = vmatmul.bf16.gmra.mxu2 %v19390_v55  ;;  %4206 = vmatmul.bf16.gmra.mxu3 %v19308_v19 }
 0x56f   : > { %v6047_v14 = vsel %vm5991_vm0, %v6042_v41, %v6046_v59 }
 0x570   : > { %v15337_v62 = vadd.f32 %v6047_v14, %v19391_v53 }
 0x571   : > { %v3807_v52 = vpop.f32.mrf.mxu2  ;;  %v3891_v9 = vpop.f32.mrf.mxu3 }
 0x572   : > { %19392 = vst [vmem:[#allocation167_spill] sm:$0xff] %v15337_v62  ;;  %v3892_v23 = vadd.f32 %v3891_v9, %v3802_v46  ;;  %v3705_v22 = vpop.f32.mrf.mxu1  ;;  %v3967_v11 = vpop.f32.mrf.mxu0  ;;  %v19395_v46 = vld [vmem:[#allocation168_spill] sm:$0xff] }
 0x573   : > { %v3706_v8 = vadd.f32 %v3705_v22, %v14894_v12  ;;  %v15341_v42 = vadd.f32 %v3967_v11, %v15205_v24  ;;  %v19396_v24 = vld [vmem:[#allocation86_spill] sm:$0xff]  ;;  %v19397_v22 = vld [vmem:[#allocation17_spill] sm:$0xff] }
 0x575   : > { %v6050_v38 = vrot.slane %v3706_v8, 1 }
 0x577   : > { %v6051_v55 = vsel %vm5991_vm0, %v6046_v59, %v6050_v38  ;;  %v19398_v59 = vld [vmem:[#allocation43_spill] sm:$0xff] }
 0x578   : > { %v15345_v19 = vadd.f32 %v6051_v55, %v19393_v25 }
 0x579   : > { %v3809_v41 = vpop.f32.mrf.mxu2  ;;  %v3893_v35 = vpop.f32.mrf.mxu3 }
 0x57a   : > { %19394 = vst [vmem:[#allocation113_spill] sm:$0xff] %v15345_v19  ;;  %v15347_v14 = vadd.f32 %v3893_v35, %v3804_v61  ;;  %v3708_v53 = vpop.f32.mrf.mxu1  ;;  %v3970_v62 = vpop.f32.mrf.mxu0  ;;  %v19399_v35 = vld [vmem:[#allocation119_spill] sm:$0xff] }
 0x57b   : > { %v3709_v9 = vadd.f32 %v3708_v53, %v19395_v46  ;;  %v15351_v10 = vadd.f32 %v3970_v62, %v15243_v49 }
 0x57d   : > { %v6054_v12 = vrot.slane %v3709_v9, 1  ;;  %4009 = vmatmul.bf16.gmra.mxu0 %v19396_v24  ;;  %4023 = vmatmul.bf16.vlgmr.msra.gmra.mxu1 %v19397_v22  ;;  %v19402_v24 = vld [vmem:[#allocation120_spill] sm:$0xff] }
 0x57e   : > { %4127 = vmatmul.bf16.gmra.mxu2 %v19398_v59  ;;  %4211 = vmatmul.bf16.gmra.mxu3 %v19311_v1 }
 0x57f   : > { %v6055_v55 = vsel %vm5991_vm0, %v6050_v38, %v6054_v12 }
 0x580   : > { %v15359_v61 = vadd.f32 %v6055_v55, %v19399_v35 }
 0x581   : > { %v3812_v25 = vpop.f32.mrf.mxu2  ;;  %v3896_v11 = vpop.f32.mrf.mxu3 }
 0x582   : > { %19400 = vst [vmem:[#allocation115_spill] sm:$0xff] %v15359_v61  ;;  %v3897_v8 = vadd.f32 %v3896_v11, %v3807_v52  ;;  %v3710_v53 = vpop.f32.mrf.mxu1  ;;  %v3972_v49 = vpop.f32.mrf.mxu0 }
 0x583   : > { %v3711_v62 = vadd.f32 %v3710_v53, %v14906_v48  ;;  %v15363_v46 = vadd.f32 %v3972_v49, %v15277_v31  ;;  %v19405_v31 = vld [vmem:[#allocation21_spill] sm:$0xff]  ;;  %v19406_v53 = vld [vmem:[#allocation2_spill] sm:$0xff] }
 0x585   : > { %19401 = vst [vmem:[#allocation116_spill] sm:$0xff] %v15363_v46  ;;  %v6058_v9 = vrot.slane %v3711_v62, 1 }
 0x587   : > { %v6059_v19 = vsel %vm5991_vm0, %v6054_v12, %v6058_v9  ;;  %v19407_v12 = vld [vmem:[#allocation51_spill] sm:$0xff] }
 0x588   : > { %v15367_v1 = vadd.f32 %v6059_v19, %v19402_v24  ;;  %v19408_v19 = vld [vmem:[#allocation99_spill] sm:$0xff] }
 0x589   : > { %v3814_v38 = vpop.f32.mrf.mxu2  ;;  %v3898_v59 = vpop.f32.mrf.mxu3 }
 0x58a   : > { %19403 = vst [vmem:[#allocation118_spill] sm:$0xff] %v15367_v1  ;;  %v15369_v55 = vadd.f32 %v3898_v59, %v3809_v41  ;;  %v3713_v35 = vpop.f32.mrf.mxu1  ;;  %v3975_v61 = vpop.f32.mrf.mxu0  ;;  %v19409_v41 = vld [vmem:[#allocation121_spill] sm:$0xff] }
 0x58b   : > { %v3714_v52 = vadd.f32 %v3713_v35, %v14909_v63  ;;  %v15373_v11 = vadd.f32 %v3975_v61, %v15303_v45  ;;  %v19411_v61 = vld [vmem:[#allocation169_spill] sm:$0xff] }
 0x58d   : > { %19404 = vst [vmem:[#allocation168_spill] sm:$0xff] %v15373_v11  ;;  %v6062_v48 = vrot.slane %v3714_v52, 1  ;;  %4028 = vmatmul.bf16.gmra.mxu1 %v19405_v31  ;;  %4867 = vmatmul.bf16.vlgmr.msra.gmra.mxu0 %v19406_v53  ;;  %v19412_v11 = vld [vmem:[#allocation122_spill] sm:$0xff] }
 0x58e   : > { %4132 = vmatmul.bf16.gmra.mxu2 %v19407_v12  ;;  %4216 = vmatmul.bf16.gmra.mxu3 %v19408_v19 }
 0x58f   : > { %v6063_v24 = vsel %vm5991_vm0, %v6058_v9, %v6062_v48 }
 0x590   : > { %v15381_v59 = vadd.f32 %v6063_v24, %v19409_v41 }
 0x591   : > { %v3817_v49 = vpop.f32.mrf.mxu2  ;;  %v3901_v62 = vpop.f32.mrf.mxu3 }
 0x592   : > { %19410 = vst [vmem:[#allocation119_spill] sm:$0xff] %v15381_v59  ;;  %v3902_v63 = vadd.f32 %v3901_v62, %v3812_v25  ;;  %v3715_v35 = vpop.f32.mrf.mxu1  ;;  %v3977_v45 = vpop.f32.mrf.mxu0  ;;  %v19414_v25 = vld [vmem:[#allocation170_spill] sm:$0xff] }
 0x593   : > { %v3716_v52 = vadd.f32 %v3715_v35, %v19411_v61  ;;  %v15385_v1 = vadd.f32 %v3977_v45, %v15325_v18  ;;  %v19415_v61 = vld [vmem:[#allocation25_spill] sm:$0xff]  ;;  %v19416_v18 = vld [vmem:[#allocation6_spill] sm:$0xff] }
 0x594   : > { %v19417_v45 = vld [vmem:[#allocation57_spill] sm:$0xff] }
 0x595   : > { %v6066_v53 = vrot.slane %v3716_v52, 1 }
 0x597   : > { %v6067_v12 = vsel %vm5991_vm0, %v6062_v48, %v6066_v53  ;;  %v19418_v48 = vld [vmem:[#allocation123_spill] sm:$0xff] }
 0x598   : > { %v15389_v19 = vadd.f32 %v6067_v12, %v19412_v11 }
 0x599   : > { %v3819_v9 = vpop.f32.mrf.mxu2  ;;  %v3903_v46 = vpop.f32.mrf.mxu3 }
 0x59a   : > { %19413 = vst [vmem:[#allocation120_spill] sm:$0xff] %v15389_v19  ;;  %v15391_v24 = vadd.f32 %v3903_v46, %v3814_v38  ;;  %v3718_v41 = vpop.f32.mrf.mxu1  ;;  %v3980_v59 = vpop.f32.mrf.mxu0 }
 0x59b   : > { %v3719_v62 = vadd.f32 %v3718_v41, %v19414_v25  ;;  %v15394_v31 = vadd.f32 %v3980_v59, %v3892_v23 }
 0x59d   : > { %v6070_v35 = vrot.slane %v3719_v62, 1  ;;  %4033 = vmatmul.bf16.gmra.mxu1 %v19415_v61  ;;  %4872 = vmatmul.bf16.gmra.mxu0 %v19416_v18  ;;  %v19420_v18 = vld [vmem:[#allocation124_spill] sm:$0xff] }
 0x59e   : > { %4137 = vmatmul.bf16.gmra.mxu2 %v19417_v45  ;;  %4221 = vmatmul.bf16.gmra.mxu3 %v19322_v6 }
 0x59f   : > { %v6071_v11 = vsel %vm5991_vm0, %v6066_v53, %v6070_v35 }
 0x5a0   : > { %v15402_v46 = vadd.f32 %v6071_v11, %v19418_v48 }
 0x5a1   : > { %v3822_v38 = vpop.f32.mrf.mxu2  ;;  %v3906_v12 = vpop.f32.mrf.mxu3 }
 0x5a2   : > { %19419 = vst [vmem:[#allocation121_spill] sm:$0xff] %v15402_v46  ;;  %v3907_v52 = vadd.f32 %v3906_v12, %v3817_v49  ;;  %v3720_v41 = vpop.f32.mrf.mxu1  ;;  %v3982_v23 = vpop.f32.mrf.mxu0 }
 0x5a3   : > { %v3721_v59 = vadd.f32 %v3720_v41, %v14926_v30  ;;  %v15406_v25 = vadd.f32 %v3982_v23, %v15347_v14  ;;  %v19422_v41 = vld [vmem:[#allocation29_spill] sm:$0xff]  ;;  %v19423_v14 = vld [vmem:[#allocation10_spill] sm:$0xff] }
 0x5a4   : > { %v19424_v23 = vld [vmem:[#allocation61_spill] sm:$0xff] }
 0x5a5   : > { %v6074_v62 = vrot.slane %v3721_v59, 1 }
 0x5a7   : > { %v6075_v19 = vsel %vm5991_vm0, %v6070_v35, %v6074_v62  ;;  %v19425_v35 = vld [vmem:[#allocation125_spill] sm:$0xff] }
 0x5a8   : > { %v15410_v6 = vadd.f32 %v6075_v19, %v19420_v18 }
 0x5a9   : > { %v3824_v53 = vpop.f32.mrf.mxu2  ;;  %v3908_v45 = vpop.f32.mrf.mxu3 }
 0x5aa   : > { %19421 = vst [vmem:[#allocation169_spill] sm:$0xff] %v15410_v6  ;;  %v15412_v11 = vadd.f32 %v3908_v45, %v3819_v9  ;;  %v3723_v48 = vpop.f32.mrf.mxu1  ;;  %v3985_v46 = vpop.f32.mrf.mxu0 }
 0x5ab   : > { %v3724_v49 = vadd.f32 %v3723_v48, %v14929_v0  ;;  %v15415_v12 = vadd.f32 %v3985_v46, %v3897_v8 }
 0x5ad   : > { %v6078_v30 = vrot.slane %v3724_v49, 1  ;;  %4038 = vmatmul.bf16.gmra.mxu1 %v19422_v41  ;;  %4877 = vmatmul.bf16.gmra.mxu0 %v19423_v14  ;;  %v19427_v14 = vld [vmem:[#allocation126_spill] sm:$0xff] }
 0x5ae   : > { %4142 = vmatmul.bf16.gmra.mxu2 %v19424_v23  ;;  %4226 = vmatmul.bf16.gmra.mxu3 %v19325_v51 }
 0x5af   : > { %v6079_v19 = vsel %vm5991_vm0, %v6074_v62, %v6078_v30 }
 0x5b0   : > { %v15423_v9 = vadd.f32 %v6079_v19, %v19425_v35 }
 0x5b1   : > { %v3827_v18 = vpop.f32.mrf.mxu2  ;;  %v3911_v45 = vpop.f32.mrf.mxu3 }
 0x5b2   : > { %19426 = vst [vmem:[#allocation122_spill] sm:$0xff] %v15423_v9  ;;  %v3912_v59 = vadd.f32 %v3911_v45, %v3822_v38  ;;  %v3725_v0 = vpop.f32.mrf.mxu1  ;;  %v3987_v8 = vpop.f32.mrf.mxu0 }
 0x5b3   : > { %v3726_v46 = vadd.f32 %v3725_v0, %v14936_v4  ;;  %v15427_v48 = vadd.f32 %v3987_v8, %v15369_v55  ;;  %v19429_v0 = vld [vmem:[#allocation33_spill] sm:$0xff]  ;;  %v19430_v55 = vld [vmem:[#allocation14_spill] sm:$0xff] }
 0x5b4   : > { %v19431_v8 = vld [vmem:[#allocation65_spill] sm:$0xff] }
 0x5b5   : > { %v6082_v49 = vrot.slane %v3726_v46, 1 }
 0x5b7   : > { %v6083_v6 = vsel %vm5991_vm0, %v6078_v30, %v6082_v49  ;;  %v19432_v30 = vld [vmem:[#allocation40_spill] sm:$0xff] }
 0x5b8   : > { %v15431_v51 = vadd.f32 %v6083_v6, %v19427_v14 }
 0x5b9   : > { %v3829_v62 = vpop.f32.mrf.mxu2  ;;  %v3913_v23 = vpop.f32.mrf.mxu3 }
 0x5ba   : > { %19428 = vst [vmem:[#allocation170_spill] sm:$0xff] %v15431_v51  ;;  %v15433_v19 = vadd.f32 %v3913_v23, %v3824_v53  ;;  %v3728_v35 = vpop.f32.mrf.mxu1  ;;  %v3990_v9 = vpop.f32.mrf.mxu0 }
 0x5bb   : > { %v3729_v38 = vadd.f32 %v3728_v35, %v14939_v21  ;;  %v15436_v45 = vadd.f32 %v3990_v9, %v3902_v63 }
 0x5bd   : > { %v6086_v4 = vrot.slane %v3729_v38, 1  ;;  %4043 = vmatmul.bf16.gmra.mxu1 %v19429_v0  ;;  %4882 = vmatmul.bf16.gmra.mxu0 %v19430_v55  ;;  %v19434_v55 = vld [vmem:[#allocation48_spill] sm:$0xff] }
 0x5be   : > { %4147 = vmatmul.bf16.gmra.mxu2 %v19431_v8  ;;  %4231 = vmatmul.bf16.gmra.mxu3 %v19328_v50 }
 0x5bf   : > { %v6087_v6 = vsel %vm5991_vm0, %v6082_v49, %v6086_v4 }
 0x5c0   : > { %v15444_v53 = vadd.f32 %v6087_v6, %v19432_v30 }
 0x5c1   : > { %v3832_v14 = vpop.f32.mrf.mxu2  ;;  %v3916_v23 = vpop.f32.mrf.mxu3 }
 0x5c2   : > { %19433 = vst [vmem:[#allocation123_spill] sm:$0xff] %v15444_v53  ;;  %v3917_v46 = vadd.f32 %v3916_v23, %v3827_v18  ;;  %v3730_v21 = vpop.f32.mrf.mxu1  ;;  %v3992_v63 = vpop.f32.mrf.mxu0 }
 0x5c3   : > { %v3731_v9 = vadd.f32 %v3730_v21, %v14946_v29  ;;  %v15448_v35 = vadd.f32 %v3992_v63, %v15391_v24  ;;  %v19436_v21 = vld [vmem:[#allocation37_spill] sm:$0xff]  ;;  %v19437_v24 = vld [vmem:[#allocation18_spill] sm:$0xff] }
 0x5c4   : > { %v19438_v63 = vld [vmem:[#allocation69_spill] sm:$0xff] }
 0x5c5   : > { %v6090_v38 = vrot.slane %v3731_v9, 1 }
 0x5c7   : > { %v6091_v51 = vsel %vm5991_vm0, %v6086_v4, %v6090_v38  ;;  %v19439_v4 = vld [vmem:[#allocation39_spill] sm:$0xff] }
 0x5c8   : > { %v15452_v50 = vadd.f32 %v6091_v51, %v19434_v55 }
 0x5c9   : > { %v3834_v49 = vpop.f32.mrf.mxu2  ;;  %v3918_v8 = vpop.f32.mrf.mxu3 }
 0x5ca   : > { %19435 = vst [vmem:[#allocation124_spill] sm:$0xff] %v15452_v50  ;;  %v15454_v6 = vadd.f32 %v3918_v8, %v3829_v62  ;;  %v3733_v30 = vpop.f32.mrf.mxu1  ;;  %v3995_v53 = vpop.f32.mrf.mxu0 }
 0x5cb   : > { %v3734_v18 = vadd.f32 %v3733_v30, %v14949_v36  ;;  %v15457_v23 = vadd.f32 %v3995_v53, %v3907_v52 }
 0x5cd   : > { %v6094_v29 = vrot.slane %v3734_v18, 1  ;;  %4048 = vmatmul.bf16.gmra.mxu1 %v19436_v21  ;;  %4887 = vmatmul.bf16.gmra.mxu0 %v19437_v24  ;;  %v19441_v24 = vld [vmem:[#allocation47_spill] sm:$0xff] }
 0x5ce   : > { %4152 = vmatmul.bf16.gmra.mxu2 %v19438_v63  ;;  %4236 = vmatmul.bf16.gmra.mxu3 %v19331_v33 }
 0x5cf   : > { %v6095_v51 = vsel %vm5991_vm0, %v6090_v38, %v6094_v29 }
 0x5d0   : > { %v15465_v62 = vadd.f32 %v6095_v51, %v19439_v4 }
 0x5d1   : > { %v3921_v55 = vpop.f32.mrf.mxu3  ;;  %v4113_v8 = vpop.f32.mrf.mxu2 }
 0x5d2   : > { %19440 = vst [vmem:[#allocation125_spill] sm:$0xff] %v15465_v62  ;;  %v3922_v9 = vadd.f32 %v3921_v55, %v3832_v14  ;;  %v3735_v36 = vpop.f32.mrf.mxu1  ;;  %v3997_v52 = vpop.f32.mrf.mxu0 }
 0x5d3   : > { %v3736_v53 = vadd.f32 %v3735_v36, %v14956_v17  ;;  %v15469_v30 = vadd.f32 %v3997_v52, %v15412_v11  ;;  %v19444_v36 = vld [vmem:[#allocation45_spill] sm:$0xff]  ;;  %v19445_v11 = vld [vmem:[#allocation22_spill] sm:$0xff]  ;;  %v19446_v52 = vld [vmem:[#allocation75_spill] sm:$0xff] }
 0x5d5   : > { %v6098_v18 = vrot.slane %v3736_v53, 1 }
 0x5d7   : > { %v6099_v50 = vsel %vm5991_vm0, %v6094_v29, %v6098_v18  ;;  %v19447_v29 = vld [vmem:[#allocation128_spill] sm:$0xff] }
 0x5d8   : > { %v15473_v33 = vadd.f32 %v6099_v50, %v19441_v24 }
 0x5d9   : > { %v3923_v38 = vpop.f32.mrf.mxu3  ;;  %v15475_v63 = vpop.f32.mrf.mxu2 }
 0x5da   : > { %19442 = vst [vmem:[#allocation126_spill] sm:$0xff] %v15473_v33  ;;  %v3924_v51 = vadd.f32 %v3923_v38, %v3834_v49  ;;  %v3738_v4 = vpop.f32.mrf.mxu1  ;;  %v4000_v62 = vpop.f32.mrf.mxu0  ;;  %v19450_v33 = vld [vmem:[#allocation129_spill] sm:$0xff] }
 0x5db   : > { %v3739_v14 = vadd.f32 %v3738_v4, %v14961_v39  ;;  %v15478_v55 = vadd.f32 %v4000_v62, %v3912_v59 }
 0x5dd   : > { %19443 = vst [vmem:[#allocation40_spill] sm:$0xff] %v15478_v55  ;;  %v6102_v17 = vrot.slane %v3739_v14, 1  ;;  %4053 = vmatmul.bf16.gmra.mxu1 %v19444_v36  ;;  %4892 = vmatmul.bf16.gmra.mxu0 %v19445_v11 }
 0x5de   : > { %4157 = vmatmul.bf16.gmra.mxu2 %v19446_v52  ;;  %4241 = vmatmul.bf16.gmra.mxu3 %v19334_v43 }
 0x5df   : > { %v6103_v50 = vsel %vm5991_vm0, %v6098_v18, %v6102_v17 }
 0x5e0   : > { %v15486_v24 = vadd.f32 %v6103_v50, %v19447_v29 }
 0x5e1   : > { %v15488_v49 = vpop.f32.mrf.mxu2  ;;  %v4202_v53 = vpop.f32.mrf.mxu3 }
 0x5e2   : > { %19448 = vst [vmem:[#allocation48_spill] sm:$0xff] %v15486_v24  ;;  %v3740_v39 = vpop.f32.mrf.mxu1  ;;  %v4002_v59 = vpop.f32.mrf.mxu0 }
 0x5e3   : > { %v3741_v62 = vadd.f32 %v3740_v39, %v14970_v32  ;;  %v15492_v38 = vadd.f32 %v4002_v59, %v15433_v19  ;;  %v19453_v32 = vld [vmem:[#allocation53_spill] sm:$0xff]  ;;  %v19454_v19 = vld [vmem:[#allocation3_spill] sm:$0xff] }
 0x5e4   : > { %v19455_v39 = vld [vmem:[#allocation81_spill] sm:$0xff] }
 0x5e5   : > { %19449 = vst [vmem:[#allocation39_spill] sm:$0xff] %v15492_v38  ;;  %v6106_v4 = vrot.slane %v3741_v62, 1 }
 0x5e7   : > { %v6107_v14 = vsel %vm5991_vm0, %v6102_v17, %v6106_v4  ;;  %v19456_v17 = vld [vmem:[#allocation130_spill] sm:$0xff] }
 0x5e8   : > { %v15496_v43 = vadd.f32 %v6107_v14, %v19450_v33 }
 0x5e9   : > { %v15498_v18 = vpop.f32.mrf.mxu2  ;;  %v4204_v50 = vpop.f32.mrf.mxu3 }
 0x5ea   : > { %19451 = vst [vmem:[#allocation47_spill] sm:$0xff] %v15496_v43  ;;  %v3743_v29 = vpop.f32.mrf.mxu1  ;;  %v4005_v24 = vpop.f32.mrf.mxu0 }
 0x5eb   : > { %v3744_v11 = vadd.f32 %v3743_v29, %v14974_v58  ;;  %v15501_v52 = vadd.f32 %v4005_v24, %v3917_v46 }
 0x5ed   : > { %19452 = vst [vmem:[#allocation128_spill] sm:$0xff] %v15501_v52  ;;  %v6110_v55 = vrot.slane %v3744_v11, 1  ;;  %4058 = vmatmul.bf16.gmra.mxu1 %v19453_v32  ;;  %4897 = vmatmul.bf16.gmra.mxu0 %v19454_v19  ;;  %v19458_v19 = vld [vmem:[#allocation134_spill] sm:$0xff] }
 0x5ee   : > { %4162 = vmatmul.bf16.gmra.mxu2 %v19455_v39  ;;  %4246 = vmatmul.bf16.gmra.mxu3 %v19339_v56 }
 0x5ef   : > { %v6111_v33 = vsel %vm5991_vm0, %v6106_v4, %v6110_v55  ;;  %v19460_v4 = vld [vmem:[#allocation132_spill] sm:$0xff] }
 0x5f0   : > { %v15509_v59 = vadd.f32 %v6111_v33, %v19456_v17 }
 0x5f1   : > { %v15511_v62 = vpop.f32.mrf.mxu2  ;;  %v4207_v14 = vpop.f32.mrf.mxu3 }
 0x5f2   : > { %19457 = vst [vmem:[#allocation129_spill] sm:$0xff] %v15509_v59  ;;  %v3745_v58 = vpop.f32.mrf.mxu1  ;;  %v4007_v46 = vpop.f32.mrf.mxu0 }
 0x5f3   : > { %v3746_v11 = vadd.f32 %v3745_v58, %v14983_v40  ;;  %v15515_v24 = vadd.f32 %v4007_v46, %v15454_v6  ;;  %v19462_v58 = vld [vmem:[#allocation59_spill] sm:$0xff] }
 0x5f4   : > { %v19463_v46 = vld [vmem:[#allocation7_spill] sm:$0xff] }
 0x5f5   : > { %v6114_v29 = vrot.slane %v3746_v11, 1 }
 0x5f7   : > { %v6115_v43 = vsel %vm5991_vm0, %v6110_v55, %v6114_v29  ;;  %v15519_v56 = vadd.f32 %v6114_v29, %v19458_v19  ;;  %v19464_v55 = vld [vmem:[#allocation85_spill] sm:$0xff] }
 0x5f8   : > { %v15522_v39 = vadd.f32 %v6115_v43, %v19460_v4 }
 0x5f9   : > { %19459 = vst [vmem:[#allocation130_spill] sm:$0xff] %v15519_v56  ;;  %v15524_v33 = vpop.f32.mrf.mxu2  ;;  %v4209_v17 = vpop.f32.mrf.mxu3 }
 0x5fa   : > { %19461 = vst [vmem:[#allocation134_spill] sm:$0xff] %v15522_v39  ;;  %v4010_v59 = vpop.f32.mrf.mxu0  ;;  %v4024_v52 = vpop.f32.mrf.mxu1 }
 0x5fb   : > { %v15526_v38 = vadd.f32 %v4010_v59, %v3922_v9  ;;  %v4025_v40 = vadd.f32 %v4024_v52, %v14993_v44 }
 0x5fd   : > { %v4114_v6 = vadd.f32 %v4113_v8, %v4025_v40  ;;  %4063 = vmatmul.bf16.gmra.mxu1 %v19462_v58  ;;  %4902 = vmatmul.bf16.gmra.mxu0 %v19463_v46 }
 0x5fe   : > { %4167 = vmatmul.bf16.gmra.mxu2 %v19464_v55  ;;  %4251 = vmatmul.bf16.gmra.mxu3 %v19347_v34 }
 0x5ff   : > { %v4203_v43 = vadd.f32 %v4202_v53, %v4114_v6 }
 0x601   : > { %v15533_v19 = vpop.f32.mrf.mxu2  ;;  %v15535_v11 = vpop.f32.mrf.mxu3  ;;  %v5995_v59 = vrot.slane %v4203_v43, 1  ;;  %v19467_v43 = vld [vmem:[#allocation63_spill] sm:$0xff] }
 0x602   : > { %v4012_v29 = vpop.f32.mrf.mxu0  ;;  %v4026_v4 = vpop.f32.mrf.mxu1 }
 0x603   : > { %v15537_v9 = vadd.f32 %v4012_v29, %v3924_v51  ;;  %v4027_v44 = vadd.f32 %v4026_v4, %v15019_v47  ;;  %v19465_v51 = vld [vmem:[#allocation135_spill] sm:$0xff]  ;;  %v11196_v47 = vld [vmem:[%s18689_s1 + $0x770] sm:$0xf] }
 0x604   : > { %v19468_v4 = vld [vmem:[#allocation11_spill] sm:$0xff] }
 0x605   : > { %v4116_v8 = vadd.f32 %v15475_v63, %v4027_v44  ;;  %v12119_v63 = vld [vmem:[%s18689_s1 + $0x774] sm:$0xf0] }
 0x606   : > { %v11197_v44 = vor.u32 %v12119_v63, %v11196_v47 }
 0x607   : > { %v4205_v52 = vadd.f32 %v4204_v50, %v4116_v8  ;;  %v19469_v8 = vld [vmem:[#allocation89_spill] sm:$0xff] }
 0x608   : > { %5037 = vmatpush.bf16.msrb.mxu2 %v11197_v44 }
 0x609   : > { %v5996_v40 = vrot.slane %v4205_v52, 1  ;;  %v15541_v39 = vpop.f32.mrf.mxu2  ;;  %v15543_v56 = vpop.f32.mrf.mxu3  ;;  %v12117_v52 = vld [vmem:[%s18689_s1 + $0x764] sm:$0xf0] }
 0x60a   : > { %v4029_v53 = vpop.f32.mrf.mxu1  ;;  %v15545_v6 = vpop.f32.mrf.mxu0 }
 0x60b   : > { %v5997_v34 = vsel %vm5991_vm0, %v5995_v59, %v5996_v40  ;;  %v4030_v46 = vadd.f32 %v4029_v53, %v15041_v5 }
 0x60c   : > { %v15550_v29 = vadd.f32 %v5997_v34, %v19465_v51  ;;  %v11188_v34 = vld [vmem:[%s18689_s1 + $0x760] sm:$0xf] }
 0x60d   : > { %v4119_v50 = vadd.f32 %v15488_v49, %v4030_v46  ;;  %4068 = vmatmul.bf16.gmra.mxu1 %v19467_v43  ;;  %4907 = vmatmul.bf16.gmra.mxu0 %v19468_v4  ;;  %v11189_v53 = vor.u32 %v12117_v52, %v11188_v34 }
 0x60e   : > { %19466 = vst [vmem:[#allocation132_spill] sm:$0xff] %v15550_v29  ;;  %4172 = vmatmul.bf16.gmra.mxu2 %v19469_v8  ;;  %4256 = vmatmul.bf16.gmra.mxu3 %v19354_v7  ;;  %v12115_v29 = vld [vmem:[%s18689_s1 + $0x754] sm:$0xf0] }
 0x60f   : > { %v4208_v5 = vadd.f32 %v4207_v14, %v4119_v50  ;;  %5038 = vmatpush.bf16.msrb.mxu2 %v11189_v53  ;;  %v19470_v50 = vld [vmem:[#allocation136_spill] sm:$0xff] }
 0x611   : > { %v6000_v49 = vrot.slane %v4208_v5, 1  ;;  %v15569_v46 = vpop.f32.mrf.mxu2  ;;  %v15571_v59 = vpop.f32.mrf.mxu3  ;;  %v11180_v5 = vld [vmem:[%s18689_s1 + $0x750] sm:$0xf] }
 0x612   : > { %v4031_v51 = vpop.f32.mrf.mxu1  ;;  %v15573_v47 = vpop.f32.mrf.mxu0  ;;  %v11181_v52 = vor.u32 %v12115_v29, %v11180_v5  ;;  %v19472_v29 = vld [vmem:[#allocation102_spill] sm:$0xff]  ;;  %v12111_v5 = vld [vmem:[%s18689_s1 + $0x734] sm:$0xf0] }
 0x613   : > { %v6001_v14 = vsel %vm5991_vm0, %v5996_v40, %v6000_v49  ;;  %v4032_v63 = vadd.f32 %v4031_v51, %v15079_v20  ;;  %v11172_v20 = vld [vmem:[%s18689_s1 + $0x740] sm:$0xf]  ;;  %v12113_v40 = vld [vmem:[%s18689_s1 + $0x744] sm:$0xf0] }
 0x614   : > { %v15578_v44 = vadd.f32 %v6001_v14, %v19470_v50  ;;  %5039 = vmatpush.bf16.msrb.mxu2 %v11181_v52  ;;  %v11173_v50 = vor.u32 %v12113_v40, %v11172_v20  ;;  %v19474_v52 = vld [vmem:[#allocation67_spill] sm:$0xff]  ;;  %v19475_v20 = vld [vmem:[#allocation92_spill] sm:$0xff] }
 0x615   : > { %v4121_v34 = vadd.f32 %v15498_v18, %v4032_v63 }
 0x616   : > { %19471 = vst [vmem:[#allocation135_spill] sm:$0xff] %v15578_v44 }
 0x617   : > { %v4210_v7 = vadd.f32 %v4209_v17, %v4121_v34  ;;  %v11260_v34 = vld [vmem:[%s18689_s1 + $0x7f0] sm:$0xf] }
 0x618   : > { %5040 = vmatpush.bf16.msrb.mxu2 %v11173_v50 }
 0x619   : > { %v6004_v53 = vrot.slane %v4210_v7, 1  ;;  %v15593_v51 = vpop.f32.mrf.mxu2  ;;  %v15595_v14 = vpop.f32.mrf.mxu3  ;;  %v11164_v7 = vld [vmem:[%s18689_s1 + $0x730] sm:$0xf] }
 0x61a   : > { %v4034_v44 = vpop.f32.mrf.mxu1  ;;  %v15597_v4 = vpop.f32.mrf.mxu0 }
 0x61b   : > { %v6005_v18 = vsel %vm5991_vm0, %v6000_v49, %v6004_v53  ;;  %v4035_v17 = vadd.f32 %v4034_v44, %v15113_v13  ;;  %v11165_v13 = vor.u32 %v12111_v5, %v11164_v7  ;;  %v12135_v44 = vld [vmem:[%s18689_s1 + $0x7f4] sm:$0xf0] }
 0x61c   : > { %v15602_v63 = vadd.f32 %v6005_v18, %v19472_v29  ;;  %v11261_v40 = vor.u32 %v12135_v44, %v11260_v34  ;;  %v12109_v18 = vld [vmem:[%s18689_s1 + $0x724] sm:$0xf0] }
 0x61d   : > { %v4124_v49 = vadd.f32 %v15511_v62, %v4035_v17  ;;  %4073 = vmatmul.bf16.gmra.mxu1 %v19474_v52  ;;  %4912 = vmatmul.bf16.gmra.mxu0 %v19330_v26  ;;  %v11156_v62 = vld [vmem:[%s18689_s1 + $0x720] sm:$0xf]  ;;  %v12133_v34 = vld [vmem:[%s18689_s1 + $0x7e4] sm:$0xf0] }
 0x61e   : > { %19473 = vst [vmem:[#allocation136_spill] sm:$0xff] %v15602_v63  ;;  %4177 = vmatmul.bf16.gmra.mxu2 %v19475_v20  ;;  %4261 = vmatmul.bf16.gmra.mxu3 %v19361_v3  ;;  %v11252_v17 = vld [vmem:[%s18689_s1 + $0x7e0] sm:$0xf]  ;;  %v19476_v3 = vld [vmem:[#allocation104_spill] sm:$0xff]  ;;  %v19502_v20 = vld [vmem:[#allocation143_spill] sm:$0xff] }
 0x61f   : > { %v4213_v50 = vadd.f32 %v15535_v11, %v4124_v49  ;;  %5041 = vmatpush.bf16.msrb.mxu2 %v11165_v13  ;;  %5126 = vmatpush.bf16.msrb.mxu3 %v11261_v40  ;;  %v11157_v11 = vor.u32 %v12109_v18, %v11156_v62  ;;  %v11253_v44 = vor.u32 %v12133_v34, %v11252_v17  ;;  %v11148_v62 = vld [vmem:[%s18689_s1 + $0x710] sm:$0xf]  ;;  %v12107_v18 = vld [vmem:[%s18689_s1 + $0x714] sm:$0xf0] }
 0x620   : > { %v11244_v17 = vld [vmem:[%s18689_s1 + $0x7d0] sm:$0xf] }
 0x621   : > { %v6008_v29 = vrot.slane %v4213_v50, 1  ;;  %v15631_v7 = vpop.f32.mrf.mxu2  ;;  %v15633_v5 = vpop.f32.mrf.mxu3 }
 0x622   : > { %v4036_v49 = vpop.f32.mrf.mxu1  ;;  %v15638_v13 = vpop.f32.mrf.mxu0 }
 0x623   : > { %v6009_v40 = vsel %vm5991_vm0, %v6004_v53, %v6008_v29  ;;  %v4037_v63 = vadd.f32 %v4036_v49, %v15139_v28  ;;  %5042 = vmatpush.bf16.msrb.mxu2 %v11157_v11  ;;  %5127 = vmatpush.bf16.msrb.mxu3 %v11253_v44  ;;  %v11149_v28 = vor.u32 %v12107_v18, %v11148_v62  ;;  %v11140_v49 = vld [vmem:[%s18689_s1 + $0x700] sm:$0xf]  ;;  %v12105_v44 = vld [vmem:[%s18689_s1 + $0x704] sm:$0xf0] }
 0x624   : > { %v15643_v50 = vadd.f32 %v6009_v40, %v19476_v3  ;;  %v12131_v3 = vld [vmem:[%s18689_s1 + $0x7d4] sm:$0xf0]  ;;  %v12129_v18 = vld [vmem:[%s18689_s1 + $0x7c4] sm:$0xf0] }
 0x625   : > { %v4126_v53 = vadd.f32 %v15524_v33, %v4037_v63  ;;  %v11245_v11 = vor.u32 %v12131_v3, %v11244_v17  ;;  %v11236_v33 = vld [vmem:[%s18689_s1 + $0x7c0] sm:$0xf] }
 0x626   : > { %19477 = vst [vmem:[#allocation102_spill] sm:$0xff] %v15643_v50  ;;  %v19478_v50 = vld [vmem:[#allocation137_spill] sm:$0xff] }
 0x627   : > { %v4215_v34 = vadd.f32 %v15543_v56, %v4126_v53  ;;  %5043 = vmatpush.bf16.msrb.mxu2 %v11149_v28  ;;  %5128 = vmatpush.bf16.msrb.mxu3 %v11245_v11  ;;  %v11141_v56 = vor.u32 %v12105_v44, %v11140_v49  ;;  %v11237_v28 = vor.u32 %v12129_v18, %v11236_v33  ;;  %v11228_v49 = vld [vmem:[%s18689_s1 + $0x7b0] sm:$0xf]  ;;  %v12127_v44 = vld [vmem:[%s18689_s1 + $0x7b4] sm:$0xf0]  ;;  %v19480_v33 = vld [vmem:[#allocation71_spill] sm:$0xff] }
 0x629   : > { %v6012_v63 = vrot.slane %v4215_v34, 1  ;;  %v15668_v40 = vpop.f32.mrf.mxu2  ;;  %v15670_v62 = vpop.f32.mrf.mxu3 }
 0x62a   : > { %v4039_v17 = vpop.f32.mrf.mxu1  ;;  %v15675_v53 = vpop.f32.mrf.mxu0 }
 0x62b   : > { %v6013_v3 = vsel %vm5991_vm0, %v6008_v29, %v6012_v63  ;;  %v4040_v11 = vadd.f32 %v4039_v17, %v15161_v15  ;;  %5044 = vmatpush.bf16.msrb.mxu2 %v11141_v56  ;;  %5129 = vmatpush.bf16.msrb.mxu3 %v11237_v28  ;;  %v11229_v15 = vor.u32 %v12127_v44, %v11228_v49  ;;  %v19481_v29 = vld [vmem:[#allocation94_spill] sm:$0xff] }
 0x62c   : > { %v15680_v34 = vadd.f32 %v6013_v3, %v19478_v50  ;;  %v11220_v56 = vld [vmem:[%s18689_s1 + $0x7a0] sm:$0xf] }
 0x62d   : > { %v4129_v26 = vadd.f32 %v15533_v19, %v4040_v11  ;;  %4078 = vmatmul.bf16.gmra.mxu1 %v19480_v33  ;;  %4917 = vmatmul.bf16.gmra.mxu0 %v19333_v60  ;;  %v12125_v19 = vld [vmem:[%s18689_s1 + $0x7a4] sm:$0xf0]  ;;  %v19482_v44 = vld [vmem:[#allocation138_spill] sm:$0xff] }
 0x62e   : > { %19479 = vst [vmem:[#allocation104_spill] sm:$0xff] %v15680_v34  ;;  %4182 = vmatmul.bf16.gmra.mxu2 %v19481_v29  ;;  %4266 = vmatmul.bf16.gmra.mxu3 %v19369_v16  ;;  %v11221_v3 = vor.u32 %v12125_v19, %v11220_v56  ;;  %v12123_v34 = vld [vmem:[%s18689_s1 + $0x794] sm:$0xf0]  ;;  %v19498_v29 = vld [vmem:[#allocation142_spill] sm:$0xff] }
 0x62f   : > { %v4218_v50 = vadd.f32 %v15571_v59, %v4129_v26  ;;  %5130 = vmatpush.bf16.msrb.mxu3 %v11229_v15 }
 0x631   : > { %v6016_v18 = vrot.slane %v4218_v50, 1  ;;  %v15700_v17 = vpop.f32.mrf.mxu2  ;;  %v15702_v28 = vpop.f32.mrf.mxu3  ;;  %v11212_v50 = vld [vmem:[%s18689_s1 + $0x790] sm:$0xf] }
 0x632   : > { %v4041_v11 = vpop.f32.mrf.mxu1  ;;  %v15704_v49 = vpop.f32.mrf.mxu0  ;;  %v11213_v19 = vor.u32 %v12123_v34, %v11212_v50 }
 0x633   : > { %v6017_v26 = vsel %vm5991_vm0, %v6012_v63, %v6016_v18  ;;  %v4042_v59 = vadd.f32 %v4041_v11, %v15187_v27  ;;  %5131 = vmatpush.bf16.msrb.mxu3 %v11221_v3  ;;  %v11204_v27 = vld [vmem:[%s18689_s1 + $0x780] sm:$0xf]  ;;  %v12121_v63 = vld [vmem:[%s18689_s1 + $0x784] sm:$0xf0] }
 0x634   : > { %v15709_v15 = vadd.f32 %v6017_v26, %v19482_v44  ;;  %v11205_v44 = vor.u32 %v12121_v63, %v11204_v27  ;;  %v19486_v27 = vld [vmem:[#allocation77_spill] sm:$0xff]  ;;  %v11124_v63 = vld [vmem:[%s18689_s1 + $0x6e0] sm:$0xf] }
 0x635   : > { %v4131_v56 = vadd.f32 %v15541_v39, %v4042_v59  ;;  %v19484_v59 = vld [vmem:[#allocation139_spill] sm:$0xff] }
 0x636   : > { %19483 = vst [vmem:[#allocation137_spill] sm:$0xff] %v15709_v15 }
 0x637   : > { %v4220_v16 = vadd.f32 %v15595_v14, %v4131_v56  ;;  %5132 = vmatpush.bf16.msrb.mxu3 %v11213_v19  ;;  %v12103_v56 = vld [vmem:[%s18689_s1 + $0x6f4] sm:$0xf0] }
 0x639   : > { %v6020_v3 = vrot.slane %v4220_v16, 1  ;;  %v15725_v11 = vpop.f32.mrf.mxu2  ;;  %v15727_v26 = vpop.f32.mrf.mxu3  ;;  %v11132_v16 = vld [vmem:[%s18689_s1 + $0x6f0] sm:$0xf] }
 0x63a   : > { %v4044_v15 = vpop.f32.mrf.mxu1  ;;  %v15729_v39 = vpop.f32.mrf.mxu0 }
 0x63b   : > { %v6021_v14 = vsel %vm5991_vm0, %v6016_v18, %v6020_v3  ;;  %v4045_v34 = vadd.f32 %v4044_v15, %v15209_v54  ;;  %5133 = vmatpush.bf16.msrb.mxu3 %v11205_v44  ;;  %v11133_v18 = vor.u32 %v12103_v56, %v11132_v16  ;;  %v19487_v54 = vld [vmem:[#allocation95_spill] sm:$0xff] }
 0x63c   : > { %v15734_v50 = vadd.f32 %v6021_v14, %v19484_v59 }
 0x63d   : > { %v4134_v19 = vadd.f32 %v15569_v46, %v4045_v34  ;;  %4083 = vmatmul.bf16.gmra.mxu1 %v19486_v27  ;;  %4922 = vmatmul.bf16.gmra.mxu0 %v19336_v37  ;;  %v12101_v46 = vld [vmem:[%s18689_s1 + $0x6e4] sm:$0xf0]  ;;  %v12099_v37 = vld [vmem:[%s18689_s1 + $0x6d4] sm:$0xf0] }
 0x63e   : > { %19485 = vst [vmem:[#allocation138_spill] sm:$0xff] %v15734_v50  ;;  %4187 = vmatmul.bf16.gmra.mxu2 %v19487_v54  ;;  %4271 = vmatmul.bf16.gmra.mxu3 %v19379_v2  ;;  %v11125_v59 = vor.u32 %v12101_v46, %v11124_v63  ;;  %v19489_v50 = vld [vmem:[#allocation140_spill] sm:$0xff] }
 0x63f   : > { %v4223_v15 = vadd.f32 %v15633_v5, %v4134_v19  ;;  %4948 = vmatpush.bf16.msrb.mxu1 %v11133_v18  ;;  %v19488_v19 = vld [vmem:[#allocation107_spill] sm:$0xff] }
 0x641   : > { %v6024_v44 = vrot.slane %v4223_v15, 1  ;;  %v15754_v14 = vpop.f32.mrf.mxu2  ;;  %v15756_v34 = vpop.f32.mrf.mxu3  ;;  %v11116_v15 = vld [vmem:[%s18689_s1 + $0x6d0] sm:$0xf] }
 0x642   : > { %v4046_v16 = vpop.f32.mrf.mxu1  ;;  %v15758_v56 = vpop.f32.mrf.mxu0  ;;  %v11117_v46 = vor.u32 %v12099_v37, %v11116_v15 }
 0x643   : > { %v6025_v5 = vsel %vm5991_vm0, %v6020_v3, %v6024_v44  ;;  %v4047_v18 = vadd.f32 %v4046_v16, %v19488_v19  ;;  %4949 = vmatpush.bf16.msrb.mxu1 %v11125_v59  ;;  %v11108_v3 = vld [vmem:[%s18689_s1 + $0x6c0] sm:$0xf] }
 0x644   : > { %v15763_v2 = vadd.f32 %v6025_v5, %v19489_v50  ;;  %v12097_v50 = vld [vmem:[%s18689_s1 + $0x6c4] sm:$0xf0] }
 0x645   : > { %v4136_v63 = vadd.f32 %v15593_v51, %v4047_v18  ;;  %v11109_v19 = vor.u32 %v12097_v50, %v11108_v3  ;;  %v19491_v18 = vld [vmem:[#allocation141_spill] sm:$0xff]  ;;  %v19493_v3 = vld [vmem:[#allocation83_spill] sm:$0xff] }
 0x646   : > { %19490 = vst [vmem:[#allocation139_spill] sm:$0xff] %v15763_v2  ;;  %v12151_v50 = vld [vmem:[%s18689_s1 + $0x874] sm:$0xf0] }
 0x647   : > { %v4225_v60 = vadd.f32 %v15670_v62, %v4136_v63  ;;  %4950 = vmatpush.bf16.msrb.mxu1 %v11117_v46  ;;  %v12095_v63 = vld [vmem:[%s18689_s1 + $0x6b4] sm:$0xf0]  ;;  %v11324_v46 = vld [vmem:[%s18689_s1 + $0x870] sm:$0xf] }
 0x649   : > { %v6028_v59 = vrot.slane %v4225_v60, 1  ;;  %v15779_v16 = vpop.f32.mrf.mxu2  ;;  %v15781_v5 = vpop.f32.mrf.mxu3  ;;  %v11100_v60 = vld [vmem:[%s18689_s1 + $0x6b0] sm:$0xf] }
 0x64a   : > { %v4049_v2 = vpop.f32.mrf.mxu1  ;;  %v15783_v51 = vpop.f32.mrf.mxu0 }
 0x64b   : > { %v6029_v37 = vsel %vm5991_vm0, %v6024_v44, %v6028_v59  ;;  %v4050_v62 = vadd.f32 %v4049_v2, %v15281_v57  ;;  %4951 = vmatpush.bf16.msrb.mxu1 %v11109_v19  ;;  %v19494_v57 = vld [vmem:[#allocation8_spill] sm:$0xff]  ;;  %v11101_v2 = vor.u32 %v12095_v63, %v11100_v60  ;;  %v19495_v19 = vld [vmem:[#allocation117_spill] sm:$0xff]  ;;  %v11316_v60 = vld [vmem:[%s18689_s1 + $0x860] sm:$0xf] }
 0x64c   : > { %v15788_v15 = vadd.f32 %v6029_v37, %v19491_v18  ;;  %v19496_v37 = vld [vmem:[#allocation13_spill] sm:$0xff]  ;;  %v11325_v18 = vor.u32 %v12151_v50, %v11324_v46 }
 0x64d   : > { %v4139_v44 = vadd.f32 %v15631_v7, %v4050_v62  ;;  %4088 = vmatmul.bf16.gmra.mxu1 %v19493_v3  ;;  %4927 = vmatmul.bf16.gmra.mxu0 %v19494_v57  ;;  %v11092_v7 = vld [vmem:[%s18689_s1 + $0x6a0] sm:$0xf]  ;;  %v12093_v62 = vld [vmem:[%s18689_s1 + $0x6a4] sm:$0xf0] }
 0x64e   : > { %19492 = vst [vmem:[#allocation107_spill] sm:$0xff] %v15788_v15  ;;  %4276 = vmatmul.bf16.gmra.mxu3 %v19495_v19  ;;  %5045 = vmatmul.bf16.vlgmr.msrb.gmra.mxu2 %v19496_v37  ;;  %v19497_v37 = vld [vmem:[#allocation110_spill] sm:$0xff] }
 0x64f   : > { %v4228_v15 = vadd.f32 %v15702_v28, %v4139_v44  ;;  %4952 = vmatpush.bf16.msrb.mxu1 %v11101_v2  ;;  %5215 = vmatpush.bf16.msrb.mxu0 %v11325_v18  ;;  %v11093_v28 = vor.u32 %v12093_v62, %v11092_v7  ;;  %v12149_v44 = vld [vmem:[%s18689_s1 + $0x864] sm:$0xf0]  ;;  %v11084_v7 = vld [vmem:[%s18689_s1 + $0x690] sm:$0xf]  ;;  %v12091_v62 = vld [vmem:[%s18689_s1 + $0x694] sm:$0xf0] }
 0x650   : > { %v11317_v18 = vor.u32 %v12149_v44, %v11316_v60  ;;  %v11308_v60 = vld [vmem:[%s18689_s1 + $0x850] sm:$0xf]  ;;  %v11076_v44 = vld [vmem:[%s18689_s1 + $0x680] sm:$0xf] }
 0x651   : > { %v6032_v63 = vrot.slane %v4228_v15, 1  ;;  %v15817_v19 = vpop.f32.mrf.mxu2  ;;  %v15819_v46 = vpop.f32.mrf.mxu3 }
 0x652   : > { %v4051_v2 = vpop.f32.mrf.mxu1  ;;  %v15824_v50 = vpop.f32.mrf.mxu0 }
 0x653   : > { %v6033_v57 = vsel %vm5991_vm0, %v6028_v59, %v6032_v63  ;;  %v4052_v54 = vadd.f32 %v4051_v2, %v19497_v37  ;;  %4953 = vmatpush.bf16.msrb.mxu1 %v11093_v28  ;;  %5216 = vmatpush.bf16.msrb.mxu0 %v11317_v18  ;;  %v11085_v37 = vor.u32 %v12091_v62, %v11084_v7  ;;  %v12089_v2 = vld [vmem:[%s18689_s1 + $0x684] sm:$0xf0] }
 0x654   : > { %v15829_v15 = vadd.f32 %v6033_v57, %v19498_v29  ;;  %v12147_v29 = vld [vmem:[%s18689_s1 + $0x854] sm:$0xf0]  ;;  %v12145_v62 = vld [vmem:[%s18689_s1 + $0x844] sm:$0xf0] }
 0x655   : > { %v4141_v59 = vadd.f32 %v15668_v40, %v4052_v54  ;;  %v11309_v57 = vor.u32 %v12147_v29, %v11308_v60  ;;  %v11300_v40 = vld [vmem:[%s18689_s1 + $0x840] sm:$0xf] }
 0x656   : > { %19499 = vst [vmem:[#allocation140_spill] sm:$0xff] %v15829_v15 }
 0x657   : > { %v4230_v28 = vadd.f32 %v15727_v26, %v4141_v59  ;;  %4954 = vmatpush.bf16.msrb.mxu1 %v11085_v37  ;;  %5217 = vmatpush.bf16.msrb.mxu0 %v11309_v57  ;;  %v11077_v26 = vor.u32 %v12089_v2, %v11076_v44  ;;  %v11301_v37 = vor.u32 %v12145_v62, %v11300_v40  ;;  %v19501_v57 = vld [vmem:[#allocation112_spill] sm:$0xff]  ;;  %v12143_v2 = vld [vmem:[%s18689_s1 + $0x834] sm:$0xf0]  ;;  %v19504_v40 = vld [vmem:[#allocation87_spill] sm:$0xff] }
 0x658   : > { %v11292_v44 = vld [vmem:[%s18689_s1 + $0x830] sm:$0xf] }
 0x659   : > { %v6036_v54 = vrot.slane %v4230_v28, 1  ;;  %v15854_v18 = vpop.f32.mrf.mxu2  ;;  %v15856_v7 = vpop.f32.mrf.mxu3  ;;  %v11293_v62 = vor.u32 %v12143_v2, %v11292_v44 }
 0x65a   : > { %v4054_v60 = vpop.f32.mrf.mxu1  ;;  %v15861_v59 = vpop.f32.mrf.mxu0 }
 0x65b   : > { %19500 = vst [vmem:[#allocation141_spill] sm:$0xff] %v15861_v59  ;;  %v6037_v29 = vsel %vm5991_vm0, %v6032_v63, %v6036_v54  ;;  %v4055_v15 = vadd.f32 %v4054_v60, %v19501_v57  ;;  %4955 = vmatpush.bf16.msrb.mxu1 %v11077_v26  ;;  %5218 = vmatpush.bf16.msrb.mxu0 %v11301_v37  ;;  %v19505_v63 = vld [vmem:[#allocation5_spill] sm:$0xff]  ;;  %v19506_v26 = vld [vmem:[#allocation16_spill] sm:$0xff]  ;;  %v11284_v60 = vld [vmem:[%s18689_s1 + $0x820] sm:$0xf] }
 0x65c   : > { %v15866_v28 = vadd.f32 %v6037_v29, %v19502_v20  ;;  %v19522_v59 = vld [vmem:[#allocation147_spill] sm:$0xff] }
 0x65d   : > { %v4144_v8 = vadd.f32 %v15700_v17, %v4055_v15  ;;  %4093 = vmatmul.bf16.gmra.mxu1 %v19504_v40  ;;  %4932 = vmatmul.bf16.gmra.mxu0 %v19505_v63  ;;  %v12141_v17 = vld [vmem:[%s18689_s1 + $0x824] sm:$0xf0] }
 0x65e   : > { %19503 = vst [vmem:[#allocation110_spill] sm:$0xff] %v15866_v28  ;;  %5050 = vmatmul.bf16.gmra.mxu2 %v19506_v26  ;;  %5134 = vmatmul.bf16.vlgmr.msrb.gmra.mxu3 %v19397_v22  ;;  %v11285_v57 = vor.u32 %v12141_v17, %v11284_v60  ;;  %v11276_v22 = vld [vmem:[%s18689_s1 + $0x810] sm:$0xf] }
 0x65f   : > { %v4233_v20 = vadd.f32 %v15756_v34, %v4144_v8  ;;  %5219 = vmatpush.bf16.msrb.mxu0 %v11293_v62  ;;  %v19508_v34 = vld [vmem:[#allocation144_spill] sm:$0xff] }
 0x661   : > { %v6040_v15 = vrot.slane %v4233_v20, 1  ;;  %v15886_v37 = vpop.f32.mrf.mxu2  ;;  %v4242_v29 = vpop.f32.mrf.mxu3  ;;  %v12139_v20 = vld [vmem:[%s18689_s1 + $0x814] sm:$0xf0] }
 0x662   : > { %v4056_v44 = vpop.f32.mrf.mxu1  ;;  %v15888_v2 = vpop.f32.mrf.mxu0  ;;  %v11277_v17 = vor.u32 %v12139_v20, %v11276_v22 }
 0x663   : > { %19507 = vst [vmem:[#allocation142_spill] sm:$0xff] %v15888_v2  ;;  %v6041_v28 = vsel %vm5991_vm0, %v6036_v54, %v6040_v15  ;;  %v4057_v8 = vadd.f32 %v4056_v44, %v15341_v42  ;;  %5220 = vmatpush.bf16.msrb.mxu0 %v11285_v57  ;;  %v11268_v42 = vld [vmem:[%s18689_s1 + $0x800] sm:$0xf]  ;;  %v12137_v54 = vld [vmem:[%s18689_s1 + $0x804] sm:$0xf0] }
 0x664   : > { %v15893_v62 = vadd.f32 %v6041_v28, %v19508_v34  ;;  %v11269_v34 = vor.u32 %v12137_v54, %v11268_v42  ;;  %v19516_v42 = vld [vmem:[#allocation21_spill] sm:$0xff] }
 0x665   : > { %v4146_v60 = vadd.f32 %v15725_v11, %v4057_v8 }
 0x666   : > { %19509 = vst [vmem:[#allocation112_spill] sm:$0xff] %v15893_v62 }
 0x667   : > { %v4235_v63 = vadd.f32 %v15781_v5, %v4146_v60  ;;  %5221 = vmatpush.bf16.msrb.mxu0 %v11277_v17  ;;  %v19511_v5 = vld [vmem:[#allocation145_spill] sm:$0xff]  ;;  %v19513_v60 = vld [vmem:[#allocation90_spill] sm:$0xff]  ;;  %v19515_v17 = vld [vmem:[#allocation20_spill] sm:$0xff] }
 0x669   : > { %v6044_v28 = vrot.slane %v4235_v63, 1  ;;  %v15909_v57 = vpop.f32.mrf.mxu2  ;;  %v4244_v44 = vpop.f32.mrf.mxu3  ;;  %v19514_v63 = vld [vmem:[#allocation9_spill] sm:$0xff] }
 0x66a   : > { %v4059_v62 = vpop.f32.mrf.mxu1  ;;  %v15911_v26 = vpop.f32.mrf.mxu0 }
 0x66b   : > { %19510 = vst [vmem:[#allocation143_spill] sm:$0xff] %v15911_v26  ;;  %v6045_v22 = vsel %vm5991_vm0, %v6040_v15, %v6044_v28  ;;  %v4060_v11 = vadd.f32 %v4059_v62, %v15351_v10  ;;  %5222 = vmatpush.bf16.msrb.mxu0 %v11269_v34 }
 0x66c   : > { %v15916_v8 = vadd.f32 %v6045_v22, %v19511_v5  ;;  %v19519_v5 = vld [vmem:[#allocation146_spill] sm:$0xff] }
 0x66d   : > { %v4149_v20 = vadd.f32 %v15754_v14, %v4060_v11  ;;  %4098 = vmatmul.bf16.gmra.mxu1 %v19513_v60  ;;  %4937 = vmatmul.bf16.gmra.mxu0 %v19514_v63  ;;  %v19518_v14 = vld [vmem:[#allocation116_spill] sm:$0xff] }
 0x66e   : > { %19512 = vst [vmem:[#allocation144_spill] sm:$0xff] %v15916_v8  ;;  %5055 = vmatmul.bf16.gmra.mxu2 %v19515_v17  ;;  %5139 = vmatmul.bf16.gmra.mxu3 %v19516_v42  ;;  %v19521_v60 = vld [vmem:[#allocation168_spill] sm:$0xff] }
 0x66f   : > { %v4238_v54 = vadd.f32 %v15819_v46, %v4149_v20 }
 0x671   : > { %v6048_v26 = vrot.slane %v4238_v54, 1  ;;  %v15924_v15 = vpop.f32.mrf.mxu2  ;;  %v4247_v10 = vpop.f32.mrf.mxu3 }
 0x672   : > { %v4061_v62 = vpop.f32.mrf.mxu1  ;;  %v15926_v22 = vpop.f32.mrf.mxu0 }
 0x673   : > { %19517 = vst [vmem:[#allocation145_spill] sm:$0xff] %v15926_v22  ;;  %v6049_v34 = vsel %vm5991_vm0, %v6044_v28, %v6048_v26  ;;  %v4062_v11 = vadd.f32 %v4061_v62, %v19518_v14  ;;  %v19524_v14 = vld [vmem:[#allocation12_spill] sm:$0xff] }
 0x674   : > { %v15931_v8 = vadd.f32 %v6049_v34, %v19519_v5 }
 0x675   : > { %v4151_v63 = vadd.f32 %v15779_v16, %v4062_v11  ;;  %v19525_v16 = vld [vmem:[#allocation23_spill] sm:$0xff] }
 0x676   : > { %19520 = vst [vmem:[#allocation116_spill] sm:$0xff] %v15931_v8 }
 0x677   : > { %v4240_v42 = vadd.f32 %v15856_v7, %v4151_v63  ;;  %v19526_v7 = vld [vmem:[#allocation24_spill] sm:$0xff] }
 0x679   : > { %v6052_v17 = vrot.slane %v4240_v42, 1  ;;  %v15935_v46 = vpop.f32.mrf.mxu2  ;;  %v4249_v20 = vpop.f32.mrf.mxu3 }
 0x67a   : > { %v4064_v54 = vpop.f32.mrf.mxu1  ;;  %v15937_v2 = vpop.f32.mrf.mxu0 }
 0x67b   : > { %v6053_v22 = vsel %vm5991_vm0, %v6048_v26, %v6052_v17  ;;  %v4065_v28 = vadd.f32 %v4064_v54, %v19521_v60 }
 0x67c   : > { %v15942_v62 = vadd.f32 %v6053_v22, %v19522_v59  ;;  %v19528_v22 = vld [vmem:[#allocation149_spill] sm:$0xff] }
 0x67d   : > { %v4154_v34 = vadd.f32 %v15817_v19, %v4065_v28  ;;  %4942 = vmatmul.bf16.gmra.mxu0 %v19524_v14  ;;  %4956 = vmatmul.bf16.vlgmr.msrb.gmra.mxu1 %v19525_v16 }
 0x67e   : > { %19523 = vst [vmem:[#allocation146_spill] sm:$0xff] %v15942_v62  ;;  %5060 = vmatmul.bf16.gmra.mxu2 %v19526_v7  ;;  %5144 = vmatmul.bf16.gmra.mxu3 %v19415_v61 }
 0x67f   : > { %v4243_v63 = vadd.f32 %v4242_v29, %v4154_v34 }
 0x681   : > { %v6056_v42 = vrot.slane %v4243_v63, 1  ;;  %v15949_v11 = vpop.f32.mrf.mxu2  ;;  %v4252_v26 = vpop.f32.mrf.mxu3 }
 0x682   : > { %v4066_v5 = vpop.f32.mrf.mxu1  ;;  %v15951_v60 = vpop.f32.mrf.mxu0 }
 0x683   : > { %19527 = vst [vmem:[#allocation168_spill] sm:$0xff] %v15951_v60  ;;  %v6057_v59 = vsel %vm5991_vm0, %v6052_v17, %v6056_v42  ;;  %v4067_v19 = vadd.f32 %v4066_v5, %v15385_v1  ;;  %v19530_v17 = vld [vmem:[#allocation150_spill] sm:$0xff] }
 0x684   : > { %v15956_v54 = vadd.f32 %v6057_v59, %v19528_v22  ;;  %v19532_v5 = vld [vmem:[#allocation26_spill] sm:$0xff] }
 0x685   : > { %v4156_v28 = vadd.f32 %v15854_v18, %v4067_v19  ;;  %v19533_v18 = vld [vmem:[#allocation27_spill] sm:$0xff] }
 0x686   : > { %19529 = vst [vmem:[#allocation147_spill] sm:$0xff] %v15956_v54 }
 0x687   : > { %v4245_v62 = vadd.f32 %v4244_v44, %v4156_v28  ;;  %v19534_v44 = vld [vmem:[#allocation28_spill] sm:$0xff] }
 0x689   : > { %v6060_v8 = vrot.slane %v4245_v62, 1  ;;  %v15959_v61 = vpop.f32.mrf.mxu2  ;;  %v4254_v29 = vpop.f32.mrf.mxu3 }
 0x68a   : > { %v4069_v34 = vpop.f32.mrf.mxu1  ;;  %v15961_v63 = vpop.f32.mrf.mxu0 }
 0x68b   : > { %v6061_v14 = vsel %vm5991_vm0, %v6056_v42, %v6060_v8  ;;  %v4070_v7 = vadd.f32 %v4069_v34, %v15394_v31 }
 0x68c   : > { %v15966_v60 = vadd.f32 %v6061_v14, %v19530_v17 }
 0x68d   : > { %v4159_v1 = vadd.f32 %v15886_v37, %v4070_v7  ;;  %4961 = vmatmul.bf16.gmra.mxu1 %v19532_v5  ;;  %5223 = vmatmul.bf16.vlgmr.msrb.gmra.mxu0 %v19533_v18  ;;  %v19535_v7 = vld [vmem:[#allocation151_spill] sm:$0xff] }
 0x68e   : > { %19531 = vst [vmem:[#allocation23_spill] sm:$0xff] %v15966_v60  ;;  %5065 = vmatmul.bf16.gmra.mxu2 %v19534_v44  ;;  %5149 = vmatmul.bf16.gmra.mxu3 %v19422_v41 }
 0x68f   : > { %v4248_v62 = vadd.f32 %v4247_v10, %v4159_v1 }
 0x691   : > { %v6064_v59 = vrot.slane %v4248_v62, 1  ;;  %v15973_v19 = vpop.f32.mrf.mxu2  ;;  %v4257_v42 = vpop.f32.mrf.mxu3 }
 0x692   : > { %v4071_v22 = vpop.f32.mrf.mxu1  ;;  %v15975_v31 = vpop.f32.mrf.mxu0 }
 0x693   : > { %v6065_v14 = vsel %vm5991_vm0, %v6060_v8, %v6064_v59  ;;  %v4072_v37 = vadd.f32 %v4071_v22, %v15406_v25  ;;  %v19537_v8 = vld [vmem:[#allocation152_spill] sm:$0xff]  ;;  %v19539_v22 = vld [vmem:[#allocation30_spill] sm:$0xff] }
 0x694   : > { %v15980_v28 = vadd.f32 %v6065_v14, %v19535_v7 }
 0x695   : > { %v4161_v34 = vadd.f32 %v15909_v57, %v4072_v37  ;;  %v19540_v57 = vld [vmem:[#allocation31_spill] sm:$0xff] }
 0x696   : > { %19536 = vst [vmem:[#allocation149_spill] sm:$0xff] %v15980_v28 }
 0x697   : > { %v4250_v17 = vadd.f32 %v4249_v20, %v4161_v34  ;;  %v19541_v20 = vld [vmem:[#allocation32_spill] sm:$0xff] }
 0x699   : > { %v6068_v60 = vrot.slane %v4250_v17, 1  ;;  %v15983_v54 = vpop.f32.mrf.mxu2  ;;  %v4259_v10 = vpop.f32.mrf.mxu3 }
 0x69a   : > { %v4074_v1 = vpop.f32.mrf.mxu1  ;;  %v15985_v62 = vpop.f32.mrf.mxu0 }
 0x69b   : > { %v6069_v41 = vsel %vm5991_vm0, %v6064_v59, %v6068_v60  ;;  %v4075_v18 = vadd.f32 %v4074_v1, %v15415_v12 }
 0x69c   : > { %v15990_v44 = vadd.f32 %v6069_v41, %v19537_v8 }
 0x69d   : > { %v4164_v25 = vadd.f32 %v15924_v15, %v4075_v18  ;;  %4966 = vmatmul.bf16.gmra.mxu1 %v19539_v22  ;;  %5228 = vmatmul.bf16.gmra.mxu0 %v19540_v57  ;;  %v19542_v18 = vld [vmem:[#allocation153_spill] sm:$0xff] }
 0x69e   : > { %19538 = vst [vmem:[#allocation150_spill] sm:$0xff] %v15990_v44  ;;  %5070 = vmatmul.bf16.gmra.mxu2 %v19541_v20  ;;  %5154 = vmatmul.bf16.gmra.mxu3 %v19429_v0 }
 0x69f   : > { %v4253_v14 = vadd.f32 %v4252_v26, %v4164_v25 }
 0x6a1   : > { %v6072_v37 = vrot.slane %v4253_v14, 1  ;;  %v15997_v7 = vpop.f32.mrf.mxu2  ;;  %v4262_v59 = vpop.f32.mrf.mxu3 }
 0x6a2   : > { %v4076_v34 = vpop.f32.mrf.mxu1  ;;  %v15999_v12 = vpop.f32.mrf.mxu0 }
 0x6a3   : > { %v6073_v41 = vsel %vm5991_vm0, %v6068_v60, %v6072_v37  ;;  %v4077_v15 = vadd.f32 %v4076_v34, %v15427_v48  ;;  %v19544_v60 = vld [vmem:[#allocation154_spill] sm:$0xff] }
 0x6a4   : > { %v16004_v17 = vadd.f32 %v6073_v41, %v19542_v18  ;;  %v19546_v34 = vld [vmem:[#allocation34_spill] sm:$0xff] }
 0x6a5   : > { %v4166_v1 = vadd.f32 %v15935_v46, %v4077_v15  ;;  %v19547_v46 = vld [vmem:[#allocation35_spill] sm:$0xff] }
 0x6a6   : > { %19543 = vst [vmem:[#allocation26_spill] sm:$0xff] %v16004_v17 }
 0x6a7   : > { %v4255_v8 = vadd.f32 %v4254_v29, %v4166_v1  ;;  %v19548_v29 = vld [vmem:[#allocation36_spill] sm:$0xff] }
 0x6a9   : > { %v6076_v44 = vrot.slane %v4255_v8, 1  ;;  %v16007_v28 = vpop.f32.mrf.mxu2  ;;  %v4264_v26 = vpop.f32.mrf.mxu3 }
 0x6aa   : > { %v4079_v25 = vpop.f32.mrf.mxu1  ;;  %v16009_v14 = vpop.f32.mrf.mxu0 }
 0x6ab   : > { %v6077_v0 = vsel %vm5991_vm0, %v6072_v37, %v6076_v44  ;;  %v4080_v57 = vadd.f32 %v4079_v25, %v15436_v45 }
 0x6ac   : > { %v16014_v20 = vadd.f32 %v6077_v0, %v19544_v60 }
 0x6ad   : > { %v4169_v48 = vadd.f32 %v15949_v11, %v4080_v57  ;;  %4971 = vmatmul.bf16.gmra.mxu1 %v19546_v34  ;;  %5233 = vmatmul.bf16.gmra.mxu0 %v19547_v46  ;;  %v19549_v57 = vld [vmem:[#allocation155_spill] sm:$0xff] }
 0x6ae   : > { %19545 = vst [vmem:[#allocation151_spill] sm:$0xff] %v16014_v20  ;;  %5075 = vmatmul.bf16.gmra.mxu2 %v19548_v29  ;;  %5159 = vmatmul.bf16.gmra.mxu3 %v19436_v21 }
 0x6af   : > { %v4258_v41 = vadd.f32 %v4257_v42, %v4169_v48 }
 0x6b1   : > { %v6080_v15 = vrot.slane %v4258_v41, 1  ;;  %v16021_v18 = vpop.f32.mrf.mxu2  ;;  %v4267_v37 = vpop.f32.mrf.mxu3 }
 0x6b2   : > { %v4081_v1 = vpop.f32.mrf.mxu1  ;;  %v16023_v45 = vpop.f32.mrf.mxu0 }
 0x6b3   : > { %v6081_v0 = vsel %vm5991_vm0, %v6076_v44, %v6080_v15  ;;  %v4082_v11 = vadd.f32 %v4081_v1, %v15448_v35  ;;  %v19551_v44 = vld [vmem:[#allocation127_spill] sm:$0xff]  ;;  %v19553_v1 = vld [vmem:[#allocation42_spill] sm:$0xff] }
 0x6b4   : > { %v16028_v8 = vadd.f32 %v6081_v0, %v19549_v57 }
 0x6b5   : > { %v4171_v25 = vadd.f32 %v15959_v61, %v4082_v11  ;;  %v19554_v61 = vld [vmem:[#allocation43_spill] sm:$0xff] }
 0x6b6   : > { %19550 = vst [vmem:[#allocation152_spill] sm:$0xff] %v16028_v8 }
 0x6b7   : > { %v4260_v60 = vadd.f32 %v4259_v10, %v4171_v25  ;;  %v19555_v10 = vld [vmem:[#allocation44_spill] sm:$0xff] }
 0x6b9   : > { %v6084_v20 = vrot.slane %v4260_v60, 1  ;;  %v16031_v17 = vpop.f32.mrf.mxu2  ;;  %v4269_v42 = vpop.f32.mrf.mxu3 }
 0x6ba   : > { %v4084_v48 = vpop.f32.mrf.mxu1  ;;  %v16033_v41 = vpop.f32.mrf.mxu0 }
 0x6bb   : > { %v6085_v21 = vsel %vm5991_vm0, %v6080_v15, %v6084_v20  ;;  %v4085_v46 = vadd.f32 %v4084_v48, %v15457_v23 }
 0x6bc   : > { %v16038_v29 = vadd.f32 %v6085_v21, %v19551_v44 }
 0x6bd   : > { %v4174_v35 = vadd.f32 %v15973_v19, %v4085_v46  ;;  %4976 = vmatmul.bf16.gmra.mxu1 %v19553_v1  ;;  %5238 = vmatmul.bf16.gmra.mxu0 %v19554_v61  ;;  %v19557_v46 = vld [vmem:[#allocation156_spill] sm:$0xff] }
 0x6be   : > { %19552 = vst [vmem:[#allocation30_spill] sm:$0xff] %v16038_v29  ;;  %5080 = vmatmul.bf16.gmra.mxu2 %v19555_v10  ;;  %5164 = vmatmul.bf16.gmra.mxu3 %v19444_v36  ;;  %v19560_v61 = vld [vmem:[#allocation40_spill] sm:$0xff] }
 0x6bf   : > { %v4263_v0 = vadd.f32 %v4262_v59, %v4174_v35 }
 0x6c1   : > { %v6088_v11 = vrot.slane %v4263_v0, 1  ;;  %v16045_v57 = vpop.f32.mrf.mxu2  ;;  %v4272_v15 = vpop.f32.mrf.mxu3 }
 0x6c2   : > { %v4086_v25 = vpop.f32.mrf.mxu1  ;;  %v16047_v23 = vpop.f32.mrf.mxu0 }
 0x6c3   : > { %19556 = vst [vmem:[#allocation153_spill] sm:$0xff] %v16047_v23  ;;  %v6089_v21 = vsel %vm5991_vm0, %v6084_v20, %v6088_v11  ;;  %v4087_v19 = vadd.f32 %v4086_v25, %v15469_v30  ;;  %v19561_v20 = vld [vmem:[#allocation157_spill] sm:$0xff]  ;;  %v19563_v25 = vld [vmem:[#allocation50_spill] sm:$0xff] }
 0x6c4   : > { %v16052_v60 = vadd.f32 %v6089_v21, %v19557_v46 }
 0x6c5   : > { %v4176_v48 = vadd.f32 %v15983_v54, %v4087_v19  ;;  %v19564_v54 = vld [vmem:[#allocation51_spill] sm:$0xff] }
 0x6c6   : > { %19558 = vst [vmem:[#allocation154_spill] sm:$0xff] %v16052_v60 }
 0x6c7   : > { %v4265_v44 = vadd.f32 %v4264_v26, %v4176_v48  ;;  %v19565_v26 = vld [vmem:[#allocation52_spill] sm:$0xff] }
 0x6c9   : > { %v6092_v29 = vrot.slane %v4265_v44, 1  ;;  %v16055_v8 = vpop.f32.mrf.mxu2  ;;  %v4274_v59 = vpop.f32.mrf.mxu3  ;;  %v19567_v44 = vld [vmem:[#allocation39_spill] sm:$0xff] }
 0x6ca   : > { %v4089_v35 = vpop.f32.mrf.mxu1  ;;  %v16057_v0 = vpop.f32.mrf.mxu0 }
 0x6cb   : > { %19559 = vst [vmem:[#allocation34_spill] sm:$0xff] %v16057_v0  ;;  %v6093_v36 = vsel %vm5991_vm0, %v6088_v11, %v6092_v29  ;;  %v4090_v10 = vadd.f32 %v4089_v35, %v19560_v61 }
 0x6cc   : > { %v16062_v23 = vadd.f32 %v6093_v36, %v19561_v20 }
 0x6cd   : > { %v4179_v30 = vadd.f32 %v15997_v7, %v4090_v10  ;;  %4981 = vmatmul.bf16.gmra.mxu1 %v19563_v25  ;;  %5243 = vmatmul.bf16.gmra.mxu0 %v19564_v54  ;;  %v19568_v10 = vld [vmem:[#allocation159_spill] sm:$0xff] }
 0x6ce   : > { %19562 = vst [vmem:[#allocation155_spill] sm:$0xff] %v16062_v23  ;;  %5085 = vmatmul.bf16.gmra.mxu2 %v19565_v26  ;;  %5169 = vmatmul.bf16.gmra.mxu3 %v19453_v32  ;;  %v19570_v26 = vld [vmem:[#allocation128_spill] sm:$0xff] }
 0x6cf   : > { %v4268_v21 = vadd.f32 %v4267_v37, %v4179_v30 }
 0x6d1   : > { %v6096_v19 = vrot.slane %v4268_v21, 1  ;;  %v4277_v46 = vpop.f32.mrf.mxu3  ;;  %v16069_v48 = vpop.f32.mrf.mxu2 }
 0x6d2   : > { %v4091_v11 = vpop.f32.mrf.mxu1  ;;  %v16071_v61 = vpop.f32.mrf.mxu0 }
 0x6d3   : > { %19566 = vst [vmem:[#allocation127_spill] sm:$0xff] %v16071_v61  ;;  %v6097_v36 = vsel %vm5991_vm0, %v6092_v29, %v6096_v19  ;;  %v4092_v7 = vadd.f32 %v4091_v11, %v19567_v44  ;;  %v19571_v29 = vld [vmem:[#allocation161_spill] sm:$0xff] }
 0x6d4   : > { %v16076_v35 = vadd.f32 %v6097_v36, %v19568_v10  ;;  %v19573_v36 = vld [vmem:[#allocation56_spill] sm:$0xff] }
 0x6d5   : > { %v4181_v20 = vadd.f32 %v16007_v28, %v4092_v7  ;;  %v19574_v28 = vld [vmem:[#allocation57_spill] sm:$0xff] }
 0x6d6   : > { %19569 = vst [vmem:[#allocation42_spill] sm:$0xff] %v16076_v35 }
 0x6d7   : > { %v4270_v23 = vadd.f32 %v4269_v42, %v4181_v20  ;;  %v19575_v42 = vld [vmem:[#allocation58_spill] sm:$0xff] }
 0x6d9   : > { %v6100_v60 = vrot.slane %v4270_v23, 1  ;;  %v4279_v32 = vpop.f32.mrf.mxu3  ;;  %v16079_v37 = vpop.f32.mrf.mxu2 }
 0x6da   : > { %v4094_v30 = vpop.f32.mrf.mxu1  ;;  %v16081_v21 = vpop.f32.mrf.mxu0 }
 0x6db   : > { %v6101_v54 = vsel %vm5991_vm0, %v6096_v19, %v6100_v60  ;;  %v4095_v61 = vadd.f32 %v4094_v30, %v19570_v26 }
 0x6dc   : > { %v16086_v0 = vadd.f32 %v6101_v54, %v19571_v29 }
 0x6dd   : > { %v4184_v11 = vadd.f32 %v16021_v18, %v4095_v61  ;;  %4986 = vmatmul.bf16.gmra.mxu1 %v19573_v36  ;;  %5248 = vmatmul.bf16.gmra.mxu0 %v19574_v28  ;;  %v19576_v61 = vld [vmem:[#allocation131_spill] sm:$0xff] }
 0x6de   : > { %19572 = vst [vmem:[#allocation156_spill] sm:$0xff] %v16086_v0  ;;  %5090 = vmatmul.bf16.gmra.mxu2 %v19575_v42  ;;  %5174 = vmatmul.bf16.gmra.mxu3 %v19462_v58 }
 0x6df   : > { %v4273_v23 = vadd.f32 %v4272_v15, %v4184_v11 }
 0x6e1   : > { %v6104_v44 = vrot.slane %v4273_v23, 1  ;;  %v16093_v7 = vpop.f32.mrf.mxu2  ;;  %v5135_v19 = vpop.f32.mrf.mxu3 }
 0x6e2   : > { %v4096_v10 = vpop.f32.mrf.mxu1  ;;  %v16095_v26 = vpop.f32.mrf.mxu0 }
 0x6e3   : > { %v6105_v54 = vsel %vm5991_vm0, %v6100_v60, %v6104_v44  ;;  %v4097_v18 = vadd.f32 %v4096_v10, %v15515_v24  ;;  %v19578_v60 = vld [vmem:[#allocation133_spill] sm:$0xff]  ;;  %v19580_v10 = vld [vmem:[#allocation60_spill] sm:$0xff] }
 0x6e4   : > { %v16100_v20 = vadd.f32 %v6105_v54, %v19576_v61 }
 0x6e5   : > { %v4186_v30 = vadd.f32 %v16031_v17, %v4097_v18  ;;  %v19581_v17 = vld [vmem:[#allocation61_spill] sm:$0xff] }
 0x6e6   : > { %19577 = vst [vmem:[#allocation40_spill] sm:$0xff] %v16100_v20 }
 0x6e7   : > { %v4275_v29 = vadd.f32 %v4274_v59, %v4186_v30  ;;  %v19582_v59 = vld [vmem:[#allocation62_spill] sm:$0xff] }
 0x6e9   : > { %v6108_v0 = vrot.slane %v4275_v29, 1  ;;  %v16103_v35 = vpop.f32.mrf.mxu2  ;;  %v5137_v15 = vpop.f32.mrf.mxu3 }
 0x6ea   : > { %v4099_v11 = vpop.f32.mrf.mxu1  ;;  %v16105_v23 = vpop.f32.mrf.mxu0 }
 0x6eb   : > { %v6109_v58 = vsel %vm5991_vm0, %v6104_v44, %v6108_v0  ;;  %v4100_v28 = vadd.f32 %v4099_v11, %v15526_v38 }
 0x6ec   : > { %v16110_v42 = vadd.f32 %v6109_v58, %v19578_v60 }
 0x6ed   : > { %v4189_v24 = vadd.f32 %v16045_v57, %v4100_v28  ;;  %4991 = vmatmul.bf16.gmra.mxu1 %v19580_v10  ;;  %5253 = vmatmul.bf16.gmra.mxu0 %v19581_v17  ;;  %v19583_v28 = vld [vmem:[#allocation162_spill] sm:$0xff]  ;;  %v19585_v17 = vld [vmem:[#allocation164_spill] sm:$0xff] }
 0x6ee   : > { %19579 = vst [vmem:[#allocation157_spill] sm:$0xff] %v16110_v42  ;;  %5095 = vmatmul.bf16.gmra.mxu2 %v19582_v59  ;;  %5179 = vmatmul.bf16.gmra.mxu3 %v19467_v43 }
 0x6ef   : > { %v4278_v54 = vadd.f32 %v4277_v46, %v4189_v24 }
 0x6f1   : > { %v6112_v18 = vrot.slane %v4278_v54, 1  ;;  %v16117_v61 = vpop.f32.mrf.mxu2  ;;  %v5140_v44 = vpop.f32.mrf.mxu3 }
 0x6f2   : > { %v4101_v30 = vpop.f32.mrf.mxu1  ;;  %v16119_v38 = vpop.f32.mrf.mxu0 }
 0x6f3   : > { %v6113_v58 = vsel %vm5991_vm0, %v6108_v0, %v6112_v18  ;;  %v4102_v57 = vadd.f32 %v4101_v30, %v15537_v9  ;;  %v19587_v0 = vld [vmem:[#allocation163_spill] sm:$0xff] }
 0x6f4   : > { %v16124_v29 = vadd.f32 %v6113_v58, %v19583_v28  ;;  %v19590_v58 = vld [vmem:[#allocation65_spill] sm:$0xff] }
 0x6f5   : > { %v4191_v11 = vadd.f32 %v16055_v8, %v4102_v57  ;;  %v19591_v57 = vld [vmem:[#allocation66_spill] sm:$0xff] }
 0x6f6   : > { %19584 = vst [vmem:[#allocation50_spill] sm:$0xff] %v16124_v29 }
 0x6f7   : > { %v4280_v60 = vadd.f32 %v4279_v32, %v4191_v11  ;;  %v19589_v32 = vld [vmem:[#allocation64_spill] sm:$0xff] }
 0x6f9   : > { %v6116_v42 = vrot.slane %v4280_v60, 1  ;;  %v16127_v20 = vpop.f32.mrf.mxu2  ;;  %v5142_v46 = vpop.f32.mrf.mxu3 }
 0x6fa   : > { %v16129_v24 = vpop.f32.mrf.mxu0  ;;  %v4957_v54 = vpop.f32.mrf.mxu1 }
 0x6fb   : > { %v6117_v43 = vsel %vm5991_vm0, %v6112_v18, %v6116_v42  ;;  %v16133_v59 = vadd.f32 %v6116_v42, %v19585_v17  ;;  %v4958_v9 = vadd.f32 %v4957_v54, %v15545_v6 }
 0x6fc   : > { %v16137_v30 = vadd.f32 %v6117_v43, %v19587_v0 }
 0x6fd   : > { %19586 = vst [vmem:[#allocation39_spill] sm:$0xff] %v16133_v59  ;;  %v5047_v8 = vadd.f32 %v16069_v48, %v4958_v9  ;;  %4996 = vmatmul.bf16.gmra.mxu1 %v19589_v32  ;;  %5258 = vmatmul.bf16.gmra.mxu0 %v19590_v58  ;;  %v19599_v58 = vld [vmem:[#allocation81_spill] sm:$0xff] }
 0x6fe   : > { %19588 = vst [vmem:[#allocation159_spill] sm:$0xff] %v16137_v30  ;;  %5100 = vmatmul.bf16.gmra.mxu2 %v19591_v57  ;;  %5184 = vmatmul.bf16.gmra.mxu3 %v19474_v52 }
 0x6ff   : > { %v5136_v28 = vadd.f32 %v5135_v19, %v5047_v8  ;;  %v12086_v8 = vld [vmem:[%s18689_s1 + $0x674] sm:$0xf] }
 0x701   : > { %v16144_v18 = vpop.f32.mrf.mxu2  ;;  %v5145_v42 = vpop.f32.mrf.mxu3 }
 0x702   : > { %v16146_v17 = vpop.f32.mrf.mxu0  ;;  %v4959_v6 = vpop.f32.mrf.mxu1 }
 0x703   : > { %v4960_v43 = vadd.f32 %v4959_v6, %v15573_v47  ;;  %v11070_v47 = vld [vmem:[%s18689_s1 + $0x678] sm:$0xf0] }
 0x704   : > { %v19593_v6 = vld [vmem:[#allocation69_spill] sm:$0xff] }
 0x705   : > { %v5049_v11 = vadd.f32 %v16079_v37, %v4960_v43  ;;  %v11073_v43 = vor.u32 %v12086_v8, %v11070_v47 }
 0x707   : > { %v5138_v48 = vadd.f32 %v5137_v15, %v5049_v11  ;;  %v19592_v15 = vld [vmem:[#allocation68_spill] sm:$0xff]  ;;  %v19594_v11 = vld [vmem:[#allocation70_spill] sm:$0xff]  ;;  %5393 = vmatpush.bf16.msra.mxu2 %v11073_v43 }
 0x709   : > { %v16150_v60 = vpop.f32.mrf.mxu2  ;;  %v16152_v54 = vpop.f32.mrf.mxu3 }
 0x70a   : > { %v4962_v9 = vpop.f32.mrf.mxu1  ;;  %v5224_v0 = vpop.f32.mrf.mxu0 }
 0x70b   : > { %v4963_v30 = vadd.f32 %v4962_v9, %v15597_v4  ;;  %v16155_v19 = vadd.f32 %v5224_v0, %v5136_v28  ;;  %v12084_v28 = vld [vmem:[%s18689_s1 + $0x664] sm:$0xf]  ;;  %v11062_v9 = vld [vmem:[%s18689_s1 + $0x668] sm:$0xf0] }
 0x70c   : > { %v11065_v0 = vor.u32 %v12084_v28, %v11062_v9 }
 0x70d   : > { %v5052_v37 = vadd.f32 %v16093_v7, %v4963_v30  ;;  %5001 = vmatmul.bf16.gmra.mxu1 %v19592_v15  ;;  %5263 = vmatmul.bf16.gmra.mxu0 %v19593_v6  ;;  %v19598_v6 = vld [vmem:[#allocation80_spill] sm:$0xff] }
 0x70e   : > { %5105 = vmatmul.bf16.gmra.mxu2 %v19594_v11  ;;  %5189 = vmatmul.bf16.gmra.mxu3 %v19480_v33  ;;  %v19612_v11 = vld [vmem:[#allocation91_spill] sm:$0xff] }
 0x70f   : > { %v5141_v4 = vadd.f32 %v5140_v44, %v5052_v37  ;;  %5394 = vmatpush.bf16.msra.mxu2 %v11065_v0  ;;  %v12082_v44 = vld [vmem:[%s18689_s1 + $0x654] sm:$0xf]  ;;  %v11054_v37 = vld [vmem:[%s18689_s1 + $0x658] sm:$0xf0] }
 0x710   : > { %v11057_v33 = vor.u32 %v12082_v44, %v11054_v37  ;;  %v12102_v44 = vld [vmem:[%s18689_s1 + $0x6f4] sm:$0xf] }
 0x711   : > { %v16174_v7 = vpop.f32.mrf.mxu2  ;;  %v16176_v30 = vpop.f32.mrf.mxu3 }
 0x712   : > { %v4964_v8 = vpop.f32.mrf.mxu1  ;;  %v5226_v47 = vpop.f32.mrf.mxu0 }
 0x713   : > { %v4965_v59 = vadd.f32 %v4964_v8, %v15638_v13  ;;  %v16179_v29 = vadd.f32 %v5226_v47, %v5138_v48  ;;  %5395 = vmatpush.bf16.msra.mxu2 %v11057_v33  ;;  %v12080_v13 = vld [vmem:[%s18689_s1 + $0x644] sm:$0xf]  ;;  %v11046_v48 = vld [vmem:[%s18689_s1 + $0x648] sm:$0xf0]  ;;  %v12078_v33 = vld [vmem:[%s18689_s1 + $0x634] sm:$0xf] }
 0x714   : > { %v11049_v0 = vor.u32 %v12080_v13, %v11046_v48  ;;  %v11134_v13 = vld [vmem:[%s18689_s1 + $0x6f8] sm:$0xf0]  ;;  %v19597_v48 = vld [vmem:[#allocation76_spill] sm:$0xff] }
 0x715   : > { %v5054_v43 = vadd.f32 %v16103_v35, %v4965_v59 }
 0x717   : > { %v5143_v52 = vadd.f32 %v5142_v46, %v5054_v43  ;;  %5396 = vmatpush.bf16.msra.mxu2 %v11049_v0  ;;  %v11038_v46 = vld [vmem:[%s18689_s1 + $0x638] sm:$0xf0]  ;;  %v19595_v43 = vld [vmem:[#allocation74_spill] sm:$0xff]  ;;  %v11137_v0 = vor.u32 %v12102_v44, %v11134_v13 }
 0x719   : > { %v16194_v28 = vpop.f32.mrf.mxu2  ;;  %v16196_v9 = vpop.f32.mrf.mxu3  ;;  %5482 = vmatpush.bf16.msra.mxu3 %v11137_v0 }
 0x71a   : > { %v4967_v8 = vpop.f32.mrf.mxu1  ;;  %v5229_v47 = vpop.f32.mrf.mxu0 }
 0x71b   : > { %v4968_v35 = vadd.f32 %v4967_v8, %v15675_v53  ;;  %v16199_v59 = vadd.f32 %v5229_v47, %v5141_v4  ;;  %v19596_v53 = vld [vmem:[#allocation75_spill] sm:$0xff]  ;;  %v11041_v4 = vor.u32 %v12078_v33, %v11038_v46 }
 0x71c   : > { %v11030_v47 = vld [vmem:[%s18689_s1 + $0x628] sm:$0xf0] }
 0x71d   : > { %v5057_v37 = vadd.f32 %v16117_v61, %v4968_v35  ;;  %5006 = vmatmul.bf16.gmra.mxu1 %v19595_v43  ;;  %5268 = vmatmul.bf16.gmra.mxu0 %v19596_v53  ;;  %v12076_v61 = vld [vmem:[%s18689_s1 + $0x624] sm:$0xf]  ;;  %v12074_v53 = vld [vmem:[%s18689_s1 + $0x614] sm:$0xf] }
 0x71e   : > { %5110 = vmatmul.bf16.gmra.mxu2 %v19597_v48  ;;  %5194 = vmatmul.bf16.gmra.mxu3 %v19486_v27  ;;  %v12100_v35 = vld [vmem:[%s18689_s1 + $0x6e4] sm:$0xf]  ;;  %v11033_v44 = vor.u32 %v12076_v61, %v11030_v47  ;;  %v11022_v61 = vld [vmem:[%s18689_s1 + $0x618] sm:$0xf0]  ;;  %v12098_v47 = vld [vmem:[%s18689_s1 + $0x6d4] sm:$0xf] }
 0x71f   : > { %v5146_v8 = vadd.f32 %v5145_v42, %v5057_v37  ;;  %5397 = vmatpush.bf16.msra.mxu2 %v11041_v4  ;;  %v11126_v42 = vld [vmem:[%s18689_s1 + $0x6e8] sm:$0xf0]  ;;  %v12110_v48 = vld [vmem:[%s18689_s1 + $0x734] sm:$0xf] }
 0x720   : > { %v11129_v13 = vor.u32 %v12100_v35, %v11126_v42  ;;  %v11025_v42 = vor.u32 %v12074_v53, %v11022_v61 }
 0x721   : > { %v16227_v33 = vpop.f32.mrf.mxu2  ;;  %v16229_v46 = vpop.f32.mrf.mxu3 }
 0x722   : > { %v4969_v37 = vpop.f32.mrf.mxu1  ;;  %v5231_v4 = vpop.f32.mrf.mxu0  ;;  %5483 = vmatpush.bf16.msra.mxu3 %v11129_v13 }
 0x723   : > { %v4970_v0 = vadd.f32 %v4969_v37, %v15704_v49  ;;  %v16235_v27 = vadd.f32 %v5231_v4, %v5143_v52  ;;  %5398 = vmatpush.bf16.msra.mxu2 %v11033_v44  ;;  %v11118_v52 = vld [vmem:[%s18689_s1 + $0x6d8] sm:$0xf0]  ;;  %v12072_v37 = vld [vmem:[%s18689_s1 + $0x604] sm:$0xf]  ;;  %v11014_v4 = vld [vmem:[%s18689_s1 + $0x608] sm:$0xf0] }
 0x724   : > { %v11121_v49 = vor.u32 %v12098_v47, %v11118_v52 }
 0x725   : > { %v5059_v35 = vadd.f32 %v16127_v20, %v4970_v0  ;;  %v12096_v20 = vld [vmem:[%s18689_s1 + $0x6c4] sm:$0xf]  ;;  %v11017_v0 = vor.u32 %v12072_v37, %v11014_v4  ;;  %v11102_v37 = vld [vmem:[%s18689_s1 + $0x6b8] sm:$0xf0] }
 0x726   : > { %5484 = vmatpush.bf16.msra.mxu3 %v11121_v49  ;;  %v12094_v49 = vld [vmem:[%s18689_s1 + $0x6b4] sm:$0xf] }
 0x727   : > { %v5148_v44 = vadd.f32 %v16152_v54, %v5059_v35  ;;  %5399 = vmatpush.bf16.msra.mxu2 %v11025_v42  ;;  %v11110_v54 = vld [vmem:[%s18689_s1 + $0x6c8] sm:$0xf0] }
 0x728   : > { %v11113_v35 = vor.u32 %v12096_v20, %v11110_v54  ;;  %v11105_v20 = vor.u32 %v12094_v49, %v11102_v37 }
 0x729   : > { %v16260_v53 = vpop.f32.mrf.mxu2  ;;  %v16262_v13 = vpop.f32.mrf.mxu3 }
 0x72a   : > { %v4972_v61 = vpop.f32.mrf.mxu1  ;;  %v5234_v47 = vpop.f32.mrf.mxu0  ;;  %5485 = vmatpush.bf16.msra.mxu3 %v11113_v35 }
 0x72b   : > { %v4973_v42 = vadd.f32 %v4972_v61, %v15729_v39  ;;  %v16268_v52 = vadd.f32 %v5234_v47, %v5146_v8  ;;  %5400 = vmatpush.bf16.msra.mxu2 %v11017_v0  ;;  %v19600_v39 = vld [vmem:[#allocation82_spill] sm:$0xff] }
 0x72c   : > { %v12092_v0 = vld [vmem:[%s18689_s1 + $0x6a4] sm:$0xf] }
 0x72d   : > { %v5062_v4 = vadd.f32 %v16144_v18, %v4973_v42  ;;  %5011 = vmatmul.bf16.gmra.mxu1 %v19598_v6  ;;  %5273 = vmatmul.bf16.gmra.mxu0 %v19599_v58  ;;  %v11094_v18 = vld [vmem:[%s18689_s1 + $0x6a8] sm:$0xf0] }
 0x72e   : > { %5115 = vmatmul.bf16.gmra.mxu2 %v19600_v39  ;;  %5199 = vmatmul.bf16.gmra.mxu3 %v19493_v3  ;;  %v11097_v47 = vor.u32 %v12092_v0, %v11094_v18  ;;  %v11340_v39 = vld [vmem:[%s18689_s1 + $0x890] sm:$0xf] }
 0x72f   : > { %v5151_v8 = vadd.f32 %v16176_v30, %v5062_v4  ;;  %5486 = vmatpush.bf16.msra.mxu3 %v11105_v20  ;;  %v12090_v30 = vld [vmem:[%s18689_s1 + $0x694] sm:$0xf]  ;;  %v11086_v4 = vld [vmem:[%s18689_s1 + $0x698] sm:$0xf0] }
 0x730   : > { %v11089_v3 = vor.u32 %v12090_v30, %v11086_v4  ;;  %v19601_v4 = vld [vmem:[#allocation84_spill] sm:$0xff] }
 0x731   : > { %v16288_v54 = vpop.f32.mrf.mxu2  ;;  %v16290_v61 = vpop.f32.mrf.mxu3 }
 0x732   : > { %v4974_v35 = vpop.f32.mrf.mxu1  ;;  %v5236_v42 = vpop.f32.mrf.mxu0 }
 0x733   : > { %v4975_v49 = vadd.f32 %v4974_v35, %v15758_v56  ;;  %v16293_v37 = vadd.f32 %v5236_v42, %v5148_v44  ;;  %5487 = vmatpush.bf16.msra.mxu3 %v11097_v47  ;;  %v12088_v56 = vld [vmem:[%s18689_s1 + $0x684] sm:$0xf]  ;;  %v11078_v44 = vld [vmem:[%s18689_s1 + $0x688] sm:$0xf0] }
 0x734   : > { %v11081_v35 = vor.u32 %v12088_v56, %v11078_v44  ;;  %v19602_v56 = vld [vmem:[#allocation86_spill] sm:$0xff] }
 0x735   : > { %v5064_v20 = vadd.f32 %v16150_v60, %v4975_v49 }
 0x737   : > { %v5153_v0 = vadd.f32 %v16196_v9, %v5064_v20  ;;  %5488 = vmatpush.bf16.msra.mxu3 %v11089_v3  ;;  %v11388_v3 = vld [vmem:[%s18689_s1 + $0x8f0] sm:$0xf]  ;;  %v12167_v9 = vld [vmem:[%s18689_s1 + $0x8f4] sm:$0xf0] }
 0x738   : > { %v11389_v20 = vor.u32 %v12167_v9, %v11388_v3 }
 0x739   : > { %v16309_v18 = vpop.f32.mrf.mxu2  ;;  %v16311_v47 = vpop.f32.mrf.mxu3 }
 0x73a   : > { %v4977_v42 = vpop.f32.mrf.mxu1  ;;  %v5239_v58 = vpop.f32.mrf.mxu0  ;;  %5304 = vmatpush.bf16.msra.mxu1 %v11389_v20 }
 0x73b   : > { %v4978_v60 = vadd.f32 %v4977_v42, %v15783_v51  ;;  %v16314_v49 = vadd.f32 %v5239_v58, %v5151_v8  ;;  %5489 = vmatpush.bf16.msra.mxu3 %v11081_v35  ;;  %v11380_v58 = vld [vmem:[%s18689_s1 + $0x8e0] sm:$0xf] }
 0x73d   : > { %v5067_v30 = vadd.f32 %v16174_v7, %v4978_v60  ;;  %5016 = vmatmul.bf16.gmra.mxu1 %v19601_v4  ;;  %5278 = vmatmul.bf16.gmra.mxu0 %v19464_v55  ;;  %v12165_v7 = vld [vmem:[%s18689_s1 + $0x8e4] sm:$0xf0] }
 0x73e   : > { %5120 = vmatmul.bf16.gmra.mxu2 %v19602_v56  ;;  %5204 = vmatmul.bf16.gmra.mxu3 %v19504_v40  ;;  %v11381_v35 = vor.u32 %v12165_v7, %v11380_v58 }
 0x73f   : > { %v5156_v51 = vadd.f32 %v16229_v46, %v5067_v30  ;;  %v11372_v46 = vld [vmem:[%s18689_s1 + $0x8d0] sm:$0xf]  ;;  %v12163_v30 = vld [vmem:[%s18689_s1 + $0x8d4] sm:$0xf0] }
 0x740   : > { %5305 = vmatpush.bf16.msra.mxu1 %v11381_v35  ;;  %v11373_v40 = vor.u32 %v12163_v30, %v11372_v46  ;;  %v12118_v30 = vld [vmem:[%s18689_s1 + $0x774] sm:$0xf] }
 0x741   : > { %v16334_v8 = vpop.f32.mrf.mxu2  ;;  %v16336_v44 = vpop.f32.mrf.mxu3 }
 0x742   : > { %v4979_v42 = vpop.f32.mrf.mxu1  ;;  %v5241_v60 = vpop.f32.mrf.mxu0 }
 0x743   : > { %v4980_v3 = vadd.f32 %v4979_v42, %v15824_v50  ;;  %v16339_v9 = vadd.f32 %v5241_v60, %v5153_v0  ;;  %v11364_v50 = vld [vmem:[%s18689_s1 + $0x8c0] sm:$0xf]  ;;  %v12161_v0 = vld [vmem:[%s18689_s1 + $0x8c4] sm:$0xf0] }
 0x744   : > { %5306 = vmatpush.bf16.msra.mxu1 %v11373_v40  ;;  %v11365_v42 = vor.u32 %v12161_v0, %v11364_v50  ;;  %v11356_v40 = vld [vmem:[%s18689_s1 + $0x8b0] sm:$0xf]  ;;  %v19605_v0 = vld [vmem:[#allocation89_spill] sm:$0xff] }
 0x745   : > { %v5069_v20 = vadd.f32 %v16194_v28, %v4980_v3  ;;  %v19603_v28 = vld [vmem:[#allocation141_spill] sm:$0xff]  ;;  %v19604_v50 = vld [vmem:[#allocation88_spill] sm:$0xff] }
 0x747   : > { %v5158_v58 = vadd.f32 %v16262_v13, %v5069_v20  ;;  %v12159_v13 = vld [vmem:[%s18689_s1 + $0x8b4] sm:$0xf0] }
 0x748   : > { %5307 = vmatpush.bf16.msra.mxu1 %v11365_v42  ;;  %v19606_v42 = vld [vmem:[#allocation90_spill] sm:$0xff] }
 0x749   : > { %v16355_v7 = vpop.f32.mrf.mxu2  ;;  %v16357_v35 = vpop.f32.mrf.mxu3 }
 0x74a   : > { %v4982_v60 = vpop.f32.mrf.mxu1  ;;  %v5244_v55 = vpop.f32.mrf.mxu0 }
 0x74b   : > { %v4983_v3 = vadd.f32 %v4982_v60, %v19603_v28  ;;  %v16360_v46 = vadd.f32 %v5244_v55, %v5156_v51  ;;  %v11357_v55 = vor.u32 %v12159_v13, %v11356_v40  ;;  %v11198_v51 = vld [vmem:[%s18689_s1 + $0x778] sm:$0xf0]  ;;  %v19607_v60 = vld [vmem:[#allocation2_spill] sm:$0xff] }
 0x74c   : > { %v11201_v28 = vor.u32 %v12118_v30, %v11198_v51  ;;  %v12116_v40 = vld [vmem:[%s18689_s1 + $0x764] sm:$0xf] }
 0x74d   : > { %v5072_v20 = vadd.f32 %v16227_v33, %v4983_v3  ;;  %5021 = vmatmul.bf16.gmra.mxu1 %v19604_v50  ;;  %5283 = vmatmul.bf16.gmra.mxu0 %v19605_v0  ;;  %v11348_v33 = vld [vmem:[%s18689_s1 + $0x8a0] sm:$0xf]  ;;  %v12157_v3 = vld [vmem:[%s18689_s1 + $0x8a4] sm:$0xf0] }
 0x74e   : > { %5209 = vmatmul.bf16.gmra.mxu3 %v19606_v42  ;;  %5401 = vmatmul.bf16.vlgmr.msra.gmra.mxu2 %v19607_v60  ;;  %v11349_v30 = vor.u32 %v12157_v3, %v11348_v33  ;;  %v12155_v33 = vld [vmem:[%s18689_s1 + $0x894] sm:$0xf0]  ;;  %v12114_v3 = vld [vmem:[%s18689_s1 + $0x754] sm:$0xf] }
 0x74f   : > { %v5161_v56 = vadd.f32 %v16290_v61, %v5072_v20  ;;  %5308 = vmatpush.bf16.msra.mxu1 %v11357_v55  ;;  %5571 = vmatpush.bf16.msra.mxu0 %v11201_v28  ;;  %v11190_v61 = vld [vmem:[%s18689_s1 + $0x768] sm:$0xf0]  ;;  %v19608_v28 = vld [vmem:[#allocation142_spill] sm:$0xff] }
 0x750   : > { %v11193_v51 = vor.u32 %v12116_v40, %v11190_v61  ;;  %v11341_v61 = vor.u32 %v12155_v33, %v11340_v39 }
 0x751   : > { %v16389_v13 = vpop.f32.mrf.mxu2  ;;  %v16391_v60 = vpop.f32.mrf.mxu3 }
 0x752   : > { %v4984_v20 = vpop.f32.mrf.mxu1  ;;  %v5246_v55 = vpop.f32.mrf.mxu0 }
 0x753   : > { %v4985_v42 = vadd.f32 %v4984_v20, %v19608_v28  ;;  %v16397_v0 = vadd.f32 %v5246_v55, %v5158_v58  ;;  %5309 = vmatpush.bf16.msra.mxu1 %v11349_v30  ;;  %5572 = vmatpush.bf16.msra.mxu0 %v11193_v51  ;;  %v11182_v58 = vld [vmem:[%s18689_s1 + $0x758] sm:$0xf0]  ;;  %v11332_v55 = vld [vmem:[%s18689_s1 + $0x880] sm:$0xf]  ;;  %v12153_v51 = vld [vmem:[%s18689_s1 + $0x884] sm:$0xf0] }
 0x754   : > { %v11185_v30 = vor.u32 %v12114_v3, %v11182_v58  ;;  %v11333_v28 = vor.u32 %v12153_v51, %v11332_v55  ;;  %v11166_v55 = vld [vmem:[%s18689_s1 + $0x738] sm:$0xf0] }
 0x755   : > { %19609 = vst [vmem:[#allocation128_spill] sm:$0xff] %v16397_v0  ;;  %v5074_v40 = vadd.f32 %v16260_v53, %v4985_v42  ;;  %v12112_v53 = vld [vmem:[%s18689_s1 + $0x744] sm:$0xf]  ;;  %v19613_v0 = vld [vmem:[#allocation92_spill] sm:$0xff] }
 0x757   : > { %v5163_v20 = vadd.f32 %v16311_v47, %v5074_v40  ;;  %5310 = vmatpush.bf16.msra.mxu1 %v11341_v61  ;;  %5573 = vmatpush.bf16.msra.mxu0 %v11185_v30  ;;  %v11174_v47 = vld [vmem:[%s18689_s1 + $0x748] sm:$0xf0] }
 0x758   : > { %v11177_v40 = vor.u32 %v12112_v53, %v11174_v47  ;;  %v19610_v61 = vld [vmem:[#allocation143_spill] sm:$0xff]  ;;  %v11169_v53 = vor.u32 %v12110_v48, %v11166_v55  ;;  %v19614_v47 = vld [vmem:[#allocation6_spill] sm:$0xff] }
 0x759   : > { %v16422_v39 = vpop.f32.mrf.mxu2  ;;  %v5172_v42 = vpop.f32.mrf.mxu3 }
 0x75a   : > { %v4987_v33 = vpop.f32.mrf.mxu1  ;;  %v5249_v3 = vpop.f32.mrf.mxu0 }
 0x75b   : > { %v4988_v58 = vadd.f32 %v4987_v33, %v19610_v61  ;;  %v16428_v30 = vadd.f32 %v5249_v3, %v5161_v56  ;;  %5311 = vmatpush.bf16.msra.mxu1 %v11333_v28  ;;  %5574 = vmatpush.bf16.msra.mxu0 %v11177_v40  ;;  %v12108_v28 = vld [vmem:[%s18689_s1 + $0x724] sm:$0xf] }
 0x75d   : > { %19611 = vst [vmem:[#allocation161_spill] sm:$0xff] %v16428_v30  ;;  %v5077_v51 = vadd.f32 %v16288_v54, %v4988_v58  ;;  %5026 = vmatmul.bf16.gmra.mxu1 %v19612_v11  ;;  %5288 = vmatmul.bf16.gmra.mxu0 %v19613_v0  ;;  %v11158_v54 = vld [vmem:[%s18689_s1 + $0x728] sm:$0xf0]  ;;  %v19615_v58 = vld [vmem:[#allocation145_spill] sm:$0xff] }
 0x75e   : > { %5406 = vmatmul.bf16.gmra.mxu2 %v19614_v47  ;;  %5490 = vmatmul.bf16.vlgmr.msra.gmra.mxu3 %v19525_v16  ;;  %v11161_v40 = vor.u32 %v12108_v28, %v11158_v54  ;;  %v11142_v54 = vld [vmem:[%s18689_s1 + $0x708] sm:$0xf0] }
 0x75f   : > { %v5166_v56 = vadd.f32 %v16336_v44, %v5077_v51  ;;  %5575 = vmatpush.bf16.msra.mxu0 %v11169_v53  ;;  %v12106_v44 = vld [vmem:[%s18689_s1 + $0x714] sm:$0xf]  ;;  %v11150_v51 = vld [vmem:[%s18689_s1 + $0x718] sm:$0xf0] }
 0x760   : > { %v11153_v47 = vor.u32 %v12106_v44, %v11150_v51  ;;  %v19619_v44 = vld [vmem:[#allocation94_spill] sm:$0xff] }
 0x761   : > { %v16448_v33 = vpop.f32.mrf.mxu2  ;;  %v5175_v3 = vpop.f32.mrf.mxu3  ;;  %v19620_v51 = vld [vmem:[#allocation10_spill] sm:$0xff] }
 0x762   : > { %v4989_v48 = vpop.f32.mrf.mxu1  ;;  %v5251_v61 = vpop.f32.mrf.mxu0 }
 0x763   : > { %v4990_v55 = vadd.f32 %v4989_v48, %v19615_v58  ;;  %v16451_v16 = vadd.f32 %v5251_v61, %v5163_v20  ;;  %5576 = vmatpush.bf16.msra.mxu0 %v11161_v40  ;;  %v12104_v20 = vld [vmem:[%s18689_s1 + $0x704] sm:$0xf] }
 0x764   : > { %v11145_v61 = vor.u32 %v12104_v20, %v11142_v54 }
 0x765   : > { %19616 = vst [vmem:[#allocation56_spill] sm:$0xff] %v16451_v16  ;;  %v5079_v53 = vadd.f32 %v16309_v18, %v4990_v55  ;;  %v19618_v55 = vld [vmem:[#allocation93_spill] sm:$0xff] }
 0x767   : > { %v5168_v28 = vadd.f32 %v16357_v35, %v5079_v53  ;;  %5577 = vmatpush.bf16.msra.mxu0 %v11153_v47 }
 0x769   : > { %v5093_v40 = vpop.f32.mrf.mxu2  ;;  %v5177_v48 = vpop.f32.mrf.mxu3 }
 0x76a   : > { %v4992_v58 = vpop.f32.mrf.mxu1  ;;  %v5254_v0 = vpop.f32.mrf.mxu0 }
 0x76b   : > { %v4993_v16 = vadd.f32 %v4992_v58, %v15937_v2  ;;  %v16468_v18 = vadd.f32 %v5254_v0, %v5166_v56  ;;  %5578 = vmatpush.bf16.msra.mxu0 %v11145_v61  ;;  %v19621_v2 = vld [vmem:[#allocation168_spill] sm:$0xff] }
 0x76d   : > { %19617 = vst [vmem:[#allocation131_spill] sm:$0xff] %v16468_v18  ;;  %v5082_v35 = vadd.f32 %v16334_v8, %v4993_v16  ;;  %5031 = vmatmul.bf16.gmra.mxu1 %v19618_v55  ;;  %5293 = vmatmul.bf16.gmra.mxu0 %v19619_v44  ;;  %v19623_v55 = vld [vmem:[#allocation96_spill] sm:$0xff] }
 0x76e   : > { %5411 = vmatmul.bf16.gmra.mxu2 %v19620_v51  ;;  %5495 = vmatmul.bf16.gmra.mxu3 %v19532_v5 }
 0x76f   : > { %v5171_v53 = vadd.f32 %v16391_v60, %v5082_v35  ;;  %v19622_v35 = vld [vmem:[#allocation95_spill] sm:$0xff] }
 0x771   : > { %v5096_v47 = vpop.f32.mrf.mxu2  ;;  %v5180_v20 = vpop.f32.mrf.mxu3 }
 0x772   : > { %v4994_v54 = vpop.f32.mrf.mxu1  ;;  %v5256_v30 = vpop.f32.mrf.mxu0 }
 0x773   : > { %v4995_v0 = vadd.f32 %v4994_v54, %v19621_v2  ;;  %v16477_v56 = vadd.f32 %v5256_v30, %v5168_v28  ;;  %v19624_v54 = vld [vmem:[#allocation14_spill] sm:$0xff] }
 0x775   : > { %v5084_v8 = vadd.f32 %v16355_v7, %v4995_v0 }
 0x777   : > { %v5173_v16 = vadd.f32 %v5172_v42, %v5084_v8 }
 0x779   : > { %v5098_v61 = vpop.f32.mrf.mxu2  ;;  %v5182_v58 = vpop.f32.mrf.mxu3 }
 0x77a   : > { %v4997_v44 = vpop.f32.mrf.mxu1  ;;  %v5259_v18 = vpop.f32.mrf.mxu0 }
 0x77b   : > { %v4998_v51 = vadd.f32 %v4997_v44, %v15961_v63  ;;  %v16481_v5 = vadd.f32 %v5259_v18, %v5171_v53 }
 0x77d   : > { %v5087_v60 = vadd.f32 %v16389_v13, %v4998_v51  ;;  %5298 = vmatmul.bf16.gmra.mxu0 %v19622_v35  ;;  %5312 = vmatmul.bf16.vlgmr.msra.gmra.mxu1 %v19623_v55 }
 0x77e   : > { %5416 = vmatmul.bf16.gmra.mxu2 %v19624_v54  ;;  %5500 = vmatmul.bf16.gmra.mxu3 %v19539_v22 }
 0x77f   : > { %v5176_v7 = vadd.f32 %v5175_v3, %v5087_v60  ;;  %v19626_v3 = vld [vmem:[#allocation97_spill] sm:$0xff] }
 0x780   : > { %v19627_v60 = vld [vmem:[#allocation13_spill] sm:$0xff] }
 0x781   : > { %v5101_v42 = vpop.f32.mrf.mxu2  ;;  %v5185_v30 = vpop.f32.mrf.mxu3 }
 0x782   : > { %v4999_v28 = vpop.f32.mrf.mxu1  ;;  %v5261_v2 = vpop.f32.mrf.mxu0 }
 0x783   : > { %v5000_v0 = vadd.f32 %v4999_v28, %v15975_v31  ;;  %v16489_v63 = vadd.f32 %v5261_v2, %v5173_v16  ;;  %v19628_v31 = vld [vmem:[#allocation18_spill] sm:$0xff] }
 0x785   : > { %v5089_v18 = vadd.f32 %v16422_v39, %v5000_v0 }
 0x787   : > { %v5178_v13 = vadd.f32 %v5177_v48, %v5089_v18 }
 0x789   : > { %v5103_v44 = vpop.f32.mrf.mxu2  ;;  %v5187_v53 = vpop.f32.mrf.mxu3 }
 0x78a   : > { %v5002_v8 = vpop.f32.mrf.mxu1  ;;  %v5264_v51 = vpop.f32.mrf.mxu0 }
 0x78b   : > { %v5003_v54 = vadd.f32 %v5002_v8, %v15985_v62  ;;  %v16493_v35 = vadd.f32 %v5264_v51, %v5176_v7 }
 0x78d   : > { %19625 = vst [vmem:[#allocation133_spill] sm:$0xff] %v16493_v35  ;;  %v5092_v22 = vadd.f32 %v16448_v33, %v5003_v54  ;;  %5317 = vmatmul.bf16.gmra.mxu1 %v19626_v3  ;;  %5579 = vmatmul.bf16.vlgmr.msra.gmra.mxu0 %v19627_v60  ;;  %v19631_v35 = vld [vmem:[#allocation22_spill] sm:$0xff] }
 0x78e   : > { %5421 = vmatmul.bf16.gmra.mxu2 %v19628_v31  ;;  %5505 = vmatmul.bf16.gmra.mxu3 %v19546_v34 }
 0x78f   : > { %v5181_v39 = vadd.f32 %v5180_v20, %v5092_v22  ;;  %v19629_v20 = vld [vmem:[#allocation98_spill] sm:$0xff]  ;;  %v19630_v22 = vld [vmem:[#allocation16_spill] sm:$0xff] }
 0x791   : > { %v5106_v48 = vpop.f32.mrf.mxu2  ;;  %v5190_v16 = vpop.f32.mrf.mxu3 }
 0x792   : > { %v5004_v28 = vpop.f32.mrf.mxu1  ;;  %v5266_v2 = vpop.f32.mrf.mxu0 }
 0x793   : > { %v5005_v0 = vadd.f32 %v5004_v28, %v15999_v12  ;;  %v16501_v62 = vadd.f32 %v5266_v2, %v5178_v13 }
 0x795   : > { %v5094_v7 = vadd.f32 %v5093_v40, %v5005_v0 }
 0x797   : > { %v5183_v18 = vadd.f32 %v5182_v58, %v5094_v7 }
 0x799   : > { %v5108_v33 = vpop.f32.mrf.mxu2  ;;  %v5192_v8 = vpop.f32.mrf.mxu3 }
 0x79a   : > { %v5007_v51 = vpop.f32.mrf.mxu1  ;;  %v5269_v54 = vpop.f32.mrf.mxu0 }
 0x79b   : > { %v5008_v60 = vadd.f32 %v5007_v51, %v16009_v14  ;;  %v16504_v31 = vadd.f32 %v5269_v54, %v5181_v39 }
 0x79d   : > { %v5097_v34 = vadd.f32 %v5096_v47, %v5008_v60  ;;  %5322 = vmatmul.bf16.gmra.mxu1 %v19629_v20  ;;  %5584 = vmatmul.bf16.gmra.mxu0 %v19630_v22  ;;  %v19636_v22 = vld [vmem:[#allocation3_spill] sm:$0xff] }
 0x79e   : > { %5426 = vmatmul.bf16.gmra.mxu2 %v19631_v35  ;;  %5510 = vmatmul.bf16.gmra.mxu3 %v19553_v1 }
 0x79f   : > { %v5186_v12 = vadd.f32 %v5185_v30, %v5097_v34  ;;  %v19634_v30 = vld [vmem:[#allocation99_spill] sm:$0xff]  ;;  %v19635_v34 = vld [vmem:[#allocation20_spill] sm:$0xff] }
 0x7a1   : > { %v5111_v40 = vpop.f32.mrf.mxu2  ;;  %v5195_v58 = vpop.f32.mrf.mxu3 }
 0x7a2   : > { %v5009_v13 = vpop.f32.mrf.mxu1  ;;  %v5271_v28 = vpop.f32.mrf.mxu0 }
 0x7a3   : > { %v5010_v2 = vadd.f32 %v5009_v13, %v16023_v45  ;;  %v16511_v0 = vadd.f32 %v5271_v28, %v5183_v18  ;;  %v19637_v28 = vld [vmem:[#allocation153_spill] sm:$0xff] }
 0x7a5   : > { %19632 = vst [vmem:[#allocation60_spill] sm:$0xff] %v16511_v0  ;;  %v5099_v14 = vadd.f32 %v5098_v61, %v5010_v2  ;;  %v19642_v0 = vld [vmem:[#allocation7_spill] sm:$0xff] }
 0x7a7   : > { %v5188_v39 = vadd.f32 %v5187_v53, %v5099_v14 }
 0x7a9   : > { %v5113_v47 = vpop.f32.mrf.mxu2  ;;  %v5197_v7 = vpop.f32.mrf.mxu3 }
 0x7aa   : > { %v5012_v51 = vpop.f32.mrf.mxu1  ;;  %v5274_v54 = vpop.f32.mrf.mxu0 }
 0x7ab   : > { %v5013_v60 = vadd.f32 %v5012_v51, %v16033_v41  ;;  %v16514_v35 = vadd.f32 %v5274_v54, %v5186_v12 }
 0x7ad   : > { %19633 = vst [vmem:[#allocation162_spill] sm:$0xff] %v16514_v35  ;;  %v5102_v1 = vadd.f32 %v5101_v42, %v5013_v60  ;;  %5327 = vmatmul.bf16.gmra.mxu1 %v19634_v30  ;;  %5589 = vmatmul.bf16.gmra.mxu0 %v19635_v34  ;;  %v19638_v34 = vld [vmem:[#allocation34_spill] sm:$0xff] }
 0x7ae   : > { %5431 = vmatmul.bf16.gmra.mxu2 %v19636_v22  ;;  %5515 = vmatmul.bf16.gmra.mxu3 %v19563_v25 }
 0x7af   : > { %v5191_v45 = vadd.f32 %v5190_v16, %v5102_v1  ;;  %v19640_v16 = vld [vmem:[#allocation38_spill] sm:$0xff]  ;;  %v19641_v1 = vld [vmem:[#allocation24_spill] sm:$0xff] }
 0x7b1   : > { %v5116_v61 = vpop.f32.mrf.mxu2  ;;  %v5200_v53 = vpop.f32.mrf.mxu3 }
 0x7b2   : > { %v5014_v18 = vpop.f32.mrf.mxu1  ;;  %v5276_v13 = vpop.f32.mrf.mxu0 }
 0x7b3   : > { %v5015_v2 = vadd.f32 %v5014_v18, %v19637_v28  ;;  %v16521_v14 = vadd.f32 %v5276_v13, %v5188_v39  ;;  %v19643_v28 = vld [vmem:[#allocation127_spill] sm:$0xff] }
 0x7b5   : > { %v5104_v41 = vadd.f32 %v5103_v44, %v5015_v2 }
 0x7b7   : > { %v5193_v12 = vadd.f32 %v5192_v8, %v5104_v41 }
 0x7b9   : > { %v5118_v42 = vpop.f32.mrf.mxu2  ;;  %v5202_v51 = vpop.f32.mrf.mxu3 }
 0x7ba   : > { %v5017_v54 = vpop.f32.mrf.mxu1  ;;  %v5279_v60 = vpop.f32.mrf.mxu0 }
 0x7bb   : > { %v5018_v35 = vadd.f32 %v5017_v54, %v19638_v34  ;;  %v16524_v22 = vadd.f32 %v5279_v60, %v5191_v45 }
 0x7bd   : > { %19639 = vst [vmem:[#allocation164_spill] sm:$0xff] %v16524_v22  ;;  %v5107_v25 = vadd.f32 %v5106_v48, %v5018_v35  ;;  %5332 = vmatmul.bf16.gmra.mxu1 %v19640_v16  ;;  %5594 = vmatmul.bf16.gmra.mxu0 %v19641_v1  ;;  %v19646_v22 = vld [vmem:[#allocation11_spill] sm:$0xff] }
 0x7be   : > { %5436 = vmatmul.bf16.gmra.mxu2 %v19642_v0  ;;  %5520 = vmatmul.bf16.gmra.mxu3 %v19573_v36 }
 0x7bf   : > { %v5196_v39 = vadd.f32 %v5195_v58, %v5107_v25  ;;  %v19644_v58 = vld [vmem:[#allocation46_spill] sm:$0xff]  ;;  %v19645_v25 = vld [vmem:[#allocation28_spill] sm:$0xff] }
 0x7c1   : > { %v5121_v44 = vpop.f32.mrf.mxu2  ;;  %v5205_v8 = vpop.f32.mrf.mxu3 }
 0x7c2   : > { %v5019_v18 = vpop.f32.mrf.mxu1  ;;  %v5281_v13 = vpop.f32.mrf.mxu0 }
 0x7c3   : > { %v5020_v2 = vadd.f32 %v5019_v18, %v19643_v28  ;;  %v16531_v41 = vadd.f32 %v5281_v13, %v5193_v12 }
 0x7c5   : > { %v5109_v45 = vadd.f32 %v5108_v33, %v5020_v2 }
 0x7c7   : > { %v5198_v54 = vadd.f32 %v5197_v7, %v5109_v45 }
 0x7c9   : > { %v5123_v48 = vpop.f32.mrf.mxu2  ;;  %v5207_v35 = vpop.f32.mrf.mxu3 }
 0x7ca   : > { %v5022_v60 = vpop.f32.mrf.mxu1  ;;  %v5284_v34 = vpop.f32.mrf.mxu0 }
 0x7cb   : > { %v5023_v1 = vadd.f32 %v5022_v60, %v16081_v21  ;;  %v16534_v0 = vadd.f32 %v5284_v34, %v5196_v39 }
 0x7cd   : > { %v5112_v36 = vadd.f32 %v5111_v40, %v5023_v1  ;;  %5337 = vmatmul.bf16.gmra.mxu1 %v19644_v58  ;;  %5599 = vmatmul.bf16.gmra.mxu0 %v19645_v25  ;;  %v19649_v25 = vld [vmem:[#allocation15_spill] sm:$0xff] }
 0x7ce   : > { %5441 = vmatmul.bf16.gmra.mxu2 %v19646_v22  ;;  %5525 = vmatmul.bf16.gmra.mxu3 %v19580_v10 }
 0x7cf   : > { %v5201_v12 = vadd.f32 %v5200_v53, %v5112_v36  ;;  %v19647_v53 = vld [vmem:[#allocation41_spill] sm:$0xff]  ;;  %v19648_v36 = vld [vmem:[#allocation32_spill] sm:$0xff] }
 0x7d1   : > { %v5210_v33 = vpop.f32.mrf.mxu3  ;;  %v5402_v7 = vpop.f32.mrf.mxu2 }
 0x7d2   : > { %v5024_v18 = vpop.f32.mrf.mxu1  ;;  %v5286_v13 = vpop.f32.mrf.mxu0 }
 0x7d3   : > { %v5025_v28 = vadd.f32 %v5024_v18, %v16095_v26  ;;  %v16541_v2 = vadd.f32 %v5286_v13, %v5198_v54 }
 0x7d5   : > { %v5114_v21 = vadd.f32 %v5113_v47, %v5025_v28 }
 0x7d7   : > { %v5203_v39 = vadd.f32 %v5202_v51, %v5114_v21 }
 0x7d9   : > { %v5212_v40 = vpop.f32.mrf.mxu3  ;;  %v5404_v45 = vpop.f32.mrf.mxu2 }
 0x7da   : > { %v5027_v60 = vpop.f32.mrf.mxu1  ;;  %v5289_v34 = vpop.f32.mrf.mxu0 }
 0x7db   : > { %v5028_v1 = vadd.f32 %v5027_v60, %v16105_v23  ;;  %v16544_v22 = vadd.f32 %v5289_v34, %v5201_v12 }
 0x7dd   : > { %v5117_v10 = vadd.f32 %v5116_v61, %v5028_v1  ;;  %5342 = vmatmul.bf16.gmra.mxu1 %v19647_v53  ;;  %5604 = vmatmul.bf16.gmra.mxu0 %v19648_v36 }
 0x7de   : > { %5446 = vmatmul.bf16.gmra.mxu2 %v19649_v25  ;;  %5530 = vmatmul.bf16.gmra.mxu3 %v19589_v32  ;;  %v19651_v25 = vld [vmem:[#allocation36_spill] sm:$0xff] }
 0x7df   : > { %v5206_v26 = vadd.f32 %v5205_v8, %v5117_v10 }
 0x7e1   : > { %v5407_v47 = vpop.f32.mrf.mxu2  ;;  %v5491_v51 = vpop.f32.mrf.mxu3 }
 0x7e2   : > { %v5492_v54 = vadd.f32 %v5491_v51, %v5402_v7  ;;  %v5029_v18 = vpop.f32.mrf.mxu1  ;;  %v5291_v13 = vpop.f32.mrf.mxu0  ;;  %v19650_v7 = vld [vmem:[#allocation49_spill] sm:$0xff] }
 0x7e3   : > { %v5030_v28 = vadd.f32 %v5029_v18, %v16119_v38  ;;  %v16551_v23 = vadd.f32 %v5291_v13, %v5203_v39  ;;  %v19652_v38 = vld [vmem:[#allocation19_spill] sm:$0xff] }
 0x7e5   : > { %v5119_v12 = vadd.f32 %v5118_v42, %v5030_v28 }
 0x7e7   : > { %v5208_v61 = vadd.f32 %v5207_v35, %v5119_v12 }
 0x7e9   : > { %v5409_v21 = vpop.f32.mrf.mxu2  ;;  %v5493_v60 = vpop.f32.mrf.mxu3 }
 0x7ea   : > { %v16553_v34 = vadd.f32 %v5493_v60, %v5404_v45  ;;  %v5032_v1 = vpop.f32.mrf.mxu1  ;;  %v5294_v36 = vpop.f32.mrf.mxu0 }
 0x7eb   : > { %v5033_v32 = vadd.f32 %v5032_v1, %v16129_v24  ;;  %v16556_v8 = vadd.f32 %v5294_v36, %v5206_v26 }
 0x7ed   : > { %v5122_v10 = vadd.f32 %v5121_v44, %v5033_v32  ;;  %5347 = vmatmul.bf16.gmra.mxu1 %v19650_v7  ;;  %5609 = vmatmul.bf16.gmra.mxu0 %v19651_v25  ;;  %v19654_v32 = vld [vmem:[#allocation44_spill] sm:$0xff] }
 0x7ee   : > { %5451 = vmatmul.bf16.gmra.mxu2 %v19652_v38  ;;  %5535 = vmatmul.bf16.gmra.mxu3 %v19592_v15 }
 0x7ef   : > { %v5211_v42 = vadd.f32 %v5210_v33, %v5122_v10  ;;  %v19655_v10 = vld [vmem:[#allocation4_spill] sm:$0xff] }
 0x7f1   : > { %v5412_v35 = vpop.f32.mrf.mxu2  ;;  %v5496_v39 = vpop.f32.mrf.mxu3 }
 0x7f2   : > { %v16562_v45 = vadd.f32 %v5496_v39, %v5407_v47  ;;  %v5034_v51 = vpop.f32.mrf.mxu1  ;;  %v5296_v18 = vpop.f32.mrf.mxu0  ;;  %v19653_v47 = vld [vmem:[#allocation54_spill] sm:$0xff] }
 0x7f3   : > { %v5035_v24 = vadd.f32 %v5034_v51, %v16146_v17  ;;  %v16565_v26 = vadd.f32 %v5296_v18, %v5208_v61  ;;  %v6565_v51 = vld [vmem:[%s18690_s2] sm:$0x3] }
 0x7f5   : > { %v5124_v44 = vadd.f32 %v5123_v48, %v5035_v24 }
 0x7f7   : > { %v5213_v13 = vadd.f32 %v5212_v40, %v5124_v44  ;;  %v16586_v44 = vperm.slane %v6565_v51, 0  ;;  %v11318_v51 = vld [vmem:[%s18689_s1 + $0x868] sm:$0xf0] }
 0x7f9   : > { %v5414_v28 = vpop.f32.mrf.mxu2  ;;  %v5498_v12 = vpop.f32.mrf.mxu3 }
 0x7fa   : > { %v16567_v60 = vadd.f32 %v5498_v12, %v5409_v21  ;;  %v5299_v1 = vpop.f32.mrf.mxu0  ;;  %v5313_v36 = vpop.f32.mrf.mxu1 }
 0x7fb   : > { %v16569_v15 = vadd.f32 %v5299_v1, %v5211_v42  ;;  %v5314_v33 = vadd.f32 %v5313_v36, %v16155_v19 }
 0x7fd   : > { %5352 = vmatmul.bf16.gmra.mxu1 %v19653_v47  ;;  %5614 = vmatmul.bf16.gmra.mxu0 %v19654_v32  ;;  %v6311_v19 = vrot.slane %v5314_v33, 2  ;;  %v12150_v33 = vld [vmem:[%s18689_s1 + $0x874] sm:$0xf]  ;;  %v11326_v32 = vld [vmem:[%s18689_s1 + $0x878] sm:$0xf0] }
 0x7fe   : > { %5456 = vmatmul.bf16.gmra.mxu2 %v19655_v10  ;;  %5540 = vmatmul.bf16.gmra.mxu3 %v19595_v43  ;;  %v19656_v43 = vld [vmem:[#allocation158_spill] sm:$0xff] }
 0x801   : > { %v5417_v17 = vpop.f32.mrf.mxu2  ;;  %v5501_v48 = vpop.f32.mrf.mxu3 }
 0x802   : > { %v16576_v40 = vadd.f32 %v5501_v48, %v5412_v35  ;;  %v5301_v61 = vpop.f32.mrf.mxu0  ;;  %v5315_v21 = vpop.f32.mrf.mxu1  ;;  %v19657_v48 = vld [vmem:[#allocation73_spill] sm:$0xff] }
 0x803   : > { %v16578_v25 = vadd.f32 %v5301_v61, %v5213_v13  ;;  %v5316_v38 = vadd.f32 %v5315_v21, %v16179_v29  ;;  %v19658_v61 = vld [vmem:[#allocation52_spill] sm:$0xff] }
 0x805   : > { %v6312_v42 = vrot.slane %v5316_v38, 2  ;;  %v19659_v38 = vld [vmem:[#allocation8_spill] sm:$0xff] }
 0x807   : > { %v6313_v39 = vsel %vm6310_vm1, %v6311_v19, %v6312_v42 }
 0x808   : > { %v6501_v18 = vadd.f32 %v6313_v39, %v19656_v43  ;;  %v12148_v39 = vld [vmem:[%s18689_s1 + $0x864] sm:$0xf] }
 0x809   : > { %v5419_v24 = vpop.f32.mrf.mxu2  ;;  %v5503_v35 = vpop.f32.mrf.mxu3 }
 0x80a   : > { %v16588_v12 = vadd.f32 %v5503_v35, %v5414_v28  ;;  %v5318_v13 = vpop.f32.mrf.mxu1  ;;  %v5580_v1 = vpop.f32.mrf.mxu0  ;;  %v11329_v28 = vor.u32 %v12150_v33, %v11326_v32  ;;  %v6571_v21 = vadd.f32 %v16586_v44, %v6501_v18  ;;  %v11321_v18 = vor.u32 %v12148_v39, %v11318_v51  ;;  %v12144_v39 = vld [vmem:[%s18689_s1 + $0x844] sm:$0xf]  ;;  %v11302_v51 = vld [vmem:[%s18689_s1 + $0x848] sm:$0xf0] }
 0x80b   : > { %v5319_v29 = vadd.f32 %v5318_v13, %v16199_v59  ;;  %v16591_v36 = vadd.f32 %v5580_v1, %v5492_v54  ;;  %v19660_v54 = vld [vmem:[#allocation160_spill] sm:$0xff] }
 0x80c   : > { %5749 = vmatpush.bf16.msrb.mxu2 %v11329_v28  ;;  %v6635_v13 = vmax.f32 %v6571_v21, 0.0  ;;  %v12146_v28 = vld [vmem:[%s18689_s1 + $0x854] sm:$0xf]  ;;  %v11310_v21 = vld [vmem:[%s18689_s1 + $0x858] sm:$0xf0] }
 0x80d   : > { %v6317_v10 = vrot.slane %v5319_v29, 2  ;;  %5357 = vmatmul.bf16.gmra.mxu1 %v19657_v48  ;;  %5619 = vmatmul.bf16.gmra.mxu0 %v19658_v61 }
 0x80e   : > { %5461 = vmatmul.bf16.gmra.mxu2 %v19659_v38  ;;  %5545 = vmatmul.bf16.gmra.mxu3 %v19598_v6 }
 0x80f   : > { %v6318_v59 = vsel %vm6310_vm1, %v6312_v42, %v6317_v10 }
 0x810   : > { %v6503_v19 = vadd.f32 %v6318_v59, %v19660_v54  ;;  %5750 = vmatpush.bf16.msrb.mxu2 %v11321_v18  ;;  %v6763_v59 = vrot.slane %v6635_v13, 1 }
 0x811   : > { %v5422_v43 = vpop.f32.mrf.mxu2  ;;  %v5506_v35 = vpop.f32.mrf.mxu3 }
 0x812   : > { %v6573_v1 = vadd.f32 %v16586_v44, %v6503_v19  ;;  %v16613_v6 = vadd.f32 %v5506_v35, %v5417_v17  ;;  %v5320_v42 = vpop.f32.mrf.mxu1  ;;  %v5582_v29 = vpop.f32.mrf.mxu0  ;;  %v11313_v17 = vor.u32 %v12146_v28, %v11310_v21 }
 0x813   : > { %v5321_v33 = vadd.f32 %v5320_v42, %v16235_v27  ;;  %v16617_v32 = vadd.f32 %v5582_v29, %v16553_v34  ;;  %v19662_v27 = vld [vmem:[#allocation55_spill] sm:$0xff]  ;;  %v11305_v42 = vor.u32 %v12144_v39, %v11302_v51  ;;  %v19665_v39 = vld [vmem:[#allocation58_spill] sm:$0xff]  ;;  %v11390_v51 = vld [vmem:[%s18689_s1 + $0x8f8] sm:$0xf0] }
 0x814   : > { %v6637_v61 = vmax.f32 %v6573_v1, 0.0  ;;  %5751 = vmatpush.bf16.msrb.mxu2 %v11313_v17 }
 0x815   : > { %19661 = vst [vmem:[#allocation163_spill] sm:$0xff] %v16617_v32  ;;  %v6321_v38 = vrot.slane %v5321_v33, 2 }
 0x816   : > { %v6764_v54 = vrot.slane %v6637_v61, 1 }
 0x817   : > { %v6322_v19 = vsel %vm6310_vm1, %v6317_v10, %v6321_v38 }
 0x818   : > { %v6505_v34 = vadd.f32 %v6322_v19, %v19662_v27  ;;  %v6765_v35 = vsel %vm5991_vm0, %v6763_v59, %v6764_v54  ;;  %5752 = vmatpush.bf16.msrb.mxu2 %v11305_v42  ;;  %v12142_v27 = vld [vmem:[%s18689_s1 + $0x834] sm:$0xf] }
 0x819   : > { %v16634_v18 = vpop.f32.mrf.mxu2  ;;  %v5508_v1 = vpop.f32.mrf.mxu3  ;;  %v6953_v29 = vmax.f32 %v6635_v13, %v6765_v35  ;;  %v11294_v13 = vld [vmem:[%s18689_s1 + $0x838] sm:$0xf0] }
 0x81a   : > { %v16637_v10 = vadd.f32 %v16586_v44, %v6505_v34  ;;  %v16639_v33 = vadd.f32 %v5508_v1, %v5419_v24  ;;  %v5323_v28 = vpop.f32.mrf.mxu1  ;;  %v5585_v21 = vpop.f32.mrf.mxu0  ;;  %v19664_v34 = vld [vmem:[#allocation100_spill] sm:$0xff]  ;;  %v19666_v1 = vld [vmem:[#allocation5_spill] sm:$0xff] }
 0x81b   : > { %v5324_v17 = vadd.f32 %v5323_v28, %v16268_v52  ;;  %v16643_v19 = vadd.f32 %v5585_v21, %v16562_v45  ;;  %v11297_v52 = vor.u32 %v12142_v27, %v11294_v13  ;;  %v12166_v45 = vld [vmem:[%s18689_s1 + $0x8f4] sm:$0xf]  ;;  %v11286_v27 = vld [vmem:[%s18689_s1 + $0x828] sm:$0xf0]  ;;  %v12164_v13 = vld [vmem:[%s18689_s1 + $0x8e4] sm:$0xf] }
 0x81c   : > { %v6639_v59 = vmax.f32 %v16637_v10, 0.0  ;;  %v11393_v42 = vor.u32 %v12166_v45, %v11390_v51  ;;  %v19667_v28 = vld [vmem:[#allocation72_spill] sm:$0xff]  ;;  %v11382_v45 = vld [vmem:[%s18689_s1 + $0x8e8] sm:$0xf0] }
 0x81d   : > { %19663 = vst [vmem:[#allocation64_spill] sm:$0xff] %v16643_v19  ;;  %v6325_v24 = vrot.slane %v5324_v17, 2  ;;  %5362 = vmatmul.bf16.gmra.mxu1 %v19664_v34  ;;  %5624 = vmatmul.bf16.gmra.mxu0 %v19665_v39  ;;  %v12140_v17 = vld [vmem:[%s18689_s1 + $0x824] sm:$0xf] }
 0x81e   : > { %v6769_v35 = vrot.slane %v6639_v59, 1  ;;  %5466 = vmatmul.bf16.gmra.mxu2 %v19666_v1  ;;  %5550 = vmatmul.bf16.gmra.mxu3 %v19601_v4 }
 0x81f   : > { %v6326_v10 = vsel %vm6310_vm1, %v6321_v38, %v6325_v24  ;;  %5753 = vmatpush.bf16.msrb.mxu2 %v11297_v52  ;;  %5838 = vmatpush.bf16.msrb.mxu3 %v11393_v42  ;;  %v11289_v52 = vor.u32 %v12140_v17, %v11286_v27 }
 0x820   : > { %v6507_v21 = vadd.f32 %v6326_v10, %v19667_v28  ;;  %v6770_v4 = vsel %vm5991_vm0, %v6764_v54, %v6769_v35  ;;  %v11385_v28 = vor.u32 %v12164_v13, %v11382_v45  ;;  %v12136_v45 = vld [vmem:[%s18689_s1 + $0x804] sm:$0xf] }
 0x821   : > { %v16674_v39 = vpop.f32.mrf.mxu2  ;;  %v5511_v38 = vpop.f32.mrf.mxu3  ;;  %v6955_v51 = vmax.f32 %v6637_v61, %v6770_v4  ;;  %v12138_v61 = vld [vmem:[%s18689_s1 + $0x814] sm:$0xf] }
 0x822   : > { %v16679_v1 = vadd.f32 %v5511_v38, %v5422_v43  ;;  %v5325_v42 = vpop.f32.mrf.mxu1  ;;  %v5587_v10 = vpop.f32.mrf.mxu0  ;;  %v6577_v19 = vadd.f32 %v16586_v44, %v6507_v21  ;;  %v11278_v43 = vld [vmem:[%s18689_s1 + $0x818] sm:$0xf0]  ;;  %v12162_v21 = vld [vmem:[%s18689_s1 + $0x8d4] sm:$0xf] }
 0x823   : > { %v5326_v32 = vadd.f32 %v5325_v42, %v16293_v37  ;;  %v16684_v54 = vadd.f32 %v5587_v10, %v16567_v60  ;;  %5754 = vmatpush.bf16.msrb.mxu2 %v11289_v52  ;;  %v16686_v34 = vpack.c.bf16 %v6955_v51, %v6953_v29  ;;  %5839 = vmatpush.bf16.msrb.mxu3 %v11385_v28  ;;  %v11374_v60 = vld [vmem:[%s18689_s1 + $0x8d8] sm:$0xf0]  ;;  %v11366_v10 = vld [vmem:[%s18689_s1 + $0x8c8] sm:$0xf0] }
 0x824   : > { %v11281_v17 = vor.u32 %v12138_v61, %v11278_v43  ;;  %v6641_v29 = vmax.f32 %v6577_v19, 0.0  ;;  %v11377_v27 = vor.u32 %v12162_v21, %v11374_v60  ;;  %v19668_v38 = vld [vmem:[#allocation165_spill] sm:$0xff]  ;;  %v12160_v19 = vld [vmem:[%s18689_s1 + $0x8c4] sm:$0xf] }
 0x825   : > { %v6329_v37 = vrot.slane %v5326_v32, 2  ;;  %v11270_v32 = vld [vmem:[%s18689_s1 + $0x808] sm:$0xf0]  ;;  %v11369_v60 = vor.u32 %v12160_v19, %v11366_v10  ;;  %v19671_v19 = vld [vmem:[#allocation9_spill] sm:$0xff] }
 0x826   : > { %v6773_v4 = vrot.slane %v6641_v29, 1 }
 0x827   : > { %v6330_v13 = vsel %vm6310_vm1, %v6325_v24, %v6329_v37  ;;  %5755 = vmatpush.bf16.msrb.mxu2 %v11281_v17  ;;  %5840 = vmatpush.bf16.msrb.mxu3 %v11377_v27  ;;  %v11273_v24 = vor.u32 %v12136_v45, %v11270_v32  ;;  %v19669_v32 = vld [vmem:[#allocation105_spill] sm:$0xff] }
 0x828   : > { %v6509_v52 = vadd.f32 %v6330_v13, %v19668_v38  ;;  %v6774_v28 = vsel %vm5991_vm0, %v6769_v35, %v6773_v4  ;;  %v12158_v35 = vld [vmem:[%s18689_s1 + $0x8b4] sm:$0xf] }
 0x829   : > { %v5429_v51 = vpop.f32.mrf.mxu2  ;;  %v5513_v42 = vpop.f32.mrf.mxu3  ;;  %v6957_v27 = vmax.f32 %v6639_v59, %v6774_v28  ;;  %v19670_v59 = vld [vmem:[#allocation62_spill] sm:$0xff] }
 0x82a   : > { %v6579_v61 = vadd.f32 %v16586_v44, %v6509_v52  ;;  %v16717_v43 = vadd.f32 %v5513_v42, %v16634_v18  ;;  %v5328_v21 = vpop.f32.mrf.mxu1  ;;  %v5590_v17 = vpop.f32.mrf.mxu0  ;;  %v11358_v18 = vld [vmem:[%s18689_s1 + $0x8b8] sm:$0xf0]  ;;  %v12156_v28 = vld [vmem:[%s18689_s1 + $0x8a4] sm:$0xf] }
 0x82b   : > { %v5329_v13 = vadd.f32 %v5328_v21, %v16314_v49  ;;  %v16721_v38 = vadd.f32 %v5590_v17, %v16576_v40  ;;  %5756 = vmatpush.bf16.msrb.mxu2 %v11273_v24  ;;  %5841 = vmatpush.bf16.msrb.mxu3 %v11369_v60  ;;  %v11361_v49 = vor.u32 %v12158_v35, %v11358_v18  ;;  %v19672_v24 = vld [vmem:[#allocation78_spill] sm:$0xff] }
 0x82c   : > { %v6643_v45 = vmax.f32 %v6579_v61, 0.0  ;;  %v11350_v61 = vld [vmem:[%s18689_s1 + $0x8a8] sm:$0xf0] }
 0x82d   : > { %v6333_v52 = vrot.slane %v5329_v13, 2  ;;  %5367 = vmatmul.bf16.gmra.mxu1 %v19669_v32  ;;  %5629 = vmatmul.bf16.gmra.mxu0 %v19670_v59  ;;  %v11353_v13 = vor.u32 %v12156_v28, %v11350_v61  ;;  %v19674_v61 = vld [vmem:[#allocation79_spill] sm:$0xff] }
 0x82e   : > { %5471 = vmatmul.bf16.gmra.mxu2 %v19671_v19  ;;  %5555 = vmatmul.bf16.gmra.mxu3 %v19604_v50  ;;  %v6777_v40 = vrot.slane %v6643_v45, 1 }
 0x82f   : > { %v6334_v42 = vsel %vm6310_vm1, %v6329_v37, %v6333_v52  ;;  %5842 = vmatpush.bf16.msrb.mxu3 %v11361_v49 }
 0x830   : > { %v6511_v10 = vadd.f32 %v6334_v42, %v19672_v24  ;;  %v6778_v21 = vsel %vm5991_vm0, %v6773_v4, %v6777_v40  ;;  %v12154_v4 = vld [vmem:[%s18689_s1 + $0x894] sm:$0xf] }
 0x831   : > { %v5432_v17 = vpop.f32.mrf.mxu2  ;;  %v5516_v60 = vpop.f32.mrf.mxu3  ;;  %v6959_v50 = vmax.f32 %v6641_v29, %v6778_v21  ;;  %v11334_v21 = vld [vmem:[%s18689_s1 + $0x888] sm:$0xf0] }
 0x832   : > { %v16743_v35 = vadd.f32 %v5516_v60, %v16674_v39  ;;  %v5330_v37 = vpop.f32.mrf.mxu1  ;;  %v5592_v18 = vpop.f32.mrf.mxu0  ;;  %v6581_v59 = vadd.f32 %v16586_v44, %v6511_v10  ;;  %v11342_v39 = vld [vmem:[%s18689_s1 + $0x898] sm:$0xf0] }
 0x833   : > { %v5331_v49 = vadd.f32 %v5330_v37, %v16339_v9  ;;  %v16748_v19 = vadd.f32 %v5592_v18, %v16588_v12  ;;  %v16750_v42 = vpack.c.bf16 %v6959_v50, %v6957_v27  ;;  %5843 = vmatpush.bf16.msrb.mxu3 %v11353_v13  ;;  %v11345_v28 = vor.u32 %v12154_v4, %v11342_v39  ;;  %v12152_v27 = vld [vmem:[%s18689_s1 + $0x884] sm:$0xf] }
 0x834   : > { %v6645_v29 = vmax.f32 %v6581_v59, 0.0  ;;  %v11337_v37 = vor.u32 %v12152_v27, %v11334_v21  ;;  %v19678_v21 = vld [vmem:[#allocation101_spill] sm:$0xff] }
 0x835   : > { %19673 = vst [vmem:[#allocation66_spill] sm:$0xff] %v16748_v19  ;;  %v6337_v24 = vrot.slane %v5331_v49, 2  ;;  %v19694_v19 = vld [vmem:[#allocation76_spill] sm:$0xff] }
 0x836   : > { %v6781_v10 = vrot.slane %v6645_v29, 1 }
 0x837   : > { %v6338_v9 = vsel %vm6310_vm1, %v6333_v52, %v6337_v24  ;;  %5844 = vmatpush.bf16.msrb.mxu3 %v11345_v28 }
 0x838   : > { %v6513_v12 = vadd.f32 %v6338_v9, %v19674_v61  ;;  %v6782_v60 = vsel %vm5991_vm0, %v6777_v40, %v6781_v10  ;;  %v12134_v40 = vld [vmem:[%s18689_s1 + $0x7f4] sm:$0xf] }
 0x839   : > { %v5434_v13 = vpop.f32.mrf.mxu2  ;;  %v5518_v50 = vpop.f32.mrf.mxu3  ;;  %v6961_v18 = vmax.f32 %v6643_v45, %v6782_v60  ;;  %v11262_v45 = vld [vmem:[%s18689_s1 + $0x7f8] sm:$0xf0] }
 0x83a   : > { %v6583_v59 = vadd.f32 %v16586_v44, %v6513_v12  ;;  %v16768_v52 = vadd.f32 %v5518_v50, %v5429_v51  ;;  %v5333_v49 = vpop.f32.mrf.mxu1  ;;  %v5595_v4 = vpop.f32.mrf.mxu0  ;;  %v19676_v51 = vld [vmem:[#allocation108_spill] sm:$0xff]  ;;  %v11265_v12 = vor.u32 %v12134_v40, %v11262_v45  ;;  %v12132_v50 = vld [vmem:[%s18689_s1 + $0x7e4] sm:$0xf] }
 0x83b   : > { %v5334_v39 = vadd.f32 %v5333_v49, %v16360_v46  ;;  %v16772_v28 = vadd.f32 %v5595_v4, %v16613_v6  ;;  %5845 = vmatpush.bf16.msrb.mxu3 %v11337_v37  ;;  %v19677_v46 = vld [vmem:[#allocation12_spill] sm:$0xff]  ;;  %v11254_v37 = vld [vmem:[%s18689_s1 + $0x7e8] sm:$0xf0] }
 0x83c   : > { %v6647_v9 = vmax.f32 %v6583_v59, 0.0  ;;  %5660 = vmatpush.bf16.msrb.mxu1 %v11265_v12  ;;  %v11257_v4 = vor.u32 %v12132_v50, %v11254_v37  ;;  %v19679_v12 = vld [vmem:[#allocation128_spill] sm:$0xff] }
 0x83d   : > { %19675 = vst [vmem:[#allocation68_spill] sm:$0xff] %v16772_v28  ;;  %v6341_v61 = vrot.slane %v5334_v39, 2  ;;  %5372 = vmatmul.bf16.gmra.mxu1 %v19676_v51  ;;  %5634 = vmatmul.bf16.gmra.mxu0 %v19591_v57 }
 0x83e   : > { %5476 = vmatmul.bf16.gmra.mxu2 %v19677_v46  ;;  %5560 = vmatmul.bf16.gmra.mxu3 %v19612_v11  ;;  %v6785_v6 = vrot.slane %v6647_v9, 1 }
 0x83f   : > { %v6342_v27 = vsel %vm6310_vm1, %v6337_v24, %v6341_v61 }
 0x840   : > { %v6515_v60 = vadd.f32 %v6342_v27, %v19678_v21  ;;  %v6786_v57 = vsel %vm5991_vm0, %v6781_v10, %v6785_v6  ;;  %5661 = vmatpush.bf16.msrb.mxu1 %v11257_v4  ;;  %v12130_v10 = vld [vmem:[%s18689_s1 + $0x7d4] sm:$0xf]  ;;  %v11238_v4 = vld [vmem:[%s18689_s1 + $0x7c8] sm:$0xf0] }
 0x841   : > { %v5437_v59 = vpop.f32.mrf.mxu2  ;;  %v5521_v49 = vpop.f32.mrf.mxu3  ;;  %v6963_v11 = vmax.f32 %v6645_v29, %v6786_v57 }
 0x842   : > { %v16793_v39 = vadd.f32 %v5521_v49, %v5432_v17  ;;  %v5335_v24 = vpop.f32.mrf.mxu1  ;;  %v5597_v40 = vpop.f32.mrf.mxu0  ;;  %v6585_v45 = vadd.f32 %v16586_v44, %v6515_v60  ;;  %v11246_v17 = vld [vmem:[%s18689_s1 + $0x7d8] sm:$0xf0] }
 0x843   : > { %v5336_v46 = vadd.f32 %v5335_v24, %v19679_v12  ;;  %v16798_v27 = vadd.f32 %v5597_v40, %v16639_v33  ;;  %v16800_v21 = vpack.c.bf16 %v6963_v11, %v6961_v18  ;;  %v11249_v37 = vor.u32 %v12130_v10, %v11246_v17  ;;  %v19681_v33 = vld [vmem:[#allocation103_spill] sm:$0xff]  ;;  %v12128_v18 = vld [vmem:[%s18689_s1 + $0x7c4] sm:$0xf] }
 0x844   : > { %v6649_v29 = vmax.f32 %v6585_v45, 0.0  ;;  %v11241_v45 = vor.u32 %v12128_v18, %v11238_v4  ;;  %v19685_v18 = vld [vmem:[#allocation70_spill] sm:$0xff] }
 0x845   : > { %19680 = vst [vmem:[#allocation74_spill] sm:$0xff] %v16798_v27  ;;  %v6345_v50 = vrot.slane %v5336_v46, 2  ;;  %5662 = vmatpush.bf16.msrb.mxu1 %v11249_v37  ;;  %v19682_v37 = vld [vmem:[#allocation161_spill] sm:$0xff] }
 0x846   : > { %v6789_v60 = vrot.slane %v6649_v29, 1 }
 0x847   : > { %v6346_v57 = vsel %vm6310_vm1, %v6341_v61, %v6345_v50 }
 0x848   : > { %v6517_v49 = vadd.f32 %v6346_v57, %v19681_v33  ;;  %v6790_v11 = vsel %vm5991_vm0, %v6785_v6, %v6789_v60  ;;  %v12126_v6 = vld [vmem:[%s18689_s1 + $0x7b4] sm:$0xf] }
 0x849   : > { %v16817_v24 = vpop.f32.mrf.mxu2  ;;  %v5523_v40 = vpop.f32.mrf.mxu3  ;;  %v6965_v12 = vmax.f32 %v6647_v9, %v6790_v11  ;;  %5663 = vmatpush.bf16.msrb.mxu1 %v11241_v45  ;;  %v11230_v9 = vld [vmem:[%s18689_s1 + $0x7b8] sm:$0xf0] }
 0x84a   : > { %v6587_v61 = vadd.f32 %v16586_v44, %v6517_v49  ;;  %v16820_v46 = vadd.f32 %v5523_v40, %v5434_v13  ;;  %v5338_v10 = vpop.f32.mrf.mxu1  ;;  %v5600_v17 = vpop.f32.mrf.mxu0  ;;  %v19684_v13 = vld [vmem:[#allocation111_spill] sm:$0xff]  ;;  %v11233_v4 = vor.u32 %v12126_v6, %v11230_v9  ;;  %v19686_v11 = vld [vmem:[#allocation93_spill] sm:$0xff] }
 0x84b   : > { %v5339_v57 = vadd.f32 %v5338_v10, %v19682_v37  ;;  %v16824_v33 = vadd.f32 %v5600_v17, %v16679_v1  ;;  %v12175_v1 = vld [vmem:[%s18691_s3 + $0x38] sm:$0xff]  ;;  %v19687_v40 = vld [vmem:[#allocation27_spill] sm:$0xff]  ;;  %v19688_v10 = vld [vmem:[#allocation106_spill] sm:$0xff] }
 0x84c   : > { %v6651_v27 = vmax.f32 %v6587_v61, 0.0  ;;  %7177 = vmatpush.bf16.msrb.mxu0 %v12175_v1  ;;  %v12124_v37 = vld [vmem:[%s18689_s1 + $0x7a4] sm:$0xf] }
 0x84d   : > { %19683 = vst [vmem:[#allocation80_spill] sm:$0xff] %v16824_v33  ;;  %v6349_v49 = vrot.slane %v5339_v57, 2  ;;  %5377 = vmatmul.bf16.gmra.mxu1 %v19684_v13  ;;  %5639 = vmatmul.bf16.gmra.mxu0 %v19685_v18  ;;  %v11222_v57 = vld [vmem:[%s18689_s1 + $0x7a8] sm:$0xf0]  ;;  %v19689_v33 = vld [vmem:[#allocation56_spill] sm:$0xff] }
 0x84e   : > { %5565 = vmatmul.bf16.gmra.mxu3 %v19686_v11  ;;  %5757 = vmatmul.bf16.vlgmr.msrb.gmra.mxu2 %v19687_v40  ;;  %v6793_v45 = vrot.slane %v6651_v27, 1  ;;  %v11225_v11 = vor.u32 %v12124_v37, %v11222_v57  ;;  %v12122_v37 = vld [vmem:[%s18689_s1 + $0x794] sm:$0xf] }
 0x84f   : > { %v6350_v61 = vsel %vm6310_vm1, %v6345_v50, %v6349_v49  ;;  %5664 = vmatpush.bf16.msrb.mxu1 %v11233_v4  ;;  %v12174_v50 = vld [vmem:[%s18691_s3 + $0x30] sm:$0xff] }
 0x850   : > { %v6519_v17 = vadd.f32 %v6350_v61, %v19688_v10  ;;  %v6794_v6 = vsel %vm5991_vm0, %v6789_v60, %v6793_v45  ;;  %7178 = vmatpush.bf16.msrb.mxu0 %v12174_v50 }
 0x851   : > { %v5442_v9 = vpop.f32.mrf.mxu2  ;;  %v5526_v18 = vpop.f32.mrf.mxu3  ;;  %v6967_v4 = vmax.f32 %v6649_v29, %v6794_v6 }
 0x852   : > { %v16851_v1 = vadd.f32 %v5526_v18, %v5437_v59  ;;  %v5340_v40 = vpop.f32.mrf.mxu1  ;;  %v5602_v61 = vpop.f32.mrf.mxu0  ;;  %v6589_v10 = vadd.f32 %v16586_v44, %v6519_v17  ;;  %v11214_v59 = vld [vmem:[%s18689_s1 + $0x798] sm:$0xf0] }
 0x853   : > { %v5341_v13 = vadd.f32 %v5340_v40, %v19689_v33  ;;  %v16856_v28 = vadd.f32 %v5602_v61, %v16717_v43  ;;  %5665 = vmatpush.bf16.msrb.mxu1 %v11225_v11  ;;  %v16858_v60 = vpack.c.bf16 %v6967_v4, %v6965_v12  ;;  %v11217_v17 = vor.u32 %v12122_v37, %v11214_v59  ;;  %v12173_v43 = vld [vmem:[%s18691_s3 + $0x28] sm:$0xff]  ;;  %v19691_v12 = vld [vmem:[#allocation109_spill] sm:$0xff]  ;;  %v12120_v11 = vld [vmem:[%s18689_s1 + $0x784] sm:$0xf] }
 0x854   : > { %v6653_v29 = vmax.f32 %v6589_v10, 0.0  ;;  %7179 = vmatpush.bf16.msrb.mxu0 %v12173_v43 }
 0x855   : > { %19690 = vst [vmem:[#allocation84_spill] sm:$0xff] %v16856_v28  ;;  %v6353_v57 = vrot.slane %v5341_v13, 2  ;;  %v11206_v13 = vld [vmem:[%s18689_s1 + $0x788] sm:$0xf0] }
 0x856   : > { %v6797_v33 = vrot.slane %v6653_v29, 1  ;;  %v11209_v61 = vor.u32 %v12120_v11, %v11206_v13  ;;  %v19693_v13 = vld [vmem:[#allocation114_spill] sm:$0xff] }
 0x857   : > { %v6354_v6 = vsel %vm6310_vm1, %v6349_v49, %v6353_v57  ;;  %5666 = vmatpush.bf16.msrb.mxu1 %v11217_v17  ;;  %v12172_v49 = vld [vmem:[%s18691_s3 + $0x20] sm:$0xff] }
 0x858   : > { %v6521_v18 = vadd.f32 %v6354_v6, %v19691_v12  ;;  %v6798_v50 = vsel %vm5991_vm0, %v6793_v45, %v6797_v33  ;;  %v19692_v6 = vld [vmem:[#allocation131_spill] sm:$0xff]  ;;  %7180 = vmatpush.bf16.msrb.mxu0 %v12172_v49 }
 0x859   : > { %v5444_v4 = vpop.f32.mrf.mxu2  ;;  %v5528_v40 = vpop.f32.mrf.mxu3  ;;  %v6969_v10 = vmax.f32 %v6651_v27, %v6798_v50  ;;  %v12171_v27 = vld [vmem:[%s18691_s3 + $0x18] sm:$0xff]  ;;  %v19696_v50 = vld [vmem:[#allocation166_spill] sm:$0xff] }
 0x85a   : > { %v6591_v37 = vadd.f32 %v16586_v44, %v6521_v18  ;;  %v16883_v59 = vadd.f32 %v5528_v40, %v16817_v24  ;;  %v5343_v17 = vpop.f32.mrf.mxu1  ;;  %v5605_v43 = vpop.f32.mrf.mxu0  ;;  %v19695_v24 = vld [vmem:[#allocation31_spill] sm:$0xff] }
 0x85b   : > { %v5344_v12 = vadd.f32 %v5343_v17, %v19692_v6  ;;  %v16887_v28 = vadd.f32 %v5605_v43, %v16743_v35  ;;  %5667 = vmatpush.bf16.msrb.mxu1 %v11209_v61 }
 0x85c   : > { %v6655_v45 = vmax.f32 %v6591_v37, 0.0  ;;  %7181 = vmatpush.bf16.msrb.mxu0 %v12171_v27 }
 0x85d   : > { %v6357_v11 = vrot.slane %v5344_v12, 2  ;;  %5382 = vmatmul.bf16.gmra.mxu1 %v19693_v13  ;;  %5644 = vmatmul.bf16.gmra.mxu0 %v19694_v19  ;;  %v12170_v19 = vld [vmem:[%s18691_s3 + $0x10] sm:$0xff] }
 0x85e   : > { %5762 = vmatmul.bf16.gmra.mxu2 %v19695_v24  ;;  %5846 = vmatmul.bf16.vlgmr.msrb.gmra.mxu3 %v19623_v55  ;;  %v6801_v18 = vrot.slane %v6655_v45, 1 }
 0x85f   : > { %v6358_v35 = vsel %vm6310_vm1, %v6353_v57, %v6357_v11 }
 0x860   : > { %v6523_v40 = vadd.f32 %v6358_v35, %v19696_v50  ;;  %v6802_v61 = vsel %vm5991_vm0, %v6797_v33, %v6801_v18  ;;  %7182 = vmatpush.bf16.msrb.mxu0 %v12170_v19 }
 0x861   : > { %v5447_v49 = vpop.f32.mrf.mxu2  ;;  %v5531_v37 = vpop.f32.mrf.mxu3  ;;  %v6971_v17 = vmax.f32 %v6653_v29, %v6802_v61  ;;  %v12169_v29 = vld [vmem:[%s18691_s3 + $0x8] sm:$0xff]  ;;  %v19698_v61 = vld [vmem:[#allocation148_spill] sm:$0xff] }
 0x862   : > { %v16902_v43 = vadd.f32 %v5531_v37, %v5442_v9  ;;  %v5345_v6 = vpop.f32.mrf.mxu1  ;;  %v5607_v12 = vpop.f32.mrf.mxu0  ;;  %v6593_v55 = vadd.f32 %v16586_v44, %v6523_v40 }
 0x863   : > { %v5346_v57 = vadd.f32 %v5345_v6, %v16477_v56  ;;  %v16907_v27 = vadd.f32 %v5607_v12, %v16768_v52  ;;  %v16909_v33 = vpack.c.bf16 %v6971_v17, %v6969_v10  ;;  %v12168_v10 = vld [vmem:[%s18691_s3] sm:$0xff] }
 0x864   : > { %v6657_v24 = vmax.f32 %v6593_v55, 0.0  ;;  %7183 = vmatpush.bf16.msrb.mxu0 %v12169_v29 }
 0x865   : > { %19697 = vst [vmem:[#allocation141_spill] sm:$0xff] %v16907_v27  ;;  %v6361_v35 = vrot.slane %v5346_v57, 2  ;;  %v19702_v27 = vld [vmem:[#allocation35_spill] sm:$0xff] }
 0x866   : > { %v6805_v9 = vrot.slane %v6657_v24, 1 }
 0x867   : > { %v6362_v50 = vsel %vm6310_vm1, %v6357_v11, %v6361_v35 }
 0x868   : > { %v6525_v40 = vadd.f32 %v6362_v50, %v19698_v61  ;;  %v6806_v56 = vsel %vm5991_vm0, %v6801_v18, %v6805_v9  ;;  %7184 = vmatpush.bf16.msrb.mxu0 %v12168_v10  ;;  %v19700_v50 = vld [vmem:[#allocation117_spill] sm:$0xff]  ;;  %v19701_v61 = vld [vmem:[#allocation82_spill] sm:$0xff] }
 0x869   : > { %v5449_v37 = vpop.f32.mrf.mxu2  ;;  %v5533_v52 = vpop.f32.mrf.mxu3  ;;  %v6973_v19 = vmax.f32 %v6655_v45, %v6806_v56 }
 0x86a   : > { %v6595_v17 = vadd.f32 %v16586_v44, %v6525_v40  ;;  %v16921_v6 = vadd.f32 %v5533_v52, %v5444_v4  ;;  %v5348_v12 = vpop.f32.mrf.mxu1  ;;  %v5610_v55 = vpop.f32.mrf.mxu0  ;;  %v19703_v40 = vld [vmem:[#allocation167_spill] sm:$0xff] }
 0x86b   : > { %v5349_v11 = vadd.f32 %v5348_v12, %v16481_v5  ;;  %v16925_v57 = vadd.f32 %v5610_v55, %v16793_v39 }
 0x86c   : > { %v6659_v18 = vmax.f32 %v6595_v17, 0.0 }
 0x86d   : > { %19699 = vst [vmem:[#allocation88_spill] sm:$0xff] %v16925_v57  ;;  %v6365_v29 = vrot.slane %v5349_v11, 2  ;;  %5387 = vmatmul.bf16.gmra.mxu1 %v19700_v50  ;;  %5649 = vmatmul.bf16.gmra.mxu0 %v19701_v61  ;;  %v19704_v57 = vld [vmem:[#allocation113_spill] sm:$0xff] }
 0x86e   : > { %5767 = vmatmul.bf16.gmra.mxu2 %v19702_v27  ;;  %5851 = vmatmul.bf16.gmra.mxu3 %v19626_v3  ;;  %v6809_v4 = vrot.slane %v6659_v18, 1 }
 0x86f   : > { %v6366_v45 = vsel %vm6310_vm1, %v6361_v35, %v6365_v29 }
 0x870   : > { %v6527_v56 = vadd.f32 %v6366_v45, %v19703_v40  ;;  %v6810_v5 = vsel %vm5991_vm0, %v6805_v9, %v6809_v4 }
 0x871   : > { %v5452_v39 = vpop.f32.mrf.mxu2  ;;  %v5536_v52 = vpop.f32.mrf.mxu3  ;;  %v6975_v10 = vmax.f32 %v6657_v24, %v6810_v5 }
 0x872   : > { %v16934_v17 = vadd.f32 %v5536_v52, %v5447_v49  ;;  %v5350_v12 = vpop.f32.mrf.mxu1  ;;  %v5612_v55 = vpop.f32.mrf.mxu0  ;;  %v6597_v11 = vadd.f32 %v16586_v44, %v6527_v56 }
 0x873   : > { %v5351_v27 = vadd.f32 %v5350_v12, %v16489_v63  ;;  %v16939_v3 = vadd.f32 %v5612_v55, %v16820_v46  ;;  %v16941_v61 = vpack.c.bf16 %v6975_v10, %v6973_v19  ;;  %v19705_v19 = vld [vmem:[#allocation133_spill] sm:$0xff] }
 0x874   : > { %v6661_v35 = vmax.f32 %v6597_v11, 0.0 }
 0x875   : > { %v6369_v45 = vrot.slane %v5351_v27, 2  ;;  %v19707_v27 = vld [vmem:[#allocation86_spill] sm:$0xff] }
 0x876   : > { %v6813_v40 = vrot.slane %v6661_v35, 1 }
 0x877   : > { %v6370_v9 = vsel %vm6310_vm1, %v6365_v29, %v6369_v45 }
 0x878   : > { %v6529_v24 = vadd.f32 %v6370_v9, %v19704_v57  ;;  %v6814_v49 = vsel %vm5991_vm0, %v6809_v4, %v6813_v40  ;;  %v19708_v57 = vld [vmem:[#allocation17_spill] sm:$0xff]  ;;  %v19709_v4 = vld [vmem:[#allocation43_spill] sm:$0xff] }
 0x879   : > { %v5454_v5 = vpop.f32.mrf.mxu2  ;;  %v5538_v52 = vpop.f32.mrf.mxu3  ;;  %v6977_v50 = vmax.f32 %v6659_v18, %v6814_v49  ;;  %v19710_v9 = vld [vmem:[#allocation115_spill] sm:$0xff] }
 0x87a   : > { %v6599_v56 = vadd.f32 %v16586_v44, %v6529_v24  ;;  %v16947_v63 = vadd.f32 %v5538_v52, %v5449_v37  ;;  %v5353_v46 = vpop.f32.mrf.mxu1  ;;  %v5615_v12 = vpop.f32.mrf.mxu0 }
 0x87b   : > { %v5354_v10 = vadd.f32 %v5353_v46, %v19705_v19  ;;  %v16951_v55 = vadd.f32 %v5615_v12, %v16851_v1 }
 0x87c   : > { %v6663_v11 = vmax.f32 %v6599_v56, 0.0 }
 0x87d   : > { %19706 = vst [vmem:[#allocation2_spill] sm:$0xff] %v16951_v55  ;;  %v6373_v29 = vrot.slane %v5354_v10, 2  ;;  %5654 = vmatmul.bf16.gmra.mxu0 %v19707_v27  ;;  %5668 = vmatmul.bf16.vlgmr.msrb.gmra.mxu1 %v19708_v57 }
 0x87e   : > { %5772 = vmatmul.bf16.gmra.mxu2 %v19709_v4  ;;  %5856 = vmatmul.bf16.gmra.mxu3 %v19629_v20  ;;  %v6817_v18 = vrot.slane %v6663_v11, 1 }
 0x87f   : > { %v6374_v37 = vsel %vm6310_vm1, %v6369_v45, %v6373_v29 }
 0x880   : > { %v6531_v24 = vadd.f32 %v6374_v37, %v19710_v9  ;;  %v6818_v49 = vsel %vm5991_vm0, %v6813_v40, %v6817_v18  ;;  %v19711_v9 = vld [vmem:[#allocation118_spill] sm:$0xff] }
 0x881   : > { %v5457_v52 = vpop.f32.mrf.mxu2  ;;  %v5541_v1 = vpop.f32.mrf.mxu3  ;;  %v6979_v46 = vmax.f32 %v6661_v35, %v6818_v49 }
 0x882   : > { %v16960_v56 = vadd.f32 %v5541_v1, %v5452_v39  ;;  %v5355_v12 = vpop.f32.mrf.mxu1  ;;  %v5617_v19 = vpop.f32.mrf.mxu0  ;;  %v6601_v10 = vadd.f32 %v16586_v44, %v6531_v24 }
 0x883   : > { %v5356_v27 = vadd.f32 %v5355_v12, %v16501_v62  ;;  %v16965_v20 = vadd.f32 %v5617_v19, %v16883_v59  ;;  %v16967_v57 = vpack.c.bf16 %v6979_v46, %v6977_v50 }
 0x884   : > { %v6665_v45 = vmax.f32 %v6601_v10, 0.0  ;;  %v19713_v10 = vld [vmem:[#allocation21_spill] sm:$0xff] }
 0x885   : > { %v6377_v4 = vrot.slane %v5356_v27, 2  ;;  %v19715_v27 = vld [vmem:[#allocation119_spill] sm:$0xff] }
 0x886   : > { %v6821_v37 = vrot.slane %v6665_v45, 1 }
 0x887   : > { %v6378_v40 = vsel %vm6310_vm1, %v6373_v29, %v6377_v4 }
 0x888   : > { %v6533_v35 = vadd.f32 %v6378_v40, %v19711_v9  ;;  %v6822_v39 = vsel %vm5991_vm0, %v6817_v18, %v6821_v37  ;;  %v19714_v18 = vld [vmem:[#allocation51_spill] sm:$0xff] }
 0x889   : > { %v5459_v49 = vpop.f32.mrf.mxu2  ;;  %v5543_v1 = vpop.f32.mrf.mxu3  ;;  %v6981_v55 = vmax.f32 %v6663_v11, %v6822_v39 }
 0x88a   : > { %v6603_v24 = vadd.f32 %v16586_v44, %v6533_v35  ;;  %v16973_v62 = vadd.f32 %v5543_v1, %v5454_v5  ;;  %v5358_v59 = vpop.f32.mrf.mxu1  ;;  %v5620_v12 = vpop.f32.mrf.mxu0 }
 0x88b   : > { %v5359_v50 = vadd.f32 %v5358_v59, %v16504_v31  ;;  %v16977_v46 = vadd.f32 %v5620_v12, %v16902_v43  ;;  %v19716_v12 = vld [vmem:[#allocation60_spill] sm:$0xff] }
 0x88c   : > { %v6667_v19 = vmax.f32 %v6603_v24, 0.0 }
 0x88d   : > { %19712 = vst [vmem:[#allocation142_spill] sm:$0xff] %v16977_v46  ;;  %v6381_v29 = vrot.slane %v5359_v50, 2  ;;  %5673 = vmatmul.bf16.gmra.mxu1 %v19713_v10  ;;  %7185 = vmatmul.bf16.vlgmr.msrb.gmra.mxu0 %v16686_v34 }
 0x88e   : > { %5777 = vmatmul.bf16.gmra.mxu2 %v19714_v18  ;;  %5861 = vmatmul.bf16.gmra.mxu3 %v19634_v30  ;;  %v6825_v11 = vrot.slane %v6667_v19, 1 }
 0x88f   : > { %v6382_v5 = vsel %vm6310_vm1, %v6377_v4, %v6381_v29 }
 0x890   : > { %v6535_v40 = vadd.f32 %v6382_v5, %v19715_v27  ;;  %v6826_v31 = vsel %vm5991_vm0, %v6821_v37, %v6825_v11  ;;  %v19717_v27 = vld [vmem:[#allocation120_spill] sm:$0xff] }
 0x891   : > { %v5462_v9 = vpop.f32.mrf.mxu2  ;;  %v5546_v43 = vpop.f32.mrf.mxu3  ;;  %v6983_v35 = vmax.f32 %v6665_v45, %v6826_v31 }
 0x892   : > { %v16986_v39 = vadd.f32 %v5546_v43, %v5457_v52  ;;  %v5360_v1 = vpop.f32.mrf.mxu1  ;;  %v5622_v24 = vpop.f32.mrf.mxu0  ;;  %v6605_v59 = vadd.f32 %v16586_v44, %v6535_v40 }
 0x893   : > { %v5361_v50 = vadd.f32 %v5360_v1, %v19716_v12  ;;  %v16991_v30 = vadd.f32 %v5622_v24, %v16921_v6  ;;  %v16993_v10 = vpack.c.bf16 %v6983_v35, %v6981_v55  ;;  %v19718_v55 = vld [vmem:[#allocation162_spill] sm:$0xff] }
 0x894   : > { %v6669_v4 = vmax.f32 %v6605_v59, 0.0 }
 0x895   : > { %v6385_v18 = vrot.slane %v5361_v50, 2  ;;  %v19720_v50 = vld [vmem:[#allocation25_spill] sm:$0xff] }
 0x896   : > { %v6829_v5 = vrot.slane %v6669_v4, 1 }
 0x897   : > { %v6386_v37 = vsel %vm6310_vm1, %v6381_v29, %v6385_v18 }
 0x898   : > { %v6537_v45 = vadd.f32 %v6386_v37, %v19717_v27  ;;  %v6830_v52 = vsel %vm5991_vm0, %v6825_v11, %v6829_v5  ;;  %v19721_v11 = vld [vmem:[#allocation57_spill] sm:$0xff] }
 0x899   : > { %v5464_v31 = vpop.f32.mrf.mxu2  ;;  %v5548_v43 = vpop.f32.mrf.mxu3  ;;  %v6985_v46 = vmax.f32 %v6667_v19, %v6830_v52  ;;  %v19722_v37 = vld [vmem:[#allocation121_spill] sm:$0xff] }
 0x89a   : > { %v6607_v40 = vadd.f32 %v16586_v44, %v6537_v45  ;;  %v16999_v1 = vadd.f32 %v5548_v43, %v5459_v49  ;;  %v5363_v6 = vpop.f32.mrf.mxu1  ;;  %v5625_v24 = vpop.f32.mrf.mxu0 }
 0x89b   : > { %v5364_v35 = vadd.f32 %v5363_v6, %v19718_v55  ;;  %v17003_v59 = vadd.f32 %v5625_v24, %v16934_v17 }
 0x89c   : > { %v6671_v12 = vmax.f32 %v6607_v40, 0.0 }
 0x89d   : > { %19719 = vst [vmem:[#allocation143_spill] sm:$0xff] %v17003_v59  ;;  %v6389_v29 = vrot.slane %v5364_v35, 2  ;;  %5678 = vmatmul.bf16.gmra.mxu1 %v19720_v50  ;;  %7190 = vmatmul.bf16.gmra.mxu0 %v16750_v42 }
 0x89e   : > { %5782 = vmatmul.bf16.gmra.mxu2 %v19721_v11  ;;  %5866 = vmatmul.bf16.gmra.mxu3 %v19640_v16  ;;  %v6833_v19 = vrot.slane %v6671_v12, 1 }
 0x89f   : > { %v6390_v49 = vsel %vm6310_vm1, %v6385_v18, %v6389_v29 }
 0x8a0   : > { %v6539_v27 = vadd.f32 %v6390_v49, %v19722_v37  ;;  %v6834_v45 = vsel %vm5991_vm0, %v6829_v5, %v6833_v19  ;;  %v19723_v37 = vld [vmem:[#allocation169_spill] sm:$0xff] }
 0x8a1   : > { %v5467_v52 = vpop.f32.mrf.mxu2  ;;  %v5551_v17 = vpop.f32.mrf.mxu3  ;;  %v6987_v43 = vmax.f32 %v6669_v4, %v6834_v45 }
 0x8a2   : > { %v17012_v40 = vadd.f32 %v5551_v17, %v5462_v9  ;;  %v5365_v6 = vpop.f32.mrf.mxu1  ;;  %v5627_v24 = vpop.f32.mrf.mxu0  ;;  %v6609_v55 = vadd.f32 %v16586_v44, %v6539_v27 }
 0x8a3   : > { %v5366_v35 = vadd.f32 %v5365_v6, %v16521_v14  ;;  %v17017_v16 = vadd.f32 %v5627_v24, %v16947_v63  ;;  %v17019_v50 = vpack.c.bf16 %v6987_v43, %v6985_v46  ;;  %v19724_v46 = vld [vmem:[#allocation164_spill] sm:$0xff] }
 0x8a4   : > { %v6673_v18 = vmax.f32 %v6609_v55, 0.0 }
 0x8a5   : > { %v6393_v11 = vrot.slane %v5366_v35, 2  ;;  %v19726_v35 = vld [vmem:[#allocation29_spill] sm:$0xff] }
 0x8a6   : > { %v6837_v49 = vrot.slane %v6673_v18, 1 }
 0x8a7   : > { %v6394_v5 = vsel %vm6310_vm1, %v6389_v29, %v6393_v11 }
 0x8a8   : > { %v6541_v4 = vadd.f32 %v6394_v5, %v19723_v37  ;;  %v6838_v9 = vsel %vm5991_vm0, %v6833_v19, %v6837_v49  ;;  %v19727_v19 = vld [vmem:[#allocation61_spill] sm:$0xff]  ;;  %v19728_v5 = vld [vmem:[#allocation122_spill] sm:$0xff] }
 0x8a9   : > { %v5469_v45 = vpop.f32.mrf.mxu2  ;;  %v5553_v17 = vpop.f32.mrf.mxu3  ;;  %v6989_v59 = vmax.f32 %v6671_v12, %v6838_v9 }
 0x8aa   : > { %v6611_v27 = vadd.f32 %v16586_v44, %v6541_v4  ;;  %v17025_v14 = vadd.f32 %v5553_v17, %v5464_v31  ;;  %v5368_v63 = vpop.f32.mrf.mxu1  ;;  %v5630_v6 = vpop.f32.mrf.mxu0 }
 0x8ab   : > { %v5369_v43 = vadd.f32 %v5368_v63, %v19724_v46  ;;  %v17029_v24 = vadd.f32 %v5630_v6, %v16960_v56 }
 0x8ac   : > { %v6675_v55 = vmax.f32 %v6611_v27, 0.0 }
 0x8ad   : > { %19725 = vst [vmem:[#allocation91_spill] sm:$0xff] %v17029_v24  ;;  %v6397_v29 = vrot.slane %v5369_v43, 2  ;;  %5683 = vmatmul.bf16.gmra.mxu1 %v19726_v35  ;;  %7195 = vmatmul.bf16.gmra.mxu0 %v16800_v21 }
 0x8ae   : > { %5787 = vmatmul.bf16.gmra.mxu2 %v19727_v19  ;;  %5871 = vmatmul.bf16.gmra.mxu3 %v19644_v58  ;;  %v6841_v12 = vrot.slane %v6675_v55, 1 }
 0x8af   : > { %v6398_v31 = vsel %vm6310_vm1, %v6393_v11, %v6397_v29 }
 0x8b0   : > { %v6543_v37 = vadd.f32 %v6398_v31, %v19728_v5  ;;  %v6842_v4 = vsel %vm5991_vm0, %v6837_v49, %v6841_v12  ;;  %v19729_v5 = vld [vmem:[#allocation170_spill] sm:$0xff] }
 0x8b1   : > { %v5472_v9 = vpop.f32.mrf.mxu2  ;;  %v5556_v56 = vpop.f32.mrf.mxu3  ;;  %v6991_v17 = vmax.f32 %v6673_v18, %v6842_v4 }
 0x8b2   : > { %v17038_v27 = vadd.f32 %v5556_v56, %v5467_v52  ;;  %v5370_v63 = vpop.f32.mrf.mxu1  ;;  %v5632_v6 = vpop.f32.mrf.mxu0  ;;  %v6613_v46 = vadd.f32 %v16586_v44, %v6543_v37 }
 0x8b3   : > { %v5371_v43 = vadd.f32 %v5370_v63, %v16531_v41  ;;  %v17043_v58 = vadd.f32 %v5632_v6, %v16973_v62  ;;  %v17045_v35 = vpack.c.bf16 %v6991_v17, %v6989_v59 }
 0x8b4   : > { %v6677_v11 = vmax.f32 %v6613_v46, 0.0  ;;  %v19730_v46 = vld [vmem:[#allocation33_spill] sm:$0xff] }
 0x8b5   : > { %v6401_v19 = vrot.slane %v5371_v43, 2  ;;  %v19732_v43 = vld [vmem:[#allocation123_spill] sm:$0xff] }
 0x8b6   : > { %v6845_v31 = vrot.slane %v6677_v11, 1 }
 0x8b7   : > { %v6402_v49 = vsel %vm6310_vm1, %v6397_v29, %v6401_v19 }
 0x8b8   : > { %v6545_v18 = vadd.f32 %v6402_v49, %v19729_v5  ;;  %v6846_v52 = vsel %vm5991_vm0, %v6841_v12, %v6845_v31  ;;  %v19731_v12 = vld [vmem:[#allocation65_spill] sm:$0xff] }
 0x8b9   : > { %v5474_v4 = vpop.f32.mrf.mxu2  ;;  %v5558_v56 = vpop.f32.mrf.mxu3  ;;  %v6993_v24 = vmax.f32 %v6675_v55, %v6846_v52 }
 0x8ba   : > { %v6615_v37 = vadd.f32 %v16586_v44, %v6545_v18  ;;  %v17051_v41 = vadd.f32 %v5558_v56, %v5469_v45  ;;  %v5373_v62 = vpop.f32.mrf.mxu1  ;;  %v5635_v63 = vpop.f32.mrf.mxu0 }
 0x8bb   : > { %v5374_v59 = vadd.f32 %v5373_v62, %v16534_v0  ;;  %v17055_v17 = vadd.f32 %v5635_v63, %v16986_v39 }
 0x8bc   : > { %v6679_v6 = vmax.f32 %v6615_v37, 0.0 }
 0x8bd   : > { %v6405_v29 = vrot.slane %v5374_v59, 2  ;;  %5688 = vmatmul.bf16.gmra.mxu1 %v19730_v46  ;;  %7200 = vmatmul.bf16.gmra.mxu0 %v16858_v60 }
 0x8be   : > { %5792 = vmatmul.bf16.gmra.mxu2 %v19731_v12  ;;  %5876 = vmatmul.bf16.gmra.mxu3 %v19647_v53  ;;  %v6849_v55 = vrot.slane %v6679_v6, 1 }
 0x8bf   : > { %v6406_v45 = vsel %vm6310_vm1, %v6401_v19, %v6405_v29 }
 0x8c0   : > { %v6547_v49 = vadd.f32 %v6406_v45, %v19732_v43  ;;  %v6850_v0 = vsel %vm5991_vm0, %v6845_v31, %v6849_v55  ;;  %v19733_v45 = vld [vmem:[#allocation124_spill] sm:$0xff] }
 0x8c1   : > { %v5477_v5 = vpop.f32.mrf.mxu2  ;;  %v5561_v39 = vpop.f32.mrf.mxu3  ;;  %v6995_v18 = vmax.f32 %v6677_v11, %v6850_v0 }
 0x8c2   : > { %v17064_v52 = vadd.f32 %v5561_v39, %v5472_v9  ;;  %v5375_v56 = vpop.f32.mrf.mxu1  ;;  %v5637_v37 = vpop.f32.mrf.mxu0  ;;  %v6617_v62 = vadd.f32 %v16586_v44, %v6547_v49 }
 0x8c3   : > { %v5376_v63 = vadd.f32 %v5375_v56, %v16541_v2  ;;  %v17069_v53 = vadd.f32 %v5637_v37, %v16999_v1  ;;  %v17071_v59 = vpack.c.bf16 %v6995_v18, %v6993_v24 }
 0x8c4   : > { %v6681_v19 = vmax.f32 %v6617_v62, 0.0  ;;  %v19734_v62 = vld [vmem:[#allocation37_spill] sm:$0xff] }
 0x8c5   : > { %v6409_v46 = vrot.slane %v5376_v63, 2  ;;  %v19736_v63 = vld [vmem:[#allocation125_spill] sm:$0xff] }
 0x8c6   : > { %v6853_v12 = vrot.slane %v6681_v19, 1 }
 0x8c7   : > { %v6410_v31 = vsel %vm6310_vm1, %v6405_v29, %v6409_v46 }
 0x8c8   : > { %v6549_v11 = vadd.f32 %v6410_v31, %v19733_v45  ;;  %v6854_v9 = vsel %vm5991_vm0, %v6849_v55, %v6853_v12  ;;  %v19735_v55 = vld [vmem:[#allocation69_spill] sm:$0xff] }
 0x8c9   : > { %v5479_v43 = vpop.f32.mrf.mxu2  ;;  %v5563_v0 = vpop.f32.mrf.mxu3  ;;  %v6997_v39 = vmax.f32 %v6679_v6, %v6854_v9 }
 0x8ca   : > { %v6619_v49 = vadd.f32 %v16586_v44, %v6549_v11  ;;  %v17077_v2 = vadd.f32 %v5563_v0, %v5474_v4  ;;  %v5378_v1 = vpop.f32.mrf.mxu1  ;;  %v5640_v56 = vpop.f32.mrf.mxu0 }
 0x8cb   : > { %v5379_v24 = vadd.f32 %v5378_v1, %v16544_v22  ;;  %v17081_v18 = vadd.f32 %v5640_v56, %v17012_v40 }
 0x8cc   : > { %v6683_v37 = vmax.f32 %v6619_v49, 0.0 }
 0x8cd   : > { %v6413_v29 = vrot.slane %v5379_v24, 2  ;;  %5693 = vmatmul.bf16.gmra.mxu1 %v19734_v62  ;;  %7205 = vmatmul.bf16.gmra.mxu0 %v16909_v33 }
 0x8ce   : > { %5797 = vmatmul.bf16.gmra.mxu2 %v19735_v55  ;;  %5881 = vmatmul.bf16.gmra.mxu3 %v19650_v7  ;;  %v6857_v6 = vrot.slane %v6683_v37, 1 }
 0x8cf   : > { %v6414_v4 = vsel %vm6310_vm1, %v6409_v46, %v6413_v29 }
 0x8d0   : > { %v6551_v31 = vadd.f32 %v6414_v4, %v19736_v63  ;;  %v6858_v22 = vsel %vm5991_vm0, %v6853_v12, %v6857_v6  ;;  %v19737_v4 = vld [vmem:[#allocation126_spill] sm:$0xff] }
 0x8d1   : > { %v5566_v45 = vpop.f32.mrf.mxu3  ;;  %v17090_v40 = vpop.f32.mrf.mxu2  ;;  %v6999_v11 = vmax.f32 %v6681_v19, %v6858_v22 }
 0x8d2   : > { %v17092_v9 = vadd.f32 %v5566_v45, %v5477_v5  ;;  %v5380_v0 = vpop.f32.mrf.mxu1  ;;  %v5642_v49 = vpop.f32.mrf.mxu0  ;;  %v6621_v1 = vadd.f32 %v16586_v44, %v6551_v31 }
 0x8d3   : > { %v5381_v56 = vadd.f32 %v5380_v0, %v16551_v23  ;;  %v17097_v7 = vadd.f32 %v5642_v49, %v17025_v14  ;;  %v17099_v46 = vpack.c.bf16 %v6999_v11, %v6997_v39 }
 0x8d4   : > { %v6685_v24 = vmax.f32 %v6621_v1, 0.0  ;;  %v19739_v1 = vld [vmem:[#allocation45_spill] sm:$0xff] }
 0x8d5   : > { %v6417_v62 = vrot.slane %v5381_v56, 2  ;;  %v19741_v56 = vld [vmem:[#allocation48_spill] sm:$0xff] }
 0x8d6   : > { %v6861_v12 = vrot.slane %v6685_v24, 1 }
 0x8d7   : > { %v6418_v55 = vsel %vm6310_vm1, %v6413_v29, %v6417_v62 }
 0x8d8   : > { %v6553_v19 = vadd.f32 %v6418_v55, %v19737_v4  ;;  %v6862_v5 = vsel %vm5991_vm0, %v6857_v6, %v6861_v12  ;;  %v19740_v6 = vld [vmem:[#allocation75_spill] sm:$0xff] }
 0x8d9   : > { %v5568_v63 = vpop.f32.mrf.mxu3  ;;  %v17104_v22 = vpop.f32.mrf.mxu2  ;;  %v7001_v31 = vmax.f32 %v6683_v37, %v6862_v5 }
 0x8da   : > { %v6623_v23 = vadd.f32 %v16586_v44, %v6553_v19  ;;  %v17107_v45 = vadd.f32 %v5568_v63, %v5479_v43  ;;  %v5383_v14 = vpop.f32.mrf.mxu1  ;;  %v5645_v39 = vpop.f32.mrf.mxu0 }
 0x8db   : > { %v5384_v11 = vadd.f32 %v5383_v14, %v16556_v8  ;;  %v17111_v0 = vadd.f32 %v5645_v39, %v17038_v27 }
 0x8dc   : > { %v6687_v29 = vmax.f32 %v6623_v23, 0.0 }
 0x8dd   : > { %19738 = vst [vmem:[#allocation6_spill] sm:$0xff] %v17111_v0  ;;  %v6421_v49 = vrot.slane %v5384_v11, 2  ;;  %5698 = vmatmul.bf16.gmra.mxu1 %v19739_v1  ;;  %7210 = vmatmul.bf16.gmra.mxu0 %v16941_v61 }
 0x8de   : > { %5802 = vmatmul.bf16.gmra.mxu2 %v19740_v6  ;;  %5886 = vmatmul.bf16.gmra.mxu3 %v19653_v47  ;;  %v6865_v37 = vrot.slane %v6687_v29, 1  ;;  %v19743_v6 = vld [vmem:[#allocation47_spill] sm:$0xff] }
 0x8df   : > { %v6422_v43 = vsel %vm6310_vm1, %v6417_v62, %v6421_v49 }
 0x8e0   : > { %v6555_v55 = vadd.f32 %v6422_v43, %v19741_v56  ;;  %v6866_v8 = vsel %vm5991_vm0, %v6861_v12, %v6865_v37 }
 0x8e1   : > { %v17120_v4 = vpop.f32.mrf.mxu2  ;;  %v17122_v27 = vpop.f32.mrf.mxu3  ;;  %v7003_v19 = vmax.f32 %v6685_v24, %v6866_v8 }
 0x8e2   : > { %v5385_v5 = vpop.f32.mrf.mxu1  ;;  %v5647_v63 = vpop.f32.mrf.mxu0  ;;  %v6625_v23 = vadd.f32 %v16586_v44, %v6555_v55 }
 0x8e3   : > { %v5386_v14 = vadd.f32 %v5385_v5, %v16565_v26  ;;  %v17127_v47 = vadd.f32 %v5647_v63, %v17051_v41  ;;  %v17129_v39 = vpack.c.bf16 %v7003_v19, %v7001_v31 }
 0x8e4   : > { %v6689_v62 = vmax.f32 %v6625_v23, 0.0  ;;  %v19745_v23 = vld [vmem:[#allocation53_spill] sm:$0xff] }
 0x8e5   : > { %19742 = vst [vmem:[#allocation145_spill] sm:$0xff] %v17127_v47  ;;  %v6425_v11 = vrot.slane %v5386_v14, 2  ;;  %v19750_v47 = vld [vmem:[#allocation134_spill] sm:$0xff] }
 0x8e6   : > { %v6869_v1 = vrot.slane %v6689_v62, 1 }
 0x8e7   : > { %v6426_v12 = vsel %vm6310_vm1, %v6421_v49, %v6425_v11 }
 0x8e8   : > { %v6557_v43 = vadd.f32 %v6426_v12, %v19743_v6  ;;  %v6870_v24 = vsel %vm5991_vm0, %v6865_v37, %v6869_v1  ;;  %v19746_v37 = vld [vmem:[#allocation81_spill] sm:$0xff] }
 0x8e9   : > { %v17134_v56 = vpop.f32.mrf.mxu2  ;;  %v17136_v8 = vpop.f32.mrf.mxu3  ;;  %v7005_v55 = vmax.f32 %v6687_v29, %v6870_v24  ;;  %v19747_v12 = vld [vmem:[#allocation129_spill] sm:$0xff] }
 0x8ea   : > { %v6627_v26 = vadd.f32 %v16586_v44, %v6557_v43  ;;  %v5388_v41 = vpop.f32.mrf.mxu1  ;;  %v5650_v5 = vpop.f32.mrf.mxu0 }
 0x8eb   : > { %v5389_v31 = vadd.f32 %v5388_v41, %v16569_v15  ;;  %v17141_v19 = vadd.f32 %v5650_v5, %v17064_v52 }
 0x8ec   : > { %v6691_v63 = vmax.f32 %v6627_v26, 0.0 }
 0x8ed   : > { %19744 = vst [vmem:[#allocation10_spill] sm:$0xff] %v17141_v19  ;;  %v6429_v49 = vrot.slane %v5389_v31, 2  ;;  %5703 = vmatmul.bf16.gmra.mxu1 %v19745_v23  ;;  %7215 = vmatmul.bf16.gmra.mxu0 %v16967_v57 }
 0x8ee   : > { %5807 = vmatmul.bf16.gmra.mxu2 %v19746_v37  ;;  %5891 = vmatmul.bf16.gmra.mxu3 %v19657_v48  ;;  %v6873_v29 = vrot.slane %v6691_v63, 1 }
 0x8ef   : > { %v6430_v14 = vsel %vm6310_vm1, %v6425_v11, %v6429_v49 }
 0x8f0   : > { %v6559_v6 = vadd.f32 %v6430_v14, %v19747_v12  ;;  %v6874_v15 = vsel %vm5991_vm0, %v6869_v1, %v6873_v29  ;;  %v19749_v12 = vld [vmem:[#allocation130_spill] sm:$0xff] }
 0x8f1   : > { %v17150_v43 = vpop.f32.mrf.mxu2  ;;  %v17152_v52 = vpop.f32.mrf.mxu3  ;;  %v7007_v24 = vmax.f32 %v6689_v62, %v6874_v15 }
 0x8f2   : > { %v5390_v26 = vpop.f32.mrf.mxu1  ;;  %v5652_v41 = vpop.f32.mrf.mxu0  ;;  %v6629_v5 = vadd.f32 %v16586_v44, %v6559_v6 }
 0x8f3   : > { %v5391_v31 = vadd.f32 %v5390_v26, %v16578_v25  ;;  %v17157_v48 = vadd.f32 %v5652_v41, %v17077_v2  ;;  %v17159_v23 = vpack.c.bf16 %v7007_v24, %v7005_v55 }
 0x8f4   : > { %v6693_v11 = vmax.f32 %v6629_v5, 0.0 }
 0x8f5   : > { %19748 = vst [vmem:[#allocation168_spill] sm:$0xff] %v17159_v23  ;;  %v6433_v37 = vrot.slane %v5391_v31, 2  ;;  %v19751_v31 = vld [vmem:[#allocation59_spill] sm:$0xff] }
 0x8f6   : > { %v6877_v14 = vrot.slane %v6693_v11, 1 }
 0x8f7   : > { %v6434_v1 = vsel %vm6310_vm1, %v6429_v49, %v6433_v37  ;;  %v6563_v19 = vadd.f32 %v6433_v37, %v19749_v12  ;;  %v19752_v37 = vld [vmem:[#allocation85_spill] sm:$0xff] }
 0x8f8   : > { %v6561_v62 = vadd.f32 %v6434_v1, %v19750_v47  ;;  %v6878_v15 = vsel %vm5991_vm0, %v6873_v29, %v6877_v14 }
 0x8f9   : > { %v6633_v6 = vadd.f32 %v16586_v44, %v6563_v19  ;;  %v17166_v0 = vpop.f32.mrf.mxu2  ;;  %v17168_v25 = vpop.f32.mrf.mxu3  ;;  %v7009_v2 = vmax.f32 %v6691_v63, %v6878_v15  ;;  %v19753_v63 = vld [vmem:[#allocation100_spill] sm:$0xff] }
 0x8fa   : > { %v6631_v55 = vadd.f32 %v16586_v44, %v6561_v62  ;;  %v5655_v24 = vpop.f32.mrf.mxu0  ;;  %v5669_v26 = vpop.f32.mrf.mxu1 }
 0x8fb   : > { %v6697_v41 = vmax.f32 %v6633_v6, 0.0  ;;  %v17172_v49 = vadd.f32 %v5655_v24, %v17092_v9  ;;  %v5670_v5 = vadd.f32 %v5669_v26, %v16591_v36  ;;  %v19754_v26 = vld [vmem:[#allocation163_spill] sm:$0xff] }
 0x8fc   : > { %v6695_v47 = vmax.f32 %v6631_v55, 0.0 }
 0x8fd   : > { %v5759_v29 = vadd.f32 %v17090_v40, %v5670_v5  ;;  %5708 = vmatmul.bf16.gmra.mxu1 %v19751_v31  ;;  %7220 = vmatmul.bf16.gmra.mxu0 %v16993_v10  ;;  %v6885_v19 = vrot.slane %v6697_v41, 1 }
 0x8fe   : > { %5812 = vmatmul.bf16.gmra.mxu2 %v19752_v37  ;;  %5896 = vmatmul.bf16.gmra.mxu3 %v19753_v63  ;;  %v6881_v44 = vrot.slane %v6695_v47, 1 }
 0x8ff   : > { %v7015_v15 = vmax.f32 %v6697_v41, %v6885_v19 }
 0x900   : > { %v6882_v1 = vsel %vm5991_vm0, %v6877_v14, %v6881_v44  ;;  %v6886_v9 = vsel %vm5991_vm0, %v6881_v44, %v6885_v19  ;;  %v5848_v14 = vadd.f32 %v17122_v27, %v5759_v29  ;;  %v12276_v29 = vld [vmem:[%s18690_s2] sm:$0x3] }
 0x901   : > { %v17182_v12 = vpop.f32.mrf.mxu2  ;;  %v17184_v36 = vpop.f32.mrf.mxu3  ;;  %v7011_v62 = vmax.f32 %v6693_v11, %v6882_v1  ;;  %v7013_v40 = vmax.f32 %v6695_v47, %v6886_v9  ;;  %v19756_v9 = vld [vmem:[#allocation64_spill] sm:$0xff] }
 0x902   : > { %v5657_v6 = vpop.f32.mrf.mxu0  ;;  %v5671_v55 = vpop.f32.mrf.mxu1  ;;  %v6314_v11 = vrot.slane %v5848_v14, 2 }
 0x903   : > { %v17187_v24 = vadd.f32 %v5657_v6, %v17107_v45  ;;  %v5672_v5 = vadd.f32 %v5671_v55, %v19754_v26  ;;  %v17190_v31 = vpack.c.bf16 %v7011_v62, %v7009_v2  ;;  %v17192_v37 = vpack.c.bf16 %v7015_v15, %v7013_v40  ;;  %v19757_v40 = vld [vmem:[#allocation132_spill] sm:$0xff]  ;;  %v19759_v55 = vld [vmem:[#allocation89_spill] sm:$0xff] }
 0x904   : > { %v17215_v6 = vperm.slane %v12276_v29, 1 }
 0x905   : > { %19755 = vst [vmem:[#allocation96_spill] sm:$0xff] %v17190_v31  ;;  %v5761_v63 = vadd.f32 %v17104_v22, %v5672_v5  ;;  %v19758_v22 = vld [vmem:[#allocation63_spill] sm:$0xff] }
 0x907   : > { %v5850_v44 = vadd.f32 %v17136_v8, %v5761_v63  ;;  %v12191_v8 = vld [vmem:[%s18691_s3 + $0xb8] sm:$0xff]  ;;  %v12190_v63 = vld [vmem:[%s18691_s3 + $0xb0] sm:$0xff] }
 0x908   : > { %7484 = vmatpush.bf16.msra.mxu2 %v12191_v8 }
 0x909   : > { %v6315_v47 = vrot.slane %v5850_v44, 2  ;;  %v17197_v41 = vpop.f32.mrf.mxu2  ;;  %v17199_v19 = vpop.f32.mrf.mxu3 }
 0x90a   : > { %v5674_v45 = vpop.f32.mrf.mxu1  ;;  %v17201_v1 = vpop.f32.mrf.mxu0 }
 0x90b   : > { %v6316_v2 = vsel %vm6310_vm1, %v6314_v11, %v6315_v47  ;;  %v5675_v62 = vadd.f32 %v5674_v45, %v19756_v9 }
 0x90c   : > { %v6502_v15 = vadd.f32 %v6316_v2, %v19757_v40  ;;  %7485 = vmatpush.bf16.msra.mxu2 %v12190_v63  ;;  %v12189_v40 = vld [vmem:[%s18691_s3 + $0xa8] sm:$0xff] }
 0x90d   : > { %v5764_v27 = vadd.f32 %v17120_v4, %v5675_v62  ;;  %5713 = vmatmul.bf16.gmra.mxu1 %v19758_v22  ;;  %7225 = vmatmul.bf16.gmra.mxu0 %v17019_v50 }
 0x90e   : > { %5817 = vmatmul.bf16.gmra.mxu2 %v19759_v55  ;;  %5901 = vmatmul.bf16.gmra.mxu3 %v19669_v32  ;;  %v6572_v44 = vadd.f32 %v17215_v6, %v6502_v15 }
 0x90f   : > { %v5853_v4 = vadd.f32 %v17152_v52, %v5764_v27  ;;  %v19760_v52 = vld [vmem:[#allocation135_spill] sm:$0xff] }
 0x910   : > { %v6636_v27 = vmax.f32 %v6572_v44, 0.0  ;;  %7486 = vmatpush.bf16.msra.mxu2 %v12189_v40  ;;  %v12187_v40 = vld [vmem:[%s18691_s3 + $0x98] sm:$0xff] }
 0x911   : > { %v6319_v26 = vrot.slane %v5853_v4, 2  ;;  %v17220_v5 = vpop.f32.mrf.mxu2  ;;  %v17222_v14 = vpop.f32.mrf.mxu3 }
 0x912   : > { %v5676_v11 = vpop.f32.mrf.mxu1  ;;  %v17228_v45 = vpop.f32.mrf.mxu0  ;;  %v6766_v55 = vrot.slane %v6636_v27, 1 }
 0x913   : > { %v6320_v2 = vsel %vm6310_vm1, %v6315_v47, %v6319_v26  ;;  %v5677_v32 = vadd.f32 %v5676_v11, %v16684_v54 }
 0x914   : > { %v6504_v9 = vadd.f32 %v6320_v2, %v19760_v52  ;;  %v19762_v2 = vld [vmem:[#allocation136_spill] sm:$0xff] }
 0x915   : > { %v5766_v62 = vadd.f32 %v17134_v56, %v5677_v32  ;;  %v12188_v56 = vld [vmem:[%s18691_s3 + $0xa0] sm:$0xff] }
 0x916   : > { %v6574_v22 = vadd.f32 %v17215_v6, %v6504_v9  ;;  %7487 = vmatpush.bf16.msra.mxu2 %v12188_v56 }
 0x917   : > { %v5855_v15 = vadd.f32 %v17168_v25, %v5766_v62  ;;  %v19763_v62 = vld [vmem:[#allocation67_spill] sm:$0xff] }
 0x918   : > { %v6638_v8 = vmax.f32 %v6574_v22, 0.0 }
 0x919   : > { %v6323_v29 = vrot.slane %v5855_v15, 2  ;;  %v17239_v47 = vpop.f32.mrf.mxu2  ;;  %v17241_v54 = vpop.f32.mrf.mxu3  ;;  %v19764_v15 = vld [vmem:[#allocation92_spill] sm:$0xff] }
 0x91a   : > { %v6767_v4 = vrot.slane %v6638_v8, 1  ;;  %v5679_v63 = vpop.f32.mrf.mxu1  ;;  %v17246_v11 = vpop.f32.mrf.mxu0  ;;  %7488 = vmatpush.bf16.msra.mxu2 %v12187_v40  ;;  %v19767_v40 = vld [vmem:[#allocation102_spill] sm:$0xff] }
 0x91b   : > { %19761 = vst [vmem:[#allocation14_spill] sm:$0xff] %v17246_v11  ;;  %v6324_v44 = vsel %vm6310_vm1, %v6319_v26, %v6323_v29  ;;  %v5680_v25 = vadd.f32 %v5679_v63, %v16721_v38  ;;  %v12199_v26 = vld [vmem:[%s18691_s3 + $0xf8] sm:$0xff] }
 0x91c   : > { %v6506_v32 = vadd.f32 %v6324_v44, %v19762_v2  ;;  %v6768_v52 = vsel %vm5991_vm0, %v6766_v55, %v6767_v4  ;;  %7573 = vmatpush.bf16.msra.mxu3 %v12199_v26 }
 0x91d   : > { %v5769_v9 = vadd.f32 %v17150_v43, %v5680_v25  ;;  %5718 = vmatmul.bf16.gmra.mxu1 %v19763_v62  ;;  %7230 = vmatmul.bf16.gmra.mxu0 %v17045_v35  ;;  %v6954_v38 = vmax.f32 %v6636_v27, %v6768_v52  ;;  %v12186_v27 = vld [vmem:[%s18691_s3 + $0x90] sm:$0xff]  ;;  %v19766_v52 = vld [vmem:[#allocation66_spill] sm:$0xff] }
 0x91e   : > { %v6576_v22 = vadd.f32 %v17215_v6, %v6506_v32  ;;  %5822 = vmatmul.bf16.gmra.mxu2 %v19764_v15  ;;  %5906 = vmatmul.bf16.gmra.mxu3 %v19676_v51  ;;  %v12198_v25 = vld [vmem:[%s18691_s3 + $0xf0] sm:$0xff]  ;;  %v12185_v15 = vld [vmem:[%s18691_s3 + $0x88] sm:$0xff] }
 0x91f   : > { %v5858_v43 = vadd.f32 %v17184_v36, %v5769_v9  ;;  %7489 = vmatpush.bf16.msra.mxu2 %v12186_v27 }
 0x920   : > { %v6640_v56 = vmax.f32 %v6576_v22, 0.0  ;;  %7574 = vmatpush.bf16.msra.mxu3 %v12198_v25 }
 0x921   : > { %v6327_v55 = vrot.slane %v5858_v43, 2  ;;  %v17265_v63 = vpop.f32.mrf.mxu2  ;;  %v17267_v44 = vpop.f32.mrf.mxu3  ;;  %v12197_v43 = vld [vmem:[%s18691_s3 + $0xe8] sm:$0xff] }
 0x922   : > { %v6771_v2 = vrot.slane %v6640_v56, 1  ;;  %v5681_v51 = vpop.f32.mrf.mxu1  ;;  %v17275_v32 = vpop.f32.mrf.mxu0 }
 0x923   : > { %19765 = vst [vmem:[#allocation97_spill] sm:$0xff] %v17275_v32  ;;  %v6328_v36 = vsel %vm6310_vm1, %v6323_v29, %v6327_v55  ;;  %v5682_v9 = vadd.f32 %v5681_v51, %v19766_v52  ;;  %7490 = vmatpush.bf16.msra.mxu2 %v12185_v15  ;;  %v12184_v52 = vld [vmem:[%s18691_s3 + $0x80] sm:$0xff] }
 0x924   : > { %v6772_v62 = vsel %vm5991_vm0, %v6767_v4, %v6771_v2  ;;  %v6508_v26 = vadd.f32 %v6328_v36, %v19767_v40  ;;  %7575 = vmatpush.bf16.msra.mxu3 %v12197_v43 }
 0x925   : > { %v5771_v22 = vadd.f32 %v17166_v0, %v5682_v9  ;;  %v6956_v32 = vmax.f32 %v6638_v8, %v6772_v62  ;;  %v12196_v8 = vld [vmem:[%s18691_s3 + $0xe0] sm:$0xff] }
 0x926   : > { %v6578_v29 = vadd.f32 %v17215_v6, %v6508_v26  ;;  %v19771_v26 = vld [vmem:[#allocation104_spill] sm:$0xff] }
 0x927   : > { %v5860_v27 = vadd.f32 %v17199_v19, %v5771_v22  ;;  %v17290_v4 = vpack.c.bf16 %v6956_v32, %v6954_v38  ;;  %v19770_v32 = vld [vmem:[#allocation68_spill] sm:$0xff]  ;;  %7491 = vmatpush.bf16.msra.mxu2 %v12184_v52  ;;  %v19774_v52 = vld [vmem:[#allocation111_spill] sm:$0xff] }
 0x928   : > { %v6642_v25 = vmax.f32 %v6578_v29, 0.0  ;;  %7576 = vmatpush.bf16.msra.mxu3 %v12196_v8  ;;  %v19772_v29 = vld [vmem:[#allocation71_spill] sm:$0xff] }
 0x929   : > { %19768 = vst [vmem:[#allocation13_spill] sm:$0xff] %v17290_v4  ;;  %v6331_v51 = vrot.slane %v5860_v27, 2  ;;  %v17292_v0 = vpop.f32.mrf.mxu2  ;;  %v17294_v36 = vpop.f32.mrf.mxu3  ;;  %v12195_v27 = vld [vmem:[%s18691_s3 + $0xd8] sm:$0xff] }
 0x92a   : > { %v5684_v9 = vpop.f32.mrf.mxu1  ;;  %v17302_v19 = vpop.f32.mrf.mxu0  ;;  %v6775_v62 = vrot.slane %v6642_v25, 1 }
 0x92b   : > { %19769 = vst [vmem:[#allocation18_spill] sm:$0xff] %v17302_v19  ;;  %v6332_v38 = vsel %vm6310_vm1, %v6327_v55, %v6331_v51  ;;  %v5685_v40 = vadd.f32 %v5684_v9, %v19770_v32  ;;  %v19773_v9 = vld [vmem:[#allocation94_spill] sm:$0xff] }
 0x92c   : > { %v6510_v22 = vadd.f32 %v6332_v38, %v19771_v26  ;;  %v6776_v15 = vsel %vm5991_vm0, %v6771_v2, %v6775_v62  ;;  %7577 = vmatpush.bf16.msra.mxu3 %v12195_v27 }
 0x92d   : > { %v5774_v43 = vadd.f32 %v17182_v12, %v5685_v40  ;;  %5723 = vmatmul.bf16.gmra.mxu1 %v19772_v29  ;;  %7235 = vmatmul.bf16.gmra.mxu0 %v17071_v59  ;;  %v6958_v19 = vmax.f32 %v6640_v56, %v6776_v15  ;;  %v12194_v40 = vld [vmem:[%s18691_s3 + $0xd0] sm:$0xff]  ;;  %v19776_v29 = vld [vmem:[#allocation74_spill] sm:$0xff] }
 0x92e   : > { %v6580_v55 = vadd.f32 %v17215_v6, %v6510_v22  ;;  %5827 = vmatmul.bf16.gmra.mxu2 %v19773_v9  ;;  %5911 = vmatmul.bf16.gmra.mxu3 %v19774_v52  ;;  %v12193_v52 = vld [vmem:[%s18691_s3 + $0xc8] sm:$0xff] }
 0x92f   : > { %v5863_v8 = vadd.f32 %v17222_v14, %v5774_v43  ;;  %v19777_v43 = vld [vmem:[#allocation137_spill] sm:$0xff] }
 0x930   : > { %v6644_v2 = vmax.f32 %v6580_v55, 0.0  ;;  %7578 = vmatpush.bf16.msra.mxu3 %v12194_v40 }
 0x931   : > { %v6335_v12 = vrot.slane %v5863_v8, 2  ;;  %v17318_v38 = vpop.f32.mrf.mxu2  ;;  %v17320_v32 = vpop.f32.mrf.mxu3 }
 0x932   : > { %v5686_v56 = vpop.f32.mrf.mxu1  ;;  %v17325_v26 = vpop.f32.mrf.mxu0  ;;  %v6779_v22 = vrot.slane %v6644_v2, 1 }
 0x933   : > { %19775 = vst [vmem:[#allocation98_spill] sm:$0xff] %v17325_v26  ;;  %v6336_v15 = vsel %vm6310_vm1, %v6331_v51, %v6335_v12  ;;  %v5687_v9 = vadd.f32 %v5686_v56, %v19776_v29 }
 0x934   : > { %v6780_v14 = vsel %vm5991_vm0, %v6775_v62, %v6779_v22  ;;  %v6512_v27 = vadd.f32 %v6336_v15, %v19777_v43  ;;  %7579 = vmatpush.bf16.msra.mxu3 %v12193_v52  ;;  %v12183_v52 = vld [vmem:[%s18691_s3 + $0x78] sm:$0xff] }
 0x935   : > { %v5776_v55 = vadd.f32 %v17197_v41, %v5687_v9  ;;  %v6960_v8 = vmax.f32 %v6642_v25, %v6780_v14  ;;  %v12192_v41 = vld [vmem:[%s18691_s3 + $0xc0] sm:$0xff]  ;;  %7266 = vmatpush.bf16.msra.mxu1 %v12183_v52  ;;  %v12181_v52 = vld [vmem:[%s18691_s3 + $0x68] sm:$0xff] }
 0x936   : > { %v6582_v11 = vadd.f32 %v17215_v6, %v6512_v27 }
 0x937   : > { %v5865_v26 = vadd.f32 %v17241_v54, %v5776_v55  ;;  %v17337_v51 = vpack.c.bf16 %v6960_v8, %v6958_v19  ;;  %v19779_v54 = vld [vmem:[#allocation80_spill] sm:$0xff]  ;;  %v19780_v19 = vld [vmem:[#allocation138_spill] sm:$0xff]  ;;  %v19781_v55 = vld [vmem:[#allocation77_spill] sm:$0xff] }
 0x938   : > { %v6646_v56 = vmax.f32 %v6582_v11, 0.0  ;;  %7580 = vmatpush.bf16.msra.mxu3 %v12192_v41 }
 0x939   : > { %v6339_v40 = vrot.slane %v5865_v26, 2  ;;  %v17339_v29 = vpop.f32.mrf.mxu2  ;;  %v17341_v62 = vpop.f32.mrf.mxu3 }
 0x93a   : > { %v5689_v15 = vpop.f32.mrf.mxu1  ;;  %v17346_v9 = vpop.f32.mrf.mxu0  ;;  %v6783_v25 = vrot.slane %v6646_v56, 1 }
 0x93b   : > { %19778 = vst [vmem:[#allocation16_spill] sm:$0xff] %v17346_v9  ;;  %v6340_v14 = vsel %vm6310_vm1, %v6335_v12, %v6339_v40  ;;  %v5690_v43 = vadd.f32 %v5689_v15, %v19779_v54  ;;  %v19782_v9 = vld [vmem:[#allocation95_spill] sm:$0xff]  ;;  %v12182_v54 = vld [vmem:[%s18691_s3 + $0x70] sm:$0xff] }
 0x93c   : > { %v6514_v11 = vadd.f32 %v6340_v14, %v19780_v19  ;;  %v6784_v26 = vsel %vm5991_vm0, %v6779_v22, %v6783_v25  ;;  %7267 = vmatpush.bf16.msra.mxu1 %v12182_v54 }
 0x93d   : > { %v5779_v27 = vadd.f32 %v17220_v5, %v5690_v43  ;;  %5728 = vmatmul.bf16.gmra.mxu1 %v19781_v55  ;;  %7240 = vmatmul.bf16.gmra.mxu0 %v17099_v46  ;;  %v6962_v8 = vmax.f32 %v6644_v2, %v6784_v26  ;;  %v19785_v26 = vld [vmem:[#allocation139_spill] sm:$0xff] }
 0x93e   : > { %v6584_v12 = vadd.f32 %v17215_v6, %v6514_v11  ;;  %5832 = vmatmul.bf16.gmra.mxu2 %v19782_v9  ;;  %5916 = vmatmul.bf16.gmra.mxu3 %v19693_v13  ;;  %v19784_v13 = vld [vmem:[#allocation84_spill] sm:$0xff] }
 0x93f   : > { %v5868_v41 = vadd.f32 %v17267_v44, %v5779_v27 }
 0x940   : > { %v6648_v22 = vmax.f32 %v6584_v12, 0.0  ;;  %7268 = vmatpush.bf16.msra.mxu1 %v12181_v52  ;;  %v12179_v52 = vld [vmem:[%s18691_s3 + $0x58] sm:$0xff] }
 0x941   : > { %v6343_v5 = vrot.slane %v5868_v41, 2  ;;  %v17362_v15 = vpop.f32.mrf.mxu2  ;;  %v17364_v14 = vpop.f32.mrf.mxu3 }
 0x942   : > { %v5691_v2 = vpop.f32.mrf.mxu1  ;;  %v17369_v43 = vpop.f32.mrf.mxu0  ;;  %v6787_v19 = vrot.slane %v6648_v22, 1 }
 0x943   : > { %19783 = vst [vmem:[#allocation22_spill] sm:$0xff] %v17369_v43  ;;  %v6344_v9 = vsel %vm6310_vm1, %v6339_v40, %v6343_v5  ;;  %v5692_v11 = vadd.f32 %v5691_v2, %v19784_v13 }
 0x944   : > { %v6788_v44 = vsel %vm5991_vm0, %v6783_v25, %v6787_v19  ;;  %v6516_v27 = vadd.f32 %v6344_v9, %v19785_v26 }
 0x945   : > { %v5781_v55 = vadd.f32 %v17239_v47, %v5692_v11  ;;  %v6964_v12 = vmax.f32 %v6646_v56, %v6788_v44  ;;  %v12180_v47 = vld [vmem:[%s18691_s3 + $0x60] sm:$0xff] }
 0x946   : > { %v6586_v41 = vadd.f32 %v17215_v6, %v6516_v27  ;;  %7269 = vmatpush.bf16.msra.mxu1 %v12180_v47 }
 0x947   : > { %v5870_v43 = vadd.f32 %v17294_v36, %v5781_v55  ;;  %v17381_v40 = vpack.c.bf16 %v6964_v12, %v6962_v8  ;;  %v19788_v8 = vld [vmem:[#allocation107_spill] sm:$0xff] }
 0x948   : > { %v6650_v2 = vmax.f32 %v6586_v41, 0.0  ;;  %v19789_v55 = vld [vmem:[#allocation83_spill] sm:$0xff]  ;;  %v19790_v41 = vld [vmem:[#allocation117_spill] sm:$0xff] }
 0x949   : > { %19786 = vst [vmem:[#allocation99_spill] sm:$0xff] %v17381_v40  ;;  %v6347_v54 = vrot.slane %v5870_v43, 2  ;;  %v17383_v13 = vpop.f32.mrf.mxu2  ;;  %v17385_v25 = vpop.f32.mrf.mxu3 }
 0x94a   : > { %v5694_v9 = vpop.f32.mrf.mxu1  ;;  %v17390_v11 = vpop.f32.mrf.mxu0  ;;  %v6791_v56 = vrot.slane %v6650_v2, 1  ;;  %7270 = vmatpush.bf16.msra.mxu1 %v12179_v52 }
 0x94b   : > { %19787 = vst [vmem:[#allocation20_spill] sm:$0xff] %v17390_v11  ;;  %v6348_v44 = vsel %vm6310_vm1, %v6343_v5, %v6347_v54  ;;  %v5695_v36 = vadd.f32 %v5694_v9, %v16887_v28  ;;  %v12207_v5 = vld [vmem:[%s18691_s3 + $0x138] sm:$0xff] }
 0x94c   : > { %v6518_v26 = vadd.f32 %v6348_v44, %v19788_v8  ;;  %v6792_v43 = vsel %vm5991_vm0, %v6787_v19, %v6791_v56  ;;  %7791 = vmatpush.bf16.msra.mxu0 %v12207_v5  ;;  %v19793_v5 = vld [vmem:[#allocation140_spill] sm:$0xff] }
 0x94d   : > { %v5784_v27 = vadd.f32 %v17265_v63, %v5695_v36  ;;  %5733 = vmatmul.bf16.gmra.mxu1 %v19789_v55  ;;  %7245 = vmatmul.bf16.gmra.mxu0 %v17129_v39  ;;  %v6966_v28 = vmax.f32 %v6648_v22, %v6792_v43  ;;  %v12178_v22 = vld [vmem:[%s18691_s3 + $0x50] sm:$0xff] }
 0x94e   : > { %v6588_v12 = vadd.f32 %v17215_v6, %v6518_v26  ;;  %5921 = vmatmul.bf16.gmra.mxu3 %v19790_v41  ;;  %7492 = vmatmul.bf16.vlgmr.msra.gmra.mxu2 %v16686_v34  ;;  %v12206_v36 = vld [vmem:[%s18691_s3 + $0x130] sm:$0xff] }
 0x94f   : > { %v5873_v63 = vadd.f32 %v17320_v32, %v5784_v27  ;;  %v19792_v27 = vld [vmem:[#allocation141_spill] sm:$0xff]  ;;  %7271 = vmatpush.bf16.msra.mxu1 %v12178_v22 }
 0x950   : > { %v6652_v19 = vmax.f32 %v6588_v12, 0.0  ;;  %7792 = vmatpush.bf16.msra.mxu0 %v12206_v36 }
 0x951   : > { %v6351_v47 = vrot.slane %v5873_v63, 2  ;;  %v17409_v9 = vpop.f32.mrf.mxu2  ;;  %v17411_v44 = vpop.f32.mrf.mxu3  ;;  %v12177_v63 = vld [vmem:[%s18691_s3 + $0x48] sm:$0xff] }
 0x952   : > { %v5696_v8 = vpop.f32.mrf.mxu1  ;;  %v17419_v26 = vpop.f32.mrf.mxu0  ;;  %v6795_v32 = vrot.slane %v6652_v19, 1 }
 0x953   : > { %19791 = vst [vmem:[#allocation3_spill] sm:$0xff] %v17419_v26  ;;  %v6352_v43 = vsel %vm6310_vm1, %v6347_v54, %v6351_v47  ;;  %v5697_v55 = vadd.f32 %v5696_v8, %v19792_v27  ;;  %v12205_v26 = vld [vmem:[%s18691_s3 + $0x128] sm:$0xff]  ;;  %7272 = vmatpush.bf16.msra.mxu1 %v12177_v63  ;;  %v12176_v27 = vld [vmem:[%s18691_s3 + $0x40] sm:$0xff] }
 0x954   : > { %v6796_v52 = vsel %vm5991_vm0, %v6791_v56, %v6795_v32  ;;  %v6520_v12 = vadd.f32 %v6352_v43, %v19793_v5  ;;  %7793 = vmatpush.bf16.msra.mxu0 %v12205_v26  ;;  %v19796_v5 = vld [vmem:[#allocation110_spill] sm:$0xff] }
 0x955   : > { %v5786_v41 = vadd.f32 %v17292_v0, %v5697_v55  ;;  %v6968_v11 = vmax.f32 %v6650_v2, %v6796_v52  ;;  %v12204_v2 = vld [vmem:[%s18691_s3 + $0x120] sm:$0xff] }
 0x956   : > { %v6590_v54 = vadd.f32 %v17215_v6, %v6520_v12 }
 0x957   : > { %v5875_v22 = vadd.f32 %v17341_v62, %v5786_v41  ;;  %v17434_v56 = vpack.c.bf16 %v6968_v11, %v6966_v28  ;;  %v19795_v28 = vld [vmem:[#allocation88_spill] sm:$0xff]  ;;  %7273 = vmatpush.bf16.msra.mxu1 %v12176_v27 }
 0x958   : > { %v6654_v36 = vmax.f32 %v6590_v54, 0.0  ;;  %7794 = vmatpush.bf16.msra.mxu0 %v12204_v2  ;;  %v19797_v54 = vld [vmem:[#allocation87_spill] sm:$0xff] }
 0x959   : > { %v6355_v8 = vrot.slane %v5875_v22, 2  ;;  %v17436_v0 = vpop.f32.mrf.mxu2  ;;  %v17438_v43 = vpop.f32.mrf.mxu3  ;;  %v12203_v22 = vld [vmem:[%s18691_s3 + $0x118] sm:$0xff] }
 0x95a   : > { %v5699_v55 = vpop.f32.mrf.mxu1  ;;  %v17446_v62 = vpop.f32.mrf.mxu0  ;;  %v6799_v26 = vrot.slane %v6654_v36, 1 }
 0x95b   : > { %19794 = vst [vmem:[#allocation153_spill] sm:$0xff] %v17446_v62  ;;  %v6356_v11 = vsel %vm6310_vm1, %v6351_v47, %v6355_v8  ;;  %v5700_v52 = vadd.f32 %v5699_v55, %v19795_v28 }
 0x95c   : > { %v6522_v12 = vadd.f32 %v6356_v11, %v19796_v5  ;;  %v6800_v41 = vsel %vm5991_vm0, %v6795_v32, %v6799_v26  ;;  %7795 = vmatpush.bf16.msra.mxu0 %v12203_v22  ;;  %v12202_v11 = vld [vmem:[%s18691_s3 + $0x110] sm:$0xff]  ;;  %v12201_v22 = vld [vmem:[%s18691_s3 + $0x108] sm:$0xff] }
 0x95d   : > { %v5789_v63 = vadd.f32 %v17318_v38, %v5700_v52  ;;  %5738 = vmatmul.bf16.gmra.mxu1 %v19797_v54  ;;  %7250 = vmatmul.bf16.gmra.mxu0 %v17159_v23  ;;  %v6970_v62 = vmax.f32 %v6652_v19, %v6800_v41  ;;  %v19799_v41 = vld [vmem:[#allocation112_spill] sm:$0xff] }
 0x95e   : > { %v6592_v47 = vadd.f32 %v17215_v6, %v6522_v12  ;;  %7497 = vmatmul.bf16.gmra.mxu2 %v16750_v42  ;;  %7581 = vmatmul.bf16.vlgmr.msra.gmra.mxu3 %v17290_v4 }
 0x95f   : > { %v5878_v27 = vadd.f32 %v17364_v14, %v5789_v63 }
 0x960   : > { %v6656_v32 = vmax.f32 %v6592_v47, 0.0  ;;  %7796 = vmatpush.bf16.msra.mxu0 %v12202_v11 }
 0x961   : > { %v6359_v38 = vrot.slane %v5878_v27, 2  ;;  %v17462_v2 = vpop.f32.mrf.mxu2  ;;  %v17464_v55 = vpop.f32.mrf.mxu3 }
 0x962   : > { %v5701_v19 = vpop.f32.mrf.mxu1  ;;  %v6803_v28 = vrot.slane %v6656_v32, 1  ;;  %v17471_v12 = vpop.f32.mrf.mxu0 }
 0x963   : > { %v6360_v52 = vsel %vm6310_vm1, %v6355_v8, %v6359_v38  ;;  %v5702_v5 = vadd.f32 %v5701_v19, %v16939_v3  ;;  %19798 = vst [vmem:[#allocation34_spill] sm:$0xff] %v17471_v12 }
 0x964   : > { %v6804_v14 = vsel %vm5991_vm0, %v6799_v26, %v6803_v28  ;;  %v6524_v63 = vadd.f32 %v6360_v52, %v19799_v41  ;;  %7797 = vmatpush.bf16.msra.mxu0 %v12201_v22  ;;  %v19803_v22 = vld [vmem:[#allocation90_spill] sm:$0xff] }
 0x965   : > { %v5791_v54 = vadd.f32 %v17339_v29, %v5702_v5  ;;  %v6972_v47 = vmax.f32 %v6654_v36, %v6804_v14  ;;  %v12200_v29 = vld [vmem:[%s18691_s3 + $0x100] sm:$0xff] }
 0x966   : > { %v6594_v27 = vadd.f32 %v17215_v6, %v6524_v63  ;;  %v19801_v14 = vld [vmem:[#allocation2_spill] sm:$0xff] }
 0x967   : > { %v5880_v8 = vadd.f32 %v17385_v25, %v5791_v54  ;;  %v17481_v3 = vpack.c.bf16 %v6972_v47, %v6970_v62  ;;  %v19802_v25 = vld [vmem:[#allocation144_spill] sm:$0xff] }
 0x968   : > { %v6658_v11 = vmax.f32 %v6594_v27, 0.0  ;;  %7798 = vmatpush.bf16.msra.mxu0 %v12200_v29 }
 0x969   : > { %19800 = vst [vmem:[#allocation38_spill] sm:$0xff] %v17481_v3  ;;  %v6363_v19 = vrot.slane %v5880_v8, 2  ;;  %v17483_v12 = vpop.f32.mrf.mxu2  ;;  %v17485_v26 = vpop.f32.mrf.mxu3 }
 0x96a   : > { %v5704_v52 = vpop.f32.mrf.mxu1  ;;  %v6807_v5 = vrot.slane %v6658_v11, 1  ;;  %v17498_v8 = vpop.f32.mrf.mxu0 }
 0x96b   : > { %v6364_v36 = vsel %vm6310_vm1, %v6359_v38, %v6363_v19  ;;  %v5705_v41 = vadd.f32 %v5704_v52, %v19801_v14  ;;  %19804 = vst [vmem:[#allocation24_spill] sm:$0xff] %v17498_v8 }
 0x96c   : > { %v6526_v62 = vadd.f32 %v6364_v36, %v19802_v25  ;;  %v6808_v63 = vsel %vm5991_vm0, %v6803_v28, %v6807_v5 }
 0x96d   : > { %v5794_v54 = vadd.f32 %v17362_v15, %v5705_v41  ;;  %5743 = vmatmul.bf16.gmra.mxu1 %v19803_v22  ;;  %7255 = vmatmul.bf16.gmra.mxu0 %v17190_v31  ;;  %v6974_v47 = vmax.f32 %v6656_v32, %v6808_v63 }
 0x96e   : > { %v6596_v27 = vadd.f32 %v17215_v6, %v6526_v62  ;;  %7502 = vmatmul.bf16.gmra.mxu2 %v16800_v21  ;;  %7586 = vmatmul.bf16.gmra.mxu3 %v17337_v51  ;;  %v19805_v62 = vld [vmem:[#allocation116_spill] sm:$0xff] }
 0x96f   : > { %v5883_v38 = vadd.f32 %v17411_v44, %v5794_v54 }
 0x970   : > { %v6660_v29 = vmax.f32 %v6596_v27, 0.0 }
 0x971   : > { %v6367_v52 = vrot.slane %v5883_v38, 2  ;;  %v17503_v28 = vpop.f32.mrf.mxu2  ;;  %v17505_v15 = vpop.f32.mrf.mxu3 }
 0x972   : > { %v5706_v36 = vpop.f32.mrf.mxu1  ;;  %v6811_v14 = vrot.slane %v6660_v29, 1  ;;  %v17516_v38 = vpop.f32.mrf.mxu0 }
 0x973   : > { %v6368_v32 = vsel %vm6310_vm1, %v6363_v19, %v6367_v52  ;;  %v5707_v41 = vadd.f32 %v5706_v36, %v16965_v20 }
 0x974   : > { %v6812_v25 = vsel %vm5991_vm0, %v6807_v5, %v6811_v14  ;;  %v6528_v63 = vadd.f32 %v6368_v32, %v19805_v62 }
 0x975   : > { %v5796_v22 = vadd.f32 %v17383_v13, %v5707_v41  ;;  %v6976_v8 = vmax.f32 %v6658_v11, %v6812_v25  ;;  %v19807_v13 = vld [vmem:[#allocation142_spill] sm:$0xff] }
 0x976   : > { %v6598_v44 = vadd.f32 %v17215_v6, %v6528_v63  ;;  %v19808_v41 = vld [vmem:[#allocation146_spill] sm:$0xff] }
 0x977   : > { %v5885_v54 = vadd.f32 %v17438_v43, %v5796_v22  ;;  %v17514_v27 = vpack.c.bf16 %v6976_v8, %v6974_v47 }
 0x978   : > { %v6662_v31 = vmax.f32 %v6598_v44, 0.0 }
 0x979   : > { %19806 = vst [vmem:[#allocation7_spill] sm:$0xff] %v17514_v27  ;;  %v6371_v23 = vrot.slane %v5885_v54, 2  ;;  %v17518_v19 = vpop.f32.mrf.mxu2  ;;  %v17520_v20 = vpop.f32.mrf.mxu3 }
 0x97a   : > { %v5709_v5 = vpop.f32.mrf.mxu1  ;;  %v6815_v36 = vrot.slane %v6662_v31, 1 }
 0x97b   : > { %v6372_v32 = vsel %vm6310_vm1, %v6367_v52, %v6371_v23  ;;  %v5710_v11 = vadd.f32 %v5709_v5, %v19807_v13 }
 0x97c   : > { %v6530_v25 = vadd.f32 %v6372_v32, %v19808_v41  ;;  %v6816_v43 = vsel %vm5991_vm0, %v6811_v14, %v6815_v36 }
 0x97d   : > { %v5799_v47 = vadd.f32 %v17409_v9, %v5710_v11  ;;  %7260 = vmatmul.bf16.gmra.mxu0 %v17192_v37  ;;  %7274 = vmatmul.bf16.vlgmr.msra.gmra.mxu1 %v17290_v4  ;;  %v6978_v8 = vmax.f32 %v6660_v29, %v6816_v43  ;;  %v17537_v9 = vpop.f32.mrf.mxu0  ;;  %v19810_v11 = vld [vmem:[#allocation147_spill] sm:$0xff] }
 0x97e   : > { %v6600_v62 = vadd.f32 %v17215_v6, %v6530_v25  ;;  %7507 = vmatmul.bf16.gmra.mxu2 %v16858_v60  ;;  %7591 = vmatmul.bf16.gmra.mxu3 %v17381_v40  ;;  %19809 = vst [vmem:[#allocation127_spill] sm:$0xff] %v17537_v9 }
 0x97f   : > { %v5888_v52 = vadd.f32 %v17464_v55, %v5799_v47 }
 0x980   : > { %v6664_v63 = vmax.f32 %v6600_v62, 0.0 }
 0x981   : > { %v6375_v22 = vrot.slane %v5888_v52, 2  ;;  %v17533_v44 = vpop.f32.mrf.mxu2  ;;  %v17535_v14 = vpop.f32.mrf.mxu3 }
 0x982   : > { %v5711_v54 = vpop.f32.mrf.mxu1  ;;  %v6819_v5 = vrot.slane %v6664_v63, 1 }
 0x983   : > { %v6376_v29 = vsel %vm6310_vm1, %v6371_v23, %v6375_v22  ;;  %v5712_v32 = vadd.f32 %v5711_v54, %v16991_v30 }
 0x984   : > { %v6820_v13 = vsel %vm5991_vm0, %v6815_v36, %v6819_v5  ;;  %v6532_v41 = vadd.f32 %v6376_v29, %v19810_v11  ;;  %v19811_v29 = vld [vmem:[#allocation143_spill] sm:$0xff] }
 0x985   : > { %v5801_v55 = vadd.f32 %v17436_v0, %v5712_v32  ;;  %v6980_v25 = vmax.f32 %v6662_v31, %v6820_v13  ;;  %v19812_v0 = vld [vmem:[#allocation23_spill] sm:$0xff]  ;;  %v17555_v32 = vpop.f32.mrf.mxu0 }
 0x986   : > { %v6602_v43 = vadd.f32 %v17215_v6, %v6532_v41 }
 0x987   : > { %v5890_v47 = vadd.f32 %v17485_v26, %v5801_v55  ;;  %v17546_v62 = vpack.c.bf16 %v6980_v25, %v6978_v8 }
 0x988   : > { %v6666_v52 = vmax.f32 %v6602_v43, 0.0 }
 0x989   : > { %v6379_v4 = vrot.slane %v5890_v47, 2  ;;  %v17548_v9 = vpop.f32.mrf.mxu2  ;;  %v17550_v23 = vpop.f32.mrf.mxu3 }
 0x98a   : > { %v5714_v30 = vpop.f32.mrf.mxu1  ;;  %v6823_v54 = vrot.slane %v6666_v52, 1 }
 0x98b   : > { %v6380_v36 = vsel %vm6310_vm1, %v6375_v22, %v6379_v4  ;;  %v5715_v11 = vadd.f32 %v5714_v30, %v19811_v29 }
 0x98c   : > { %v6534_v31 = vadd.f32 %v6380_v36, %v19812_v0  ;;  %v6824_v26 = vsel %vm5991_vm0, %v6819_v5, %v6823_v54  ;;  %v19813_v36 = vld [vmem:[#allocation149_spill] sm:$0xff] }
 0x98d   : > { %v5804_v8 = vadd.f32 %v17462_v2, %v5715_v11  ;;  %7279 = vmatmul.bf16.gmra.mxu1 %v17337_v51  ;;  %7799 = vmatmul.bf16.vlgmr.msra.gmra.mxu0 %v16686_v34  ;;  %v6982_v13 = vmax.f32 %v6664_v63, %v6824_v26 }
 0x98e   : > { %v6604_v41 = vadd.f32 %v17215_v6, %v6534_v31  ;;  %7512 = vmatmul.bf16.gmra.mxu2 %v16909_v33  ;;  %7596 = vmatmul.bf16.gmra.mxu3 %v17434_v56 }
 0x98f   : > { %v5893_v22 = vadd.f32 %v17505_v15, %v5804_v8  ;;  %v17574_v15 = vpop.f32.mrf.mxu0 }
 0x990   : > { %v6668_v55 = vmax.f32 %v6604_v41, 0.0 }
 0x991   : > { %v6383_v25 = vrot.slane %v5893_v22, 2  ;;  %v17565_v43 = vpop.f32.mrf.mxu2  ;;  %v17567_v5 = vpop.f32.mrf.mxu3 }
 0x992   : > { %v5716_v2 = vpop.f32.mrf.mxu1  ;;  %v6827_v47 = vrot.slane %v6668_v55, 1 }
 0x993   : > { %v6384_v30 = vsel %vm6310_vm1, %v6379_v4, %v6383_v25  ;;  %v5717_v34 = vadd.f32 %v5716_v2, %v17017_v16 }
 0x994   : > { %v6828_v63 = vsel %vm5991_vm0, %v6823_v54, %v6827_v47  ;;  %v6536_v29 = vadd.f32 %v6384_v30, %v19813_v36 }
 0x995   : > { %v5806_v11 = vadd.f32 %v17483_v12, %v5717_v34  ;;  %v6984_v0 = vmax.f32 %v6666_v52, %v6828_v63  ;;  %v19814_v12 = vld [vmem:[#allocation91_spill] sm:$0xff]  ;;  %v19815_v34 = vld [vmem:[#allocation150_spill] sm:$0xff] }
 0x996   : > { %v6606_v31 = vadd.f32 %v17215_v6, %v6536_v29 }
 0x997   : > { %v5895_v26 = vadd.f32 %v17520_v20, %v5806_v11  ;;  %v17578_v8 = vpack.c.bf16 %v6984_v0, %v6982_v13  ;;  %v17595_v11 = vpop.f32.mrf.mxu0 }
 0x998   : > { %v6670_v41 = vmax.f32 %v6606_v31, 0.0 }
 0x999   : > { %v6387_v22 = vrot.slane %v5895_v26, 2  ;;  %v17580_v4 = vpop.f32.mrf.mxu2  ;;  %v17582_v16 = vpop.f32.mrf.mxu3 }
 0x99a   : > { %v5719_v54 = vpop.f32.mrf.mxu1  ;;  %v6831_v2 = vrot.slane %v6670_v41, 1 }
 0x99b   : > { %v6388_v30 = vsel %vm6310_vm1, %v6383_v25, %v6387_v22  ;;  %v5720_v52 = vadd.f32 %v5719_v54, %v19814_v12  ;;  %v19816_v12 = vld [vmem:[#allocation26_spill] sm:$0xff] }
 0x99c   : > { %v6538_v63 = vadd.f32 %v6388_v30, %v19815_v34  ;;  %v6832_v36 = vsel %vm5991_vm0, %v6827_v47, %v6831_v2 }
 0x99d   : > { %v5809_v20 = vadd.f32 %v17503_v28, %v5720_v52  ;;  %7284 = vmatmul.bf16.gmra.mxu1 %v17381_v40  ;;  %7804 = vmatmul.bf16.gmra.mxu0 %v16750_v42  ;;  %v6986_v13 = vmax.f32 %v6668_v55, %v6832_v36 }
 0x99e   : > { %v6608_v29 = vadd.f32 %v17215_v6, %v6538_v63  ;;  %7517 = vmatmul.bf16.gmra.mxu2 %v16941_v61  ;;  %7601 = vmatmul.bf16.gmra.mxu3 %v17481_v3 }
 0x99f   : > { %v5898_v25 = vadd.f32 %v17535_v14, %v5809_v20 }
 0x9a0   : > { %v6672_v0 = vmax.f32 %v6608_v29, 0.0 }
 0x9a1   : > { %v6391_v31 = vrot.slane %v5898_v25, 2  ;;  %v17597_v47 = vpop.f32.mrf.mxu2  ;;  %v17599_v28 = vpop.f32.mrf.mxu3 }
 0x9a2   : > { %v5721_v26 = vpop.f32.mrf.mxu1  ;;  %v6835_v54 = vrot.slane %v6672_v0, 1 }
 0x9a3   : > { %v6392_v42 = vsel %vm6310_vm1, %v6387_v22, %v6391_v31  ;;  %v5722_v55 = vadd.f32 %v5721_v26, %v17043_v58  ;;  %v17614_v58 = vpop.f32.mrf.mxu0 }
 0x9a4   : > { %v6836_v30 = vsel %vm5991_vm0, %v6831_v2, %v6835_v54  ;;  %v6540_v52 = vadd.f32 %v6392_v42, %v19816_v12 }
 0x9a5   : > { %v5811_v14 = vadd.f32 %v17518_v19, %v5722_v55  ;;  %v6988_v34 = vmax.f32 %v6670_v41, %v6836_v30  ;;  %v19817_v41 = vld [vmem:[#allocation151_spill] sm:$0xff] }
 0x9a6   : > { %v6610_v63 = vadd.f32 %v17215_v6, %v6540_v52 }
 0x9a7   : > { %v5900_v36 = vadd.f32 %v17550_v23, %v5811_v14  ;;  %v17608_v20 = vpack.c.bf16 %v6988_v34, %v6986_v13 }
 0x9a8   : > { %v6674_v29 = vmax.f32 %v6610_v63, 0.0 }
 0x9a9   : > { %v6395_v25 = vrot.slane %v5900_v36, 2  ;;  %v17610_v40 = vpop.f32.mrf.mxu2  ;;  %v17612_v22 = vpop.f32.mrf.mxu3 }
 0x9aa   : > { %v5724_v2 = vpop.f32.mrf.mxu1  ;;  %v6839_v26 = vrot.slane %v6674_v29, 1 }
 0x9ab   : > { %v6396_v42 = vsel %vm6310_vm1, %v6391_v31, %v6395_v25  ;;  %v5725_v19 = vadd.f32 %v5724_v2, %v17055_v17  ;;  %v19818_v2 = vld [vmem:[#allocation152_spill] sm:$0xff] }
 0x9ac   : > { %v6542_v55 = vadd.f32 %v6396_v42, %v19817_v41  ;;  %v6840_v23 = vsel %vm5991_vm0, %v6835_v54, %v6839_v26 }
 0x9ad   : > { %v5814_v13 = vadd.f32 %v17533_v44, %v5725_v19  ;;  %7289 = vmatmul.bf16.gmra.mxu1 %v17434_v56  ;;  %7809 = vmatmul.bf16.gmra.mxu0 %v16800_v21  ;;  %v6990_v30 = vmax.f32 %v6672_v0, %v6840_v23  ;;  %v17633_v0 = vpop.f32.mrf.mxu0 }
 0x9ae   : > { %v6612_v12 = vadd.f32 %v17215_v6, %v6542_v55  ;;  %7522 = vmatmul.bf16.gmra.mxu2 %v16967_v57  ;;  %7606 = vmatmul.bf16.gmra.mxu3 %v17514_v27 }
 0x9af   : > { %v5903_v31 = vadd.f32 %v17567_v5, %v5814_v13 }
 0x9b0   : > { %v6676_v17 = vmax.f32 %v6612_v12, 0.0 }
 0x9b1   : > { %v6399_v52 = vrot.slane %v5903_v31, 2  ;;  %v17627_v14 = vpop.f32.mrf.mxu2  ;;  %v17629_v54 = vpop.f32.mrf.mxu3 }
 0x9b2   : > { %v5726_v44 = vpop.f32.mrf.mxu1  ;;  %v6843_v34 = vrot.slane %v6676_v17, 1 }
 0x9b3   : > { %v6400_v63 = vsel %vm6310_vm1, %v6395_v25, %v6399_v52  ;;  %v5727_v21 = vadd.f32 %v5726_v44, %v17069_v53 }
 0x9b4   : > { %v6844_v36 = vsel %vm5991_vm0, %v6839_v26, %v6843_v34  ;;  %v6544_v42 = vadd.f32 %v6400_v63, %v19818_v2 }
 0x9b5   : > { %v5816_v5 = vadd.f32 %v17548_v9, %v5727_v21  ;;  %v6992_v19 = vmax.f32 %v6674_v29, %v6844_v36  ;;  %v19819_v9 = vld [vmem:[#allocation30_spill] sm:$0xff]  ;;  %v17653_v36 = vpop.f32.mrf.mxu0 }
 0x9b6   : > { %v6614_v41 = vadd.f32 %v17215_v6, %v6544_v42 }
 0x9b7   : > { %v5905_v55 = vadd.f32 %v17582_v16, %v5816_v5  ;;  %v17640_v23 = vpack.c.bf16 %v6992_v19, %v6990_v30 }
 0x9b8   : > { %v6678_v13 = vmax.f32 %v6614_v41, 0.0 }
 0x9b9   : > { %v6403_v12 = vrot.slane %v5905_v55, 2  ;;  %v17642_v25 = vpop.f32.mrf.mxu2  ;;  %v17644_v53 = vpop.f32.mrf.mxu3  ;;  %v19820_v55 = vld [vmem:[#allocation154_spill] sm:$0xff] }
 0x9ba   : > { %v5729_v31 = vpop.f32.mrf.mxu1  ;;  %v6847_v44 = vrot.slane %v6678_v13, 1 }
 0x9bb   : > { %v6404_v26 = vsel %vm6310_vm1, %v6399_v52, %v6403_v12  ;;  %v5730_v63 = vadd.f32 %v5729_v31, %v17081_v18 }
 0x9bc   : > { %v6546_v29 = vadd.f32 %v6404_v26, %v19819_v9  ;;  %v6848_v21 = vsel %vm5991_vm0, %v6843_v34, %v6847_v44 }
 0x9bd   : > { %v5819_v16 = vadd.f32 %v17565_v43, %v5730_v63  ;;  %7294 = vmatmul.bf16.gmra.mxu1 %v17481_v3  ;;  %7814 = vmatmul.bf16.gmra.mxu0 %v16858_v60  ;;  %v6994_v30 = vmax.f32 %v6676_v17, %v6848_v21  ;;  %v17672_v21 = vpop.f32.mrf.mxu0 }
 0x9be   : > { %v6616_v2 = vadd.f32 %v17215_v6, %v6546_v29  ;;  %7527 = vmatmul.bf16.gmra.mxu2 %v16993_v10  ;;  %7611 = vmatmul.bf16.gmra.mxu3 %v17546_v62 }
 0x9bf   : > { %v5908_v18 = vadd.f32 %v17599_v28, %v5819_v16 }
 0x9c0   : > { %v6680_v52 = vmax.f32 %v6616_v2, 0.0 }
 0x9c1   : > { %v6407_v42 = vrot.slane %v5908_v18, 2  ;;  %v17659_v34 = vpop.f32.mrf.mxu2  ;;  %v17661_v43 = vpop.f32.mrf.mxu3 }
 0x9c2   : > { %v5731_v5 = vpop.f32.mrf.mxu1  ;;  %v6851_v19 = vrot.slane %v6680_v52, 1 }
 0x9c3   : > { %v6408_v60 = vsel %vm6310_vm1, %v6403_v12, %v6407_v42  ;;  %v5732_v17 = vadd.f32 %v5731_v5, %v17097_v7 }
 0x9c4   : > { %v6852_v41 = vsel %vm5991_vm0, %v6847_v44, %v6851_v19  ;;  %v6548_v31 = vadd.f32 %v6408_v60, %v19820_v55  ;;  %v19822_v60 = vld [vmem:[#allocation155_spill] sm:$0xff] }
 0x9c5   : > { %v5821_v26 = vadd.f32 %v17580_v4, %v5732_v17  ;;  %v6996_v63 = vmax.f32 %v6678_v13, %v6852_v41  ;;  %v19821_v4 = vld [vmem:[#allocation6_spill] sm:$0xff] }
 0x9c6   : > { %v6618_v28 = vadd.f32 %v17215_v6, %v6548_v31 }
 0x9c7   : > { %v5910_v9 = vadd.f32 %v17612_v22, %v5821_v26  ;;  %v17670_v29 = vpack.c.bf16 %v6996_v63, %v6994_v30 }
 0x9c8   : > { %v6682_v16 = vmax.f32 %v6618_v28, 0.0  ;;  %v17691_v28 = vpop.f32.mrf.mxu0 }
 0x9c9   : > { %v6411_v2 = vrot.slane %v5910_v9, 2  ;;  %v17674_v12 = vpop.f32.mrf.mxu2  ;;  %v17676_v7 = vpop.f32.mrf.mxu3 }
 0x9ca   : > { %v5734_v44 = vpop.f32.mrf.mxu1  ;;  %v6855_v18 = vrot.slane %v6682_v16, 1 }
 0x9cb   : > { %v6412_v5 = vsel %vm6310_vm1, %v6407_v42, %v6411_v2  ;;  %v5735_v13 = vadd.f32 %v5734_v44, %v19821_v4  ;;  %v19824_v4 = vld [vmem:[#allocation42_spill] sm:$0xff] }
 0x9cc   : > { %v6550_v17 = vadd.f32 %v6412_v5, %v19822_v60  ;;  %v6856_v22 = vsel %vm5991_vm0, %v6851_v19, %v6855_v18 }
 0x9cd   : > { %v5824_v30 = vadd.f32 %v17597_v47, %v5735_v13  ;;  %7299 = vmatmul.bf16.gmra.mxu1 %v17514_v27  ;;  %7819 = vmatmul.bf16.gmra.mxu0 %v16909_v33  ;;  %v6998_v41 = vmax.f32 %v6680_v52, %v6856_v22  ;;  %v19823_v52 = vld [vmem:[#allocation145_spill] sm:$0xff] }
 0x9ce   : > { %v6620_v55 = vadd.f32 %v17215_v6, %v6550_v17  ;;  %7532 = vmatmul.bf16.gmra.mxu2 %v17019_v50  ;;  %7616 = vmatmul.bf16.gmra.mxu3 %v17578_v8 }
 0x9cf   : > { %v5913_v42 = vadd.f32 %v17629_v54, %v5824_v30 }
 0x9d0   : > { %v6684_v31 = vmax.f32 %v6620_v55, 0.0 }
 0x9d1   : > { %v6415_v26 = vrot.slane %v5913_v42, 2  ;;  %v17689_v63 = vpop.f32.mrf.mxu3  ;;  %v7493_v19 = vpop.f32.mrf.mxu2 }
 0x9d2   : > { %v5736_v47 = vpop.f32.mrf.mxu1  ;;  %v6859_v9 = vrot.slane %v6684_v31, 1 }
 0x9d3   : > { %v6416_v33 = vsel %vm6310_vm1, %v6411_v2, %v6415_v26  ;;  %v5737_v44 = vadd.f32 %v5736_v47, %v19823_v52  ;;  %v19825_v52 = vld [vmem:[#allocation10_spill] sm:$0xff] }
 0x9d4   : > { %v6860_v5 = vsel %vm5991_vm0, %v6855_v18, %v6859_v9  ;;  %v6552_v13 = vadd.f32 %v6416_v33, %v19824_v4  ;;  %v17706_v4 = vpop.f32.mrf.mxu0 }
 0x9d5   : > { %v5826_v60 = vadd.f32 %v17610_v40, %v5737_v44  ;;  %v7000_v54 = vmax.f32 %v6682_v16, %v6860_v5  ;;  %v19826_v40 = vld [vmem:[#allocation156_spill] sm:$0xff] }
 0x9d6   : > { %v6622_v17 = vadd.f32 %v17215_v6, %v6552_v13 }
 0x9d7   : > { %v5915_v22 = vadd.f32 %v17644_v53, %v5826_v60  ;;  %v17700_v30 = vpack.c.bf16 %v7000_v54, %v6998_v41 }
 0x9d8   : > { %v6686_v55 = vmax.f32 %v6622_v17, 0.0 }
 0x9d9   : > { %v6419_v42 = vrot.slane %v5915_v22, 2  ;;  %v17702_v27 = vpop.f32.mrf.mxu3  ;;  %v7495_v2 = vpop.f32.mrf.mxu2 }
 0x9da   : > { %v5739_v3 = vpop.f32.mrf.mxu1  ;;  %v6863_v47 = vrot.slane %v6686_v55, 1 }
 0x9db   : > { %v6420_v18 = vsel %vm6310_vm1, %v6415_v26, %v6419_v42  ;;  %v5740_v33 = vadd.f32 %v5739_v3, %v19825_v52 }
 0x9dc   : > { %v6554_v16 = vadd.f32 %v6420_v18, %v19826_v40  ;;  %v6864_v44 = vsel %vm5991_vm0, %v6859_v9, %v6863_v47  ;;  %v19827_v18 = vld [vmem:[#allocation40_spill] sm:$0xff] }
 0x9dd   : > { %v5829_v53 = vadd.f32 %v17627_v14, %v5740_v33  ;;  %7304 = vmatmul.bf16.gmra.mxu1 %v17546_v62  ;;  %7824 = vmatmul.bf16.gmra.mxu0 %v16941_v61  ;;  %v7002_v41 = vmax.f32 %v6684_v31, %v6864_v44 }
 0x9de   : > { %v6624_v5 = vadd.f32 %v17215_v6, %v6554_v16  ;;  %7537 = vmatmul.bf16.gmra.mxu2 %v17045_v35  ;;  %7621 = vmatmul.bf16.gmra.mxu3 %v17608_v20  ;;  %v17722_v16 = vpop.f32.mrf.mxu0 }
 0x9df   : > { %v5918_v3 = vadd.f32 %v17661_v43, %v5829_v53 }
 0x9e0   : > { %v6688_v26 = vmax.f32 %v6624_v5, 0.0 }
 0x9e1   : > { %v6423_v13 = vrot.slane %v5918_v3, 2  ;;  %v7498_v60 = vpop.f32.mrf.mxu2  ;;  %v7582_v54 = vpop.f32.mrf.mxu3 }
 0x9e2   : > { %v7583_v9 = vadd.f32 %v7582_v54, %v7493_v19  ;;  %v5741_v17 = vpop.f32.mrf.mxu1  ;;  %v6867_v14 = vrot.slane %v6688_v26, 1 }
 0x9e3   : > { %v6424_v22 = vsel %vm6310_vm1, %v6419_v42, %v6423_v13  ;;  %v5742_v61 = vadd.f32 %v5741_v17, %v17157_v48 }
 0x9e4   : > { %v6868_v31 = vsel %vm5991_vm0, %v6863_v47, %v6867_v14  ;;  %v6556_v52 = vadd.f32 %v6424_v22, %v19827_v18  ;;  %v19828_v22 = vld [vmem:[#allocation157_spill] sm:$0xff] }
 0x9e5   : > { %v5831_v33 = vadd.f32 %v17642_v25, %v5742_v61  ;;  %v7004_v40 = vmax.f32 %v6686_v55, %v6868_v31  ;;  %v8001_v55 = vrot.slane %v7583_v9, 2 }
 0x9e6   : > { %v6626_v43 = vadd.f32 %v17215_v6, %v6556_v52  ;;  %v17740_v9 = vpop.f32.mrf.mxu0 }
 0x9e7   : > { %v5920_v44 = vadd.f32 %v17676_v7, %v5831_v33  ;;  %v17726_v19 = vpack.c.bf16 %v7004_v40, %v7002_v41 }
 0x9e8   : > { %v6690_v53 = vmax.f32 %v6626_v43, 0.0 }
 0x9e9   : > { %v6427_v5 = vrot.slane %v5920_v44, 2  ;;  %v7500_v42 = vpop.f32.mrf.mxu2  ;;  %v7584_v3 = vpop.f32.mrf.mxu3 }
 0x9ea   : > { %v7585_v48 = vadd.f32 %v7584_v3, %v7495_v2  ;;  %v5744_v54 = vpop.f32.mrf.mxu1  ;;  %v6871_v47 = vrot.slane %v6690_v53, 1 }
 0x9eb   : > { %v6428_v17 = vsel %vm6310_vm1, %v6423_v13, %v6427_v5  ;;  %v5745_v25 = vadd.f32 %v5744_v54, %v17172_v49  ;;  %v19829_v54 = vld [vmem:[#allocation50_spill] sm:$0xff] }
 0x9ec   : > { %v6558_v61 = vadd.f32 %v6428_v17, %v19828_v22  ;;  %v8002_v31 = vrot.slane %v7585_v48, 2  ;;  %v6872_v18 = vsel %vm5991_vm0, %v6867_v14, %v6871_v47 }
 0x9ed   : > { %v5834_v7 = vadd.f32 %v17659_v34, %v5745_v25  ;;  %7309 = vmatmul.bf16.gmra.mxu1 %v17578_v8  ;;  %7829 = vmatmul.bf16.gmra.mxu0 %v16967_v57  ;;  %v7006_v41 = vmax.f32 %v6688_v26, %v6872_v18 }
 0x9ee   : > { %v6628_v2 = vadd.f32 %v17215_v6, %v6558_v61  ;;  %7542 = vmatmul.bf16.gmra.mxu2 %v17071_v59  ;;  %7626 = vmatmul.bf16.gmra.mxu3 %v17640_v23  ;;  %v8003_v49 = vsel %vm6310_vm1, %v8001_v55, %v8002_v31 }
 0x9ef   : > { %v5923_v13 = vadd.f32 %v17689_v63, %v5834_v7 }
 0x9f0   : > { %v6692_v14 = vmax.f32 %v6628_v2, 0.0  ;;  %v17752_v2 = vpop.f32.mrf.mxu0 }
 0x9f1   : > { %v6431_v52 = vrot.slane %v5923_v13, 2  ;;  %v7503_v34 = vpop.f32.mrf.mxu2  ;;  %v7587_v33 = vpop.f32.mrf.mxu3 }
 0x9f2   : > { %v7588_v40 = vadd.f32 %v7587_v33, %v7498_v60  ;;  %v5746_v43 = vpop.f32.mrf.mxu1  ;;  %v6875_v57 = vrot.slane %v6692_v14, 1 }
 0x9f3   : > { %v6432_v26 = vsel %vm6310_vm1, %v6427_v5, %v6431_v52  ;;  %v5747_v44 = vadd.f32 %v5746_v43, %v17187_v24  ;;  %v19832_v43 = vld [vmem:[#allocation159_spill] sm:$0xff] }
 0x9f4   : > { %v8004_v3 = vrot.slane %v7588_v40, 2  ;;  %v6876_v48 = vsel %vm5991_vm0, %v6871_v47, %v6875_v57  ;;  %v6560_v17 = vadd.f32 %v6432_v26, %v19829_v54 }
 0x9f5   : > { %v5836_v63 = vadd.f32 %v17674_v12, %v5747_v44  ;;  %v7008_v25 = vmax.f32 %v6690_v53, %v6876_v48  ;;  %v19831_v53 = vld [vmem:[#allocation39_spill] sm:$0xff] }
 0x9f6   : > { %v8005_v55 = vsel %vm6310_vm1, %v8002_v31, %v8004_v3  ;;  %v6630_v22 = vadd.f32 %v17215_v6, %v6560_v17 }
 0x9f7   : > { %v5925_v60 = vadd.f32 %v17702_v27, %v5836_v63  ;;  %v17750_v61 = vpack.c.bf16 %v7008_v25, %v7006_v41 }
 0x9f8   : > { %v6694_v18 = vmax.f32 %v6630_v22, 0.0 }
 0x9f9   : > { %19830 = vst [vmem:[#allocation46_spill] sm:$0xff] %v17750_v61  ;;  %v6435_v5 = vrot.slane %v5925_v60, 2  ;;  %v7505_v7 = vpop.f32.mrf.mxu2  ;;  %v7589_v24 = vpop.f32.mrf.mxu3 }
 0x9fa   : > { %v7590_v47 = vadd.f32 %v7589_v24, %v7500_v42  ;;  %v7275_v13 = vpop.f32.mrf.mxu1  ;;  %v6879_v33 = vrot.slane %v6694_v18, 1 }
 0x9fb   : > { %v6436_v12 = vsel %vm6310_vm1, %v6431_v52, %v6435_v5  ;;  %v6564_v40 = vadd.f32 %v6435_v5, %v19831_v53  ;;  %v7276_v31 = vadd.f32 %v7275_v13, %v17201_v1 }
 0x9fc   : > { %v6562_v26 = vadd.f32 %v6436_v12, %v19832_v43  ;;  %v8006_v27 = vrot.slane %v7590_v47, 2  ;;  %v6880_v41 = vsel %vm5991_vm0, %v6875_v57, %v6879_v33 }
 0x9fd   : > { %v17759_v44 = vadd.f32 %v8003_v49, %v7276_v31  ;;  %7314 = vmatmul.bf16.gmra.mxu1 %v17608_v20  ;;  %7834 = vmatmul.bf16.gmra.mxu0 %v16993_v10  ;;  %v7010_v42 = vmax.f32 %v6692_v14, %v6880_v41  ;;  %v6634_v48 = vadd.f32 %v17215_v6, %v6564_v40  ;;  %v17769_v14 = vpop.f32.mrf.mxu0  ;;  %v19834_v41 = vld [vmem:[#allocation14_spill] sm:$0xff] }
 0x9fe   : > { %v6632_v52 = vadd.f32 %v17215_v6, %v6562_v26  ;;  %7547 = vmatmul.bf16.gmra.mxu2 %v17099_v46  ;;  %7631 = vmatmul.bf16.gmra.mxu3 %v17670_v29  ;;  %v8007_v1 = vsel %vm6310_vm1, %v8004_v3, %v8006_v27 }
 0x9ff   : > { %v6698_v54 = vmax.f32 %v6634_v48, 0.0 }
 0xa00   : > { %v6696_v17 = vmax.f32 %v6632_v52, 0.0 }
 0xa01   : > { %v7508_v57 = vpop.f32.mrf.mxu2  ;;  %v7592_v49 = vpop.f32.mrf.mxu3  ;;  %v6887_v63 = vrot.slane %v6698_v54, 1 }
 0xa02   : > { %v7593_v25 = vadd.f32 %v7592_v49, %v7503_v34  ;;  %v7277_v22 = vpop.f32.mrf.mxu1  ;;  %v6883_v60 = vrot.slane %v6696_v17, 1 }
 0xa03   : > { %v7278_v10 = vadd.f32 %v7277_v22, %v17228_v45  ;;  %v7016_v12 = vmax.f32 %v6698_v54, %v6887_v63 }
 0xa04   : > { %v8008_v5 = vrot.slane %v7593_v25, 2  ;;  %v6884_v6 = vsel %vm5991_vm0, %v6879_v33, %v6883_v60  ;;  %v6888_v24 = vsel %vm5991_vm0, %v6883_v60, %v6887_v63 }
 0xa05   : > { %v17773_v47 = vadd.f32 %v8005_v55, %v7278_v10  ;;  %v7012_v3 = vmax.f32 %v6694_v18, %v6884_v6  ;;  %v7014_v13 = vmax.f32 %v6696_v17, %v6888_v24  ;;  %v17785_v55 = vpop.f32.mrf.mxu0  ;;  %v19835_v17 = vld [vmem:[#allocation97_spill] sm:$0xff]  ;;  %v19836_v24 = vld [vmem:[#allocation18_spill] sm:$0xff] }
 0xa06   : > { %v8009_v53 = vsel %vm6310_vm1, %v8006_v27, %v8008_v5 }
 0xa07   : > { %v17776_v40 = vpack.c.bf16 %v7012_v3, %v7010_v42  ;;  %v17778_v34 = vpack.c.bf16 %v7016_v12, %v7014_v13 }
 0xa09   : > { %19833 = vst [vmem:[#allocation28_spill] sm:$0xff] %v17776_v40  ;;  %v7510_v31 = vpop.f32.mrf.mxu2  ;;  %v7594_v45 = vpop.f32.mrf.mxu3 }
 0xa0a   : > { %v7595_v43 = vadd.f32 %v7594_v45, %v7505_v7  ;;  %v7280_v26 = vpop.f32.mrf.mxu1 }
 0xa0b   : > { %v7281_v48 = vadd.f32 %v7280_v26, %v19834_v41  ;;  %v19838_v41 = vld [vmem:[#allocation98_spill] sm:$0xff] }
 0xa0c   : > { %v8010_v33 = vrot.slane %v7595_v43, 2 }
 0xa0d   : > { %v17781_v52 = vadd.f32 %v8007_v1, %v7281_v48  ;;  %7319 = vmatmul.bf16.gmra.mxu1 %v17640_v23  ;;  %7839 = vmatmul.bf16.gmra.mxu0 %v17019_v50  ;;  %v17794_v50 = vpop.f32.mrf.mxu0 }
 0xa0e   : > { %7552 = vmatmul.bf16.gmra.mxu2 %v17129_v39  ;;  %7636 = vmatmul.bf16.gmra.mxu3 %v17700_v30  ;;  %v8011_v18 = vsel %vm6310_vm1, %v8008_v5, %v8010_v33 }
 0xa11   : > { %v7513_v27 = vpop.f32.mrf.mxu2  ;;  %v7597_v7 = vpop.f32.mrf.mxu3 }
 0xa12   : > { %v7598_v42 = vadd.f32 %v7597_v7, %v7508_v57  ;;  %v7282_v54 = vpop.f32.mrf.mxu1  ;;  %v19837_v57 = vld [vmem:[#allocation168_spill] sm:$0xff] }
 0xa13   : > { %v7283_v49 = vadd.f32 %v7282_v54, %v19835_v17  ;;  %v19839_v17 = vld [vmem:[#allocation16_spill] sm:$0xff] }
 0xa14   : > { %v8012_v1 = vrot.slane %v7598_v42, 2 }
 0xa15   : > { %v17791_v63 = vadd.f32 %v8009_v53, %v7283_v49  ;;  %v17804_v43 = vpop.f32.mrf.mxu0 }
 0xa16   : > { %v8013_v25 = vsel %vm6310_vm1, %v8010_v33, %v8012_v1 }
 0xa19   : > { %v7515_v22 = vpop.f32.mrf.mxu2  ;;  %v7599_v60 = vpop.f32.mrf.mxu3 }
 0xa1a   : > { %v7600_v10 = vadd.f32 %v7599_v60, %v7510_v31  ;;  %v7285_v6 = vpop.f32.mrf.mxu1 }
 0xa1b   : > { %v7286_v3 = vadd.f32 %v7285_v6, %v19836_v24 }
 0xa1c   : > { %v8014_v5 = vrot.slane %v7600_v10, 2 }
 0xa1d   : > { %v17797_v13 = vadd.f32 %v8011_v18, %v7286_v3  ;;  %7324 = vmatmul.bf16.gmra.mxu1 %v17670_v29  ;;  %7844 = vmatmul.bf16.gmra.mxu0 %v17045_v35  ;;  %v17811_v60 = vpop.f32.mrf.mxu0  ;;  %v19842_v3 = vld [vmem:[#allocation22_spill] sm:$0xff] }
 0xa1e   : > { %7557 = vmatmul.bf16.gmra.mxu2 %v19837_v57  ;;  %7641 = vmatmul.bf16.gmra.mxu3 %v17726_v19  ;;  %v8015_v12 = vsel %vm6310_vm1, %v8012_v1, %v8014_v5  ;;  %19840 = vst [vmem:[#allocation11_spill] sm:$0xff] %v17811_v60 }
 0xa21   : > { %v7518_v53 = vpop.f32.mrf.mxu2  ;;  %v7602_v45 = vpop.f32.mrf.mxu3 }
 0xa22   : > { %v7603_v31 = vadd.f32 %v7602_v45, %v7513_v27  ;;  %v7287_v26 = vpop.f32.mrf.mxu1  ;;  %v19841_v27 = vld [vmem:[#allocation96_spill] sm:$0xff] }
 0xa23   : > { %v7288_v48 = vadd.f32 %v7287_v26, %v19838_v41 }
 0xa24   : > { %v8016_v33 = vrot.slane %v7603_v31, 2 }
 0xa25   : > { %v17807_v18 = vadd.f32 %v8013_v25, %v7288_v48  ;;  %v17822_v26 = vpop.f32.mrf.mxu0 }
 0xa26   : > { %v8017_v7 = vsel %vm6310_vm1, %v8014_v5, %v8016_v33 }
 0xa29   : > { %v7520_v35 = vpop.f32.mrf.mxu2  ;;  %v7604_v42 = vpop.f32.mrf.mxu3 }
 0xa2a   : > { %v7290_v54 = vpop.f32.mrf.mxu1  ;;  %v7605_v45 = vadd.f32 %v7604_v42, %v7515_v22  ;;  %v12215_v22 = vld [vmem:[%s18691_s3 + $0x178] sm:$0xff] }
 0xa2b   : > { %v7291_v49 = vadd.f32 %v7290_v54, %v19839_v17  ;;  %7880 = vmatpush.bf16.msrb.mxu1 %v12215_v22 }
 0xa2d   : > { %v17813_v1 = vadd.f32 %v8015_v12, %v7291_v49  ;;  %7329 = vmatmul.bf16.gmra.mxu1 %v17700_v30  ;;  %7849 = vmatmul.bf16.gmra.mxu0 %v17071_v59  ;;  %v8018_v12 = vrot.slane %v7605_v45, 2  ;;  %v19844_v59 = vld [vmem:[#allocation20_spill] sm:$0xff] }
 0xa2e   : > { %7562 = vmatmul.bf16.gmra.mxu2 %v19841_v27  ;;  %7646 = vmatmul.bf16.gmra.mxu3 %v17750_v61 }
 0xa2f   : > { %v8019_v49 = vsel %vm6310_vm1, %v8016_v33, %v8018_v12 }
 0xa31   : > { %v7523_v25 = vpop.f32.mrf.mxu2  ;;  %v7607_v10 = vpop.f32.mrf.mxu3 }
 0xa32   : > { %v7608_v6 = vadd.f32 %v7607_v10, %v7518_v53  ;;  %v7292_v24 = vpop.f32.mrf.mxu1  ;;  %v17835_v53 = vpop.f32.mrf.mxu0  ;;  %v12214_v10 = vld [vmem:[%s18691_s3 + $0x170] sm:$0xff] }
 0xa33   : > { %v7293_v5 = vadd.f32 %v7292_v24, %v19842_v3  ;;  %v19846_v3 = vld [vmem:[#allocation3_spill] sm:$0xff]  ;;  %7881 = vmatpush.bf16.msrb.mxu1 %v12214_v10 }
 0xa35   : > { %v17820_v31 = vadd.f32 %v8017_v7, %v7293_v5  ;;  %v8020_v7 = vrot.slane %v7608_v6, 2  ;;  %v12213_v6 = vld [vmem:[%s18691_s3 + $0x168] sm:$0xff] }
 0xa37   : > { %19843 = vst [vmem:[#allocation41_spill] sm:$0xff] %v17820_v31  ;;  %7882 = vmatpush.bf16.msrb.mxu1 %v12213_v6 }
 0xa39   : > { %v7525_v41 = vpop.f32.mrf.mxu2  ;;  %v7609_v48 = vpop.f32.mrf.mxu3 }
 0xa3a   : > { %v7295_v54 = vpop.f32.mrf.mxu1  ;;  %v7610_v45 = vadd.f32 %v7609_v48, %v7520_v35  ;;  %v19848_v35 = vld [vmem:[#allocation153_spill] sm:$0xff] }
 0xa3b   : > { %v7296_v17 = vadd.f32 %v7295_v54, %v19844_v59  ;;  %v8021_v54 = vsel %vm6310_vm1, %v8018_v12, %v8020_v7 }
 0xa3d   : > { %v17826_v60 = vadd.f32 %v8019_v49, %v7296_v17  ;;  %7334 = vmatmul.bf16.gmra.mxu1 %v17726_v19  ;;  %7854 = vmatmul.bf16.gmra.mxu0 %v17099_v46  ;;  %v8022_v17 = vrot.slane %v7610_v45, 2 }
 0xa3e   : > { %7567 = vmatmul.bf16.gmra.mxu2 %v17192_v37  ;;  %7651 = vmatmul.bf16.gmra.mxu3 %v17776_v40 }
 0xa3f   : > { %19845 = vst [vmem:[#allocation32_spill] sm:$0xff] %v17826_v60  ;;  %v8023_v12 = vsel %vm6310_vm1, %v8020_v7, %v8022_v17  ;;  %v12210_v7 = vld [vmem:[%s18691_s3 + $0x150] sm:$0xff] }
 0xa41   : > { %v7528_v42 = vpop.f32.mrf.mxu2  ;;  %v7612_v33 = vpop.f32.mrf.mxu3 }
 0xa42   : > { %v7613_v24 = vadd.f32 %v7612_v33, %v7523_v25  ;;  %v7297_v46 = vpop.f32.mrf.mxu1  ;;  %v12212_v25 = vld [vmem:[%s18691_s3 + $0x160] sm:$0xff]  ;;  %v17850_v33 = vpop.f32.mrf.mxu0 }
 0xa43   : > { %v7298_v5 = vadd.f32 %v7297_v46, %v19846_v3  ;;  %7883 = vmatpush.bf16.msrb.mxu1 %v12212_v25  ;;  %v12211_v3 = vld [vmem:[%s18691_s3 + $0x158] sm:$0xff] }
 0xa45   : > { %v17842_v59 = vadd.f32 %v8021_v54, %v7298_v5  ;;  %v8024_v5 = vrot.slane %v7613_v24, 2  ;;  %v12209_v24 = vld [vmem:[%s18691_s3 + $0x148] sm:$0xff] }
 0xa47   : > { %19847 = vst [vmem:[#allocation15_spill] sm:$0xff] %v17842_v59  ;;  %7884 = vmatpush.bf16.msrb.mxu1 %v12211_v3 }
 0xa49   : > { %v7530_v49 = vpop.f32.mrf.mxu2  ;;  %v7614_v22 = vpop.f32.mrf.mxu3 }
 0xa4a   : > { %v7300_v10 = vpop.f32.mrf.mxu1 }
 0xa4b   : > { %v7301_v48 = vadd.f32 %v7300_v10, %v19848_v35  ;;  %v19850_v10 = vld [vmem:[#allocation34_spill] sm:$0xff]  ;;  %7885 = vmatpush.bf16.msrb.mxu1 %v12210_v7  ;;  %v19852_v7 = vld [vmem:[#allocation24_spill] sm:$0xff] }
 0xa4d   : > { %v17854_v46 = vadd.f32 %v8023_v12, %v7301_v48  ;;  %7339 = vmatmul.bf16.gmra.mxu1 %v17750_v61  ;;  %7859 = vmatmul.bf16.gmra.mxu0 %v17129_v39  ;;  %v17866_v39 = vpop.f32.mrf.mxu0  ;;  %v7615_v48 = vadd.f32 %v7614_v22, %v7525_v41  ;;  %v8025_v12 = vsel %vm6310_vm1, %v8022_v17, %v8024_v5 }
 0xa4e   : > { %7656 = vmatmul.bf16.gmra.mxu3 %v17778_v34 }
 0xa4f   : > { %19849 = vst [vmem:[#allocation49_spill] sm:$0xff] %v17854_v46  ;;  %7886 = vmatpush.bf16.msrb.mxu1 %v12209_v24  ;;  %v8026_v3 = vrot.slane %v7615_v48, 2 }
 0xa51   : > { %v7533_v45 = vpop.f32.mrf.mxu2  ;;  %v7617_v54 = vpop.f32.mrf.mxu3  ;;  %v8027_v41 = vsel %vm6310_vm1, %v8024_v5, %v8026_v3 }
 0xa52   : > { %v7618_v6 = vadd.f32 %v7617_v54, %v7528_v42  ;;  %v7302_v25 = vpop.f32.mrf.mxu1  ;;  %v12208_v42 = vld [vmem:[%s18691_s3 + $0x140] sm:$0xff] }
 0xa53   : > { %v7303_v35 = vadd.f32 %v7302_v25, %v19850_v10  ;;  %7887 = vmatpush.bf16.msrb.mxu1 %v12208_v42 }
 0xa54   : > { %v8028_v10 = vrot.slane %v7618_v6, 2 }
 0xa55   : > { %v17869_v46 = vadd.f32 %v8025_v12, %v7303_v35  ;;  %v17883_v22 = vpop.f32.mrf.mxu0 }
 0xa56   : > { %v8029_v42 = vsel %vm6310_vm1, %v8026_v3, %v8028_v10 }
 0xa57   : > { %19851 = vst [vmem:[#allocation36_spill] sm:$0xff] %v17869_v46 }
 0xa59   : > { %v7535_v59 = vpop.f32.mrf.mxu2  ;;  %v7619_v61 = vpop.f32.mrf.mxu3 }
 0xa5a   : > { %v7305_v54 = vpop.f32.mrf.mxu1  ;;  %v7620_v60 = vadd.f32 %v7619_v61, %v7530_v49 }
 0xa5b   : > { %v7306_v25 = vadd.f32 %v7305_v54, %v19852_v7 }
 0xa5c   : > { %v8030_v7 = vrot.slane %v7620_v60, 2 }
 0xa5d   : > { %v17879_v17 = vadd.f32 %v8027_v41, %v7306_v25  ;;  %7344 = vmatmul.bf16.gmra.mxu1 %v17776_v40  ;;  %7864 = vmatmul.bf16.gmra.mxu0 %v19837_v57  ;;  %v17889_v5 = vpop.f32.mrf.mxu0 }
 0xa5e   : > { %v8031_v6 = vsel %vm6310_vm1, %v8028_v10, %v8030_v7 }
 0xa5f   : > { %19853 = vst [vmem:[#allocation19_spill] sm:$0xff] %v17879_v17  ;;  %v19854_v17 = vld [vmem:[#allocation127_spill] sm:$0xff] }
 0xa61   : > { %v7538_v35 = vpop.f32.mrf.mxu2  ;;  %v7622_v48 = vpop.f32.mrf.mxu3 }
 0xa62   : > { %v7623_v12 = vadd.f32 %v7622_v48, %v7533_v45  ;;  %v7307_v24 = vpop.f32.mrf.mxu1 }
 0xa63   : > { %v7308_v46 = vadd.f32 %v7307_v24, %v17516_v38 }
 0xa64   : > { %v8032_v38 = vrot.slane %v7623_v12, 2 }
 0xa65   : > { %v17887_v54 = vadd.f32 %v8029_v42, %v7308_v46  ;;  %v17897_v3 = vpop.f32.mrf.mxu0 }
 0xa69   : > { %v7540_v25 = vpop.f32.mrf.mxu2  ;;  %v7624_v41 = vpop.f32.mrf.mxu3 }
 0xa6a   : > { %v7310_v57 = vpop.f32.mrf.mxu1  ;;  %v7625_v48 = vadd.f32 %v7624_v41, %v7535_v59 }
 0xa6b   : > { %v7311_v40 = vadd.f32 %v7310_v57, %v19854_v17  ;;  %v8033_v17 = vsel %vm6310_vm1, %v8030_v7, %v8032_v38 }
 0xa6d   : > { %v17893_v31 = vadd.f32 %v8031_v6, %v7311_v40  ;;  %7349 = vmatmul.bf16.gmra.mxu1 %v17778_v34  ;;  %7869 = vmatmul.bf16.gmra.mxu0 %v19841_v27  ;;  %v8034_v40 = vrot.slane %v7625_v48, 2  ;;  %v17905_v6 = vpop.f32.mrf.mxu0 }
 0xa6f   : > { %v8035_v12 = vsel %vm6310_vm1, %v8032_v38, %v8034_v40 }
 0xa71   : > { %v7543_v61 = vpop.f32.mrf.mxu2  ;;  %v7627_v49 = vpop.f32.mrf.mxu3 }
 0xa72   : > { %v7628_v46 = vadd.f32 %v7627_v49, %v7538_v35  ;;  %v7312_v45 = vpop.f32.mrf.mxu1 }
 0xa73   : > { %v7313_v60 = vadd.f32 %v7312_v45, %v17555_v32  ;;  %v19855_v32 = vld [vmem:[#allocation13_spill] sm:$0xff] }
 0xa74   : > { %v8036_v59 = vrot.slane %v7628_v46, 2 }
 0xa75   : > { %v17901_v24 = vadd.f32 %v8033_v17, %v7313_v60 }
 0xa79   : > { %v7545_v10 = vpop.f32.mrf.mxu2  ;;  %v7629_v42 = vpop.f32.mrf.mxu3 }
 0xa7a   : > { %v7315_v57 = vpop.f32.mrf.mxu1  ;;  %v7630_v48 = vadd.f32 %v7629_v42, %v7540_v25 }
 0xa7b   : > { %v7316_v27 = vadd.f32 %v7315_v57, %v17574_v15  ;;  %v8037_v15 = vsel %vm6310_vm1, %v8034_v40, %v8036_v59 }
 0xa7c   : > { %v8038_v38 = vrot.slane %v7630_v48, 2 }
 0xa7d   : > { %v17907_v35 = vadd.f32 %v8035_v12, %v7316_v27  ;;  %7874 = vmatmul.bf16.gmra.mxu0 %v17192_v37  ;;  %7888 = vmatmul.bf16.vlgmr.msrb.gmra.mxu1 %v19855_v32 }
 0xa7e   : > { %v8039_v32 = vsel %vm6310_vm1, %v8036_v59, %v8038_v38 }
 0xa81   : > { %v7548_v7 = vpop.f32.mrf.mxu2  ;;  %v7632_v41 = vpop.f32.mrf.mxu3 }
 0xa82   : > { %v7633_v49 = vadd.f32 %v7632_v41, %v7543_v61  ;;  %v7317_v45 = vpop.f32.mrf.mxu1 }
 0xa83   : > { %v7318_v60 = vadd.f32 %v7317_v45, %v17595_v11 }
 0xa84   : > { %v8040_v61 = vrot.slane %v7633_v49, 2  ;;  %v19856_v49 = vld [vmem:[#allocation99_spill] sm:$0xff] }
 0xa85   : > { %v17913_v17 = vadd.f32 %v8037_v15, %v7318_v60 }
 0xa86   : > { %v8041_v45 = vsel %vm6310_vm1, %v8038_v38, %v8040_v61 }
 0xa89   : > { %v7634_v57 = vpop.f32.mrf.mxu3  ;;  %v7550_v12 = vpop.f32.mrf.mxu2 }
 0xa8a   : > { %v7320_v27 = vpop.f32.mrf.mxu1  ;;  %v7635_v42 = vadd.f32 %v7634_v57, %v7545_v10 }
 0xa8b   : > { %v7321_v37 = vadd.f32 %v7320_v27, %v17614_v58 }
 0xa8c   : > { %v8042_v15 = vrot.slane %v7635_v42, 2 }
 0xa8d   : > { %v17917_v46 = vadd.f32 %v8039_v32, %v7321_v37  ;;  %7893 = vmatmul.bf16.gmra.mxu1 %v17337_v51 }
 0xa8e   : > { %v8043_v37 = vsel %vm6310_vm1, %v8040_v61, %v8042_v15 }
 0xa91   : > { %v7637_v41 = vpop.f32.mrf.mxu3  ;;  %v7553_v60 = vpop.f32.mrf.mxu2 }
 0xa92   : > { %v7638_v11 = vadd.f32 %v7637_v41, %v7548_v7  ;;  %v7322_v25 = vpop.f32.mrf.mxu1 }
 0xa93   : > { %v7323_v40 = vadd.f32 %v7322_v25, %v17633_v0 }
 0xa94   : > { %v8044_v32 = vrot.slane %v7638_v11, 2 }
 0xa95   : > { %v17922_v48 = vadd.f32 %v8041_v45, %v7323_v40 }
 0xa96   : > { %v8045_v25 = vsel %vm6310_vm1, %v8042_v15, %v8044_v32 }
 0xa99   : > { %v7639_v58 = vpop.f32.mrf.mxu3  ;;  %v7555_v7 = vpop.f32.mrf.mxu2 }
 0xa9a   : > { %v7325_v27 = vpop.f32.mrf.mxu1  ;;  %v7640_v41 = vadd.f32 %v7639_v58, %v7550_v12 }
 0xa9b   : > { %v7326_v59 = vadd.f32 %v7325_v27, %v17653_v36 }
 0xa9c   : > { %v8046_v42 = vrot.slane %v7640_v41, 2 }
 0xa9d   : > { %v17926_v51 = vadd.f32 %v8043_v37, %v7326_v59  ;;  %7898 = vmatmul.bf16.gmra.mxu1 %v19856_v49 }
 0xa9e   : > { %v8047_v59 = vsel %vm6310_vm1, %v8044_v32, %v8046_v42 }
 0xaa1   : > { %v7642_v0 = vpop.f32.mrf.mxu3  ;;  %v7558_v36 = vpop.f32.mrf.mxu2 }
 0xaa2   : > { %v7643_v10 = vadd.f32 %v7642_v0, %v7553_v60  ;;  %v7327_v57 = vpop.f32.mrf.mxu1 }
 0xaa3   : > { %v7328_v38 = vadd.f32 %v7327_v57, %v17672_v21  ;;  %v17940_v57 = vpop.f32.mrf.mxu0 }
 0xaa4   : > { %v8048_v11 = vrot.slane %v7643_v10, 2 }
 0xaa5   : > { %v17931_v40 = vadd.f32 %v8045_v25, %v7328_v38 }
 0xaa6   : > { %v8049_v0 = vsel %vm6310_vm1, %v8046_v42, %v8048_v11 }
 0xaa9   : > { %v7644_v45 = vpop.f32.mrf.mxu3  ;;  %v7560_v58 = vpop.f32.mrf.mxu2 }
 0xaaa   : > { %v7330_v61 = vpop.f32.mrf.mxu1  ;;  %v7645_v49 = vadd.f32 %v7644_v45, %v7555_v7 }
 0xaab   : > { %v7331_v27 = vadd.f32 %v7330_v61, %v17691_v28  ;;  %v19857_v61 = vld [vmem:[#allocation38_spill] sm:$0xff] }
 0xaac   : > { %v8050_v28 = vrot.slane %v7645_v49, 2 }
 0xaad   : > { %v17935_v37 = vadd.f32 %v8047_v59, %v7331_v27  ;;  %7903 = vmatmul.bf16.gmra.mxu1 %v17434_v56 }
 0xaae   : > { %v8051_v56 = vsel %vm6310_vm1, %v8048_v11, %v8050_v28 }
 0xab1   : > { %v7647_v60 = vpop.f32.mrf.mxu3  ;;  %v7563_v10 = vpop.f32.mrf.mxu2 }
 0xab2   : > { %v7648_v21 = vadd.f32 %v7647_v60, %v7558_v36  ;;  %v7332_v12 = vpop.f32.mrf.mxu1 }
 0xab3   : > { %v7333_v15 = vadd.f32 %v7332_v12, %v17706_v4  ;;  %v17949_v4 = vpop.f32.mrf.mxu0 }
 0xab4   : > { %v8052_v7 = vrot.slane %v7648_v21, 2 }
 0xab5   : > { %v17942_v38 = vadd.f32 %v8049_v0, %v7333_v15 }
 0xab6   : > { %v8053_v12 = vsel %vm6310_vm1, %v8050_v28, %v8052_v7 }
 0xab9   : > { %v7649_v32 = vpop.f32.mrf.mxu3 }
 0xaba   : > { %v7335_v41 = vpop.f32.mrf.mxu1  ;;  %v7650_v60 = vadd.f32 %v7649_v32, %v7560_v58 }
 0xabb   : > { %v7336_v25 = vadd.f32 %v7335_v41, %v17722_v16  ;;  %v7565_v16 = vpop.f32.mrf.mxu2  ;;  %v17955_v49 = vpop.f32.mrf.mxu0 }
 0xabc   : > { %v8054_v11 = vrot.slane %v7650_v60, 2 }
 0xabd   : > { %v17946_v36 = vadd.f32 %v8051_v56, %v7336_v25  ;;  %7908 = vmatmul.bf16.gmra.mxu1 %v19857_v61 }
 0xabe   : > { %v8055_v21 = vsel %vm6310_vm1, %v8052_v7, %v8054_v11 }
 0xac1   : > { %v7652_v42 = vpop.f32.mrf.mxu3 }
 0xac2   : > { %v7653_v45 = vadd.f32 %v7652_v42, %v7563_v10  ;;  %v7337_v27 = vpop.f32.mrf.mxu1  ;;  %v19858_v10 = vld [vmem:[#allocation7_spill] sm:$0xff] }
 0xac3   : > { %v7338_v59 = vadd.f32 %v7337_v27, %v17740_v9  ;;  %v7568_v58 = vpop.f32.mrf.mxu2  ;;  %v17962_v42 = vpop.f32.mrf.mxu0 }
 0xac4   : > { %v8056_v9 = vrot.slane %v7653_v45, 2 }
 0xac5   : > { %v17953_v15 = vadd.f32 %v8053_v12, %v7338_v59 }
 0xac6   : > { %v8057_v60 = vsel %vm6310_vm1, %v8054_v11, %v8056_v9 }
 0xac9   : > { %v7654_v0 = vpop.f32.mrf.mxu3 }
 0xaca   : > { %v7340_v41 = vpop.f32.mrf.mxu1  ;;  %v7655_v59 = vadd.f32 %v7654_v0, %v7565_v16 }
 0xacb   : > { %v7341_v25 = vadd.f32 %v7340_v41, %v17752_v2  ;;  %v17970_v45 = vpop.f32.mrf.mxu0  ;;  %v7570_v16 = vpop.f32.mrf.mxu2 }
 0xacc   : > { %v8058_v2 = vrot.slane %v7655_v59, 2  ;;  %v12230_v59 = vld [vmem:[%s18693_s5 + $0x70] sm:$0xff] }
 0xacd   : > { %v17959_v56 = vadd.f32 %v8055_v21, %v7341_v25  ;;  %7913 = vmatmul.bf16.gmra.mxu1 %v19858_v10 }
 0xace   : > { %v8059_v25 = vsel %vm6310_vm1, %v8056_v9, %v8058_v2  ;;  %v12239_v9 = vld [vmem:[%s18693_s5 + $0xb8] sm:$0xff] }
 0xacf   : > { %8898 = vmatpush.bf16.msrb.mxu0 %v12239_v9  ;;  %v12235_v9 = vld [vmem:[%s18693_s5 + $0x98] sm:$0xff] }
 0xad1   : > { %v7657_v32 = vpop.f32.mrf.mxu3 }
 0xad2   : > { %v7658_v28 = vadd.f32 %v7657_v32, %v7568_v58  ;;  %v7342_v61 = vpop.f32.mrf.mxu1 }
 0xad3   : > { %v7343_v27 = vadd.f32 %v7342_v61, %v17769_v14 }
 0xad4   : > { %v8060_v10 = vrot.slane %v7658_v28, 2  ;;  %v17990_v28 = vpop.f32.mrf.mxu0 }
 0xad5   : > { %v17966_v12 = vadd.f32 %v8057_v60, %v7343_v27  ;;  %v12222_v27 = vld [vmem:[%s18693_s5 + $0x30] sm:$0xff] }
 0xad6   : > { %v8061_v32 = vsel %vm6310_vm1, %v8058_v2, %v8060_v10  ;;  %v12238_v60 = vld [vmem:[%s18693_s5 + $0xb0] sm:$0xff] }
 0xad7   : > { %8899 = vmatpush.bf16.msrb.mxu0 %v12238_v60  ;;  %v12234_v60 = vld [vmem:[%s18693_s5 + $0x90] sm:$0xff] }
 0xad9   : > { %v7659_v58 = vpop.f32.mrf.mxu3 }
 0xada   : > { %v7345_v7 = vpop.f32.mrf.mxu1  ;;  %v17976_v0 = vadd.f32 %v7659_v58, %v7570_v16  ;;  %v12221_v58 = vld [vmem:[%s18693_s5 + $0x28] sm:$0xff]  ;;  %v12228_v16 = vld [vmem:[%s18693_s5 + $0x60] sm:$0xff] }
 0xadb   : > { %v7346_v41 = vadd.f32 %v7345_v7, %v17785_v55  ;;  %v12223_v55 = vld [vmem:[%s18693_s5 + $0x38] sm:$0xff] }
 0xadc   : > { %8593 = vmatpush.bf16.msrb.mxu2 %v12223_v55  ;;  %v12219_v55 = vld [vmem:[%s18693_s5 + $0x18] sm:$0xff] }
 0xadd   : > { %v17972_v21 = vadd.f32 %v8059_v25, %v7346_v41  ;;  %7918 = vmatmul.bf16.gmra.mxu1 %v17546_v62  ;;  %v12231_v62 = vld [vmem:[%s18693_s5 + $0x78] sm:$0xff] }
 0xade   : > { %8745 = vmatpush.bf16.msrb.mxu3 %v12231_v62  ;;  %v12227_v62 = vld [vmem:[%s18693_s5 + $0x58] sm:$0xff] }
 0xae0   : > { %8594 = vmatpush.bf16.msrb.mxu2 %v12222_v27  ;;  %v12218_v27 = vld [vmem:[%s18693_s5 + $0x10] sm:$0xff] }
 0xae2   : > { %v7347_v14 = vpop.f32.mrf.mxu1  ;;  %8746 = vmatpush.bf16.msrb.mxu3 %v12230_v59  ;;  %v12226_v59 = vld [vmem:[%s18693_s5 + $0x50] sm:$0xff] }
 0xae3   : > { %v7348_v11 = vadd.f32 %v7347_v14, %v17794_v50  ;;  %v8062_v50 = vrot.slane %v17976_v0, 2  ;;  %v12229_v14 = vld [vmem:[%s18693_s5 + $0x68] sm:$0xff] }
 0xae4   : > { %8595 = vmatpush.bf16.msrb.mxu2 %v12221_v58  ;;  %v12225_v58 = vld [vmem:[%s18693_s5 + $0x48] sm:$0xff] }
 0xae5   : > { %v17979_v61 = vadd.f32 %v8061_v32, %v7348_v11  ;;  %v8063_v41 = vsel %vm6310_vm1, %v8060_v10, %v8062_v50  ;;  %v18018_v10 = vpop.f32.mrf.mxu0  ;;  %v12236_v11 = vld [vmem:[%s18693_s5 + $0xa0] sm:$0xff] }
 0xae6   : > { %8747 = vmatpush.bf16.msrb.mxu3 %v12229_v14  ;;  %v12233_v14 = vld [vmem:[%s18693_s5 + $0x88] sm:$0xff] }
 0xaea   : > { %v7350_v2 = vpop.f32.mrf.mxu1  ;;  %8748 = vmatpush.bf16.msrb.mxu3 %v12228_v16  ;;  %v12232_v16 = vld [vmem:[%s18693_s5 + $0x80] sm:$0xff] }
 0xaeb   : > { %v7351_v7 = vadd.f32 %v7350_v2, %v17804_v43  ;;  %v12237_v43 = vld [vmem:[%s18693_s5 + $0xa8] sm:$0xff] }
 0xaec   : > { %8900 = vmatpush.bf16.msrb.mxu0 %v12237_v43 }
 0xaed   : > { %v18006_v25 = vadd.f32 %v8063_v41, %v7351_v7  ;;  %7923 = vmatmul.bf16.gmra.mxu1 %v17578_v8  ;;  %v12220_v8 = vld [vmem:[%s18693_s5 + $0x20] sm:$0xff]  ;;  %v18049_v7 = vpop.f32.mrf.mxu0  ;;  %v12217_v41 = vld [vmem:[%s18693_s5 + $0x8] sm:$0xff] }
 0xaee   : > { %8596 = vmatpush.bf16.msrb.mxu2 %v12220_v8  ;;  %8749 = vmatpush.bf16.msrb.mxu3 %v12227_v62  ;;  %v12224_v8 = vld [vmem:[%s18693_s5 + $0x40] sm:$0xff] }
 0xaf0   : > { %8901 = vmatpush.bf16.msrb.mxu0 %v12236_v11 }
 0xaf2   : > { %v18029_v32 = vpop.f32.mrf.mxu1  ;;  %8597 = vmatpush.bf16.msrb.mxu2 %v12219_v55  ;;  %8750 = vmatpush.bf16.msrb.mxu3 %v12226_v59 }
 0xaf4   : > { %8902 = vmatpush.bf16.msrb.mxu0 %v12235_v9 }
 0xaf6   : > { %8598 = vmatpush.bf16.msrb.mxu2 %v12218_v27  ;;  %8751 = vmatpush.bf16.msrb.mxu3 %v12225_v58 }
 0xaf8   : > { %8903 = vmatpush.bf16.msrb.mxu0 %v12234_v60  ;;  %v18079_v60 = vld [vmem:[%s18692_s4] ss:$0 sm:$0xff] }
 0xafa   : > { %v7889_v2 = vpop.f32.mrf.mxu1  ;;  %8599 = vmatpush.bf16.msrb.mxu2 %v12217_v41  ;;  %8752 = vmatpush.bf16.msrb.mxu3 %v12224_v8 }
 0xafb   : > { %v7890_v43 = vadd.f32 %v7889_v2, %v17822_v26  ;;  %v18072_v26 = vpop.f32.mrf.mxu0 }
 0xafc   : > { %8904 = vmatpush.bf16.msrb.mxu0 %v12233_v14 }
 0xafd   : > { %7928 = vmatmul.bf16.gmra.mxu1 %v17608_v20  ;;  %v12216_v20 = vld [vmem:[%s18693_s5] sm:$0xff]  ;;  %v8161_v62 = vrot.slane %v7890_v43, 4 }
 0xafe   : > { %8600 = vmatpush.bf16.msrb.mxu2 %v12216_v20 }
 0xb00   : > { %8905 = vmatpush.bf16.msrb.mxu0 %v12232_v16 }
 0xb02   : > { %v7891_v11 = vpop.f32.mrf.mxu1 }
 0xb03   : > { %v7892_v55 = vadd.f32 %v7891_v11, %v17835_v53  ;;  %v18084_v14 = vpop.f32.mrf.mxu0 }
 0xb05   : > { %v8162_v9 = vrot.slane %v7892_v55, 4 }
 0xb07   : > { %v8163_v27 = vsel %vm8160_vm2, %v8161_v62, %v8162_v9 }
 0xb08   : > { %v8256_v59 = vadd.f32 %v8163_v27, %v17759_v44 }
 0xb0a   : > { %v7894_v2 = vpop.f32.mrf.mxu1  ;;  %v8292_v58 = vadd.f32 %v18079_v60, %v8256_v59 }
 0xb0b   : > { %v7895_v53 = vadd.f32 %v7894_v2, %v17850_v33 }
 0xb0c   : > { %v8324_v44 = vmax.f32 %v8292_v58, 0.0 }
 0xb0d   : > { %v8164_v41 = vrot.slane %v7895_v53, 4  ;;  %7933 = vmatmul.bf16.gmra.mxu1 %v17640_v23  ;;  %v18093_v53 = vpop.f32.mrf.mxu0 }
 0xb0e   : > { %v8388_v33 = vrot.slane %v8324_v44, 2 }
 0xb0f   : > { %v8165_v43 = vsel %vm8160_vm2, %v8162_v9, %v8164_v41 }
 0xb10   : > { %v8257_v20 = vadd.f32 %v8165_v43, %v17773_v47 }
 0xb12   : > { %v8293_v8 = vadd.f32 %v18079_v60, %v8257_v20  ;;  %v7896_v16 = vpop.f32.mrf.mxu1 }
 0xb13   : > { %v7897_v11 = vadd.f32 %v7896_v16, %v17866_v39 }
 0xb14   : > { %v8325_v55 = vmax.f32 %v8293_v8, 0.0 }
 0xb15   : > { %v8166_v62 = vrot.slane %v7897_v11, 4 }
 0xb16   : > { %v8389_v27 = vrot.slane %v8325_v55, 2 }
 0xb17   : > { %v8167_v23 = vsel %vm8160_vm2, %v8164_v41, %v8166_v62 }
 0xb18   : > { %v8258_v59 = vadd.f32 %v8167_v23, %v17781_v52  ;;  %v8390_v2 = vsel %vm6310_vm1, %v8388_v33, %v8389_v27  ;;  %v18102_v23 = vpop.f32.mrf.mxu0 }
 0xb19   : > { %v8482_v9 = vmax.f32 %v8324_v44, %v8390_v2 }
 0xb1a   : > { %v8294_v47 = vadd.f32 %v18079_v60, %v8258_v59  ;;  %v7899_v58 = vpop.f32.mrf.mxu1 }
 0xb1b   : > { %v7900_v43 = vadd.f32 %v7899_v58, %v17883_v22 }
 0xb1c   : > { %v8326_v20 = vmax.f32 %v8294_v47, 0.0 }
 0xb1d   : > { %v8168_v39 = vrot.slane %v7900_v43, 4  ;;  %7938 = vmatmul.bf16.gmra.mxu1 %v17670_v29 }
 0xb1e   : > { %v8391_v8 = vrot.slane %v8326_v20, 2 }
 0xb1f   : > { %v8169_v16 = vsel %vm8160_vm2, %v8166_v62, %v8168_v39 }
 0xb20   : > { %v8259_v41 = vadd.f32 %v8169_v16, %v17791_v63  ;;  %v8392_v52 = vsel %vm6310_vm1, %v8389_v27, %v8391_v8 }
 0xb21   : > { %v8483_v11 = vmax.f32 %v8325_v55, %v8392_v52 }
 0xb22   : > { %v7901_v33 = vpop.f32.mrf.mxu1  ;;  %v8295_v44 = vadd.f32 %v18079_v60, %v8259_v41 }
 0xb23   : > { %v7902_v59 = vadd.f32 %v7901_v33, %v17889_v5  ;;  %v8513_v22 = vpack.c.bf16 %v8483_v11, %v8482_v9  ;;  %v18110_v9 = vpop.f32.mrf.mxu0 }
 0xb24   : > { %v8327_v2 = vmax.f32 %v8295_v44, 0.0 }
 0xb25   : > { %v8170_v47 = vrot.slane %v7902_v59, 4  ;;  %8601 = vmatmul.bf16.vlgmr.msrb.gmra.mxu2 %v8513_v22  ;;  %8753 = vmatmul.bf16.vlgmr.msrb.gmra.mxu3 %v8513_v22 }
 0xb26   : > { %8906 = vmatmul.bf16.vlgmr.msrb.gmra.mxu0 %v8513_v22  ;;  %v8393_v29 = vrot.slane %v8327_v2, 2 }
 0xb27   : > { %v8171_v62 = vsel %vm8160_vm2, %v8168_v39, %v8170_v47 }
 0xb28   : > { %v8260_v63 = vadd.f32 %v8171_v62, %v17797_v13  ;;  %v8394_v55 = vsel %vm6310_vm1, %v8391_v8, %v8393_v29 }
 0xb29   : > { %v8484_v27 = vmax.f32 %v8326_v20, %v8394_v55 }
 0xb2a   : > { %v8296_v58 = vadd.f32 %v18079_v60, %v8260_v63  ;;  %v7904_v43 = vpop.f32.mrf.mxu1 }
 0xb2b   : > { %v7905_v16 = vadd.f32 %v7904_v43, %v17897_v3  ;;  %v18118_v62 = vpop.f32.mrf.mxu0 }
 0xb2c   : > { %v8328_v5 = vmax.f32 %v8296_v58, 0.0 }
 0xb2d   : > { %v8172_v41 = vrot.slane %v7905_v16, 4  ;;  %7943 = vmatmul.bf16.gmra.mxu1 %v17700_v30 }
 0xb2e   : > { %v8395_v52 = vrot.slane %v8328_v5, 2 }
 0xb2f   : > { %v8173_v11 = vsel %vm8160_vm2, %v8170_v47, %v8172_v41 }
 0xb30   : > { %v8261_v39 = vadd.f32 %v8173_v11, %v17807_v18  ;;  %v8396_v13 = vsel %vm6310_vm1, %v8393_v29, %v8395_v52  ;;  %v19859_v11 = vld [vmem:[#allocation41_spill] sm:$0xff] }
 0xb31   : > { %v8485_v8 = vmax.f32 %v8327_v2, %v8396_v13 }
 0xb32   : > { %v7906_v20 = vpop.f32.mrf.mxu1  ;;  %v8297_v33 = vadd.f32 %v18079_v60, %v8261_v39 }
 0xb33   : > { %v7907_v44 = vadd.f32 %v7906_v20, %v17905_v6  ;;  %v8514_v3 = vpack.c.bf16 %v8485_v8, %v8484_v27 }
 0xb34   : > { %v8329_v59 = vmax.f32 %v8297_v33, 0.0 }
 0xb35   : > { %v8174_v22 = vrot.slane %v7907_v44, 4  ;;  %8606 = vmatmul.bf16.gmra.mxu2 %v8514_v3  ;;  %8758 = vmatmul.bf16.gmra.mxu3 %v8514_v3 }
 0xb36   : > { %8910 = vmatmul.bf16.gmra.mxu0 %v8514_v3  ;;  %v8397_v30 = vrot.slane %v8329_v59, 2  ;;  %v19860_v3 = vld [vmem:[#allocation32_spill] sm:$0xff] }
 0xb37   : > { %v8175_v47 = vsel %vm8160_vm2, %v8172_v41, %v8174_v22 }
 0xb38   : > { %v8262_v18 = vadd.f32 %v8175_v47, %v17813_v1  ;;  %v8398_v2 = vsel %vm6310_vm1, %v8395_v52, %v8397_v30  ;;  %v18129_v1 = vpop.f32.mrf.mxu0 }
 0xb39   : > { %v8486_v29 = vmax.f32 %v8328_v5, %v8398_v2 }
 0xb3a   : > { %v8298_v63 = vadd.f32 %v18079_v60, %v8262_v18  ;;  %v7909_v55 = vpop.f32.mrf.mxu1 }
 0xb3b   : > { %v7910_v6 = vadd.f32 %v7909_v55, %v17940_v57  ;;  %v19861_v55 = vld [vmem:[#allocation46_spill] sm:$0xff] }
 0xb3c   : > { %v8330_v27 = vmax.f32 %v8298_v63, 0.0 }
 0xb3d   : > { %v8176_v58 = vrot.slane %v7910_v6, 4  ;;  %7948 = vmatmul.bf16.gmra.mxu1 %v17726_v19 }
 0xb3e   : > { %v8399_v43 = vrot.slane %v8330_v27, 2 }
 0xb3f   : > { %v8177_v16 = vsel %vm8160_vm2, %v8174_v22, %v8176_v58 }
 0xb40   : > { %v8263_v39 = vadd.f32 %v8177_v16, %v19859_v11  ;;  %v8400_v41 = vsel %vm6310_vm1, %v8397_v30, %v8399_v43  ;;  %v18137_v2 = vpop.f32.mrf.mxu0 }
 0xb41   : > { %v8487_v52 = vmax.f32 %v8329_v59, %v8400_v41 }
 0xb42   : > { %v7911_v5 = vpop.f32.mrf.mxu1  ;;  %v8299_v13 = vadd.f32 %v18079_v60, %v8263_v39 }
 0xb43   : > { %v7912_v8 = vadd.f32 %v7911_v5, %v17949_v4  ;;  %v8515_v57 = vpack.c.bf16 %v8487_v52, %v8486_v29 }
 0xb44   : > { %v8331_v20 = vmax.f32 %v8299_v13, 0.0 }
 0xb45   : > { %v8178_v33 = vrot.slane %v7912_v8, 4  ;;  %8611 = vmatmul.bf16.gmra.mxu2 %v8515_v57  ;;  %8763 = vmatmul.bf16.gmra.mxu3 %v8515_v57 }
 0xb46   : > { %8915 = vmatmul.bf16.gmra.mxu0 %v8515_v57  ;;  %v8401_v19 = vrot.slane %v8331_v20, 2 }
 0xb47   : > { %v8179_v44 = vsel %vm8160_vm2, %v8176_v58, %v8178_v33  ;;  %v19862_v58 = vld [vmem:[#allocation15_spill] sm:$0xff] }
 0xb48   : > { %v8264_v22 = vadd.f32 %v8179_v44, %v19860_v3  ;;  %v8402_v30 = vsel %vm6310_vm1, %v8399_v43, %v8401_v19  ;;  %v19863_v44 = vld [vmem:[#allocation49_spill] sm:$0xff] }
 0xb49   : > { %v8488_v47 = vmax.f32 %v8330_v27, %v8402_v30 }
 0xb4a   : > { %v8300_v59 = vadd.f32 %v18079_v60, %v8264_v22  ;;  %v7914_v18 = vpop.f32.mrf.mxu1 }
 0xb4b   : > { %v7915_v4 = vadd.f32 %v7914_v18, %v17955_v49  ;;  %v18146_v49 = vpop.f32.mrf.mxu0  ;;  %v19864_v18 = vld [vmem:[#allocation28_spill] sm:$0xff] }
 0xb4c   : > { %v8332_v29 = vmax.f32 %v8300_v59, 0.0 }
 0xb4d   : > { %v8180_v63 = vrot.slane %v7915_v4, 4  ;;  %7953 = vmatmul.bf16.gmra.mxu1 %v19861_v55 }
 0xb4e   : > { %v8403_v6 = vrot.slane %v8332_v29, 2 }
 0xb4f   : > { %v8181_v16 = vsel %vm8160_vm2, %v8178_v33, %v8180_v63 }
 0xb50   : > { %v8265_v11 = vadd.f32 %v8181_v16, %v19862_v58  ;;  %v8404_v39 = vsel %vm6310_vm1, %v8401_v19, %v8403_v6 }
 0xb51   : > { %v8489_v43 = vmax.f32 %v8331_v20, %v8404_v39 }
 0xb52   : > { %v7916_v27 = vpop.f32.mrf.mxu1  ;;  %v8301_v41 = vadd.f32 %v18079_v60, %v8265_v11 }
 0xb53   : > { %v7917_v52 = vadd.f32 %v7916_v27, %v17962_v42  ;;  %v8516_v5 = vpack.c.bf16 %v8489_v43, %v8488_v47  ;;  %v18154_v55 = vpop.f32.mrf.mxu0 }
 0xb54   : > { %v8333_v13 = vmax.f32 %v8301_v41, 0.0 }
 0xb55   : > { %v8182_v8 = vrot.slane %v7917_v52, 4  ;;  %8616 = vmatmul.bf16.gmra.mxu2 %v8516_v5  ;;  %8768 = vmatmul.bf16.gmra.mxu3 %v8516_v5 }
 0xb56   : > { %8920 = vmatmul.bf16.gmra.mxu0 %v8516_v5  ;;  %v8405_v57 = vrot.slane %v8333_v13, 2 }
 0xb57   : > { %v8183_v33 = vsel %vm8160_vm2, %v8180_v63, %v8182_v8  ;;  %v19865_v63 = vld [vmem:[#allocation36_spill] sm:$0xff] }
 0xb58   : > { %v8266_v3 = vadd.f32 %v8183_v33, %v19863_v44  ;;  %v8406_v20 = vsel %vm6310_vm1, %v8403_v6, %v8405_v57 }
 0xb59   : > { %v8490_v19 = vmax.f32 %v8332_v29, %v8406_v20 }
 0xb5a   : > { %v8302_v22 = vadd.f32 %v18079_v60, %v8266_v3  ;;  %v7919_v30 = vpop.f32.mrf.mxu1 }
 0xb5b   : > { %v7920_v42 = vadd.f32 %v7919_v30, %v17970_v45 }
 0xb5c   : > { %v8334_v47 = vmax.f32 %v8302_v22, 0.0 }
 0xb5d   : > { %v8184_v59 = vrot.slane %v7920_v42, 4  ;;  %7958 = vmatmul.bf16.gmra.mxu1 %v19864_v18 }
 0xb5e   : > { %v8407_v4 = vrot.slane %v8334_v47, 2 }
 0xb5f   : > { %v8185_v16 = vsel %vm8160_vm2, %v8182_v8, %v8184_v59  ;;  %v19866_v8 = vld [vmem:[#allocation19_spill] sm:$0xff] }
 0xb60   : > { %v8267_v58 = vadd.f32 %v8185_v16, %v19865_v63  ;;  %v8408_v11 = vsel %vm6310_vm1, %v8405_v57, %v8407_v4  ;;  %v18164_v57 = vpop.f32.mrf.mxu0 }
 0xb61   : > { %v8491_v6 = vmax.f32 %v8333_v13, %v8408_v11 }
 0xb62   : > { %v7921_v29 = vpop.f32.mrf.mxu1  ;;  %v8303_v39 = vadd.f32 %v18079_v60, %v8267_v58 }
 0xb63   : > { %v7922_v43 = vadd.f32 %v7921_v29, %v17990_v28  ;;  %v8517_v45 = vpack.c.bf16 %v8491_v6, %v8490_v19 }
 0xb64   : > { %v8335_v27 = vmax.f32 %v8303_v39, 0.0 }
 0xb65   : > { %v8186_v41 = vrot.slane %v7922_v43, 4  ;;  %8621 = vmatmul.bf16.gmra.mxu2 %v8517_v45  ;;  %8773 = vmatmul.bf16.gmra.mxu3 %v8517_v45 }
 0xb66   : > { %8925 = vmatmul.bf16.gmra.mxu0 %v8517_v45  ;;  %v8409_v52 = vrot.slane %v8335_v27, 2 }
 0xb67   : > { %v8187_v5 = vsel %vm8160_vm2, %v8184_v59, %v8186_v41 }
 0xb68   : > { %v8268_v33 = vadd.f32 %v8187_v5, %v19866_v8  ;;  %v8410_v44 = vsel %vm6310_vm1, %v8407_v4, %v8409_v52  ;;  %v18173_v63 = vpop.f32.mrf.mxu0 }
 0xb69   : > { %v8492_v13 = vmax.f32 %v8334_v47, %v8410_v44 }
 0xb6a   : > { %v8304_v3 = vadd.f32 %v18079_v60, %v8268_v33  ;;  %v7924_v20 = vpop.f32.mrf.mxu1 }
 0xb6b   : > { %v7925_v28 = vadd.f32 %v7924_v20, %v18018_v10 }
 0xb6c   : > { %v8336_v19 = vmax.f32 %v8304_v3, 0.0 }
 0xb6d   : > { %v8188_v22 = vrot.slane %v7925_v28, 4  ;;  %7963 = vmatmul.bf16.gmra.mxu1 %v17778_v34 }
 0xb6e   : > { %v8411_v30 = vrot.slane %v8336_v19, 2 }
 0xb6f   : > { %v8189_v42 = vsel %vm8160_vm2, %v8186_v41, %v8188_v22 }
 0xb70   : > { %v8269_v59 = vadd.f32 %v8189_v42, %v17887_v54  ;;  %v8412_v18 = vsel %vm6310_vm1, %v8409_v52, %v8411_v30  ;;  %v18181_v52 = vpop.f32.mrf.mxu0 }
 0xb71   : > { %v8493_v4 = vmax.f32 %v8335_v27, %v8412_v18 }
 0xb72   : > { %v7926_v16 = vpop.f32.mrf.mxu1  ;;  %v8305_v47 = vadd.f32 %v18079_v60, %v8269_v59 }
 0xb73   : > { %v7927_v58 = vadd.f32 %v7926_v16, %v18049_v7  ;;  %v8518_v10 = vpack.c.bf16 %v8493_v4, %v8492_v13 }
 0xb74   : > { %v8337_v11 = vmax.f32 %v8305_v47, 0.0 }
 0xb75   : > { %v8190_v6 = vrot.slane %v7927_v58, 4  ;;  %8626 = vmatmul.bf16.gmra.mxu2 %v8518_v10  ;;  %8778 = vmatmul.bf16.gmra.mxu3 %v8518_v10 }
 0xb76   : > { %8930 = vmatmul.bf16.gmra.mxu0 %v8518_v10  ;;  %v8413_v34 = vrot.slane %v8337_v11, 2 }
 0xb77   : > { %v8191_v29 = vsel %vm8160_vm2, %v8188_v22, %v8190_v6 }
 0xb78   : > { %v8270_v54 = vadd.f32 %v8191_v29, %v17893_v31  ;;  %v8414_v39 = vsel %vm6310_vm1, %v8411_v30, %v8413_v34  ;;  %v18188_v42 = vpop.f32.mrf.mxu0 }
 0xb79   : > { %v8494_v43 = vmax.f32 %v8336_v19, %v8414_v39 }
 0xb7a   : > { %v8306_v45 = vadd.f32 %v18079_v60, %v8270_v54  ;;  %v7929_v27 = vpop.f32.mrf.mxu1 }
 0xb7b   : > { %v7930_v41 = vadd.f32 %v7929_v27, %v18072_v26 }
 0xb7c   : > { %v8338_v7 = vmax.f32 %v8306_v45, 0.0 }
 0xb7d   : > { %v8192_v5 = vrot.slane %v7930_v41, 4 }
 0xb7e   : > { %v8415_v8 = vrot.slane %v8338_v7, 2 }
 0xb7f   : > { %v8193_v33 = vsel %vm8160_vm2, %v8190_v6, %v8192_v5 }
 0xb80   : > { %v8271_v44 = vadd.f32 %v8193_v33, %v17901_v24  ;;  %v8416_v13 = vsel %vm6310_vm1, %v8413_v34, %v8415_v8  ;;  %v18198_v54 = vpop.f32.mrf.mxu0 }
 0xb81   : > { %v8495_v31 = vmax.f32 %v8337_v11, %v8416_v13 }
 0xb82   : > { %v7931_v3 = vpop.f32.mrf.mxu1  ;;  %v8307_v20 = vadd.f32 %v18079_v60, %v8271_v44 }
 0xb83   : > { %v7932_v28 = vadd.f32 %v7931_v3, %v18084_v14  ;;  %v8519_v19 = vpack.c.bf16 %v8495_v31, %v8494_v43 }
 0xb84   : > { %v8339_v22 = vmax.f32 %v8307_v20, 0.0 }
 0xb85   : > { %v8194_v26 = vrot.slane %v7932_v28, 4  ;;  %8631 = vmatmul.bf16.gmra.mxu2 %v8519_v19  ;;  %8783 = vmatmul.bf16.gmra.mxu3 %v8519_v19 }
 0xb86   : > { %8935 = vmatmul.bf16.gmra.mxu0 %v8519_v19  ;;  %v8417_v30 = vrot.slane %v8339_v22, 2 }
 0xb87   : > { %v8195_v59 = vsel %vm8160_vm2, %v8192_v5, %v8194_v26 }
 0xb88   : > { %v8272_v24 = vadd.f32 %v8195_v59, %v17907_v35  ;;  %v8418_v18 = vsel %vm6310_vm1, %v8415_v8, %v8417_v30  ;;  %v18206_v31 = vpop.f32.mrf.mxu0 }
 0xb89   : > { %v8496_v4 = vmax.f32 %v8338_v7, %v8418_v18 }
 0xb8a   : > { %v8308_v16 = vadd.f32 %v18079_v60, %v8272_v24  ;;  %v7934_v47 = vpop.f32.mrf.mxu1 }
 0xb8b   : > { %v7935_v14 = vadd.f32 %v7934_v47, %v18093_v53 }
 0xb8c   : > { %v8340_v58 = vmax.f32 %v8308_v16, 0.0 }
 0xb8d   : > { %v8196_v10 = vrot.slane %v7935_v14, 4 }
 0xb8e   : > { %v8419_v11 = vrot.slane %v8340_v58, 2 }
 0xb8f   : > { %v8197_v6 = vsel %vm8160_vm2, %v8194_v26, %v8196_v10 }
 0xb90   : > { %v8273_v34 = vadd.f32 %v8197_v6, %v17913_v17  ;;  %v8420_v29 = vsel %vm6310_vm1, %v8417_v30, %v8419_v11 }
 0xb91   : > { %v8497_v35 = vmax.f32 %v8339_v22, %v8420_v29 }
 0xb92   : > { %v7936_v39 = vpop.f32.mrf.mxu1  ;;  %v8309_v43 = vadd.f32 %v18079_v60, %v8273_v34 }
 0xb93   : > { %v7937_v45 = vadd.f32 %v7936_v39, %v18102_v23  ;;  %v8520_v27 = vpack.c.bf16 %v8497_v35, %v8496_v4 }
 0xb94   : > { %v8341_v41 = vmax.f32 %v8309_v43, 0.0 }
 0xb95   : > { %v8198_v53 = vrot.slane %v7937_v45, 4  ;;  %8636 = vmatmul.bf16.gmra.mxu2 %v8520_v27  ;;  %8788 = vmatmul.bf16.gmra.mxu3 %v8520_v27 }
 0xb96   : > { %8940 = vmatmul.bf16.gmra.mxu0 %v8520_v27  ;;  %v8421_v7 = vrot.slane %v8341_v41, 2 }
 0xb97   : > { %v8199_v5 = vsel %vm8160_vm2, %v8196_v10, %v8198_v53 }
 0xb98   : > { %v8274_v17 = vadd.f32 %v8199_v5, %v17917_v46  ;;  %v8422_v8 = vsel %vm6310_vm1, %v8419_v11, %v8421_v7 }
 0xb99   : > { %v8498_v33 = vmax.f32 %v8340_v58, %v8422_v8 }
 0xb9a   : > { %v8310_v44 = vadd.f32 %v18079_v60, %v8274_v17  ;;  %v7939_v13 = vpop.f32.mrf.mxu1 }
 0xb9b   : > { %v7940_v23 = vadd.f32 %v7939_v13, %v18110_v9 }
 0xb9c   : > { %v8342_v3 = vmax.f32 %v8310_v44, 0.0 }
 0xb9d   : > { %v8200_v20 = vrot.slane %v7940_v23, 4 }
 0xb9e   : > { %v8423_v28 = vrot.slane %v8342_v3, 2 }
 0xb9f   : > { %v8201_v19 = vsel %vm8160_vm2, %v8198_v53, %v8200_v20 }
 0xba0   : > { %v8275_v22 = vadd.f32 %v8201_v19, %v17922_v48  ;;  %v8424_v26 = vsel %vm6310_vm1, %v8421_v7, %v8423_v28 }
 0xba1   : > { %v8499_v46 = vmax.f32 %v8341_v41, %v8424_v26 }
 0xba2   : > { %v7941_v30 = vpop.f32.mrf.mxu1  ;;  %v8311_v59 = vadd.f32 %v18079_v60, %v8275_v22 }
 0xba3   : > { %v7942_v24 = vadd.f32 %v7941_v30, %v18118_v62  ;;  %v8907_v18 = vpop.f32.mrf.mxu0  ;;  %v8521_v4 = vpack.c.bf16 %v8499_v46, %v8498_v33 }
 0xba4   : > { %v8343_v16 = vmax.f32 %v8311_v59, 0.0 }
 0xba5   : > { %v8202_v47 = vrot.slane %v7942_v24, 4  ;;  %8641 = vmatmul.bf16.gmra.mxu2 %v8521_v4  ;;  %8793 = vmatmul.bf16.gmra.mxu3 %v8521_v4 }
 0xba6   : > { %8945 = vmatmul.bf16.gmra.mxu0 %v8521_v4  ;;  %v8425_v9 = vrot.slane %v8343_v16, 2 }
 0xba7   : > { %v8203_v14 = vsel %vm8160_vm2, %v8200_v20, %v8202_v47 }
 0xba8   : > { %v8276_v48 = vadd.f32 %v8203_v14, %v17926_v51  ;;  %v8602_v58 = vpop.f32.mrf.mxu2  ;;  %v8754_v10 = vpop.f32.mrf.mxu3  ;;  %v8426_v11 = vsel %vm6310_vm1, %v8423_v28, %v8425_v9 }
 0xba9   : > { %v8500_v6 = vmax.f32 %v8342_v3, %v8426_v11  ;;  %v9016_v5 = vrot.slane %v8754_v10, 4 }
 0xbaa   : > { %v8312_v34 = vadd.f32 %v18079_v60, %v8276_v48  ;;  %v7944_v62 = vpop.f32.mrf.mxu1 }
 0xbab   : > { %v7945_v29 = vadd.f32 %v7944_v62, %v18129_v1  ;;  %v8908_v35 = vpop.f32.mrf.mxu0 }
 0xbac   : > { %v8344_v39 = vmax.f32 %v8312_v34, 0.0 }
 0xbad   : > { %v8204_v43 = vrot.slane %v7945_v29, 4 }
 0xbae   : > { %v8427_v45 = vrot.slane %v8344_v39, 2 }
 0xbaf   : > { %v8205_v27 = vsel %vm8160_vm2, %v8202_v47, %v8204_v43 }
 0xbb0   : > { %v8277_v41 = vadd.f32 %v8205_v27, %v17931_v40  ;;  %v8604_v53 = vpop.f32.mrf.mxu2  ;;  %v8756_v51 = vpop.f32.mrf.mxu3  ;;  %v8428_v7 = vsel %vm6310_vm1, %v8425_v9, %v8427_v45 }
 0xbb1   : > { %v9017_v17 = vrot.slane %v8756_v51, 4  ;;  %v8501_v8 = vmax.f32 %v8343_v16, %v8428_v7 }
 0xbb2   : > { %v7946_v33 = vpop.f32.mrf.mxu1  ;;  %v8313_v44 = vadd.f32 %v18079_v60, %v8277_v41 }
 0xbb3   : > { %v9018_v1 = vsel %vm8160_vm2, %v9016_v5, %v9017_v17  ;;  %v7947_v13 = vadd.f32 %v7946_v33, %v18137_v2  ;;  %v8911_v23 = vpop.f32.mrf.mxu0  ;;  %v8522_v3 = vpack.c.bf16 %v8501_v8, %v8500_v6  ;;  %v18231_v2 = vld [vmem:[%s18694_s6] ss:$0 sm:$0xff] }
 0xbb4   : > { %v9107_v20 = vadd.f32 %v9018_v1, %v8602_v58  ;;  %v8345_v28 = vmax.f32 %v8313_v44, 0.0 }
 0xbb5   : > { %v8206_v19 = vrot.slane %v7947_v13, 4  ;;  %8646 = vmatmul.bf16.gmra.mxu2 %v8522_v3  ;;  %8798 = vmatmul.bf16.gmra.mxu3 %v8522_v3 }
 0xbb6   : > { %v9137_v40 = vadd.f32 %v9107_v20, %v8908_v35  ;;  %8950 = vmatmul.bf16.gmra.mxu0 %v8522_v3  ;;  %v8429_v22 = vrot.slane %v8345_v28, 2 }
 0xbb7   : > { %v8207_v26 = vsel %vm8160_vm2, %v8204_v43, %v8206_v19 }
 0xbb8   : > { %v8278_v46 = vadd.f32 %v8207_v26, %v17935_v37  ;;  %v8607_v30 = vpop.f32.mrf.mxu2  ;;  %v8759_v59 = vpop.f32.mrf.mxu3  ;;  %v8430_v24 = vsel %vm6310_vm1, %v8427_v45, %v8429_v22  ;;  %v9171_v10 = vadd.f32 %v18231_v2, %v9137_v40 }
 0xbb9   : > { %v9019_v18 = vrot.slane %v8759_v59, 4  ;;  %v8502_v4 = vmax.f32 %v8344_v39, %v8430_v24 }
 0xbba   : > { %v8314_v16 = vadd.f32 %v18079_v60, %v8278_v46  ;;  %v7949_v47 = vpop.f32.mrf.mxu1  ;;  %v9201_v27 = vmax.f32 %v9171_v10, 0.0 }
 0xbbb   : > { %v9020_v9 = vsel %vm8160_vm2, %v9017_v17, %v9019_v18  ;;  %v7950_v14 = vadd.f32 %v7949_v47, %v18146_v49  ;;  %v8913_v48 = vpop.f32.mrf.mxu0 }
 0xbbc   : > { %v8346_v37 = vmax.f32 %v8314_v16, 0.0  ;;  %v9108_v58 = vadd.f32 %v9020_v9, %v8604_v53  ;;  %v9261_v13 = vrot.slane %v9201_v27, 4 }
 0xbbd   : > { %v8208_v11 = vrot.slane %v7950_v14, 4 }
 0xbbe   : > { %v8431_v6 = vrot.slane %v8346_v37, 2  ;;  %v9138_v34 = vadd.f32 %v9108_v58, %v8911_v23 }
 0xbbf   : > { %v8209_v62 = vsel %vm8160_vm2, %v8206_v19, %v8208_v11 }
 0xbc0   : > { %v8279_v29 = vadd.f32 %v8209_v62, %v17942_v38  ;;  %v8609_v35 = vpop.f32.mrf.mxu2  ;;  %v8761_v39 = vpop.f32.mrf.mxu3  ;;  %v8432_v43 = vsel %vm6310_vm1, %v8429_v22, %v8431_v6  ;;  %v9172_v45 = vadd.f32 %v18231_v2, %v9138_v34 }
 0xbc1   : > { %v9021_v49 = vrot.slane %v8761_v39, 4  ;;  %v8503_v41 = vmax.f32 %v8345_v28, %v8432_v43 }
 0xbc2   : > { %v7951_v51 = vpop.f32.mrf.mxu1  ;;  %v8315_v53 = vadd.f32 %v18079_v60, %v8279_v29  ;;  %v9202_v7 = vmax.f32 %v9172_v45, 0.0 }
 0xbc3   : > { %v9022_v5 = vsel %vm8160_vm2, %v9019_v18, %v9021_v49  ;;  %v7952_v17 = vadd.f32 %v7951_v51, %v18154_v55  ;;  %v8916_v8 = vpop.f32.mrf.mxu0  ;;  %v8523_v33 = vpack.c.bf16 %v8503_v41, %v8502_v4 }
 0xbc4   : > { %v9109_v38 = vadd.f32 %v9022_v5, %v8607_v30  ;;  %v8347_v44 = vmax.f32 %v8315_v53, 0.0  ;;  %v9262_v1 = vrot.slane %v9202_v7, 4 }
 0xbc5   : > { %v8210_v23 = vrot.slane %v7952_v17, 4  ;;  %8651 = vmatmul.bf16.gmra.mxu2 %v8523_v33  ;;  %8803 = vmatmul.bf16.gmra.mxu3 %v8523_v33 }
 0xbc6   : > { %v9139_v3 = vadd.f32 %v9109_v38, %v8913_v48  ;;  %8955 = vmatmul.bf16.gmra.mxu0 %v8523_v33  ;;  %v8433_v20 = vrot.slane %v8347_v44, 2  ;;  %v9263_v28 = vsel %vm8160_vm2, %v9261_v13, %v9262_v1 }
 0xbc7   : > { %v8211_v19 = vsel %vm8160_vm2, %v8208_v11, %v8210_v23  ;;  %v18246_v40 = vmax.f32 %v9201_v27, %v9263_v28 }
 0xbc8   : > { %v8280_v55 = vadd.f32 %v8211_v19, %v17946_v36  ;;  %v8612_v22 = vpop.f32.mrf.mxu2  ;;  %v8764_v26 = vpop.f32.mrf.mxu3  ;;  %v8434_v46 = vsel %vm6310_vm1, %v8431_v6, %v8433_v20  ;;  %v9173_v30 = vadd.f32 %v18231_v2, %v9139_v3 }
 0xbc9   : > { %v9023_v59 = vrot.slane %v8764_v26, 4  ;;  %v8504_v24 = vmax.f32 %v8346_v37, %v8434_v46 }
 0xbca   : > { %v8316_v18 = vadd.f32 %v18079_v60, %v8280_v55  ;;  %v7954_v4 = vpop.f32.mrf.mxu1  ;;  %v9203_v16 = vmax.f32 %v9173_v30, 0.0 }
 0xbcb   : > { %v9024_v47 = vsel %vm8160_vm2, %v9021_v49, %v9023_v59  ;;  %v7955_v9 = vadd.f32 %v7954_v4, %v18164_v57  ;;  %v8918_v14 = vpop.f32.mrf.mxu0 }
 0xbcc   : > { %v8348_v48 = vmax.f32 %v8316_v18, 0.0  ;;  %v9110_v58 = vadd.f32 %v9024_v47, %v8609_v35  ;;  %v9264_v36 = vrot.slane %v9203_v16, 4 }
 0xbcd   : > { %v8212_v10 = vrot.slane %v7955_v9, 4 }
 0xbce   : > { %v8435_v11 = vrot.slane %v8348_v48, 2  ;;  %v9140_v34 = vadd.f32 %v9110_v58, %v8916_v8  ;;  %v9265_v6 = vsel %vm8160_vm2, %v9262_v1, %v9264_v36 }
 0xbcf   : > { %v8213_v62 = vsel %vm8160_vm2, %v8210_v23, %v8212_v10  ;;  %v18256_v37 = vmax.f32 %v9202_v7, %v9265_v6 }
 0xbd0   : > { %v8281_v29 = vadd.f32 %v8213_v62, %v17953_v15  ;;  %v8614_v39 = vpop.f32.mrf.mxu2  ;;  %v8766_v43 = vpop.f32.mrf.mxu3  ;;  %v8436_v45 = vsel %vm6310_vm1, %v8433_v20, %v8435_v11  ;;  %v9174_v57 = vadd.f32 %v18231_v2, %v9140_v34 }
 0xbd1   : > { %v9025_v27 = vrot.slane %v8766_v43, 4  ;;  %v8505_v35 = vmax.f32 %v8347_v44, %v8436_v45  ;;  %v9380_v49 = vmax.f32 %v18246_v40, %v18256_v37 }
 0xbd2   : > { %v7956_v41 = vpop.f32.mrf.mxu1  ;;  %v8317_v51 = vadd.f32 %v18079_v60, %v8281_v29  ;;  %v9204_v53 = vmax.f32 %v9174_v57, 0.0 }
 0xbd3   : > { %v9026_v7 = vsel %vm8160_vm2, %v9023_v59, %v9025_v27  ;;  %v7957_v5 = vadd.f32 %v7956_v41, %v18173_v63  ;;  %v8921_v15 = vpop.f32.mrf.mxu0  ;;  %v8524_v17 = vpack.c.bf16 %v8505_v35, %v8504_v24 }
 0xbd4   : > { %v9111_v8 = vadd.f32 %v9026_v7, %v8612_v22  ;;  %v8349_v33 = vmax.f32 %v8317_v51, 0.0  ;;  %v9266_v38 = vrot.slane %v9204_v53, 4 }
 0xbd5   : > { %v8214_v1 = vrot.slane %v7957_v5, 4  ;;  %8656 = vmatmul.bf16.gmra.mxu2 %v8524_v17  ;;  %8808 = vmatmul.bf16.gmra.mxu3 %v8524_v17 }
 0xbd6   : > { %v9141_v44 = vadd.f32 %v9111_v8, %v8918_v14  ;;  %8960 = vmatmul.bf16.gmra.mxu0 %v8524_v17  ;;  %v8437_v13 = vrot.slane %v8349_v33, 2  ;;  %v9267_v23 = vsel %vm8160_vm2, %v9264_v36, %v9266_v38 }
 0xbd7   : > { %v8215_v3 = vsel %vm8160_vm2, %v8212_v10, %v8214_v1  ;;  %v18268_v20 = vmax.f32 %v9203_v16, %v9267_v23 }
 0xbd8   : > { %v8282_v28 = vadd.f32 %v8215_v3, %v17959_v56  ;;  %v8617_v63 = vpop.f32.mrf.mxu2  ;;  %v8769_v19 = vpop.f32.mrf.mxu3  ;;  %v8438_v55 = vsel %vm6310_vm1, %v8435_v11, %v8437_v13  ;;  %v9175_v22 = vadd.f32 %v18231_v2, %v9141_v44 }
 0xbd9   : > { %v9027_v26 = vrot.slane %v8769_v19, 4  ;;  %v8506_v46 = vmax.f32 %v8348_v48, %v8438_v55  ;;  %v9381_v30 = vmax.f32 %v18256_v37, %v18268_v20 }
 0xbda   : > { %v8318_v59 = vadd.f32 %v18079_v60, %v8282_v28  ;;  %v7959_v24 = vpop.f32.mrf.mxu1  ;;  %v9205_v18 = vmax.f32 %v9175_v22, 0.0 }
 0xbdb   : > { %v9028_v4 = vsel %vm8160_vm2, %v9025_v27, %v9027_v26  ;;  %v7960_v16 = vadd.f32 %v7959_v24, %v18181_v52  ;;  %v8923_v56 = vpop.f32.mrf.mxu0 }
 0xbdc   : > { %v8350_v47 = vmax.f32 %v8318_v59, 0.0  ;;  %v9112_v9 = vadd.f32 %v9028_v4, %v8614_v39  ;;  %v9268_v14 = vrot.slane %v9205_v18, 4 }
 0xbdd   : > { %v8216_v58 = vrot.slane %v7960_v16, 4 }
 0xbde   : > { %v8439_v36 = vrot.slane %v8350_v47, 2  ;;  %v9142_v10 = vadd.f32 %v9112_v9, %v8921_v15  ;;  %v9269_v48 = vsel %vm8160_vm2, %v9266_v38, %v9268_v14 }
 0xbdf   : > { %v8217_v11 = vsel %vm8160_vm2, %v8214_v1, %v8216_v58  ;;  %v18280_v34 = vmax.f32 %v9204_v53, %v9269_v48 }
 0xbe0   : > { %v8283_v6 = vadd.f32 %v8217_v11, %v17966_v12  ;;  %v8619_v62 = vpop.f32.mrf.mxu2  ;;  %v8771_v29 = vpop.f32.mrf.mxu3  ;;  %v8440_v43 = vsel %vm6310_vm1, %v8437_v13, %v8439_v36  ;;  %v9176_v52 = vadd.f32 %v18231_v2, %v9142_v10 }
 0xbe1   : > { %v9029_v45 = vrot.slane %v8771_v29, 4  ;;  %v8507_v39 = vmax.f32 %v8349_v33, %v8440_v43  ;;  %v9382_v57 = vmax.f32 %v18268_v20, %v18280_v34  ;;  %v19867_v43 = vld [vmem:[#allocation11_spill] sm:$0xff] }
 0xbe2   : > { %v7961_v27 = vpop.f32.mrf.mxu1  ;;  %v8319_v35 = vadd.f32 %v18079_v60, %v8283_v6  ;;  %v9206_v41 = vmax.f32 %v9176_v52, 0.0 }
 0xbe3   : > { %v9030_v51 = vsel %vm8160_vm2, %v9027_v26, %v9029_v45  ;;  %v7962_v53 = vadd.f32 %v7961_v27, %v18188_v42  ;;  %v8926_v12 = vpop.f32.mrf.mxu0  ;;  %v8525_v7 = vpack.c.bf16 %v8507_v39, %v8506_v46 }
 0xbe4   : > { %v9113_v5 = vadd.f32 %v9030_v51, %v8617_v63  ;;  %v8351_v15 = vmax.f32 %v8319_v35, 0.0  ;;  %v9270_v17 = vrot.slane %v9206_v41, 4 }
 0xbe5   : > { %v8218_v8 = vrot.slane %v7962_v53, 4  ;;  %8661 = vmatmul.bf16.gmra.mxu2 %v8525_v7  ;;  %8813 = vmatmul.bf16.gmra.mxu3 %v8525_v7 }
 0xbe6   : > { %v9143_v33 = vadd.f32 %v9113_v5, %v8923_v56  ;;  %8965 = vmatmul.bf16.gmra.mxu0 %v8525_v7  ;;  %v8441_v38 = vrot.slane %v8351_v15, 2  ;;  %v9271_v1 = vsel %vm8160_vm2, %v9268_v14, %v9270_v17 }
 0xbe7   : > { %v8219_v44 = vsel %vm8160_vm2, %v8216_v58, %v8218_v8  ;;  %v18292_v13 = vmax.f32 %v9205_v18, %v9271_v1 }
 0xbe8   : > { %v8284_v23 = vadd.f32 %v8219_v44, %v17972_v21  ;;  %v8622_v42 = vpop.f32.mrf.mxu2  ;;  %v8774_v3 = vpop.f32.mrf.mxu3  ;;  %v8442_v28 = vsel %vm6310_vm1, %v8439_v36, %v8441_v38  ;;  %v9177_v63 = vadd.f32 %v18231_v2, %v9143_v33 }
 0xbe9   : > { %v9031_v19 = vrot.slane %v8774_v3, 4  ;;  %v8508_v55 = vmax.f32 %v8350_v47, %v8442_v28  ;;  %v9383_v22 = vmax.f32 %v18280_v34, %v18292_v13 }
 0xbea   : > { %v8320_v26 = vadd.f32 %v18079_v60, %v8284_v23  ;;  %v7964_v46 = vpop.f32.mrf.mxu1  ;;  %v9207_v59 = vmax.f32 %v9177_v63, 0.0 }
 0xbeb   : > { %v9032_v24 = vsel %vm8160_vm2, %v9029_v45, %v9031_v19  ;;  %v7965_v18 = vadd.f32 %v7964_v46, %v18198_v54  ;;  %v8928_v21 = vpop.f32.mrf.mxu0 }
 0xbec   : > { %v8352_v4 = vmax.f32 %v8320_v26, 0.0  ;;  %v9114_v16 = vadd.f32 %v9032_v24, %v8619_v62  ;;  %v9272_v56 = vrot.slane %v9207_v59, 4  ;;  %v7353_v62 = vadd.f32 %v18029_v32, %v19867_v43 }
 0xbed   : > { %v8220_v9 = vrot.slane %v7965_v18, 4 }
 0xbee   : > { %v8443_v14 = vrot.slane %v8352_v4, 2  ;;  %v9144_v58 = vadd.f32 %v9114_v16, %v8926_v12  ;;  %v9273_v47 = vsel %vm8160_vm2, %v9270_v17, %v9272_v56  ;;  %v8127_v32 = vadd.f32 %v8062_v50, %v7353_v62 }
 0xbef   : > { %v8221_v36 = vsel %vm8160_vm2, %v8218_v8, %v8220_v9  ;;  %v18304_v10 = vmax.f32 %v9206_v41, %v9273_v47 }
 0xbf0   : > { %v8285_v48 = vadd.f32 %v8221_v36, %v17979_v61  ;;  %v8624_v11 = vpop.f32.mrf.mxu2  ;;  %v8776_v6 = vpop.f32.mrf.mxu3  ;;  %v8444_v29 = vsel %vm6310_vm1, %v8441_v38, %v8443_v14  ;;  %v9178_v54 = vadd.f32 %v18231_v2, %v9144_v58 }
 0xbf1   : > { %v9033_v52 = vrot.slane %v8776_v6, 4  ;;  %v8509_v45 = vmax.f32 %v8351_v15, %v8444_v29  ;;  %v9384_v39 = vmax.f32 %v18292_v13, %v18304_v10 }
 0xbf2   : > { %v7966_v27 = vpop.f32.mrf.mxu1  ;;  %v8321_v35 = vadd.f32 %v18079_v60, %v8285_v48  ;;  %v9208_v41 = vmax.f32 %v9178_v54, 0.0 }
 0xbf3   : > { %v9034_v61 = vsel %vm8160_vm2, %v9031_v19, %v9033_v52  ;;  %v7967_v51 = vadd.f32 %v7966_v27, %v18206_v31  ;;  %v8931_v53 = vpop.f32.mrf.mxu0  ;;  %v8526_v12 = vpack.c.bf16 %v8509_v45, %v8508_v55 }
 0xbf4   : > { %v9115_v7 = vadd.f32 %v9034_v61, %v8622_v42  ;;  %v8353_v5 = vmax.f32 %v8321_v35, 0.0  ;;  %v9274_v17 = vrot.slane %v9208_v41, 4 }
 0xbf5   : > { %v8222_v15 = vrot.slane %v7967_v51, 4  ;;  %8666 = vmatmul.bf16.gmra.mxu2 %v8526_v12  ;;  %8818 = vmatmul.bf16.gmra.mxu3 %v8526_v12 }
 0xbf6   : > { %v9145_v8 = vadd.f32 %v9115_v7, %v8928_v21  ;;  %8970 = vmatmul.bf16.gmra.mxu0 %v8526_v12  ;;  %v8445_v33 = vrot.slane %v8353_v5, 2  ;;  %v9275_v38 = vsel %vm8160_vm2, %v9272_v56, %v9274_v17 }
 0xbf7   : > { %v8223_v1 = vsel %vm8160_vm2, %v8220_v9, %v8222_v15  ;;  %v8287_v44 = vadd.f32 %v8222_v15, %v8127_v32  ;;  %v18320_v31 = vmax.f32 %v9207_v59, %v9275_v38 }
 0xbf8   : > { %v8286_v23 = vadd.f32 %v8223_v1, %v18006_v25  ;;  %v8627_v42 = vpop.f32.mrf.mxu2  ;;  %v8779_v3 = vpop.f32.mrf.mxu3  ;;  %v8446_v0 = vsel %vm6310_vm1, %v8443_v14, %v8445_v33  ;;  %v9179_v50 = vadd.f32 %v18231_v2, %v9145_v8 }
 0xbf9   : > { %v8323_v28 = vadd.f32 %v18079_v60, %v8287_v44  ;;  %v9035_v63 = vrot.slane %v8779_v3, 4  ;;  %v8510_v19 = vmax.f32 %v8352_v4, %v8446_v0  ;;  %v9385_v55 = vmax.f32 %v18304_v10, %v18320_v31 }
 0xbfa   : > { %v8322_v26 = vadd.f32 %v18079_v60, %v8286_v23  ;;  %v9209_v46 = vmax.f32 %v9179_v50, 0.0 }
 0xbfb   : > { %v8355_v59 = vmax.f32 %v8323_v28, 0.0  ;;  %v9036_v24 = vsel %vm8160_vm2, %v9033_v52, %v9035_v63  ;;  %v8933_v25 = vpop.f32.mrf.mxu0 }
 0xbfc   : > { %v8354_v18 = vmax.f32 %v8322_v26, 0.0  ;;  %v9116_v21 = vadd.f32 %v9036_v24, %v8624_v11  ;;  %v9276_v16 = vrot.slane %v9209_v46, 4 }
 0xbfd   : > { %v8449_v56 = vrot.slane %v8355_v59, 2 }
 0xbfe   : > { %v8447_v9 = vrot.slane %v8354_v18, 2  ;;  %v9146_v14 = vadd.f32 %v9116_v21, %v8931_v53  ;;  %v9277_v58 = vsel %vm8160_vm2, %v9274_v17, %v9276_v16 }
 0xbff   : > { %v18331_v47 = vmax.f32 %v9208_v41, %v9277_v58 }
 0xc00   : > { %v8629_v4 = vpop.f32.mrf.mxu2  ;;  %v8781_v36 = vpop.f32.mrf.mxu3  ;;  %v8448_v48 = vsel %vm6310_vm1, %v8445_v33, %v8447_v9  ;;  %v8450_v60 = vsel %vm6310_vm1, %v8447_v9, %v8449_v56  ;;  %v9180_v6 = vadd.f32 %v18231_v2, %v9146_v14 }
 0xc01   : > { %v9037_v29 = vrot.slane %v8781_v36, 4  ;;  %v8511_v54 = vmax.f32 %v8353_v5, %v8448_v48  ;;  %v8512_v43 = vmax.f32 %v8354_v18, %v8450_v60  ;;  %v9386_v11 = vmax.f32 %v18320_v31, %v18331_v47 }
 0xc02   : > { %v9210_v62 = vmax.f32 %v9180_v6, 0.0 }
 0xc03   : > { %v9038_v52 = vsel %vm8160_vm2, %v9035_v63, %v9037_v29  ;;  %v8936_v45 = vpop.f32.mrf.mxu0  ;;  %v8527_v27 = vpack.c.bf16 %v8511_v54, %v8510_v19  ;;  %v8528_v59 = vpack.c.bf16 %v8512_v43, %v8512_v43 }
 0xc04   : > { %v9117_v35 = vadd.f32 %v9038_v52, %v8627_v42  ;;  %v9278_v41 = vrot.slane %v9210_v62, 4 }
 0xc05   : > { %8671 = vmatmul.bf16.gmra.mxu2 %v8527_v27  ;;  %8823 = vmatmul.bf16.gmra.mxu3 %v8527_v27 }
 0xc06   : > { %v9147_v61 = vadd.f32 %v9117_v35, %v8933_v25  ;;  %8975 = vmatmul.bf16.gmra.mxu0 %v8527_v27  ;;  %v9279_v51 = vsel %vm8160_vm2, %v9276_v16, %v9278_v41 }
 0xc07   : > { %v18340_v53 = vmax.f32 %v9209_v46, %v9279_v51 }
 0xc08   : > { %v8632_v12 = vpop.f32.mrf.mxu2  ;;  %v8784_v7 = vpop.f32.mrf.mxu3  ;;  %v9181_v5 = vadd.f32 %v18231_v2, %v9147_v61 }
 0xc09   : > { %v9039_v17 = vrot.slane %v8784_v7, 4  ;;  %v9387_v32 = vmax.f32 %v18331_v47, %v18340_v53 }
 0xc0a   : > { %v9211_v15 = vmax.f32 %v9181_v5, 0.0 }
 0xc0b   : > { %v9040_v8 = vsel %vm8160_vm2, %v9037_v29, %v9039_v17  ;;  %v8938_v33 = vpop.f32.mrf.mxu0 }
 0xc0c   : > { %v9118_v38 = vadd.f32 %v9040_v8, %v8629_v4  ;;  %v9280_v1 = vrot.slane %v9211_v15, 4 }
 0xc0e   : > { %v9148_v44 = vadd.f32 %v9118_v38, %v8936_v45  ;;  %v9281_v23 = vsel %vm8160_vm2, %v9278_v41, %v9280_v1 }
 0xc0f   : > { %v18347_v42 = vmax.f32 %v9210_v62, %v9281_v23 }
 0xc10   : > { %v8634_v3 = vpop.f32.mrf.mxu2  ;;  %v8786_v0 = vpop.f32.mrf.mxu3  ;;  %v9182_v50 = vadd.f32 %v18231_v2, %v9148_v44 }
 0xc11   : > { %v9041_v28 = vrot.slane %v8786_v0, 4  ;;  %v9388_v63 = vmax.f32 %v18340_v53, %v18347_v42 }
 0xc12   : > { %v9212_v19 = vmax.f32 %v9182_v50, 0.0 }
 0xc13   : > { %v9042_v26 = vsel %vm8160_vm2, %v9039_v17, %v9041_v28  ;;  %v8941_v46 = vpop.f32.mrf.mxu0 }
 0xc14   : > { %v9119_v24 = vadd.f32 %v9042_v26, %v8632_v12  ;;  %v9282_v25 = vrot.slane %v9212_v19, 4 }
 0xc15   : > { %8676 = vmatmul.bf16.gmra.mxu2 %v8528_v59  ;;  %8828 = vmatmul.bf16.gmra.mxu3 %v8528_v59 }
 0xc16   : > { %v9149_v18 = vadd.f32 %v9119_v24, %v8938_v33  ;;  %8980 = vmatmul.bf16.gmra.mxu0 %v8528_v59  ;;  %v9283_v21 = vsel %vm8160_vm2, %v9280_v1, %v9282_v25 }
 0xc17   : > { %v18354_v16 = vmax.f32 %v9211_v15, %v9283_v21 }
 0xc18   : > { %v8637_v56 = vpop.f32.mrf.mxu2  ;;  %v8789_v9 = vpop.f32.mrf.mxu3  ;;  %v18357_v14 = vadd.f32 %v18231_v2, %v9149_v18 }
 0xc19   : > { %v9389_v58 = vmax.f32 %v18347_v42, %v18354_v16  ;;  %v9043_v61 = vrot.slane %v8789_v9, 4 }
 0xc1a   : > { %v9213_v4 = vmax.f32 %v18357_v14, 0.0 }
 0xc1b   : > { %v8943_v36 = vpop.f32.mrf.mxu0  ;;  %v9044_v8 = vsel %vm8160_vm2, %v9041_v28, %v9043_v61 }
 0xc1c   : > { %v18364_v48 = vrot.slane %v9213_v4, 4  ;;  %v9120_v23 = vadd.f32 %v9044_v8, %v8634_v3 }
 0xc1e   : > { %v9285_v60 = vsel %vm8160_vm2, %v9282_v25, %v18364_v48  ;;  %v9150_v18 = vadd.f32 %v9120_v23, %v8941_v46 }
 0xc1f   : > { %v18368_v6 = vmax.f32 %v9212_v19, %v9285_v60 }
 0xc20   : > { %v8639_v29 = vpop.f32.mrf.mxu2  ;;  %v8791_v54 = vpop.f32.mrf.mxu3 }
 0xc21   : > { %v9390_v43 = vmax.f32 %v18354_v16, %v18368_v6  ;;  %v9045_v41 = vrot.slane %v8791_v54, 4 }
 0xc23   : > { %v8946_v62 = vpop.f32.mrf.mxu0  ;;  %v9046_v5 = vsel %vm8160_vm2, %v9043_v61, %v9045_v41 }
 0xc24   : > { %v9121_v1 = vadd.f32 %v9046_v5, %v8637_v56 }
 0xc26   : > { %v9151_v19 = vadd.f32 %v9121_v1, %v8943_v36 }
 0xc28   : > { %v8642_v52 = vpop.f32.mrf.mxu2  ;;  %v8794_v45 = vpop.f32.mrf.mxu3  ;;  %v9185_v56 = vadd.f32 %v18231_v2, %v9151_v19 }
 0xc29   : > { %v9047_v27 = vrot.slane %v8794_v45, 4 }
 0xc2b   : > { %v8948_v35 = vpop.f32.mrf.mxu0  ;;  %v9048_v51 = vsel %vm8160_vm2, %v9045_v41, %v9047_v27 }
 0xc2c   : > { %v9122_v15 = vadd.f32 %v9048_v51, %v8639_v29 }
 0xc2e   : > { %v9152_v0 = vadd.f32 %v9122_v15, %v8946_v62  ;;  %v9184_v62 = vadd.f32 %v18231_v2, %v9150_v18 }
 0xc30   : > { %v8644_v12 = vpop.f32.mrf.mxu2  ;;  %v8796_v7 = vpop.f32.mrf.mxu3  ;;  %v9186_v21 = vadd.f32 %v18231_v2, %v9152_v0  ;;  %v9214_v51 = vmax.f32 %v9184_v62, 0.0 }
 0xc31   : > { %v9049_v17 = vrot.slane %v8796_v7, 4 }
 0xc32   : > { %v9216_v54 = vmax.f32 %v9186_v21, 0.0 }
 0xc33   : > { %v9050_v33 = vsel %vm8160_vm2, %v9047_v27, %v9049_v17  ;;  %v8951_v38 = vpop.f32.mrf.mxu0 }
 0xc34   : > { %v9123_v44 = vadd.f32 %v9050_v33, %v8642_v52  ;;  %v9290_v41 = vrot.slane %v9216_v54, 4 }
 0xc36   : > { %v9153_v50 = vadd.f32 %v9123_v44, %v8948_v35  ;;  %v9215_v35 = vmax.f32 %v9185_v56, 0.0  ;;  %v9286_v44 = vrot.slane %v9214_v51, 4 }
 0xc38   : > { %v9187_v26 = vadd.f32 %v18231_v2, %v9153_v50  ;;  %v8647_v59 = vpop.f32.mrf.mxu2  ;;  %v8799_v24 = vpop.f32.mrf.mxu3  ;;  %v9288_v8 = vrot.slane %v9215_v35, 4  ;;  %v9287_v21 = vsel %vm8160_vm2, %v18364_v48, %v9286_v44 }
 0xc39   : > { %v9051_v25 = vrot.slane %v8799_v24, 4 }
 0xc3a   : > { %v9217_v60 = vmax.f32 %v9187_v26, 0.0  ;;  %v9291_v1 = vsel %vm8160_vm2, %v9288_v8, %v9290_v41  ;;  %v9289_v26 = vsel %vm8160_vm2, %v9286_v44, %v9288_v8 }
 0xc3b   : > { %v9052_v9 = vsel %vm8160_vm2, %v9049_v17, %v9051_v25  ;;  %v8953_v28 = vpop.f32.mrf.mxu0  ;;  %v9364_v18 = vmax.f32 %v9215_v35, %v9291_v1  ;;  %v9363_v56 = vmax.f32 %v9214_v51, %v9289_v26 }
 0xc3c   : > { %v9124_v29 = vadd.f32 %v9052_v9, %v8644_v12  ;;  %v9292_v36 = vrot.slane %v9217_v60, 4 }
 0xc3d   : > { %v9393_v62 = vmax.f32 %v9363_v56, %v9364_v18 }
 0xc3e   : > { %v9154_v3 = vadd.f32 %v9124_v29, %v8951_v38  ;;  %v9293_v15 = vsel %vm8160_vm2, %v9290_v41, %v9292_v36 }
 0xc3f   : > { %v9365_v23 = vmax.f32 %v9216_v54, %v9293_v15 }
 0xc40   : > { %v9188_v52 = vadd.f32 %v18231_v2, %v9154_v3  ;;  %v8649_v45 = vpop.f32.mrf.mxu2  ;;  %v8801_v27 = vpop.f32.mrf.mxu3 }
 0xc41   : > { %v9053_v46 = vrot.slane %v8801_v27, 4 }
 0xc42   : > { %v9218_v61 = vmax.f32 %v9188_v52, 0.0 }
 0xc43   : > { %v9054_v7 = vsel %vm8160_vm2, %v9051_v25, %v9053_v46  ;;  %v8956_v5 = vpop.f32.mrf.mxu0 }
 0xc44   : > { %v9294_v12 = vrot.slane %v9218_v61, 4  ;;  %v9125_v17 = vadd.f32 %v9054_v7, %v8647_v59 }
 0xc46   : > { %v9155_v33 = vadd.f32 %v9125_v17, %v8953_v28  ;;  %v9295_v38 = vsel %vm8160_vm2, %v9292_v36, %v9294_v12  ;;  %v9362_v36 = vmax.f32 %v9213_v4, %v9287_v21 }
 0xc47   : > { %v18386_v0 = vmax.f32 %v9217_v60, %v9295_v38  ;;  %v9394_v60 = vmax.f32 %v9364_v18, %v9365_v23 }
 0xc48   : > { %v8652_v50 = vpop.f32.mrf.mxu2  ;;  %v8804_v19 = vpop.f32.mrf.mxu3  ;;  %v9189_v24 = vadd.f32 %v18231_v2, %v9155_v33  ;;  %v9392_v35 = vmax.f32 %v9362_v36, %v9363_v56 }
 0xc49   : > { %v9055_v25 = vrot.slane %v8804_v19, 4  ;;  %v9395_v59 = vmax.f32 %v9365_v23, %v18386_v0 }
 0xc4a   : > { %v9219_v9 = vmax.f32 %v9189_v24, 0.0 }
 0xc4b   : > { %v9056_v28 = vsel %vm8160_vm2, %v9053_v46, %v9055_v25  ;;  %v8958_v29 = vpop.f32.mrf.mxu0  ;;  %9419 = vmatpush.msra.mxu1 %v9395_v59 }
 0xc4c   : > { %v9126_v54 = vadd.f32 %v9056_v28, %v8649_v45  ;;  %v9296_v3 = vrot.slane %v9219_v9, 4  ;;  %v9391_v45 = vmax.f32 %v18368_v6, %v9362_v36 }
 0xc4d   : > { %9420 = vmatpush.msra.mxu1 %v9394_v60 }
 0xc4e   : > { %v9156_v52 = vadd.f32 %v9126_v54, %v8956_v5  ;;  %v9297_v27 = vsel %vm8160_vm2, %v9294_v12, %v9296_v3 }
 0xc4f   : > { %9421 = vmatpush.msra.mxu1 %v9393_v62  ;;  %v18397_v48 = vmax.f32 %v9218_v61, %v9297_v27 }
 0xc50   : > { %v8654_v41 = vpop.f32.mrf.mxu2  ;;  %v8806_v46 = vpop.f32.mrf.mxu3  ;;  %v9190_v7 = vadd.f32 %v18231_v2, %v9156_v52 }
 0xc51   : > { %v9057_v17 = vrot.slane %v8806_v46, 4  ;;  %9422 = vmatpush.msra.mxu1 %v9392_v35  ;;  %v9396_v51 = vmax.f32 %v18386_v0, %v18397_v48  ;;  %v9466_v0 = vld [vmem:[%s18695_s7 + $0x38] sm:$0xff] }
 0xc52   : > { %v9220_v14 = vmax.f32 %v9190_v7, 0.0 }
 0xc53   : > { %v9058_v4 = vsel %vm8160_vm2, %v9055_v25, %v9057_v17  ;;  %v8961_v5 = vpop.f32.mrf.mxu0  ;;  %9423 = vmatpush.msra.mxu1 %v9391_v45 }
 0xc54   : > { %v9127_v12 = vadd.f32 %v9058_v4, %v8652_v50  ;;  %v9298_v15 = vrot.slane %v9220_v14, 4 }
 0xc55   : > { %9424 = vmatpush.msra.mxu1 %v9390_v43 }
 0xc56   : > { %v9157_v61 = vadd.f32 %v9127_v12, %v8958_v29  ;;  %v9299_v8 = vsel %vm8160_vm2, %v9296_v3, %v9298_v15 }
 0xc57   : > { %9425 = vmatpush.msra.mxu1 %v9389_v58  ;;  %v18411_v33 = vmax.f32 %v9219_v9, %v9299_v8 }
 0xc58   : > { %v8657_v38 = vpop.f32.mrf.mxu2  ;;  %v8809_v1 = vpop.f32.mrf.mxu3  ;;  %v9191_v44 = vadd.f32 %v18231_v2, %v9157_v61 }
 0xc59   : > { %v9059_v23 = vrot.slane %v8809_v1, 4  ;;  %9426 = vmatpush.msra.mxu1 %v9388_v63  ;;  %v9397_v6 = vmax.f32 %v18397_v48, %v18411_v33  ;;  %v9464_v48 = vld [vmem:[%s18695_s7 + $0x28] sm:$0xff] }
 0xc5a   : > { %v9221_v43 = vmax.f32 %v9191_v44, 0.0 }
 0xc5b   : > { %v9060_v50 = vsel %vm8160_vm2, %v9057_v17, %v9059_v23  ;;  %v8963_v19 = vpop.f32.mrf.mxu0  ;;  %9427 = vmatpush.msra.mxu1 %v9387_v32 }
 0xc5c   : > { %v9128_v16 = vadd.f32 %v9060_v50, %v8654_v41  ;;  %v9300_v58 = vrot.slane %v9221_v43, 4 }
 0xc5d   : > { %9428 = vmatpush.msra.mxu1 %v9386_v11 }
 0xc5e   : > { %v9158_v26 = vadd.f32 %v9128_v16, %v8961_v5  ;;  %v9301_v42 = vsel %vm8160_vm2, %v9298_v15, %v9300_v58 }
 0xc5f   : > { %9429 = vmatpush.msra.mxu1 %v9385_v55  ;;  %v18430_v63 = vmax.f32 %v9220_v14, %v9301_v42 }
 0xc60   : > { %v8659_v24 = vpop.f32.mrf.mxu2  ;;  %v8811_v25 = vpop.f32.mrf.mxu3  ;;  %v9192_v53 = vadd.f32 %v18231_v2, %v9158_v26 }
 0xc61   : > { %v9061_v32 = vrot.slane %v8811_v25, 4  ;;  %9430 = vmatpush.msra.mxu1 %v9384_v39  ;;  %v9398_v47 = vmax.f32 %v18411_v33, %v18430_v63  ;;  %v9470_v33 = vld [vmem:[%s18695_s7 + $0x58] sm:$0xff] }
 0xc62   : > { %v9222_v11 = vmax.f32 %v9192_v53, 0.0 }
 0xc63   : > { %v9062_v59 = vsel %vm8160_vm2, %v9059_v23, %v9061_v32  ;;  %v8966_v18 = vpop.f32.mrf.mxu0  ;;  %9431 = vmatpush.msra.mxu1 %v9383_v22 }
 0xc64   : > { %v9129_v31 = vadd.f32 %v9062_v59, %v8657_v38  ;;  %v9302_v55 = vrot.slane %v9222_v11, 4 }
 0xc65   : > { %9432 = vmatpush.msra.mxu1 %v9382_v57 }
 0xc66   : > { %v9159_v21 = vadd.f32 %v9129_v31, %v8963_v19  ;;  %v9303_v10 = vsel %vm8160_vm2, %v9300_v58, %v9302_v55 }
 0xc67   : > { %9433 = vmatpush.msra.mxu1 %v9381_v30  ;;  %v18449_v39 = vmax.f32 %v9221_v43, %v9303_v10 }
 0xc68   : > { %v8662_v9 = vpop.f32.mrf.mxu2  ;;  %v8814_v28 = vpop.f32.mrf.mxu3  ;;  %v9193_v13 = vadd.f32 %v18231_v2, %v9159_v21 }
 0xc69   : > { %v9063_v22 = vrot.slane %v8814_v28, 4  ;;  %9434 = vmatpush.msra.mxu1 %v9380_v49  ;;  %v9399_v34 = vmax.f32 %v18430_v63, %v18449_v39  ;;  %v9472_v63 = vld [vmem:[%s18695_s7 + $0x68] sm:$0xff] }
 0xc6a   : > { %v9223_v57 = vmax.f32 %v9193_v13, 0.0 }
 0xc6b   : > { %v9064_v29 = vsel %vm8160_vm2, %v9061_v32, %v9063_v22  ;;  %v8968_v60 = vpop.f32.mrf.mxu0 }
 0xc6c   : > { %v9130_v20 = vadd.f32 %v9064_v29, %v8659_v24  ;;  %v9304_v30 = vrot.slane %v9223_v57, 4 }
 0xc6e   : > { %v9160_v56 = vadd.f32 %v9130_v20, %v8966_v18  ;;  %v9305_v54 = vsel %vm8160_vm2, %v9302_v55, %v9304_v30 }
 0xc6f   : > { %v18459_v3 = vmax.f32 %v9222_v11, %v9305_v54 }
 0xc70   : > { %v8664_v62 = vpop.f32.mrf.mxu2  ;;  %v8816_v36 = vpop.f32.mrf.mxu3  ;;  %v9194_v52 = vadd.f32 %v18231_v2, %v9160_v56 }
 0xc71   : > { %v9065_v40 = vrot.slane %v8816_v36, 4  ;;  %v9400_v37 = vmax.f32 %v18449_v39, %v18459_v3  ;;  %v9542_v39 = vld [vmem:[%s18697_s9 + $0x78] sm:$0xff] }
 0xc72   : > { %v9224_v49 = vmax.f32 %v9194_v52, 0.0 }
 0xc73   : > { %v9066_v27 = vsel %vm8160_vm2, %v9063_v22, %v9065_v40  ;;  %v8971_v35 = vpop.f32.mrf.mxu0 }
 0xc74   : > { %v9131_v41 = vadd.f32 %v9066_v27, %v8662_v9  ;;  %v9306_v46 = vrot.slane %v9224_v49, 4 }
 0xc76   : > { %v9161_v7 = vadd.f32 %v9131_v41, %v8968_v60  ;;  %v9307_v17 = vsel %vm8160_vm2, %v9304_v30, %v9306_v46 }
 0xc77   : > { %v18466_v45 = vmax.f32 %v9223_v57, %v9307_v17 }
 0xc78   : > { %v8667_v14 = vpop.f32.mrf.mxu2  ;;  %v8819_v4 = vpop.f32.mrf.mxu3  ;;  %v18469_v5 = vadd.f32 %v18231_v2, %v9161_v7 }
 0xc79   : > { %v9401_v12 = vmax.f32 %v18459_v3, %v18466_v45  ;;  %v9067_v53 = vrot.slane %v8819_v4, 4  ;;  %v9474_v3 = vld [vmem:[%s18695_s7 + $0x78] sm:$0xff] }
 0xc7a   : > { %v9225_v15 = vmax.f32 %v18469_v5, 0.0  ;;  %v9557_v5 = vld [vmem:[%s18697_s9 + $0xf0] sm:$0xff] }
 0xc7b   : > { %v8973_v61 = vpop.f32.mrf.mxu0  ;;  %v9068_v10 = vsel %vm8160_vm2, %v9065_v40, %v9067_v53 }
 0xc7c   : > { %v18476_v8 = vrot.slane %v9225_v15, 4  ;;  %v9132_v13 = vadd.f32 %v9068_v10, %v8664_v62 }
 0xc7e   : > { %v9309_v38 = vsel %vm8160_vm2, %v9306_v46, %v18476_v8  ;;  %v9162_v36 = vadd.f32 %v9132_v13, %v8971_v35  ;;  %v9473_v35 = vld [vmem:[%s18695_s7 + $0x70] sm:$0xff] }
 0xc7f   : > { %v18480_v1 = vmax.f32 %v9224_v49, %v9309_v38  ;;  %9493 = vmatpush.msra.mxu3 %v9473_v35  ;;  %v9530_v35 = vld [vmem:[%s18697_s9 + $0x18] sm:$0xff] }
 0xc80   : > { %v8669_v44 = vpop.f32.mrf.mxu2  ;;  %v8821_v23 = vpop.f32.mrf.mxu3 }
 0xc81   : > { %v9402_v43 = vmax.f32 %v18466_v45, %v18480_v1  ;;  %v9069_v42 = vrot.slane %v8821_v23, 4  ;;  %v9410_v45 = vld [vmem:[%s18699_s11 + $0x8] sm:$0xff] }
 0xc83   : > { %v8976_v50 = vpop.f32.mrf.mxu0  ;;  %v9070_v59 = vsel %vm8160_vm2, %v9067_v53, %v9069_v42  ;;  %v9467_v53 = vld [vmem:[%s18695_s7 + $0x40] sm:$0xff] }
 0xc84   : > { %v9133_v9 = vadd.f32 %v9070_v59, %v8667_v14  ;;  %v9196_v14 = vadd.f32 %v18231_v2, %v9162_v36  ;;  %v9537_v36 = vld [vmem:[%s18697_s9 + $0x50] sm:$0xff] }
 0xc86   : > { %v9163_v20 = vadd.f32 %v9133_v9, %v8973_v61  ;;  %v9463_v9 = vld [vmem:[%s18695_s7 + $0x20] sm:$0xff] }
 0xc88   : > { %v8672_v19 = vpop.f32.mrf.mxu2  ;;  %v8824_v16 = vpop.f32.mrf.mxu3  ;;  %v9197_v40 = vadd.f32 %v18231_v2, %v9163_v20  ;;  %v9459_v20 = vld [vmem:[%s18695_s7] sm:$0xff] }
 0xc89   : > { %v9071_v26 = vrot.slane %v8824_v16, 4  ;;  %v9409_v16 = vld [vmem:[%s18699_s11] sm:$0xff] }
 0xc8a   : > { %v9227_v38 = vmax.f32 %v9197_v40, 0.0  ;;  %9435 = vmatmul.f32.vlgmr.msra.gmra.mxu1 %v9409_v16  ;;  %v9551_v40 = vld [vmem:[%s18697_s9 + $0xc0] sm:$0xff]  ;;  %v9529_v16 = vld [vmem:[%s18697_s9 + $0x10] sm:$0xff] }
 0xc8b   : > { %v8978_v58 = vpop.f32.mrf.mxu0  ;;  %v9072_v32 = vsel %vm8160_vm2, %v9069_v42, %v9071_v26 }
 0xc8c   : > { %v9134_v55 = vadd.f32 %v9072_v32, %v8669_v44  ;;  %v9471_v44 = vld [vmem:[%s18695_s7 + $0x60] sm:$0xff] }
 0xc8d   : > { %9494 = vmatpush.msra.mxu3 %v9471_v44 }
 0xc8e   : > { %v9164_v22 = vadd.f32 %v9134_v55, %v8976_v50 }
 0xc90   : > { %v8674_v24 = vpop.f32.mrf.mxu2  ;;  %v8826_v25 = vpop.f32.mrf.mxu3  ;;  %v9198_v49 = vadd.f32 %v18231_v2, %v9164_v22 }
 0xc91   : > { %v9073_v11 = vrot.slane %v8826_v25, 4 }
 0xc92   : > { %v9228_v17 = vmax.f32 %v9198_v49, 0.0  ;;  %v9536_v49 = vld [vmem:[%s18697_s9 + $0x48] sm:$0xff] }
 0xc93   : > { %v9074_v18 = vsel %vm8160_vm2, %v9071_v26, %v9073_v11  ;;  %v8981_v31 = vpop.f32.mrf.mxu0 }
 0xc94   : > { %v9135_v21 = vadd.f32 %v9074_v18, %v8672_v19  ;;  %v9314_v50 = vrot.slane %v9228_v17, 4  ;;  %v9226_v19 = vmax.f32 %v9196_v14, 0.0  ;;  %v9532_v14 = vld [vmem:[%s18697_s9 + $0x28] sm:$0xff] }
 0xc96   : > { %v9165_v28 = vadd.f32 %v9135_v21, %v8978_v58 }
 0xc98   : > { %v8677_v57 = vpop.f32.mrf.mxu2  ;;  %v8829_v29 = vpop.f32.mrf.mxu3  ;;  %v9199_v30 = vadd.f32 %v18231_v2, %v9165_v28 }
 0xc99   : > { %v9075_v60 = vrot.slane %v8829_v29, 4  ;;  %v9461_v57 = vld [vmem:[%s18695_s7 + $0x10] sm:$0xff] }
 0xc9a   : > { %v9229_v27 = vmax.f32 %v9199_v30, 0.0 }
 0xc9b   : > { %v9076_v56 = vsel %vm8160_vm2, %v9073_v11, %v9075_v60  ;;  %v8983_v54 = vpop.f32.mrf.mxu0  ;;  %v9310_v11 = vrot.slane %v9226_v19, 4 }
 0xc9c   : > { %v9136_v52 = vadd.f32 %v9076_v56, %v8674_v24  ;;  %v9316_v4 = vrot.slane %v9229_v27, 4  ;;  %v9312_v24 = vrot.slane %v9227_v38, 4  ;;  %v9538_v56 = vld [vmem:[%s18697_s9 + $0x58] sm:$0xff] }
 0xc9d   : > { %v9311_v28 = vsel %vm8160_vm2, %v18476_v8, %v9310_v11  ;;  %v9554_v54 = vld [vmem:[%s18697_s9 + $0xd8] sm:$0xff] }
 0xc9e   : > { %v9166_v41 = vadd.f32 %v9136_v52, %v8981_v31  ;;  %v9317_v42 = vsel %vm8160_vm2, %v9314_v50, %v9316_v4  ;;  %v9315_v32 = vsel %vm8160_vm2, %v9312_v24, %v9314_v50  ;;  %v9465_v31 = vld [vmem:[%s18695_s7 + $0x30] sm:$0xff]  ;;  %v9313_v55 = vsel %vm8160_vm2, %v9310_v11, %v9312_v24  ;;  %v9543_v24 = vld [vmem:[%s18697_s9 + $0x80] sm:$0xff] }
 0xc9f   : > { %v9377_v18 = vmax.f32 %v9228_v17, %v9317_v42  ;;  %v9376_v10 = vmax.f32 %v9227_v38, %v9315_v32  ;;  %v9375_v22 = vmax.f32 %v9226_v19, %v9313_v55  ;;  %v9374_v60 = vmax.f32 %v9225_v15, %v9311_v28  ;;  %v9556_v15 = vld [vmem:[%s18697_s9 + $0xe8] sm:$0xff]  ;;  %v9553_v52 = vld [vmem:[%s18697_s9 + $0xd0] sm:$0xff]  ;;  %v9547_v38 = vld [vmem:[%s18697_s9 + $0xa0] sm:$0xff] }
 0xca0   : > { %v9200_v62 = vadd.f32 %v18231_v2, %v9166_v41  ;;  %v8678_v46 = vpop.f32.mrf.mxu2  ;;  %v8831_v7 = vpop.f32.mrf.mxu3  ;;  %v9469_v2 = vld [vmem:[%s18695_s7 + $0x50] sm:$0xff]  ;;  %v9535_v41 = vld [vmem:[%s18697_s9 + $0x40] sm:$0xff]  ;;  %v9546_v19 = vld [vmem:[%s18697_s9 + $0x98] sm:$0xff] }
 0xca1   : > { %9495 = vmatpush.msra.mxu3 %v9469_v2  ;;  %v9406_v13 = vmax.f32 %v9376_v10, %v9377_v18  ;;  %v9405_v29 = vmax.f32 %v9375_v22, %v9376_v10  ;;  %v9404_v8 = vmax.f32 %v9374_v60, %v9375_v22  ;;  %v9403_v30 = vmax.f32 %v18480_v1, %v9374_v60  ;;  %v9539_v1 = vld [vmem:[%s18697_s9 + $0x60] sm:$0xff]  ;;  %v9550_v46 = vld [vmem:[%s18697_s9 + $0xb8] sm:$0xff]  ;;  %v9533_v7 = vld [vmem:[%s18697_s9 + $0x30] sm:$0xff] }
 0xca2   : > { %v9230_v61 = vmax.f32 %v9200_v62, 0.0  ;;  %v9534_v62 = vld [vmem:[%s18697_s9 + $0x38] sm:$0xff]  ;;  %v9549_v17 = vld [vmem:[%s18697_s9 + $0xb0] sm:$0xff]  ;;  %v9527_v42 = vld [vmem:[%s18697_s9] sm:$0xff] }
 0xca3   : > { %9496 = vmatpush.msra.mxu3 %v9467_v53  ;;  %v9545_v2 = vld [vmem:[%s18697_s9 + $0x90] sm:$0xff]  ;;  %v12275_v10 = vld [vmem:[%s18698_s10] ss:$0 sm:$0xff] }
 0xca4   : > { %v9318_v23 = vrot.slane %v9230_v61, 4 }
 0xca5   : > { %9497 = vmatpush.msra.mxu3 %v9465_v31 }
 0xca6   : > { %v9379_v58 = vmax.f32 %v9230_v61, %v9318_v23  ;;  %v9319_v26 = vsel %vm8160_vm2, %v9316_v4, %v9318_v23  ;;  %v9548_v4 = vld [vmem:[%s18697_s9 + $0xa8] sm:$0xff]  ;;  %v9531_v61 = vld [vmem:[%s18697_s9 + $0x20] sm:$0xff] }
 0xca7   : > { %v9378_v25 = vmax.f32 %v9229_v27, %v9319_v26  ;;  %9498 = vmatpush.msra.mxu3 %v9463_v9  ;;  %v9552_v27 = vld [vmem:[%s18697_s9 + $0xc8] sm:$0xff] }
 0xca8   : > { %v9544_v26 = vld [vmem:[%s18697_s9 + $0x88] sm:$0xff] }
 0xca9   : > { %v9408_v59 = vmax.f32 %v9378_v25, %v9379_v58  ;;  %v9407_v21 = vmax.f32 %v9377_v18, %v9378_v25  ;;  %9499 = vmatpush.msra.mxu3 %v9461_v57  ;;  %v9528_v58 = vld [vmem:[%s18697_s9 + $0x8] sm:$0xff]  ;;  %v9475_v25 = vld [vmem:[%s18696_s8] sm:$0x3] }
 0xcaa   : > { %v9477_v53 = vperm.slane %v9475_v25, 0  ;;  %v9478_v32 = vperm.slane %v9475_v25, 1 }
 0xcab   : > { %11778 = vmatpush.msk.msra.mxu2 %vm9415_vm3, %v9408_v59  ;;  %9500 = vmatpush.msra.mxu3 %v9459_v20 }
 0xcad   : > { %9443 = vmatpush.msra.mxu2 %v9407_v21 }
 0xcaf   : > { %9444 = vmatpush.msra.mxu2 %v9406_v13 }
 0xcb1   : > { %9445 = vmatpush.msra.mxu2 %v9405_v29 }
 0xcb3   : > { %9446 = vmatpush.msra.mxu2 %v9404_v8 }
 0xcb5   : > { %9447 = vmatpush.msra.mxu2 %v9403_v30 }
 0xcb7   : > { %9448 = vmatpush.msra.mxu2 %v9402_v43  ;;  %v9555_v43 = vld [vmem:[%s18697_s9 + $0xe0] sm:$0xff] }
 0xcb9   : > { %9449 = vmatpush.msra.mxu2 %v9401_v12  ;;  %v9540_v12 = vld [vmem:[%s18697_s9 + $0x68] sm:$0xff] }
 0xcbb   : > { %9450 = vmatpush.msra.mxu2 %v9400_v37  ;;  %v9558_v37 = vld [vmem:[%s18697_s9 + $0xf8] sm:$0xff] }
 0xcbc   : > { %9583 = vmatpush.msrb.mxu3 %v9558_v37 }
 0xcbd   : > { %9451 = vmatpush.msra.mxu2 %v9399_v34  ;;  %v9541_v34 = vld [vmem:[%s18697_s9 + $0x70] sm:$0xff] }
 0xcbe   : > { %9584 = vmatpush.msrb.mxu3 %v9557_v5 }
 0xcbf   : > { %9452 = vmatpush.msra.mxu2 %v9398_v47  ;;  %v9460_v47 = vld [vmem:[%s18695_s7 + $0x8] sm:$0xff] }
 0xcc0   : > { %9585 = vmatpush.msrb.mxu3 %v9556_v15 }
 0xcc1   : > { %9453 = vmatpush.msra.mxu2 %v9397_v6  ;;  %v9468_v6 = vld [vmem:[%s18695_s7 + $0x48] sm:$0xff] }
 0xcc2   : > { %9586 = vmatpush.msrb.mxu3 %v9555_v43 }
 0xcc3   : > { %9454 = vmatpush.msra.mxu2 %v9396_v51  ;;  %v9462_v51 = vld [vmem:[%s18695_s7 + $0x18] sm:$0xff] }
 0xcc4   : > { %11779 = vmatmul.msk.f32.vlgmr.msra.gmra.mxu2 %vm9411_vm4, %v9410_v45  ;;  %9587 = vmatpush.msrb.mxu3 %v9554_v54 }
 0xcc5   : > { %9513 = vmatpush.msrb.mxu2 %v9474_v3 }
 0xcc6   : > { %9588 = vmatpush.msrb.mxu3 %v9553_v52 }
 0xcc7   : > { %9514 = vmatpush.msrb.mxu2 %v9472_v63 }
 0xcc8   : > { %9589 = vmatpush.msrb.mxu3 %v9552_v27 }
 0xcc9   : > { %9515 = vmatpush.msrb.mxu2 %v9470_v33 }
 0xcca   : > { %9590 = vmatpush.msrb.mxu3 %v9551_v40 }
 0xccb   : > { %9516 = vmatpush.msrb.mxu2 %v9468_v6 }
 0xccc   : > { %9591 = vmatpush.msrb.mxu3 %v9550_v46 }
 0xccd   : > { %9517 = vmatpush.msrb.mxu2 %v9466_v0 }
 0xcce   : > { %9592 = vmatpush.msrb.mxu3 %v9549_v17 }
 0xccf   : > { %9518 = vmatpush.msrb.mxu2 %v9464_v48 }
 0xcd0   : > { %9593 = vmatpush.msrb.mxu3 %v9548_v4 }
 0xcd1   : > { %9519 = vmatpush.msrb.mxu2 %v9462_v51 }
 0xcd2   : > { %9594 = vmatpush.msrb.mxu3 %v9547_v38 }
 0xcd3   : > { %9520 = vmatpush.msrb.mxu2 %v9460_v47 }
 0xcd4   : > { %9595 = vmatpush.msrb.mxu3 %v9546_v19 }
 0xcd5   : > { %9563 = vmatpush.msra.mxu2 %v9542_v39 }
 0xcd6   : > { %9596 = vmatpush.msrb.mxu3 %v9545_v2 }
 0xcd7   : > { %9564 = vmatpush.msra.mxu2 %v9541_v34 }
 0xcd8   : > { %9597 = vmatpush.msrb.mxu3 %v9544_v26 }
 0xcd9   : > { %9565 = vmatpush.msra.mxu2 %v9540_v12 }
 0xcda   : > { %9598 = vmatpush.msrb.mxu3 %v9543_v24 }
 0xcdb   : > { %9566 = vmatpush.msra.mxu2 %v9539_v1 }
 0xcdd   : > { %9567 = vmatpush.msra.mxu2 %v9538_v56 }
 0xcdf   : > { %9568 = vmatpush.msra.mxu2 %v9537_v36 }
 0xce1   : > { %9569 = vmatpush.msra.mxu2 %v9536_v49 }
 0xce3   : > { %9570 = vmatpush.msra.mxu2 %v9535_v41 }
 0xce5   : > { %9571 = vmatpush.msra.mxu2 %v9534_v62 }
 0xce7   : > { %9572 = vmatpush.msra.mxu2 %v9533_v7 }
 0xce9   : > { %9573 = vmatpush.msra.mxu2 %v9532_v14 }
 0xceb   : > { %9574 = vmatpush.msra.mxu2 %v9531_v61 }
 0xced   : > { %9575 = vmatpush.msra.mxu2 %v9530_v35 }
 0xcef   : > { %9576 = vmatpush.msra.mxu2 %v9529_v16 }
 0xcf1   : > { %9577 = vmatpush.msra.mxu2 %v9528_v58 }
 0xcf3   : > { %9578 = vmatpush.msra.mxu2 %v9527_v42 }
 0xd07   : > { %v9436_v44 = vpop.f32.mrf.mxu1 }
 0xd47   : > { %v9456_v23 = vpop.f32.mrf.mxu2 }
 0xd48   : > { %v9457_v50 = vadd.f32 %v9456_v23, %v9436_v44 }
 0xd4a   : > { %11780 = vmatmul.msk.f32.vlgmr.msra.gmra.mxu3 %vm9481_vm5, %v9457_v50  ;;  %11781 = vmatmul.msk.f32.vlgmr.msrb.gmra.mxu2 %vm9481_vm5, %v9457_v50 }
 0xdcd   : > { %v9502_v11 = vpop.f32.mrf.mxu3  ;;  %v9522_v59 = vpop.f32.mrf.mxu2 }
 0xdce   : > { %v9503_v18 = vadd.f32 %v9502_v11, %v9477_v53  ;;  %v9523_v31 = vadd.f32 %v9522_v59, %v9478_v32 }
 0xdd0   : > { %v9525_v55 = vmax.f32 %v9503_v18, 0.0  ;;  %v9526_v21 = vmax.f32 %v9523_v31, 0.0 }
 0xdd2   : > { %9579 = vmatmul.f32.vlgmr.msra.gmra.mxu2 %v9525_v55  ;;  %9599 = vmatmul.f32.vlgmr.msrb.gmra.mxu3 %v9526_v21 }
 0xe55   : > { %v9580_v9 = vpop.f32.mrf.mxu2  ;;  %v9600_v13 = vpop.f32.mrf.mxu3 }
 0xe56   : > { %v9581_v28 = vadd.f32 %v12275_v10, %v9580_v9 }
 0xe58   : > { %v9601_v22 = vadd.f32 %v9600_v13, %v9581_v28 }
 0xe5a   : > { %v9603_v57 = vmax.f32 %v9601_v22, 0.0 }
 0xe5c   : > { %9604 = vst [vmem:[%s416_s19] sm:$0xff] %v9603_v57 }
 0xe5d PF: > { %s22_s21 = sadd.s32 1, %s12283_s21  }
 0xe5e   : > { %p19_p5 = scmp.ge.s32.totalorder %s22_s21, 5  }
 0xe60   :  { %21 = sbr.rel (!%p19_p5) target bundleno = 1 (0x1), region = 104 }

</bundles_post_ra>
